<compile_context>
chip_gen: v7x
topology: tpu7x:2x2x1
jax: 0.10.0
libtpu: 0.0.40
codegen_flags: <defaults>
</compile_context>

<pallas_src>
import functools
import math

import numpy as np
import jax
import jax.numpy as jnp
from jax.experimental import pallas as pl
from jax.experimental.pallas import tpu as pltpu


_VMEM_LIMIT = 32 * 1024 * 1024   # comfortable on v5e/v6e (128 MiB) and v7x (64 MiB)
_D_MODEL = 256
_NHEADS = 8
_FFN = 2048
_LAYERS = 6
_PATCH = 32                      # synthetic backbone total stride (ResNet-50 output stride)


# ----------------- kernel 1: backbone + input_proj + avg-pool ----------------

def _backbone_kernel(patches_ref, wa_ref, ba_ref, wb_ref, bb_ref,
                     pw_ref, pb_ref, pool_ref, bmask_ref, src_ref):
    # Fused: patch-embed (ReLU) -> 1x1 conv to 2048 (ReLU) -> per-frame average pool
    # (precomputed pooling matrix, rows for cls/pad are all-zero) -> input_proj(2048->256).
    x = patches_ref[...].astype(jnp.bfloat16)                                # (T*P, 1024)
    h = jnp.dot(x, wa_ref[...], preferred_element_type=jnp.float32) + ba_ref[...]
    h = jnp.maximum(h, 0.0)                                                  # (T*P, 256)
    f = jnp.dot(h.astype(jnp.bfloat16), wb_ref[...],
                preferred_element_type=jnp.float32) + bb_ref[...]
    f = jnp.maximum(f, 0.0)                                                  # (T*P, 2048)
    pooled = jnp.dot(pool_ref[...], f, preferred_element_type=jnp.float32)   # (S_pad, 2048)
    src = jnp.dot(pooled.astype(jnp.bfloat16), pw_ref[...],
                  preferred_element_type=jnp.float32)                        # (S_pad, 256)
    # proj bias only on the real frame rows: cls token (row 0) and pad rows stay exactly zero
    src_ref[...] = src + bmask_ref[...] * pb_ref[...]


def backbone_proj_pool(patches, pool_mat, bias_mask, p):
    s_pad = pool_mat.shape[0]
    return pl.pallas_call(
        _backbone_kernel,
        out_shape=jax.ShapeDtypeStruct((s_pad, _D_MODEL), jnp.float32),
        compiler_params=pltpu.CompilerParams(vmem_limit_bytes=_VMEM_LIMIT),
    )(patches, p['bb_w1'], p['bb_b1'], p['bb_w2'], p['bb_b2'],
      p['proj_w'], p['proj_b'], pool_mat, bias_mask)


# ----------- kernel 2: 6-layer encoder + classifier, layer-gridded -----------

def _encoder_kernel(src_ref, wqkv_ref, bqkv_ref, wo_ref, bo_ref,
                    g1_ref, be1_ref, w1_ref, b1_ref, w2_ref, b2_ref,
                    g2_ref, be2_ref, cw1_ref, cb1_ref, cw2_ref, cb2_ref,
                    out_ref, src_sc, *, nheads, s_real, eps):
    l = pl.program_id(0)

    @pl.when(l == 0)
    def _():
        src_sc[...] = src_ref[...]

    x = src_sc[...]                                    # (S, D) f32 carried across layers
    S, D = x.shape
    hd = D // nheads
    scale = 1.0 / math.sqrt(hd)

    # ---- self-attention: all heads batched (leading batch dim) on the MXU ----
    # pos embeddings are zero -> q = k = src; the float all-ones key_padding_mask is a
    # uniform additive constant -> no effect; only the sublane-pad rows are masked as keys.
    xb = jnp.broadcast_to(x.astype(jnp.bfloat16)[None], (3 * nheads, S, D))
    qkv = jax.lax.dot_general(xb, wqkv_ref[...], (((2,), (1,)), ((0,), (0,))),
                              preferred_element_type=jnp.float32) + bqkv_ref[...]  # (3H,S,hd)
    q3 = qkv[0:nheads]
    k3 = qkv[nheads:2 * nheads]
    v3 = qkv[2 * nheads:3 * nheads]

    key_idx = jax.lax.broadcasted_iota(jnp.int32, (S, S), 1)
    key_bias = jnp.where(key_idx < s_real, 0.0, -1e30)

    logits = jax.lax.dot_general(q3, k3, (((2,), (2,)), ((0,), (0,))),
                                 preferred_element_type=jnp.float32) * scale       # (H,S,S)
    logits = logits + key_bias
    logits = logits - jnp.max(logits, axis=-1, keepdims=True)
    prob = jnp.exp(logits)
    prob = prob * pl.reciprocal(jnp.sum(prob, axis=-1, keepdims=True), approx=True)

    ctx = jax.lax.dot_general(prob, v3, (((2,), (1,)), ((0,), (0,))),
                              preferred_element_type=jnp.float32)                  # (H,S,hd)

    # out_proj folded per head: y = sum_h ctx[h] @ Wo[h]  (no lane-concat of heads)
    y3 = jax.lax.dot_general(ctx.astype(jnp.bfloat16), wo_ref[...],
                             (((2,), (1,)), ((0,), (0,))),
                             preferred_element_type=jnp.float32)                   # (H,S,D)
    y = jnp.sum(y3, axis=0) + bo_ref[...]

    h1 = y + x                                         # residual + post-LayerNorm (f32)
    mu1 = jnp.mean(h1, axis=-1, keepdims=True)
    var1 = jnp.mean((h1 - mu1) * (h1 - mu1), axis=-1, keepdims=True)
    x1 = (h1 - mu1) * jax.lax.rsqrt(var1 + eps) * g1_ref[...] + be1_ref[...]

    # ---- FFN: Linear(256->2048)+ReLU + Linear(2048->256) + residual + LayerNorm ----
    ff = jnp.dot(x1.astype(jnp.bfloat16), w1_ref[...],
                 preferred_element_type=jnp.float32) + b1_ref[...]
    ff = jnp.maximum(ff, 0.0)
    y2 = jnp.dot(ff.astype(jnp.bfloat16), w2_ref[...],
                 preferred_element_type=jnp.float32) + b2_ref[...]
    h2 = y2 + x1
    mu2 = jnp.mean(h2, axis=-1, keepdims=True)
    var2 = jnp.mean((h2 - mu2) * (h2 - mu2), axis=-1, keepdims=True)
    src_new = (h2 - mu2) * jax.lax.rsqrt(var2 + eps) * g2_ref[...] + be2_ref[...]

    src_sc[...] = src_new

    # ---- classifier on the cls row, only after the last layer ----
    @pl.when(l == pl.num_programs(0) - 1)
    def _():
        cls = src_new[0:1, :]
        hcls = jnp.dot(cls, cw1_ref[...], preferred_element_type=jnp.float32) + cb1_ref[...]
        hcls = jnp.maximum(hcls, 0.0)
        out_ref[...] = jnp.dot(hcls, cw2_ref[...],
                               preferred_element_type=jnp.float32) + cb2_ref[...]


def fused_encoder_classifier(src, params, *, nheads, s_real):
    S, D = src.shape
    e = params['enc']
    L = e['wqkv'].shape[0]
    hd = D // nheads

    lmap3 = lambda l: (l, 0, 0)
    lmap4 = lambda l: (l, 0, 0, 0)
    cmap2 = lambda l: (0, 0)

    in_specs = [
        pl.BlockSpec((S, D), cmap2),                               # src (read once at l==0)
        pl.BlockSpec((None, 3 * nheads, D, hd), lmap4),            # stacked per-head QKV W
        pl.BlockSpec((None, 3 * nheads, 1, hd), lmap4),            # stacked per-head QKV b
        pl.BlockSpec((None, nheads, hd, D), lmap4),                # stacked per-head out-proj W
        pl.BlockSpec((None, 1, D), lmap3),                         # out-proj b
        pl.BlockSpec((None, 1, D), lmap3),                         # norm1 gamma
        pl.BlockSpec((None, 1, D), lmap3),                         # norm1 beta
        pl.BlockSpec((None, D, _FFN), lmap3),                      # lin1 W
        pl.BlockSpec((None, 1, _FFN), lmap3),                      # lin1 b
        pl.BlockSpec((None, _FFN, D), lmap3),                      # lin2 W
        pl.BlockSpec((None, 1, D), lmap3),                         # lin2 b
        pl.BlockSpec((None, 1, D), lmap3),                         # norm2 gamma
        pl.BlockSpec((None, 1, D), lmap3),                         # norm2 beta
        pl.BlockSpec((D, 128), cmap2),                             # classifier W1
        pl.BlockSpec((1, 128), cmap2),                             # classifier b1
        pl.BlockSpec((128, 1), cmap2),                             # classifier W2
        pl.BlockSpec((1, 1), cmap2),                               # classifier b2
    ]
    return pl.pallas_call(
        functools.partial(_encoder_kernel, nheads=nheads, s_real=s_real, eps=1e-5),
        out_shape=jax.ShapeDtypeStruct((1, 1), jnp.float32),
        grid=(L,),
        in_specs=in_specs,
        out_specs=pl.BlockSpec((1, 1), cmap2),
        scratch_shapes=[pltpu.VMEM((S, D), jnp.float32)],
        compiler_params=pltpu.CompilerParams(
            dimension_semantics=("arbitrary",),
            vmem_limit_bytes=_VMEM_LIMIT),
    )(src, e['wqkv'], e['bqkv'], e['wo'], e['bo'],
      e['g1'], e['be1'], e['w1'], e['b1'], e['w2'], e['b2'], e['g2'], e['be2'],
      params['cls_w1'], params['cls_b1'], params['cls_w2'], params['cls_b2'])


# ------------------------------- model wrapper --------------------------------

def merge_lstm_forward(x, params):
    # x: (1, T, 1, H, W); PyTorch forward does x.squeeze(0) -> per-frame NCHW.
    x = x[0]
    T, C, H, W = x.shape
    # masks = ones(...) -> all-ones *float* key_padding_mask -> uniform additive -> no effect.
    # repeat(1,3,1,1): the 3 channel copies are identical, so the repeat is folded into the
    # first backbone matmul at init; the replicated tensor is never materialized.

    hp, wp = H // _PATCH, W // _PATCH
    P = hp * wp
    patches = (x.reshape(T, C, hp, _PATCH, wp, _PATCH)
                 .transpose(0, 2, 4, 1, 3, 5)
                 .reshape(T * P, C * _PATCH * _PATCH))               # (T*P, 1024)

    s_real = T + 1                                                   # cls token + T frames
    s_pad = max(8, ((s_real + 7) // 8) * 8)                          # sublane-pad the sequence

    # trace-time constants: pooling matrix (row 0 = cls token zeros, rows 1..T average the
    # P positions of frame t, remaining rows = padding) and the proj-bias row mask.
    pool_mat = np.zeros((s_pad, T * P), np.float32)
    for t in range(T):
        pool_mat[1 + t, t * P:(t + 1) * P] = 1.0 / P
    bias_mask = np.zeros((s_pad, 1), np.float32)
    bias_mask[1:s_real, 0] = 1.0

    src = backbone_proj_pool(patches, pool_mat, bias_mask, params)   # (s_pad, 256)
    out = fused_encoder_classifier(src, params, nheads=_NHEADS, s_real=s_real)  # (1, 1)
    return out


# ------------------------------- parameter init --------------------------------

def init_params(key):
    keys = iter(jax.random.split(key, 32))

    def nrm(shape, std, dtype=jnp.float32):
        return (std * jax.random.normal(next(keys), shape)).astype(dtype)

    bf16 = jnp.bfloat16
    D, H_, hd, L = _D_MODEL, _NHEADS, _D_MODEL // _NHEADS, _LAYERS
    p = {}
    # synthetic backbone (see TODO(synk)): 32x32 patch-embed (channel-repeat x3 folded in,
    # so K = 1*32*32 = 1024) -> 256, then 1x1 conv 256 -> 2048; matmul weights bf16.
    p['bb_w1'] = nrm((_PATCH * _PATCH, D), 0.03, bf16)
    p['bb_b1'] = nrm((1, D), 0.02)
    p['bb_w2'] = nrm((D, 2048), 0.03, bf16)
    p['bb_b2'] = nrm((1, 2048), 0.02)
    # input_proj 1x1 conv 2048 -> 256
    p['proj_w'] = nrm((2048, D), 0.02, bf16)
    p['proj_b'] = nrm((1, D), 0.02)
    # 6 DETR encoder layers, stacked along a leading layer dim; QKV / out-proj weights are
    # stored per-head (pure re-layout of the same linear maps) for batched in-kernel matmuls.
    p['enc'] = dict(
        wqkv=nrm((L, 3 * H_, D, hd), 0.02, bf16),
        bqkv=nrm((L, 3 * H_, 1, hd), 0.02),
        wo=nrm((L, H_, hd, D), 0.02, bf16),
        bo=nrm((L, 1, D), 0.02),
        w1=nrm((L, D, _FFN), 0.02, bf16),
        b1=nrm((L, 1, _FFN), 0.02),
        w2=nrm((L, _FFN, D), 0.02, bf16),
        b2=nrm((L, 1, D), 0.02),
        g1=jnp.ones((L, 1, D), jnp.float32),
        be1=jnp.zeros((L, 1, D), jnp.float32),
        g2=jnp.ones((L, 1, D), jnp.float32),
        be2=jnp.zeros((L, 1, D), jnp.float32),
    )
    # classifier: Linear(256,128)+ReLU+Linear(128,1), nn.init.normal_ (std=1), kept f32
    p['cls_w1'] = nrm((D, 128), 1.0)
    p['cls_b1'] = nrm((1, 128), 1.0)
    p['cls_w2'] = nrm((128, 1), 1.0)
    p['cls_b2'] = nrm((1, 1), 1.0)
    return p


# ------------------------------------ main --------------------------------------

if __name__ == "__main__":
    key = jax.random.PRNGKey(0)
    pkey, xkey = jax.random.split(key)
    params = init_params(pkey)

    # small shapes: T=4 frames, 1 channel, 64x64 spatial (2x2 feature positions after /32)
    x = jax.random.normal(xkey, (1, 4, 1, 64, 64), dtype=jnp.float32)

    fwd = jax.jit(merge_lstm_forward)
    out = fwd(x, params)
    out = jax.block_until_ready(out)
    assert out.shape == (1, 1) and out.dtype == jnp.float32
    print("KERNEL_OK")
</pallas_src>

<mosaic_0001>
module attributes {stable_mosaic.version = 11 : i64} {
  func.func @_backbone_kernel(%arg0: memref<16x1024xf32, #tpu.memory_space<vmem>>, %arg1: memref<1024x256xbf16, #tpu.memory_space<vmem>>, %arg2: memref<1x256xf32, #tpu.memory_space<vmem>>, %arg3: memref<256x2048xbf16, #tpu.memory_space<vmem>>, %arg4: memref<1x2048xf32, #tpu.memory_space<vmem>>, %arg5: memref<2048x256xbf16, #tpu.memory_space<vmem>>, %arg6: memref<1x256xf32, #tpu.memory_space<vmem>>, %arg7: memref<8x16xf32, #tpu.memory_space<vmem>>, %arg8: memref<8x1xf32, #tpu.memory_space<vmem>>, %arg9: memref<8x256xf32, #tpu.memory_space<vmem>>) attributes {dimension_semantics = [], scalar_prefetch = 0 : i64, scratch_operands = 0 : i64, tpu.core_type = #tpu.core_type<tc>} {
    %c0 = arith.constant 0 : index
    %c0_0 = arith.constant 0 : index
    %0 = vector.load %arg0[%c0, %c0_0] : memref<16x1024xf32, #tpu.memory_space<vmem>>, vector<16x1024xf32>
    %1 = arith.truncf %0 : vector<16x1024xf32> to vector<16x1024xbf16>
    %c0_1 = arith.constant 0 : index
    %c0_2 = arith.constant 0 : index
    %2 = vector.load %arg1[%c0_1, %c0_2] : memref<1024x256xbf16, #tpu.memory_space<vmem>>, vector<1024x256xbf16>
    %cst = arith.constant dense<0.000000e+00> : vector<16x256xf32>
    %3 = tpu.matmul %1, %2, %cst {dimension_numbers = #tpu.dot_dimension_numbers<[1], [0], [0], [1], [0, 0, 1, 1], [], []>} : vector<16x1024xbf16>, vector<1024x256xbf16>, vector<16x256xf32> -> vector<16x256xf32>
    %c0_3 = arith.constant 0 : index
    %c0_4 = arith.constant 0 : index
    %4 = vector.load %arg2[%c0_3, %c0_4] : memref<1x256xf32, #tpu.memory_space<vmem>>, vector<1x256xf32>
    %5 = vector.broadcast %4 : vector<1x256xf32> to vector<16x256xf32>
    %6 = arith.addf %3, %5 : vector<16x256xf32>
    %cst_5 = arith.constant 0.000000e+00 : f32
    %7 = vector.broadcast %cst_5 : f32 to vector<16x256xf32>
    %8 = arith.maximumf %6, %7 : vector<16x256xf32>
    %9 = arith.truncf %8 : vector<16x256xf32> to vector<16x256xbf16>
    %c0_6 = arith.constant 0 : index
    %c0_7 = arith.constant 0 : index
    %10 = vector.load %arg3[%c0_6, %c0_7] : memref<256x2048xbf16, #tpu.memory_space<vmem>>, vector<256x2048xbf16>
    %cst_8 = arith.constant dense<0.000000e+00> : vector<16x2048xf32>
    %11 = tpu.matmul %9, %10, %cst_8 {dimension_numbers = #tpu.dot_dimension_numbers<[1], [0], [0], [1], [0, 0, 1, 1], [], []>} : vector<16x256xbf16>, vector<256x2048xbf16>, vector<16x2048xf32> -> vector<16x2048xf32>
    %c0_9 = arith.constant 0 : index
    %c0_10 = arith.constant 0 : index
    %12 = vector.load %arg4[%c0_9, %c0_10] : memref<1x2048xf32, #tpu.memory_space<vmem>>, vector<1x2048xf32>
    %13 = vector.broadcast %12 : vector<1x2048xf32> to vector<16x2048xf32>
    %14 = arith.addf %11, %13 : vector<16x2048xf32>
    %cst_11 = arith.constant 0.000000e+00 : f32
    %15 = vector.broadcast %cst_11 : f32 to vector<16x2048xf32>
    %16 = arith.maximumf %14, %15 : vector<16x2048xf32>
    %c0_12 = arith.constant 0 : index
    %c0_13 = arith.constant 0 : index
    %17 = vector.load %arg7[%c0_12, %c0_13] : memref<8x16xf32, #tpu.memory_space<vmem>>, vector<8x16xf32>
    %cst_14 = arith.constant dense<0.000000e+00> : vector<8x2048xf32>
    %18 = tpu.matmul %17, %16, %cst_14 {dimension_numbers = #tpu.dot_dimension_numbers<[1], [0], [0], [1], [0, 0, 1, 1], [], []>} : vector<8x16xf32>, vector<16x2048xf32>, vector<8x2048xf32> -> vector<8x2048xf32>
    %19 = arith.truncf %18 : vector<8x2048xf32> to vector<8x2048xbf16>
    %c0_15 = arith.constant 0 : index
    %c0_16 = arith.constant 0 : index
    %20 = vector.load %arg5[%c0_15, %c0_16] : memref<2048x256xbf16, #tpu.memory_space<vmem>>, vector<2048x256xbf16>
    %cst_17 = arith.constant dense<0.000000e+00> : vector<8x256xf32>
    %21 = tpu.matmul %19, %20, %cst_17 {dimension_numbers = #tpu.dot_dimension_numbers<[1], [0], [0], [1], [0, 0, 1, 1], [], []>} : vector<8x2048xbf16>, vector<2048x256xbf16>, vector<8x256xf32> -> vector<8x256xf32>
    %c0_18 = arith.constant 0 : index
    %c0_19 = arith.constant 0 : index
    %22 = vector.load %arg8[%c0_18, %c0_19] : memref<8x1xf32, #tpu.memory_space<vmem>>, vector<8x1xf32>
    %c0_20 = arith.constant 0 : index
    %c0_21 = arith.constant 0 : index
    %23 = vector.load %arg6[%c0_20, %c0_21] : memref<1x256xf32, #tpu.memory_space<vmem>>, vector<1x256xf32>
    %24 = vector.broadcast %22 : vector<8x1xf32> to vector<8x256xf32>
    %25 = vector.broadcast %23 : vector<1x256xf32> to vector<8x256xf32>
    %26 = arith.mulf %24, %25 : vector<8x256xf32>
    %27 = arith.addf %21, %26 : vector<8x256xf32>
    %c0_22 = arith.constant 0 : index
    %c0_23 = arith.constant 0 : index
    %28 = vector.load %arg9[%c0_22, %c0_23] : memref<8x256xf32, #tpu.memory_space<vmem>>, vector<8x256xf32>
    tpu.vector_store %arg9[%c0_22, %c0_23], %27 {strides = array<i32>} : memref<8x256xf32, #tpu.memory_space<vmem>>, vector<8x256xf32>,
    return
  }
}

module attributes {stable_mosaic.version = 11 : i64} {
  func.func @_encoder_kernel(%arg0: i32, %arg1: memref<8x256xf32, #tpu.memory_space<vmem>>, %arg2: memref<1x24x256x32xbf16, #tpu.memory_space<vmem>>, %arg3: memref<1x24x1x32xf32, #tpu.memory_space<vmem>>, %arg4: memref<1x8x32x256xbf16, #tpu.memory_space<vmem>>, %arg5: memref<1x1x256xf32, #tpu.memory_space<vmem>>, %arg6: memref<1x1x256xf32, #tpu.memory_space<vmem>>, %arg7: memref<1x1x256xf32, #tpu.memory_space<vmem>>, %arg8: memref<1x256x2048xbf16, #tpu.memory_space<vmem>>, %arg9: memref<1x1x2048xf32, #tpu.memory_space<vmem>>, %arg10: memref<1x2048x256xbf16, #tpu.memory_space<vmem>>, %arg11: memref<1x1x256xf32, #tpu.memory_space<vmem>>, %arg12: memref<1x1x256xf32, #tpu.memory_space<vmem>>, %arg13: memref<1x1x256xf32, #tpu.memory_space<vmem>>, %arg14: memref<256x128xf32, #tpu.memory_space<vmem>>, %arg15: memref<1x128xf32, #tpu.memory_space<vmem>>, %arg16: memref<128x1xf32, #tpu.memory_space<vmem>>, %arg17: memref<1x1xf32, #tpu.memory_space<vmem>>, %arg18: memref<1x1xf32, #tpu.memory_space<vmem>>, %arg19: memref<8x256xf32, #tpu.memory_space<vmem>>) attributes {dimension_semantics = [#tpu.dimension_semantics<arbitrary>], iteration_bounds = array<i64: 6>, scalar_prefetch = 0 : i64, scratch_operands = 1 : i64, tpu.core_type = #tpu.core_type<tc>, window_params = [{pipeline_mode = #tpu.pipeline_mode<synchronous>, transform_indices = @transform_0, window_bounds = array<i64: 8, 256>}, {transform_indices = @transform_1, window_bounds = array<i64: 1, 24, 256, 32>}, {transform_indices = @transform_2, window_bounds = array<i64: 1, 24, 1, 32>}, {transform_indices = @transform_3, window_bounds = array<i64: 1, 8, 32, 256>}, {transform_indices = @transform_4, window_bounds = array<i64: 1, 1, 256>}, {transform_indices = @transform_5, window_bounds = array<i64: 1, 1, 256>}, {transform_indices = @transform_6, window_bounds = array<i64: 1, 1, 256>}, {transform_indices = @transform_7, window_bounds = array<i64: 1, 256, 2048>}, {transform_indices = @transform_8, window_bounds = array<i64: 1, 1, 2048>}, {transform_indices = @transform_9, window_bounds = array<i64: 1, 2048, 256>}, {transform_indices = @transform_10, window_bounds = array<i64: 1, 1, 256>}, {transform_indices = @transform_11, window_bounds = array<i64: 1, 1, 256>}, {transform_indices = @transform_12, window_bounds = array<i64: 1, 1, 256>}, {pipeline_mode = #tpu.pipeline_mode<synchronous>, transform_indices = @transform_13, window_bounds = array<i64: 256, 128>}, {pipeline_mode = #tpu.pipeline_mode<synchronous>, transform_indices = @transform_14, window_bounds = array<i64: 1, 128>}, {pipeline_mode = #tpu.pipeline_mode<synchronous>, transform_indices = @transform_15, window_bounds = array<i64: 128, 1>}, {pipeline_mode = #tpu.pipeline_mode<synchronous>, transform_indices = @transform_16, window_bounds = array<i64: 1, 1>}, {pipeline_mode = #tpu.pipeline_mode<synchronous>, transform_indices = @transform_17, window_bounds = array<i64: 1, 1>}]} {
    %c0_i32 = arith.constant 0 : i32
    %0 = arith.cmpi eq, %arg0, %c0_i32 : i32
    %1 = arith.extui %0 : i1 to i32
    %c0_i32_0 = arith.constant 0 : i32
    %2 = arith.cmpi ne, %1, %c0_i32_0 : i32
    scf.if %2 {
      %c0_67 = arith.constant 0 : index
      %c0_68 = arith.constant 0 : index
      %130 = vector.load %arg1[%c0_67, %c0_68] : memref<8x256xf32, #tpu.memory_space<vmem>>, vector<8x256xf32>
      %c0_69 = arith.constant 0 : index
      %c0_70 = arith.constant 0 : index
      %131 = vector.load %arg19[%c0_69, %c0_70] : memref<8x256xf32, #tpu.memory_space<vmem>>, vector<8x256xf32>
      tpu.vector_store %arg19[%c0_69, %c0_70], %130 {strides = array<i32>} : memref<8x256xf32, #tpu.memory_space<vmem>>, vector<8x256xf32>,
    } else {
    }
    %c0 = arith.constant 0 : index
    %c0_1 = arith.constant 0 : index
    %3 = vector.load %arg19[%c0, %c0_1] : memref<8x256xf32, #tpu.memory_space<vmem>>, vector<8x256xf32>
    %4 = arith.truncf %3 : vector<8x256xf32> to vector<8x256xbf16>
    %5 = vector.shape_cast %4 : vector<8x256xbf16> to vector<1x8x256xbf16>
    %6 = vector.shape_cast %5 : vector<1x8x256xbf16> to vector<1x8x256xbf16>
    %7 = vector.broadcast %6 : vector<1x8x256xbf16> to vector<24x8x256xbf16>
    %c0_2 = arith.constant 0 : index
    %c0_3 = arith.constant 0 : index
    %c0_4 = arith.constant 0 : index
    %c0_5 = arith.constant 0 : index
    %8 = vector.load %arg2[%c0_2, %c0_3, %c0_4, %c0_5] : memref<1x24x256x32xbf16, #tpu.memory_space<vmem>>, vector<1x24x256x32xbf16>
    %9 = vector.shape_cast %8 : vector<1x24x256x32xbf16> to vector<24x256x32xbf16>
    %cst = arith.constant dense<0.000000e+00> : vector<24x8x32xf32>
    %10 = tpu.matmul %7, %9, %cst {dimension_numbers = #tpu.dot_dimension_numbers<[2], [1], [1], [2], [0, 0, 0, 1, 1, 2], [0], [0]>} : vector<24x8x256xbf16>, vector<24x256x32xbf16>, vector<24x8x32xf32> -> vector<24x8x32xf32>
    %c0_6 = arith.constant 0 : index
    %c0_7 = arith.constant 0 : index
    %c0_8 = arith.constant 0 : index
    %c0_9 = arith.constant 0 : index
    %11 = vector.load %arg3[%c0_6, %c0_7, %c0_8, %c0_9] : memref<1x24x1x32xf32, #tpu.memory_space<vmem>>, vector<1x24x1x32xf32>
    %12 = vector.shape_cast %11 : vector<1x24x1x32xf32> to vector<24x1x32xf32>
    %13 = vector.broadcast %12 : vector<24x1x32xf32> to vector<24x8x32xf32>
    %14 = arith.addf %10, %13 : vector<24x8x32xf32>
    %15 = vector.extract_strided_slice %14 {offsets = [0, 0, 0], sizes = [8, 8, 32], strides = [1, 1, 1]} : vector<24x8x32xf32> to vector<8x8x32xf32>
    %16 = vector.extract_strided_slice %14 {offsets = [8, 0, 0], sizes = [8, 8, 32], strides = [1, 1, 1]} : vector<24x8x32xf32> to vector<8x8x32xf32>
    %17 = vector.extract_strided_slice %14 {offsets = [16, 0, 0], sizes = [8, 8, 32], strides = [1, 1, 1]} : vector<24x8x32xf32> to vector<8x8x32xf32>
    %18 = tpu.iota {dimensions = array<i32: 1>} : vector<8x8xi32>
    %c5_i32 = arith.constant 5 : i32
    %19 = vector.broadcast %c5_i32 : i32 to vector<8x8xi32>
    %20 = arith.cmpi slt, %18, %19 : vector<8x8xi32>
    %cst_10 = arith.constant 0.000000e+00 : f32
    %cst_11 = arith.constant -1.000000e+30 : f32
    %21 = vector.broadcast %cst_10 : f32 to vector<8x8xf32>
    %22 = vector.broadcast %cst_11 : f32 to vector<8x8xf32>
    %23 = arith.select %20, %21, %22 : vector<8x8xi1>, vector<8x8xf32>
    %cst_12 = arith.constant dense<0.000000e+00> : vector<8x8x8xf32>
    %24 = tpu.matmul %15, %16, %cst_12 {dimension_numbers = #tpu.dot_dimension_numbers<[2], [2], [1], [1], [0, 0, 0, 1, 1, 1], [0], [0]>} : vector<8x8x32xf32>, vector<8x8x32xf32>, vector<8x8x8xf32> -> vector<8x8x8xf32>
    %cst_13 = arith.constant 0.176776692 : f32
    %25 = vector.broadcast %cst_13 : f32 to vector<8x8x8xf32>
    %26 = arith.mulf %24, %25 : vector<8x8x8xf32>
    %27 = vector.shape_cast %23 : vector<8x8xf32> to vector<1x8x8xf32>
    %28 = vector.broadcast %27 : vector<1x8x8xf32> to vector<8x8x8xf32>
    %29 = arith.addf %26, %28 : vector<8x8x8xf32>
    %cst_14 = arith.constant dense<0xFF800000> : vector<8x8xf32>
    %30 = vector.multi_reduction <maximumf>, %29, %cst_14 [2] : vector<8x8x8xf32> to vector<8x8xf32>
    %31 = vector.shape_cast %30 : vector<8x8xf32> to vector<8x8x1xf32>
    %32 = vector.broadcast %31 : vector<8x8x1xf32> to vector<8x8x8xf32>
    %33 = arith.subf %29, %32 : vector<8x8x8xf32>
    %34 = math.exp %33 : vector<8x8x8xf32>
    %cst_15 = arith.constant dense<0.000000e+00> : vector<8x8xf32>
    %35 = vector.multi_reduction <add>, %34, %cst_15 [2] : vector<8x8x8xf32> to vector<8x8xf32>
    %36 = vector.shape_cast %35 : vector<8x8xf32> to vector<8x8x1xf32>
    %37 = tpu.reciprocal %36 {approx = true} : vector<8x8x1xf32> -> vector<8x8x1xf32>
    %38 = vector.broadcast %37 : vector<8x8x1xf32> to vector<8x8x8xf32>
    %39 = arith.mulf %34, %38 : vector<8x8x8xf32>
    %cst_16 = arith.constant dense<0.000000e+00> : vector<8x8x32xf32>
    %40 = tpu.matmul %39, %17, %cst_16 {dimension_numbers = #tpu.dot_dimension_numbers<[2], [1], [1], [2], [0, 0, 0, 1, 1, 2], [0], [0]>} : vector<8x8x8xf32>, vector<8x8x32xf32>, vector<8x8x32xf32> -> vector<8x8x32xf32>
    %41 = arith.truncf %40 : vector<8x8x32xf32> to vector<8x8x32xbf16>
    %c0_17 = arith.constant 0 : index
    %c0_18 = arith.constant 0 : index
    %c0_19 = arith.constant 0 : index
    %c0_20 = arith.constant 0 : index
    %42 = vector.load %arg4[%c0_17, %c0_18, %c0_19, %c0_20] : memref<1x8x32x256xbf16, #tpu.memory_space<vmem>>, vector<1x8x32x256xbf16>
    %43 = vector.shape_cast %42 : vector<1x8x32x256xbf16> to vector<8x32x256xbf16>
    %cst_21 = arith.constant dense<0.000000e+00> : vector<8x8x256xf32>
    %44 = tpu.matmul %41, %43, %cst_21 {dimension_numbers = #tpu.dot_dimension_numbers<[2], [1], [1], [2], [0, 0, 0, 1, 1, 2], [0], [0]>} : vector<8x8x32xbf16>, vector<8x32x256xbf16>, vector<8x8x256xf32> -> vector<8x8x256xf32>
    %cst_22 = arith.constant dense<0.000000e+00> : vector<8x256xf32>
    %45 = vector.multi_reduction <add>, %44, %cst_22 [0] : vector<8x8x256xf32> to vector<8x256xf32>
    %c0_23 = arith.constant 0 : index
    %c0_24 = arith.constant 0 : index
    %c0_25 = arith.constant 0 : index
    %46 = vector.load %arg5[%c0_23, %c0_24, %c0_25] : memref<1x1x256xf32, #tpu.memory_space<vmem>>, vector<1x1x256xf32>
    %47 = vector.shape_cast %46 : vector<1x1x256xf32> to vector<1x256xf32>
    %48 = vector.broadcast %47 : vector<1x256xf32> to vector<8x256xf32>
    %49 = arith.addf %45, %48 : vector<8x256xf32>
    %50 = arith.addf %49, %3 : vector<8x256xf32>
    %cst_26 = arith.constant dense<0.000000e+00> : vector<8xf32>
    %51 = vector.multi_reduction <add>, %50, %cst_26 [1] : vector<8x256xf32> to vector<8xf32>
    %52 = vector.shape_cast %51 : vector<8xf32> to vector<8x1xf32>
    %cst_27 = arith.constant 2.560000e+02 : f32
    %53 = vector.broadcast %cst_27 : f32 to vector<8x1xf32>
    %54 = arith.divf %52, %53 : vector<8x1xf32>
    %55 = vector.broadcast %54 : vector<8x1xf32> to vector<8x256xf32>
    %56 = arith.subf %50, %55 : vector<8x256xf32>
    %57 = vector.broadcast %54 : vector<8x1xf32> to vector<8x256xf32>
    %58 = arith.subf %50, %57 : vector<8x256xf32>
    %59 = arith.mulf %56, %58 : vector<8x256xf32>
    %cst_28 = arith.constant dense<0.000000e+00> : vector<8xf32>
    %60 = vector.multi_reduction <add>, %59, %cst_28 [1] : vector<8x256xf32> to vector<8xf32>
    %61 = vector.shape_cast %60 : vector<8xf32> to vector<8x1xf32>
    %cst_29 = arith.constant 2.560000e+02 : f32
    %62 = vector.broadcast %cst_29 : f32 to vector<8x1xf32>
    %63 = arith.divf %61, %62 : vector<8x1xf32>
    %64 = vector.broadcast %54 : vector<8x1xf32> to vector<8x256xf32>
    %65 = arith.subf %50, %64 : vector<8x256xf32>
    %cst_30 = arith.constant 9.99999974E-6 : f32
    %66 = vector.broadcast %cst_30 : f32 to vector<8x1xf32>
    %67 = arith.addf %63, %66 : vector<8x1xf32>
    %68 = math.rsqrt %67 : vector<8x1xf32>
    %69 = vector.broadcast %68 : vector<8x1xf32> to vector<8x256xf32>
    %70 = arith.mulf %65, %69 : vector<8x256xf32>
    %c0_31 = arith.constant 0 : index
    %c0_32 = arith.constant 0 : index
    %c0_33 = arith.constant 0 : index
    %71 = vector.load %arg6[%c0_31, %c0_32, %c0_33] : memref<1x1x256xf32, #tpu.memory_space<vmem>>, vector<1x1x256xf32>
    %72 = vector.shape_cast %71 : vector<1x1x256xf32> to vector<1x256xf32>
    %73 = vector.broadcast %72 : vector<1x256xf32> to vector<8x256xf32>
    %74 = arith.mulf %70, %73 : vector<8x256xf32>
    %c0_34 = arith.constant 0 : index
    %c0_35 = arith.constant 0 : index
    %c0_36 = arith.constant 0 : index
    %75 = vector.load %arg7[%c0_34, %c0_35, %c0_36] : memref<1x1x256xf32, #tpu.memory_space<vmem>>, vector<1x1x256xf32>
    %76 = vector.shape_cast %75 : vector<1x1x256xf32> to vector<1x256xf32>
    %77 = vector.broadcast %76 : vector<1x256xf32> to vector<8x256xf32>
    %78 = arith.addf %74, %77 : vector<8x256xf32>
    %79 = arith.truncf %78 : vector<8x256xf32> to vector<8x256xbf16>
    %c0_37 = arith.constant 0 : index
    %c0_38 = arith.constant 0 : index
    %c0_39 = arith.constant 0 : index
    %80 = vector.load %arg8[%c0_37, %c0_38, %c0_39] : memref<1x256x2048xbf16, #tpu.memory_space<vmem>>, vector<1x256x2048xbf16>
    %81 = vector.shape_cast %80 : vector<1x256x2048xbf16> to vector<256x2048xbf16>
    %cst_40 = arith.constant dense<0.000000e+00> : vector<8x2048xf32>
    %82 = tpu.matmul %79, %81, %cst_40 {dimension_numbers = #tpu.dot_dimension_numbers<[1], [0], [0], [1], [0, 0, 1, 1], [], []>} : vector<8x256xbf16>, vector<256x2048xbf16>, vector<8x2048xf32> -> vector<8x2048xf32>
    %c0_41 = arith.constant 0 : index
    %c0_42 = arith.constant 0 : index
    %c0_43 = arith.constant 0 : index
    %83 = vector.load %arg9[%c0_41, %c0_42, %c0_43] : memref<1x1x2048xf32, #tpu.memory_space<vmem>>, vector<1x1x2048xf32>
    %84 = vector.shape_cast %83 : vector<1x1x2048xf32> to vector<1x2048xf32>
    %85 = vector.broadcast %84 : vector<1x2048xf32> to vector<8x2048xf32>
    %86 = arith.addf %82, %85 : vector<8x2048xf32>
    %cst_44 = arith.constant 0.000000e+00 : f32
    %87 = vector.broadcast %cst_44 : f32 to vector<8x2048xf32>
    %88 = arith.maximumf %86, %87 : vector<8x2048xf32>
    %89 = arith.truncf %88 : vector<8x2048xf32> to vector<8x2048xbf16>
    %c0_45 = arith.constant 0 : index
    %c0_46 = arith.constant 0 : index
    %c0_47 = arith.constant 0 : index
    %90 = vector.load %arg10[%c0_45, %c0_46, %c0_47] : memref<1x2048x256xbf16, #tpu.memory_space<vmem>>, vector<1x2048x256xbf16>
    %91 = vector.shape_cast %90 : vector<1x2048x256xbf16> to vector<2048x256xbf16>
    %cst_48 = arith.constant dense<0.000000e+00> : vector<8x256xf32>
    %92 = tpu.matmul %89, %91, %cst_48 {dimension_numbers = #tpu.dot_dimension_numbers<[1], [0], [0], [1], [0, 0, 1, 1], [], []>} : vector<8x2048xbf16>, vector<2048x256xbf16>, vector<8x256xf32> -> vector<8x256xf32>
    %c0_49 = arith.constant 0 : index
    %c0_50 = arith.constant 0 : index
    %c0_51 = arith.constant 0 : index
    %93 = vector.load %arg11[%c0_49, %c0_50, %c0_51] : memref<1x1x256xf32, #tpu.memory_space<vmem>>, vector<1x1x256xf32>
    %94 = vector.shape_cast %93 : vector<1x1x256xf32> to vector<1x256xf32>
    %95 = vector.broadcast %94 : vector<1x256xf32> to vector<8x256xf32>
    %96 = arith.addf %92, %95 : vector<8x256xf32>
    %97 = arith.addf %96, %78 : vector<8x256xf32>
    %cst_52 = arith.constant dense<0.000000e+00> : vector<8xf32>
    %98 = vector.multi_reduction <add>, %97, %cst_52 [1] : vector<8x256xf32> to vector<8xf32>
    %99 = vector.shape_cast %98 : vector<8xf32> to vector<8x1xf32>
    %cst_53 = arith.constant 2.560000e+02 : f32
    %100 = vector.broadcast %cst_53 : f32 to vector<8x1xf32>
    %101 = arith.divf %99, %100 : vector<8x1xf32>
    %102 = vector.broadcast %101 : vector<8x1xf32> to vector<8x256xf32>
    %103 = arith.subf %97, %102 : vector<8x256xf32>
    %104 = vector.broadcast %101 : vector<8x1xf32> to vector<8x256xf32>
    %105 = arith.subf %97, %104 : vector<8x256xf32>
    %106 = arith.mulf %103, %105 : vector<8x256xf32>
    %cst_54 = arith.constant dense<0.000000e+00> : vector<8xf32>
    %107 = vector.multi_reduction <add>, %106, %cst_54 [1] : vector<8x256xf32> to vector<8xf32>
    %108 = vector.shape_cast %107 : vector<8xf32> to vector<8x1xf32>
    %cst_55 = arith.constant 2.560000e+02 : f32
    %109 = vector.broadcast %cst_55 : f32 to vector<8x1xf32>
    %110 = arith.divf %108, %109 : vector<8x1xf32>
    %111 = vector.broadcast %101 : vector<8x1xf32> to vector<8x256xf32>
    %112 = arith.subf %97, %111 : vector<8x256xf32>
    %cst_56 = arith.constant 9.99999974E-6 : f32
    %113 = vector.broadcast %cst_56 : f32 to vector<8x1xf32>
    %114 = arith.addf %110, %113 : vector<8x1xf32>
    %115 = math.rsqrt %114 : vector<8x1xf32>
    %116 = vector.broadcast %115 : vector<8x1xf32> to vector<8x256xf32>
    %117 = arith.mulf %112, %116 : vector<8x256xf32>
    %c0_57 = arith.constant 0 : index
    %c0_58 = arith.constant 0 : index
    %c0_59 = arith.constant 0 : index
    %118 = vector.load %arg12[%c0_57, %c0_58, %c0_59] : memref<1x1x256xf32, #tpu.memory_space<vmem>>, vector<1x1x256xf32>
    %119 = vector.shape_cast %118 : vector<1x1x256xf32> to vector<1x256xf32>
    %120 = vector.broadcast %119 : vector<1x256xf32> to vector<8x256xf32>
    %121 = arith.mulf %117, %120 : vector<8x256xf32>
    %c0_60 = arith.constant 0 : index
    %c0_61 = arith.constant 0 : index
    %c0_62 = arith.constant 0 : index
    %122 = vector.load %arg13[%c0_60, %c0_61, %c0_62] : memref<1x1x256xf32, #tpu.memory_space<vmem>>, vector<1x1x256xf32>
    %123 = vector.shape_cast %122 : vector<1x1x256xf32> to vector<1x256xf32>
    %124 = vector.broadcast %123 : vector<1x256xf32> to vector<8x256xf32>
    %125 = arith.addf %121, %124 : vector<8x256xf32>
    %c0_63 = arith.constant 0 : index
    %c0_64 = arith.constant 0 : index
    %126 = vector.load %arg19[%c0_63, %c0_64] : memref<8x256xf32, #tpu.memory_space<vmem>>, vector<8x256xf32>
    tpu.vector_store %arg19[%c0_63, %c0_64], %125 {strides = array<i32>} : memref<8x256xf32, #tpu.memory_space<vmem>>, vector<8x256xf32>,
    %c5_i32_65 = arith.constant 5 : i32
    %127 = arith.cmpi eq, %arg0, %c5_i32_65 : i32
    %128 = arith.extui %127 : i1 to i32
    %c0_i32_66 = arith.constant 0 : i32
    %129 = arith.cmpi ne, %128, %c0_i32_66 : i32
    scf.if %129 {
      %130 = vector.extract_strided_slice %125 {offsets = [0, 0], sizes = [1, 256], strides = [1, 1]} : vector<8x256xf32> to vector<1x256xf32>
      %c0_67 = arith.constant 0 : index
      %c0_68 = arith.constant 0 : index
      %131 = vector.load %arg14[%c0_67, %c0_68] : memref<256x128xf32, #tpu.memory_space<vmem>>, vector<256x128xf32>
      %cst_69 = arith.constant dense<0.000000e+00> : vector<1x128xf32>
      %132 = tpu.matmul %130, %131, %cst_69 {dimension_numbers = #tpu.dot_dimension_numbers<[1], [0], [0], [1], [0, 0, 1, 1], [], []>} : vector<1x256xf32>, vector<256x128xf32>, vector<1x128xf32> -> vector<1x128xf32>
      %c0_70 = arith.constant 0 : index
      %c0_71 = arith.constant 0 : index
      %133 = vector.load %arg15[%c0_70, %c0_71] : memref<1x128xf32, #tpu.memory_space<vmem>>, vector<1x128xf32>
      %134 = arith.addf %132, %133 : vector<1x128xf32>
      %cst_72 = arith.constant 0.000000e+00 : f32
      %135 = vector.broadcast %cst_72 : f32 to vector<1x128xf32>
      %136 = arith.maximumf %134, %135 : vector<1x128xf32>
      %c0_73 = arith.constant 0 : index
      %c0_74 = arith.constant 0 : index
      %137 = vector.load %arg16[%c0_73, %c0_74] : memref<128x1xf32, #tpu.memory_space<vmem>>, vector<128x1xf32>
      %cst_75 = arith.constant dense<0.000000e+00> : vector<1x1xf32>
      %138 = tpu.matmul %136, %137, %cst_75 {dimension_numbers = #tpu.dot_dimension_numbers<[1], [0], [0], [1], [0, 0, 1, 1], [], []>} : vector<1x128xf32>, vector<128x1xf32>, vector<1x1xf32> -> vector<1x1xf32>
      %c0_76 = arith.constant 0 : index
      %c0_77 = arith.constant 0 : index
      %139 = vector.load %arg17[%c0_76, %c0_77] : memref<1x1xf32, #tpu.memory_space<vmem>>, vector<1x1xf32>
      %140 = arith.addf %138, %139 : vector<1x1xf32>
      %c0_78 = arith.constant 0 : index
      %c0_79 = arith.constant 0 : index
      %141 = vector.load %arg18[%c0_78, %c0_79] : memref<1x1xf32, #tpu.memory_space<vmem>>, vector<1x1xf32>
      tpu.vector_store %arg18[%c0_78, %c0_79], %140 {strides = array<i32>} : memref<1x1xf32, #tpu.memory_space<vmem>>, vector<1x1xf32>,
    } else {
    }
    return
  }
  func.func @transform_0(%arg0: i32) -> (i32, i32) {
    %c0_i32 = arith.constant 0 : i32
    %c0_i32_0 = arith.constant 0 : i32
    %c0_i32_1 = arith.constant 0 : i32
    return %c0_i32, %c0_i32_0 : i32, i32
  }
  func.func @transform_1(%arg0: i32) -> (i32, i32, i32, i32) {
    %c0_i32 = arith.constant 0 : i32
    %c0_i32_0 = arith.constant 0 : i32
    %c0_i32_1 = arith.constant 0 : i32
    %c0_i32_2 = arith.constant 0 : i32
    return %arg0, %c0_i32, %c0_i32_0, %c0_i32_1 : i32, i32, i32, i32
  }
  func.func @transform_2(%arg0: i32) -> (i32, i32, i32, i32) {
    %c0_i32 = arith.constant 0 : i32
    %c0_i32_0 = arith.constant 0 : i32
    %c0_i32_1 = arith.constant 0 : i32
    %c0_i32_2 = arith.constant 0 : i32
    return %arg0, %c0_i32, %c0_i32_0, %c0_i32_1 : i32, i32, i32, i32
  }
  func.func @transform_3(%arg0: i32) -> (i32, i32, i32, i32) {
    %c0_i32 = arith.constant 0 : i32
    %c0_i32_0 = arith.constant 0 : i32
    %c0_i32_1 = arith.constant 0 : i32
    %c0_i32_2 = arith.constant 0 : i32
    return %arg0, %c0_i32, %c0_i32_0, %c0_i32_1 : i32, i32, i32, i32
  }
  func.func @transform_4(%arg0: i32) -> (i32, i32, i32) {
    %c0_i32 = arith.constant 0 : i32
    %c0_i32_0 = arith.constant 0 : i32
    %c0_i32_1 = arith.constant 0 : i32
    return %arg0, %c0_i32, %c0_i32_0 : i32, i32, i32
  }
  func.func @transform_5(%arg0: i32) -> (i32, i32, i32) {
    %c0_i32 = arith.constant 0 : i32
    %c0_i32_0 = arith.constant 0 : i32
    %c0_i32_1 = arith.constant 0 : i32
    return %arg0, %c0_i32, %c0_i32_0 : i32, i32, i32
  }
  func.func @transform_6(%arg0: i32) -> (i32, i32, i32) {
    %c0_i32 = arith.constant 0 : i32
    %c0_i32_0 = arith.constant 0 : i32
    %c0_i32_1 = arith.constant 0 : i32
    return %arg0, %c0_i32, %c0_i32_0 : i32, i32, i32
  }
  func.func @transform_7(%arg0: i32) -> (i32, i32, i32) {
    %c0_i32 = arith.constant 0 : i32
    %c0_i32_0 = arith.constant 0 : i32
    %c0_i32_1 = arith.constant 0 : i32
    return %arg0, %c0_i32, %c0_i32_0 : i32, i32, i32
  }
  func.func @transform_8(%arg0: i32) -> (i32, i32, i32) {
    %c0_i32 = arith.constant 0 : i32
    %c0_i32_0 = arith.constant 0 : i32
    %c0_i32_1 = arith.constant 0 : i32
    return %arg0, %c0_i32, %c0_i32_0 : i32, i32, i32
  }
  func.func @transform_9(%arg0: i32) -> (i32, i32, i32) {
    %c0_i32 = arith.constant 0 : i32
    %c0_i32_0 = arith.constant 0 : i32
    %c0_i32_1 = arith.constant 0 : i32
    return %arg0, %c0_i32, %c0_i32_0 : i32, i32, i32
  }
  func.func @transform_10(%arg0: i32) -> (i32, i32, i32) {
    %c0_i32 = arith.constant 0 : i32
    %c0_i32_0 = arith.constant 0 : i32
    %c0_i32_1 = arith.constant 0 : i32
    return %arg0, %c0_i32, %c0_i32_0 : i32, i32, i32
  }
  func.func @transform_11(%arg0: i32) -> (i32, i32, i32) {
    %c0_i32 = arith.constant 0 : i32
    %c0_i32_0 = arith.constant 0 : i32
    %c0_i32_1 = arith.constant 0 : i32
    return %arg0, %c0_i32, %c0_i32_0 : i32, i32, i32
  }
  func.func @transform_12(%arg0: i32) -> (i32, i32, i32) {
    %c0_i32 = arith.constant 0 : i32
    %c0_i32_0 = arith.constant 0 : i32
    %c0_i32_1 = arith.constant 0 : i32
    return %arg0, %c0_i32, %c0_i32_0 : i32, i32, i32
  }
  func.func @transform_13(%arg0: i32) -> (i32, i32) {
    %c0_i32 = arith.constant 0 : i32
    %c0_i32_0 = arith.constant 0 : i32
    %c0_i32_1 = arith.constant 0 : i32
    return %c0_i32, %c0_i32_0 : i32, i32
  }
  func.func @transform_14(%arg0: i32) -> (i32, i32) {
    %c0_i32 = arith.constant 0 : i32
    %c0_i32_0 = arith.constant 0 : i32
    %c0_i32_1 = arith.constant 0 : i32
    return %c0_i32, %c0_i32_0 : i32, i32
  }
  func.func @transform_15(%arg0: i32) -> (i32, i32) {
    %c0_i32 = arith.constant 0 : i32
    %c0_i32_0 = arith.constant 0 : i32
    %c0_i32_1 = arith.constant 0 : i32
    return %c0_i32, %c0_i32_0 : i32, i32
  }
  func.func @transform_16(%arg0: i32) -> (i32, i32) {
    %c0_i32 = arith.constant 0 : i32
    %c0_i32_0 = arith.constant 0 : i32
    %c0_i32_1 = arith.constant 0 : i32
    return %c0_i32, %c0_i32_0 : i32, i32
  }
  func.func @transform_17(%arg0: i32) -> (i32, i32) {
    %c0_i32 = arith.constant 0 : i32
    %c0_i32_0 = arith.constant 0 : i32
    %c0_i32_1 = arith.constant 0 : i32
    return %c0_i32, %c0_i32_0 : i32, i32
  }
}

</mosaic_0001>

<bundles_post_ra>
// kernel: squeeze.1
= control target key start
LH: loop header
LB: loop body
LE: loop exit
PB: predicated region body
PF: predicated region fallthrough
CT: control target
= control target key end

     0   :  { %2 = vsyncpa [#allocation1], 0  ;;  %s2591_s6 = smov [#allocation0]   ;;  %s3553_s0 = inlined_call_operand.hbm [shape: f32[1,4,1,64,64], index: 0, kind: input, shape index: {}]   ;;  %s3554_s1 = inlined_call_operand.vmem [shape: f32[4,1,2,32,2,32], index: 1, kind: output, shape index: {}]  }
   0x1   :  { %s7_s7 = sshll.u32 %s2591_s6, 4  ;;  %s2567_s10 = scalar_lea.hbm %s3553_s0, 4096  ;;  %s8_s7 = int_to_ptr.vmem [resolvable:$true] %s7_s7 }
   0x2   :  { %p2568_p0 = scmp.ne.s32.totalorder %s3553_s0, %s2567_s10  ;;  %p2571_p1 = scmp.lt.u32.totalorder %s2567_s10, %s3553_s0 }
   0x4   :  { %p2573_p2 = pnand %p2571_p1, %p2568_p0 }
   0x6   :  { %2576 = shalt.err (!%p2573_p2)
}
   0x7   :  { %s2577_s15 = scalar_lea.vmem %s8_s7, 4096  ;;  %p2582_p4 = scmp.lt.s32.totalorder %s8_s7, %s8_s7 }
   0x8   :  { %p2578_p3 = scmp.ne.s32.totalorder %s8_s7, %s2577_s15  ;;  %p2583_p5 = scmp.lt.s32.totalorder %s2577_s15, %s2577_s15 }
   0xa   :  { %p2584_p6 = por %p2583_p5, %p2582_p4 }
   0xc   :  { %p2585_p7 = pnand %p2584_p6, %p2578_p3 }
   0xe   :  { %2588 = shalt.err (!%p2585_p7)
}
   0xf   :  { %10 = dma.hbm_to_vmem [thread:$0]  %s3553_s0, 4096, %s8_s7, [#allocation1]  }
  0x10   :  { %2589 = dma.done.wait [#allocation1], 4096  }
  0x11   :  { %2590 = vsyncadd [#allocation1], 4294963200  ;;  %vm13_vm0 = vcmask 261120   ;;  %v251_v0 = vld [vmem:[#allocation0 + $0x10] sm:$0xff]   ;;  %v233_v1 = vld [vmem:[#allocation0] sm:$0xff]   ;;  %s2592_s0 = smov 96  }
  0x12   :  { %v260_v2 = vld [vmem:[#allocation0 + $0x18] sm:$0xff]   ;;  %252 = vrot.lane.b32.xlu1 %v251_v0, %s2592_s0  ;;  %234 = vrot.lane.b32.xlu0 %v233_v1, %s2592_s0  ;;  %v242_v3 = vld [vmem:[#allocation0 + $0x8] sm:$0xff]   ;;  %v2619_v5 = vld [vmem:[#allocation0 + $0x20] sm:$0xff]   ;;  %27 = vst.msk [vmem:[#allocation2 + $0x80] ss:$8 sm:$0xf] %vm13_vm0, %v251_v0  }
  0x13   :  { %v2617_v4 = vld [vmem:[#allocation0 + $0x28] sm:$0xff]   ;;  %29 = vst.msk [vmem:[#allocation2 + $0x80] ss:$8 sm:$0xf0] %vm13_vm0, %v251_v0   ;;  %v296_v6 = vld [vmem:[#allocation0 + $0x38] sm:$0xff]   ;;  %v287_v7 = vld [vmem:[#allocation0 + $0x30] sm:$0xff]  }
  0x14   :  { %14 = vst.msk [vmem:[#allocation2] ss:$8 sm:$0xf] %vm13_vm0, %v233_v1   ;;  %15 = vst.msk [vmem:[#allocation2] ss:$8 sm:$0xf0] %vm13_vm0, %v233_v1  }
  0x15   :  { %34 = vst.msk [vmem:[#allocation2 + $0xc0] ss:$8 sm:$0xf] %vm13_vm0, %v260_v2   ;;  %36 = vst.msk [vmem:[#allocation2 + $0xc0] ss:$8 sm:$0xf0] %vm13_vm0, %v260_v2  }
  0x16   :  { %v314_v8 = vld [vmem:[#allocation0 + $0x48] sm:$0xff]   ;;  %20 = vst.msk [vmem:[#allocation2 + $0x40] ss:$8 sm:$0xf] %vm13_vm0, %v242_v3   ;;  %v305_v9 = vld [vmem:[#allocation0 + $0x40] sm:$0xff]   ;;  %v332_v10 = vld [vmem:[#allocation0 + $0x58] sm:$0xff]   ;;  %261 = vrot.lane.b32.xlu1 %v260_v2, %s2592_s0  ;;  %243 = vrot.lane.b32.xlu0 %v242_v3, %s2592_s0 }
  0x17   :  { %22 = vst.msk [vmem:[#allocation2 + $0x40] ss:$8 sm:$0xf0] %vm13_vm0, %v242_v3   ;;  %48 = vst.msk [vmem:[#allocation2 + $0x140] ss:$8 sm:$0xf] %vm13_vm0, %v2617_v4  }
  0x18   :  { %50 = vst.msk [vmem:[#allocation2 + $0x140] ss:$8 sm:$0xf0] %vm13_vm0, %v2617_v4   ;;  %41 = vst.msk [vmem:[#allocation2 + $0x100] ss:$8 sm:$0xf] %vm13_vm0, %v2619_v5  }
  0x19   :  { %43 = vst.msk [vmem:[#allocation2 + $0x100] ss:$8 sm:$0xf0] %vm13_vm0, %v2619_v5   ;;  %v323_v11 = vld [vmem:[#allocation0 + $0x50] sm:$0xff]   ;;  %v350_v12 = vld [vmem:[#allocation0 + $0x68] sm:$0xff]   ;;  %v341_v13 = vld [vmem:[#allocation0 + $0x60] sm:$0xff]  }
  0x1a   :  { %62 = vst.msk [vmem:[#allocation2 + $0x1c0] ss:$8 sm:$0xf] %vm13_vm0, %v296_v6   ;;  %64 = vst.msk [vmem:[#allocation2 + $0x1c0] ss:$8 sm:$0xf0] %vm13_vm0, %v296_v6   ;;  %279 = vrot.lane.b32.xlu1 %v2617_v4, %s2592_s0  ;;  %270 = vrot.lane.b32.xlu0 %v2619_v5, %s2592_s0 }
  0x1b   :  { %55 = vst.msk [vmem:[#allocation2 + $0x180] ss:$8 sm:$0xf] %vm13_vm0, %v287_v7   ;;  %57 = vst.msk [vmem:[#allocation2 + $0x180] ss:$8 sm:$0xf0] %vm13_vm0, %v287_v7  }
  0x1c   :  { %76 = vst.msk [vmem:[#allocation2 + $0x240] ss:$8 sm:$0xf] %vm13_vm0, %v314_v8   ;;  %78 = vst.msk [vmem:[#allocation2 + $0x240] ss:$8 sm:$0xf0] %vm13_vm0, %v314_v8  }
  0x1d   :  { %v368_v14 = vld [vmem:[#allocation0 + $0x78] sm:$0xff]   ;;  %69 = vst.msk [vmem:[#allocation2 + $0x200] ss:$8 sm:$0xf] %vm13_vm0, %v305_v9   ;;  %v359_v15 = vld [vmem:[#allocation0 + $0x70] sm:$0xff]   ;;  %v386_v16 = vld [vmem:[#allocation0 + $0x88] sm:$0xff]  }
  0x1e   :  { %71 = vst.msk [vmem:[#allocation2 + $0x200] ss:$8 sm:$0xf0] %vm13_vm0, %v305_v9   ;;  %90 = vst.msk [vmem:[#allocation2 + $0x2c0] ss:$8 sm:$0xf] %vm13_vm0, %v332_v10   ;;  %297 = vrot.lane.b32.xlu1 %v296_v6, %s2592_s0  ;;  %288 = vrot.lane.b32.xlu0 %v287_v7, %s2592_s0 }
  0x1f   :  { %92 = vst.msk [vmem:[#allocation2 + $0x2c0] ss:$8 sm:$0xf0] %vm13_vm0, %v332_v10   ;;  %83 = vst.msk [vmem:[#allocation2 + $0x280] ss:$8 sm:$0xf] %vm13_vm0, %v323_v11  }
  0x20   :  { %85 = vst.msk [vmem:[#allocation2 + $0x280] ss:$8 sm:$0xf0] %vm13_vm0, %v323_v11   ;;  %v377_v17 = vld [vmem:[#allocation0 + $0x80] sm:$0xff]   ;;  %v404_v18 = vld [vmem:[#allocation0 + $0x98] sm:$0xff]   ;;  %v395_v19 = vld [vmem:[#allocation0 + $0x90] sm:$0xff]  }
  0x21   :  { %104 = vst.msk [vmem:[#allocation2 + $0x340] ss:$8 sm:$0xf] %vm13_vm0, %v350_v12   ;;  %106 = vst.msk [vmem:[#allocation2 + $0x340] ss:$8 sm:$0xf0] %vm13_vm0, %v350_v12  }
  0x22   :  { %97 = vst.msk [vmem:[#allocation2 + $0x300] ss:$8 sm:$0xf] %vm13_vm0, %v341_v13   ;;  %99 = vst.msk [vmem:[#allocation2 + $0x300] ss:$8 sm:$0xf0] %vm13_vm0, %v341_v13   ;;  %315 = vrot.lane.b32.xlu1 %v314_v8, %s2592_s0  ;;  %306 = vrot.lane.b32.xlu0 %v305_v9, %s2592_s0 }
  0x23   :  { %118 = vst.msk [vmem:[#allocation2 + $0x3c0] ss:$8 sm:$0xf] %vm13_vm0, %v368_v14   ;;  %120 = vst.msk [vmem:[#allocation2 + $0x3c0] ss:$8 sm:$0xf0] %vm13_vm0, %v368_v14  }
  0x24   :  { %v422_v20 = vld [vmem:[#allocation0 + $0xa8] sm:$0xff]   ;;  %111 = vst.msk [vmem:[#allocation2 + $0x380] ss:$8 sm:$0xf] %vm13_vm0, %v359_v15   ;;  %v413_v21 = vld [vmem:[#allocation0 + $0xa0] sm:$0xff]   ;;  %v440_v22 = vld [vmem:[#allocation0 + $0xb8] sm:$0xff]  }
  0x25   :  { %113 = vst.msk [vmem:[#allocation2 + $0x380] ss:$8 sm:$0xf0] %vm13_vm0, %v359_v15   ;;  %132 = vst.msk [vmem:[#allocation2 + $0x440] ss:$8 sm:$0xf] %vm13_vm0, %v386_v16  }
  0x26   :  { %134 = vst.msk [vmem:[#allocation2 + $0x440] ss:$8 sm:$0xf0] %vm13_vm0, %v386_v16   ;;  %125 = vst.msk [vmem:[#allocation2 + $0x400] ss:$8 sm:$0xf] %vm13_vm0, %v377_v17   ;;  %333 = vrot.lane.b32.xlu1 %v332_v10, %s2592_s0  ;;  %324 = vrot.lane.b32.xlu0 %v323_v11, %s2592_s0 }
  0x27   :  { %127 = vst.msk [vmem:[#allocation2 + $0x400] ss:$8 sm:$0xf0] %vm13_vm0, %v377_v17   ;;  %146 = vst.msk [vmem:[#allocation2 + $0x4c0] ss:$8 sm:$0xf] %vm13_vm0, %v404_v18  }
  0x28   :  { %148 = vst.msk [vmem:[#allocation2 + $0x4c0] ss:$8 sm:$0xf0] %vm13_vm0, %v404_v18   ;;  %139 = vst.msk [vmem:[#allocation2 + $0x480] ss:$8 sm:$0xf] %vm13_vm0, %v395_v19  }
  0x29   :  { %141 = vst.msk [vmem:[#allocation2 + $0x480] ss:$8 sm:$0xf0] %vm13_vm0, %v395_v19   ;;  %160 = vst.msk [vmem:[#allocation2 + $0x540] ss:$8 sm:$0xf] %vm13_vm0, %v422_v20  }
  0x2a   :  { %162 = vst.msk [vmem:[#allocation2 + $0x540] ss:$8 sm:$0xf0] %vm13_vm0, %v422_v20   ;;  %153 = vst.msk [vmem:[#allocation2 + $0x500] ss:$8 sm:$0xf] %vm13_vm0, %v413_v21   ;;  %351 = vrot.lane.b32.xlu1 %v350_v12, %s2592_s0  ;;  %342 = vrot.lane.b32.xlu0 %v341_v13, %s2592_s0 }
  0x2b   :  { %155 = vst.msk [vmem:[#allocation2 + $0x500] ss:$8 sm:$0xf0] %vm13_vm0, %v413_v21   ;;  %174 = vst.msk [vmem:[#allocation2 + $0x5c0] ss:$8 sm:$0xf] %vm13_vm0, %v440_v22  }
  0x2c   :  { %176 = vst.msk [vmem:[#allocation2 + $0x5c0] ss:$8 sm:$0xf0] %vm13_vm0, %v440_v22   ;;  %v431_v23 = vld [vmem:[#allocation0 + $0xb0] sm:$0xff]   ;;  %v458_v24 = vld [vmem:[#allocation0 + $0xc8] sm:$0xff]   ;;  %v449_v25 = vld [vmem:[#allocation0 + $0xc0] sm:$0xff]  }
  0x2d   :  { %v164_v26 = vld [vmem:[#allocation0 + $0xb0] sm:$0xff]   ;;  %v476_v27 = vld [vmem:[#allocation0 + $0xd8] sm:$0xff]   ;;  %v494_v29 = vld [vmem:[#allocation0 + $0xe8] sm:$0xff]  }
  0x2e   :  { %369 = vrot.lane.b32.xlu1 %v368_v14, %s2592_s0  ;;  %360 = vrot.lane.b32.xlu0 %v359_v15, %s2592_s0  ;;  %v467_v28 = vld [vmem:[#allocation0 + $0xd0] sm:$0xff]   ;;  %167 = vst.msk [vmem:[#allocation2 + $0x580] ss:$8 sm:$0xf] %vm13_vm0, %v164_v26   ;;  %v485_v30 = vld [vmem:[#allocation0 + $0xe0] sm:$0xff]   ;;  %v185_v31 = vld [vmem:[#allocation0 + $0xc8] sm:$0xff]  }
  0x2f   :  { %169 = vst.msk [vmem:[#allocation2 + $0x580] ss:$8 sm:$0xf0] %vm13_vm0, %v164_v26   ;;  %v178_v32 = vld [vmem:[#allocation0 + $0xc0] sm:$0xff]   ;;  %v512_v33 = vld [vmem:[#allocation0 + $0xf8] sm:$0xff]   ;;  %v503_v34 = vld [vmem:[#allocation0 + $0xf0] sm:$0xff]  }
  0x30   :  { %188 = vst.msk [vmem:[#allocation2 + $0x640] ss:$8 sm:$0xf] %vm13_vm0, %v185_v31   ;;  %190 = vst.msk [vmem:[#allocation2 + $0x640] ss:$8 sm:$0xf0] %vm13_vm0, %v185_v31  }
  0x31   :  { %181 = vst.msk [vmem:[#allocation2 + $0x600] ss:$8 sm:$0xf] %vm13_vm0, %v178_v32   ;;  %183 = vst.msk [vmem:[#allocation2 + $0x600] ss:$8 sm:$0xf0] %vm13_vm0, %v178_v32  }
  0x32   :  { %387 = vrot.lane.b32.xlu1 %v386_v16, %s2592_s0  ;;  %378 = vrot.lane.b32.xlu0 %v377_v17, %s2592_s0  ;;  %v199_v35 = vld [vmem:[#allocation0 + $0xd8] sm:$0xff]   ;;  %v192_v36 = vld [vmem:[#allocation0 + $0xd0] sm:$0xff]   ;;  %v213_v37 = vld [vmem:[#allocation0 + $0xe8] sm:$0xff]  }
  0x33   :  { %202 = vst.msk [vmem:[#allocation2 + $0x6c0] ss:$8 sm:$0xf] %vm13_vm0, %v199_v35   ;;  %204 = vst.msk [vmem:[#allocation2 + $0x6c0] ss:$8 sm:$0xf0] %vm13_vm0, %v199_v35  }
  0x34   :  { %195 = vst.msk [vmem:[#allocation2 + $0x680] ss:$8 sm:$0xf] %vm13_vm0, %v192_v36   ;;  %197 = vst.msk [vmem:[#allocation2 + $0x680] ss:$8 sm:$0xf0] %vm13_vm0, %v192_v36  }
  0x35   :  { %v206_v38 = vld [vmem:[#allocation0 + $0xe0] sm:$0xff]   ;;  %216 = vst.msk [vmem:[#allocation2 + $0x740] ss:$8 sm:$0xf] %vm13_vm0, %v213_v37   ;;  %v227_v39 = vld [vmem:[#allocation0 + $0xf8] sm:$0xff]   ;;  %v220_v40 = vld [vmem:[#allocation0 + $0xf0] sm:$0xff]  }
  0x36   :  { %405 = vrot.lane.b32.xlu1 %v404_v18, %s2592_s0  ;;  %396 = vrot.lane.b32.xlu0 %v395_v19, %s2592_s0  ;;  %218 = vst.msk [vmem:[#allocation2 + $0x740] ss:$8 sm:$0xf0] %vm13_vm0, %v213_v37   ;;  %209 = vst.msk [vmem:[#allocation2 + $0x700] ss:$8 sm:$0xf] %vm13_vm0, %v206_v38  }
  0x37   :  { %211 = vst.msk [vmem:[#allocation2 + $0x700] ss:$8 sm:$0xf0] %vm13_vm0, %v206_v38   ;;  %230 = vst.msk [vmem:[#allocation2 + $0x7c0] ss:$8 sm:$0xf] %vm13_vm0, %v227_v39  }
  0x38   :  { %232 = vst.msk [vmem:[#allocation2 + $0x7c0] ss:$8 sm:$0xf0] %vm13_vm0, %v227_v39   ;;  %223 = vst.msk [vmem:[#allocation2 + $0x780] ss:$8 sm:$0xf] %vm13_vm0, %v220_v40  }
  0x39   :  { %225 = vst.msk [vmem:[#allocation2 + $0x780] ss:$8 sm:$0xf0] %vm13_vm0, %v220_v40  }
  0x3a   :  { %423 = vrot.lane.b32.xlu1 %v422_v20, %s2592_s0  ;;  %414 = vrot.lane.b32.xlu0 %v413_v21, %s2592_s0 }
  0x3e   :  { %441 = vrot.lane.b32.xlu1 %v440_v22, %s2592_s0  ;;  %432 = vrot.lane.b32.xlu0 %v431_v23, %s2592_s0 }
  0x42   :  { %459 = vrot.lane.b32.xlu1 %v458_v24, %s2592_s0  ;;  %450 = vrot.lane.b32.xlu0 %v449_v25, %s2592_s0 }
  0x46   :  { %477 = vrot.lane.b32.xlu1 %v476_v27, %s2592_s0  ;;  %468 = vrot.lane.b32.xlu0 %v467_v28, %s2592_s0 }
  0x4a   :  { %495 = vrot.lane.b32.xlu1 %v494_v29, %s2592_s0  ;;  %486 = vrot.lane.b32.xlu0 %v485_v30, %s2592_s0 }
  0x4e   :  { %513 = vrot.lane.b32.xlu1 %v512_v33, %s2592_s0  ;;  %504 = vrot.lane.b32.xlu0 %v503_v34, %s2592_s0 }
  0x84   :  { %v253_v41 = vpop.permute.xlu1 %252   ;;  %v235_v42 = vpop.permute.xlu0 %234  }
  0x85   :  { %256 = vst.msk [vmem:[#allocation2 + $0x81] ss:$8 sm:$0xf] %vm13_vm0, %v253_v41   ;;  %258 = vst.msk [vmem:[#allocation2 + $0x81] ss:$8 sm:$0xf0] %vm13_vm0, %v253_v41  }
  0x86   :  { %238 = vst.msk [vmem:[#allocation2 + $0x1] ss:$8 sm:$0xf] %vm13_vm0, %v235_v42   ;;  %240 = vst.msk [vmem:[#allocation2 + $0x1] ss:$8 sm:$0xf0] %vm13_vm0, %v235_v42  }
  0x88   :  { %v262_v43 = vpop.permute.xlu1 %261   ;;  %v244_v44 = vpop.permute.xlu0 %243  }
  0x89   :  { %265 = vst.msk [vmem:[#allocation2 + $0xc1] ss:$8 sm:$0xf] %vm13_vm0, %v262_v43   ;;  %267 = vst.msk [vmem:[#allocation2 + $0xc1] ss:$8 sm:$0xf0] %vm13_vm0, %v262_v43  }
  0x8a   :  { %247 = vst.msk [vmem:[#allocation2 + $0x41] ss:$8 sm:$0xf] %vm13_vm0, %v244_v44   ;;  %249 = vst.msk [vmem:[#allocation2 + $0x41] ss:$8 sm:$0xf0] %vm13_vm0, %v244_v44  }
  0x8c   :  { %v616_v45 = vld [vmem:[#allocation2 + $0x80] sm:$0x3]  ;;  %v622_v46 = vld [vmem:[#allocation2 + $0x88] sm:$0x3]  ;;  %v628_v47 = vld [vmem:[#allocation2 + $0x90] sm:$0x3]  ;;  %v280_v48 = vpop.permute.xlu1 %279   ;;  %v271_v49 = vpop.permute.xlu0 %270  }
  0x8d   :  { %2325 = vst [vmem:[%s3554_s1 + $0x20] sm:$0x3] %v616_v45  ;;  %2326 = vst [vmem:[%s3554_s1 + $0x22] sm:$0x3] %v622_v46  ;;  %v634_v50 = vld [vmem:[#allocation2 + $0x98] sm:$0x3] }
  0x8e   :  { %2327 = vst [vmem:[%s3554_s1 + $0x24] sm:$0x3] %v628_v47  ;;  %v640_v51 = vld [vmem:[#allocation2 + $0xa0] sm:$0x3]  ;;  %v646_v52 = vld [vmem:[#allocation2 + $0xa8] sm:$0x3] }
  0x8f   :  { %283 = vst.msk [vmem:[#allocation2 + $0x141] ss:$8 sm:$0xf] %vm13_vm0, %v280_v48   ;;  %285 = vst.msk [vmem:[#allocation2 + $0x141] ss:$8 sm:$0xf0] %vm13_vm0, %v280_v48  }
  0x90   :  { %274 = vst.msk [vmem:[#allocation2 + $0x101] ss:$8 sm:$0xf] %vm13_vm0, %v271_v49   ;;  %276 = vst.msk [vmem:[#allocation2 + $0x101] ss:$8 sm:$0xf0] %vm13_vm0, %v271_v49   ;;  %v298_v62 = vpop.permute.xlu1 %297   ;;  %v289_v63 = vpop.permute.xlu0 %288  }
  0x91   :  { %2328 = vst [vmem:[%s3554_s1 + $0x26] sm:$0x3] %v634_v50  ;;  %2329 = vst [vmem:[%s3554_s1 + $0x28] sm:$0x3] %v640_v51  ;;  %v652_v53 = vld [vmem:[#allocation2 + $0xb0] sm:$0x3] }
  0x92   :  { %2330 = vst [vmem:[%s3554_s1 + $0x2a] sm:$0x3] %v646_v52  ;;  %v658_v54 = vld [vmem:[#allocation2 + $0xb8] sm:$0x3]  ;;  %v523_v55 = vld [vmem:[#allocation2] sm:$0x3] }
  0x93   :  { %2331 = vst [vmem:[%s3554_s1 + $0x2c] sm:$0x3] %v652_v53  ;;  %2332 = vst [vmem:[%s3554_s1 + $0x2e] sm:$0x3] %v658_v54  ;;  %v527_v56 = vld [vmem:[#allocation2 + $0x8] sm:$0x3] }
  0x94   :  { %525 = vst [vmem:[%s3554_s1] sm:$0x3] %v523_v55  ;;  %v532_v57 = vld [vmem:[#allocation2 + $0x10] sm:$0x3]  ;;  %v538_v58 = vld [vmem:[#allocation2 + $0x18] sm:$0x3]  ;;  %v316_v12 = vpop.permute.xlu1 %315   ;;  %v307_v13 = vpop.permute.xlu0 %306  }
  0x95   :  { %2310 = vst [vmem:[%s3554_s1 + $0x2] sm:$0x3] %v527_v56  ;;  %2311 = vst [vmem:[%s3554_s1 + $0x4] sm:$0x3] %v532_v57  ;;  %v544_v59 = vld [vmem:[#allocation2 + $0x20] sm:$0x3] }
  0x96   :  { %2312 = vst [vmem:[%s3554_s1 + $0x6] sm:$0x3] %v538_v58  ;;  %v550_v60 = vld [vmem:[#allocation2 + $0x28] sm:$0x3]  ;;  %v556_v61 = vld [vmem:[#allocation2 + $0x30] sm:$0x3] }
  0x97   :  { %2313 = vst [vmem:[%s3554_s1 + $0x8] sm:$0x3] %v544_v59  ;;  %2314 = vst [vmem:[%s3554_s1 + $0xa] sm:$0x3] %v550_v60  ;;  %v562_v0 = vld [vmem:[#allocation2 + $0x38] sm:$0x3] }
  0x98   :  { %2315 = vst [vmem:[%s3554_s1 + $0xc] sm:$0x3] %v556_v61  ;;  %v664_v1 = vld [vmem:[#allocation2 + $0xc0] sm:$0x3]  ;;  %v670_v2 = vld [vmem:[#allocation2 + $0xc8] sm:$0x3]  ;;  %v334_v26 = vpop.permute.xlu1 %333   ;;  %v325_v27 = vpop.permute.xlu0 %324  }
  0x99   :  { %301 = vst.msk [vmem:[#allocation2 + $0x1c1] ss:$8 sm:$0xf] %vm13_vm0, %v298_v62   ;;  %303 = vst.msk [vmem:[#allocation2 + $0x1c1] ss:$8 sm:$0xf0] %vm13_vm0, %v298_v62  }
  0x9a   :  { %292 = vst.msk [vmem:[#allocation2 + $0x181] ss:$8 sm:$0xf] %vm13_vm0, %v289_v63   ;;  %294 = vst.msk [vmem:[#allocation2 + $0x181] ss:$8 sm:$0xf0] %vm13_vm0, %v289_v63  }
  0x9b   :  { %2316 = vst [vmem:[%s3554_s1 + $0xe] sm:$0x3] %v562_v0  ;;  %2333 = vst [vmem:[%s3554_s1 + $0x30] sm:$0x3] %v664_v1  ;;  %v676_v3 = vld [vmem:[#allocation2 + $0xd0] sm:$0x3] }
  0x9c   :  { %2334 = vst [vmem:[%s3554_s1 + $0x32] sm:$0x3] %v670_v2  ;;  %v682_v4 = vld [vmem:[#allocation2 + $0xd8] sm:$0x3]  ;;  %v688_v5 = vld [vmem:[#allocation2 + $0xe0] sm:$0x3]  ;;  %v352_v40 = vpop.permute.xlu1 %351   ;;  %v343_v41 = vpop.permute.xlu0 %342  }
  0x9d   :  { %2335 = vst [vmem:[%s3554_s1 + $0x34] sm:$0x3] %v676_v3  ;;  %2336 = vst [vmem:[%s3554_s1 + $0x36] sm:$0x3] %v682_v4  ;;  %v694_v6 = vld [vmem:[#allocation2 + $0xe8] sm:$0x3] }
  0x9e   :  { %2337 = vst [vmem:[%s3554_s1 + $0x38] sm:$0x3] %v688_v5  ;;  %v700_v7 = vld [vmem:[#allocation2 + $0xf0] sm:$0x3]  ;;  %v706_v8 = vld [vmem:[#allocation2 + $0xf8] sm:$0x3] }
  0x9f   :  { %2338 = vst [vmem:[%s3554_s1 + $0x3a] sm:$0x3] %v694_v6  ;;  %2339 = vst [vmem:[%s3554_s1 + $0x3c] sm:$0x3] %v700_v7  ;;  %v568_v9 = vld [vmem:[#allocation2 + $0x40] sm:$0x3] }
  0xa0   :  { %2340 = vst [vmem:[%s3554_s1 + $0x3e] sm:$0x3] %v706_v8  ;;  %v574_v10 = vld [vmem:[#allocation2 + $0x48] sm:$0x3]  ;;  %v580_v11 = vld [vmem:[#allocation2 + $0x50] sm:$0x3]  ;;  %v370_v54 = vpop.permute.xlu1 %369   ;;  %v361_v55 = vpop.permute.xlu0 %360  }
  0xa1   :  { %2317 = vst [vmem:[%s3554_s1 + $0x10] sm:$0x3] %v568_v9  ;;  %2318 = vst [vmem:[%s3554_s1 + $0x12] sm:$0x3] %v574_v10  ;;  %v586_v14 = vld [vmem:[#allocation2 + $0x58] sm:$0x3] }
  0xa2   :  { %2319 = vst [vmem:[%s3554_s1 + $0x14] sm:$0x3] %v580_v11  ;;  %v592_v15 = vld [vmem:[#allocation2 + $0x60] sm:$0x3]  ;;  %v598_v16 = vld [vmem:[#allocation2 + $0x68] sm:$0x3] }
  0xa3   :  { %319 = vst.msk [vmem:[#allocation2 + $0x241] ss:$8 sm:$0xf] %vm13_vm0, %v316_v12   ;;  %321 = vst.msk [vmem:[#allocation2 + $0x241] ss:$8 sm:$0xf0] %vm13_vm0, %v316_v12  }
  0xa4   :  { %310 = vst.msk [vmem:[#allocation2 + $0x201] ss:$8 sm:$0xf] %vm13_vm0, %v307_v13   ;;  %312 = vst.msk [vmem:[#allocation2 + $0x201] ss:$8 sm:$0xf0] %vm13_vm0, %v307_v13   ;;  %v388_v4 = vpop.permute.xlu1 %387   ;;  %v379_v5 = vpop.permute.xlu0 %378  }
  0xa5   :  { %2320 = vst [vmem:[%s3554_s1 + $0x16] sm:$0x3] %v586_v14  ;;  %2321 = vst [vmem:[%s3554_s1 + $0x18] sm:$0x3] %v592_v15  ;;  %v604_v17 = vld [vmem:[#allocation2 + $0x70] sm:$0x3] }
  0xa6   :  { %2322 = vst [vmem:[%s3554_s1 + $0x1a] sm:$0x3] %v598_v16  ;;  %v610_v18 = vld [vmem:[#allocation2 + $0x78] sm:$0x3]  ;;  %v760_v19 = vld [vmem:[#allocation2 + $0x140] sm:$0x3] }
  0xa7   :  { %2323 = vst [vmem:[%s3554_s1 + $0x1c] sm:$0x3] %v604_v17  ;;  %2324 = vst [vmem:[%s3554_s1 + $0x1e] sm:$0x3] %v610_v18  ;;  %v766_v20 = vld [vmem:[#allocation2 + $0x148] sm:$0x3] }
  0xa8   :  { %2349 = vst [vmem:[%s3554_s1 + $0x50] sm:$0x3] %v760_v19  ;;  %v772_v21 = vld [vmem:[#allocation2 + $0x150] sm:$0x3]  ;;  %v778_v22 = vld [vmem:[#allocation2 + $0x158] sm:$0x3]  ;;  %v406_v18 = vpop.permute.xlu1 %405   ;;  %v397_v19 = vpop.permute.xlu0 %396  }
  0xa9   :  { %2350 = vst [vmem:[%s3554_s1 + $0x52] sm:$0x3] %v766_v20  ;;  %2351 = vst [vmem:[%s3554_s1 + $0x54] sm:$0x3] %v772_v21  ;;  %v784_v23 = vld [vmem:[#allocation2 + $0x160] sm:$0x3] }
  0xaa   :  { %2352 = vst [vmem:[%s3554_s1 + $0x56] sm:$0x3] %v778_v22  ;;  %v790_v24 = vld [vmem:[#allocation2 + $0x168] sm:$0x3]  ;;  %v796_v25 = vld [vmem:[#allocation2 + $0x170] sm:$0x3] }
  0xab   :  { %2353 = vst [vmem:[%s3554_s1 + $0x58] sm:$0x3] %v784_v23  ;;  %2354 = vst [vmem:[%s3554_s1 + $0x5a] sm:$0x3] %v790_v24  ;;  %v802_v28 = vld [vmem:[#allocation2 + $0x178] sm:$0x3] }
  0xac   :  { %2355 = vst [vmem:[%s3554_s1 + $0x5c] sm:$0x3] %v796_v25  ;;  %v712_v29 = vld [vmem:[#allocation2 + $0x100] sm:$0x3]  ;;  %v718_v30 = vld [vmem:[#allocation2 + $0x108] sm:$0x3] }
  0xad   :  { %337 = vst.msk [vmem:[#allocation2 + $0x2c1] ss:$8 sm:$0xf] %vm13_vm0, %v334_v26   ;;  %339 = vst.msk [vmem:[#allocation2 + $0x2c1] ss:$8 sm:$0xf0] %vm13_vm0, %v334_v26  }
  0xae   :  { %328 = vst.msk [vmem:[#allocation2 + $0x281] ss:$8 sm:$0xf] %vm13_vm0, %v325_v27   ;;  %330 = vst.msk [vmem:[#allocation2 + $0x281] ss:$8 sm:$0xf0] %vm13_vm0, %v325_v27  }
  0xaf   :  { %2356 = vst [vmem:[%s3554_s1 + $0x5e] sm:$0x3] %v802_v28  ;;  %2341 = vst [vmem:[%s3554_s1 + $0x40] sm:$0x3] %v712_v29  ;;  %v724_v31 = vld [vmem:[#allocation2 + $0x110] sm:$0x3] }
  0xb0   :  { %2342 = vst [vmem:[%s3554_s1 + $0x42] sm:$0x3] %v718_v30  ;;  %v730_v32 = vld [vmem:[#allocation2 + $0x118] sm:$0x3]  ;;  %v736_v33 = vld [vmem:[#allocation2 + $0x120] sm:$0x3] }
  0xb1   :  { %2343 = vst [vmem:[%s3554_s1 + $0x44] sm:$0x3] %v724_v31  ;;  %2344 = vst [vmem:[%s3554_s1 + $0x46] sm:$0x3] %v730_v32  ;;  %v742_v34 = vld [vmem:[#allocation2 + $0x128] sm:$0x3]  ;;  %v424_v32 = vpop.permute.xlu1 %423  }
  0xb2   :  { %2345 = vst [vmem:[%s3554_s1 + $0x48] sm:$0x3] %v736_v33  ;;  %v748_v35 = vld [vmem:[#allocation2 + $0x130] sm:$0x3]  ;;  %v754_v36 = vld [vmem:[#allocation2 + $0x138] sm:$0x3]  ;;  %v415_v33 = vpop.permute.xlu0 %414  }
  0xb3   :  { %2346 = vst [vmem:[%s3554_s1 + $0x4a] sm:$0x3] %v742_v34  ;;  %2347 = vst [vmem:[%s3554_s1 + $0x4c] sm:$0x3] %v748_v35  ;;  %v856_v37 = vld [vmem:[#allocation2 + $0x1c0] sm:$0x3] }
  0xb4   :  { %2348 = vst [vmem:[%s3554_s1 + $0x4e] sm:$0x3] %v754_v36  ;;  %v862_v38 = vld [vmem:[#allocation2 + $0x1c8] sm:$0x3]  ;;  %v868_v39 = vld [vmem:[#allocation2 + $0x1d0] sm:$0x3] }
  0xb5   :  { %2365 = vst [vmem:[%s3554_s1 + $0x70] sm:$0x3] %v856_v37  ;;  %2366 = vst [vmem:[%s3554_s1 + $0x72] sm:$0x3] %v862_v38  ;;  %v874_v42 = vld [vmem:[#allocation2 + $0x1d8] sm:$0x3] }
  0xb6   :  { %2367 = vst [vmem:[%s3554_s1 + $0x74] sm:$0x3] %v868_v39  ;;  %v880_v43 = vld [vmem:[#allocation2 + $0x1e0] sm:$0x3]  ;;  %v886_v44 = vld [vmem:[#allocation2 + $0x1e8] sm:$0x3] }
  0xb7   :  { %355 = vst.msk [vmem:[#allocation2 + $0x341] ss:$8 sm:$0xf] %vm13_vm0, %v352_v40   ;;  %357 = vst.msk [vmem:[#allocation2 + $0x341] ss:$8 sm:$0xf0] %vm13_vm0, %v352_v40  }
  0xb8   :  { %346 = vst.msk [vmem:[#allocation2 + $0x301] ss:$8 sm:$0xf] %vm13_vm0, %v343_v41   ;;  %348 = vst.msk [vmem:[#allocation2 + $0x301] ss:$8 sm:$0xf0] %vm13_vm0, %v343_v41  }
  0xb9   :  { %2368 = vst [vmem:[%s3554_s1 + $0x76] sm:$0x3] %v874_v42  ;;  %2369 = vst [vmem:[%s3554_s1 + $0x78] sm:$0x3] %v880_v43  ;;  %v892_v45 = vld [vmem:[#allocation2 + $0x1f0] sm:$0x3] }
  0xba   :  { %2370 = vst [vmem:[%s3554_s1 + $0x7a] sm:$0x3] %v886_v44  ;;  %v898_v46 = vld [vmem:[#allocation2 + $0x1f8] sm:$0x3]  ;;  %v808_v47 = vld [vmem:[#allocation2 + $0x180] sm:$0x3] }
  0xbb   :  { %2371 = vst [vmem:[%s3554_s1 + $0x7c] sm:$0x3] %v892_v45  ;;  %2372 = vst [vmem:[%s3554_s1 + $0x7e] sm:$0x3] %v898_v46  ;;  %v814_v48 = vld [vmem:[#allocation2 + $0x188] sm:$0x3]  ;;  %v442_v46 = vpop.permute.xlu1 %441  }
  0xbc   :  { %2357 = vst [vmem:[%s3554_s1 + $0x60] sm:$0x3] %v808_v47  ;;  %v820_v49 = vld [vmem:[#allocation2 + $0x190] sm:$0x3]  ;;  %v826_v50 = vld [vmem:[#allocation2 + $0x198] sm:$0x3]  ;;  %v433_v47 = vpop.permute.xlu0 %432  }
  0xbd   :  { %2358 = vst [vmem:[%s3554_s1 + $0x62] sm:$0x3] %v814_v48  ;;  %2359 = vst [vmem:[%s3554_s1 + $0x64] sm:$0x3] %v820_v49  ;;  %v832_v51 = vld [vmem:[#allocation2 + $0x1a0] sm:$0x3] }
  0xbe   :  { %2360 = vst [vmem:[%s3554_s1 + $0x66] sm:$0x3] %v826_v50  ;;  %v838_v52 = vld [vmem:[#allocation2 + $0x1a8] sm:$0x3]  ;;  %v844_v53 = vld [vmem:[#allocation2 + $0x1b0] sm:$0x3] }
  0xbf   :  { %2361 = vst [vmem:[%s3554_s1 + $0x68] sm:$0x3] %v832_v51  ;;  %2362 = vst [vmem:[%s3554_s1 + $0x6a] sm:$0x3] %v838_v52  ;;  %v850_v56 = vld [vmem:[#allocation2 + $0x1b8] sm:$0x3] }
  0xc0   :  { %2363 = vst [vmem:[%s3554_s1 + $0x6c] sm:$0x3] %v844_v53  ;;  %v952_v57 = vld [vmem:[#allocation2 + $0x240] sm:$0x3]  ;;  %v958_v58 = vld [vmem:[#allocation2 + $0x248] sm:$0x3] }
  0xc1   :  { %373 = vst.msk [vmem:[#allocation2 + $0x3c1] ss:$8 sm:$0xf] %vm13_vm0, %v370_v54   ;;  %375 = vst.msk [vmem:[#allocation2 + $0x3c1] ss:$8 sm:$0xf0] %vm13_vm0, %v370_v54  }
  0xc2   :  { %364 = vst.msk [vmem:[#allocation2 + $0x381] ss:$8 sm:$0xf] %vm13_vm0, %v361_v55   ;;  %366 = vst.msk [vmem:[#allocation2 + $0x381] ss:$8 sm:$0xf0] %vm13_vm0, %v361_v55  }
  0xc3   :  { %2364 = vst [vmem:[%s3554_s1 + $0x6e] sm:$0x3] %v850_v56  ;;  %2381 = vst [vmem:[%s3554_s1 + $0x90] sm:$0x3] %v952_v57  ;;  %v964_v59 = vld [vmem:[#allocation2 + $0x250] sm:$0x3] }
  0xc4   :  { %2382 = vst [vmem:[%s3554_s1 + $0x92] sm:$0x3] %v958_v58  ;;  %v970_v60 = vld [vmem:[#allocation2 + $0x258] sm:$0x3]  ;;  %v976_v61 = vld [vmem:[#allocation2 + $0x260] sm:$0x3] }
  0xc5   :  { %2383 = vst [vmem:[%s3554_s1 + $0x94] sm:$0x3] %v964_v59  ;;  %2384 = vst [vmem:[%s3554_s1 + $0x96] sm:$0x3] %v970_v60  ;;  %v982_v62 = vld [vmem:[#allocation2 + $0x268] sm:$0x3]  ;;  %v460_v60 = vpop.permute.xlu1 %459  }
  0xc6   :  { %2385 = vst [vmem:[%s3554_s1 + $0x98] sm:$0x3] %v976_v61  ;;  %v988_v63 = vld [vmem:[#allocation2 + $0x270] sm:$0x3]  ;;  %v994_v0 = vld [vmem:[#allocation2 + $0x278] sm:$0x3]  ;;  %v451_v61 = vpop.permute.xlu0 %450  }
  0xc7   :  { %2386 = vst [vmem:[%s3554_s1 + $0x9a] sm:$0x3] %v982_v62  ;;  %2387 = vst [vmem:[%s3554_s1 + $0x9c] sm:$0x3] %v988_v63  ;;  %v904_v1 = vld [vmem:[#allocation2 + $0x200] sm:$0x3] }
  0xc8   :  { %2388 = vst [vmem:[%s3554_s1 + $0x9e] sm:$0x3] %v994_v0  ;;  %v910_v2 = vld [vmem:[#allocation2 + $0x208] sm:$0x3]  ;;  %v916_v3 = vld [vmem:[#allocation2 + $0x210] sm:$0x3] }
  0xc9   :  { %2373 = vst [vmem:[%s3554_s1 + $0x80] sm:$0x3] %v904_v1  ;;  %2374 = vst [vmem:[%s3554_s1 + $0x82] sm:$0x3] %v910_v2  ;;  %v922_v6 = vld [vmem:[#allocation2 + $0x218] sm:$0x3] }
  0xca   :  { %2375 = vst [vmem:[%s3554_s1 + $0x84] sm:$0x3] %v916_v3  ;;  %v928_v7 = vld [vmem:[#allocation2 + $0x220] sm:$0x3]  ;;  %v934_v8 = vld [vmem:[#allocation2 + $0x228] sm:$0x3] }
  0xcb   :  { %391 = vst.msk [vmem:[#allocation2 + $0x441] ss:$8 sm:$0xf] %vm13_vm0, %v388_v4   ;;  %393 = vst.msk [vmem:[#allocation2 + $0x441] ss:$8 sm:$0xf0] %vm13_vm0, %v388_v4  }
  0xcc   :  { %382 = vst.msk [vmem:[#allocation2 + $0x401] ss:$8 sm:$0xf] %vm13_vm0, %v379_v5   ;;  %384 = vst.msk [vmem:[#allocation2 + $0x401] ss:$8 sm:$0xf0] %vm13_vm0, %v379_v5  }
  0xcd   :  { %2376 = vst [vmem:[%s3554_s1 + $0x86] sm:$0x3] %v922_v6  ;;  %2377 = vst [vmem:[%s3554_s1 + $0x88] sm:$0x3] %v928_v7  ;;  %v940_v9 = vld [vmem:[#allocation2 + $0x230] sm:$0x3] }
  0xce   :  { %2378 = vst [vmem:[%s3554_s1 + $0x8a] sm:$0x3] %v934_v8  ;;  %v946_v10 = vld [vmem:[#allocation2 + $0x238] sm:$0x3]  ;;  %v1048_v11 = vld [vmem:[#allocation2 + $0x2c0] sm:$0x3] }
  0xcf   :  { %2379 = vst [vmem:[%s3554_s1 + $0x8c] sm:$0x3] %v940_v9  ;;  %2380 = vst [vmem:[%s3554_s1 + $0x8e] sm:$0x3] %v946_v10  ;;  %v1054_v12 = vld [vmem:[#allocation2 + $0x2c8] sm:$0x3]  ;;  %v478_v10 = vpop.permute.xlu1 %477  }
  0xd0   :  { %2397 = vst [vmem:[%s3554_s1 + $0xb0] sm:$0x3] %v1048_v11  ;;  %v1060_v13 = vld [vmem:[#allocation2 + $0x2d0] sm:$0x3]  ;;  %v1066_v14 = vld [vmem:[#allocation2 + $0x2d8] sm:$0x3]  ;;  %v469_v11 = vpop.permute.xlu0 %468  }
  0xd1   :  { %2398 = vst [vmem:[%s3554_s1 + $0xb2] sm:$0x3] %v1054_v12  ;;  %2399 = vst [vmem:[%s3554_s1 + $0xb4] sm:$0x3] %v1060_v13  ;;  %v1072_v15 = vld [vmem:[#allocation2 + $0x2e0] sm:$0x3] }
  0xd2   :  { %2400 = vst [vmem:[%s3554_s1 + $0xb6] sm:$0x3] %v1066_v14  ;;  %v1078_v16 = vld [vmem:[#allocation2 + $0x2e8] sm:$0x3]  ;;  %v1084_v17 = vld [vmem:[#allocation2 + $0x2f0] sm:$0x3] }
  0xd3   :  { %2401 = vst [vmem:[%s3554_s1 + $0xb8] sm:$0x3] %v1072_v15  ;;  %2402 = vst [vmem:[%s3554_s1 + $0xba] sm:$0x3] %v1078_v16  ;;  %v1090_v20 = vld [vmem:[#allocation2 + $0x2f8] sm:$0x3] }
  0xd4   :  { %2403 = vst [vmem:[%s3554_s1 + $0xbc] sm:$0x3] %v1084_v17  ;;  %v1000_v21 = vld [vmem:[#allocation2 + $0x280] sm:$0x3]  ;;  %v1006_v22 = vld [vmem:[#allocation2 + $0x288] sm:$0x3] }
  0xd5   :  { %409 = vst.msk [vmem:[#allocation2 + $0x4c1] ss:$8 sm:$0xf] %vm13_vm0, %v406_v18   ;;  %411 = vst.msk [vmem:[#allocation2 + $0x4c1] ss:$8 sm:$0xf0] %vm13_vm0, %v406_v18  }
  0xd6   :  { %400 = vst.msk [vmem:[#allocation2 + $0x481] ss:$8 sm:$0xf] %vm13_vm0, %v397_v19   ;;  %402 = vst.msk [vmem:[#allocation2 + $0x481] ss:$8 sm:$0xf0] %vm13_vm0, %v397_v19  }
  0xd7   :  { %2404 = vst [vmem:[%s3554_s1 + $0xbe] sm:$0x3] %v1090_v20  ;;  %2389 = vst [vmem:[%s3554_s1 + $0xa0] sm:$0x3] %v1000_v21  ;;  %v1012_v23 = vld [vmem:[#allocation2 + $0x290] sm:$0x3] }
  0xd8   :  { %2390 = vst [vmem:[%s3554_s1 + $0xa2] sm:$0x3] %v1006_v22  ;;  %v1018_v24 = vld [vmem:[#allocation2 + $0x298] sm:$0x3]  ;;  %v1024_v25 = vld [vmem:[#allocation2 + $0x2a0] sm:$0x3] }
  0xd9   :  { %2391 = vst [vmem:[%s3554_s1 + $0xa4] sm:$0x3] %v1012_v23  ;;  %2392 = vst [vmem:[%s3554_s1 + $0xa6] sm:$0x3] %v1018_v24  ;;  %v1030_v26 = vld [vmem:[#allocation2 + $0x2a8] sm:$0x3]  ;;  %v496_v24 = vpop.permute.xlu1 %495  }
  0xda   :  { %2393 = vst [vmem:[%s3554_s1 + $0xa8] sm:$0x3] %v1024_v25  ;;  %v1036_v27 = vld [vmem:[#allocation2 + $0x2b0] sm:$0x3]  ;;  %v1042_v28 = vld [vmem:[#allocation2 + $0x2b8] sm:$0x3]  ;;  %v487_v25 = vpop.permute.xlu0 %486  }
  0xdb   :  { %2394 = vst [vmem:[%s3554_s1 + $0xaa] sm:$0x3] %v1030_v26  ;;  %2395 = vst [vmem:[%s3554_s1 + $0xac] sm:$0x3] %v1036_v27  ;;  %v1144_v29 = vld [vmem:[#allocation2 + $0x340] sm:$0x3] }
  0xdc   :  { %2396 = vst [vmem:[%s3554_s1 + $0xae] sm:$0x3] %v1042_v28  ;;  %v1150_v30 = vld [vmem:[#allocation2 + $0x348] sm:$0x3]  ;;  %v1156_v31 = vld [vmem:[#allocation2 + $0x350] sm:$0x3] }
  0xdd   :  { %2413 = vst [vmem:[%s3554_s1 + $0xd0] sm:$0x3] %v1144_v29  ;;  %2414 = vst [vmem:[%s3554_s1 + $0xd2] sm:$0x3] %v1150_v30  ;;  %v1162_v34 = vld [vmem:[#allocation2 + $0x358] sm:$0x3] }
  0xde   :  { %2415 = vst [vmem:[%s3554_s1 + $0xd4] sm:$0x3] %v1156_v31  ;;  %v1168_v35 = vld [vmem:[#allocation2 + $0x360] sm:$0x3]  ;;  %v1174_v36 = vld [vmem:[#allocation2 + $0x368] sm:$0x3] }
  0xdf   :  { %427 = vst.msk [vmem:[#allocation2 + $0x541] ss:$8 sm:$0xf] %vm13_vm0, %v424_v32   ;;  %429 = vst.msk [vmem:[#allocation2 + $0x541] ss:$8 sm:$0xf0] %vm13_vm0, %v424_v32  }
  0xe0   :  { %418 = vst.msk [vmem:[#allocation2 + $0x501] ss:$8 sm:$0xf] %vm13_vm0, %v415_v33   ;;  %420 = vst.msk [vmem:[#allocation2 + $0x501] ss:$8 sm:$0xf0] %vm13_vm0, %v415_v33  }
  0xe1   :  { %2416 = vst [vmem:[%s3554_s1 + $0xd6] sm:$0x3] %v1162_v34  ;;  %2417 = vst [vmem:[%s3554_s1 + $0xd8] sm:$0x3] %v1168_v35  ;;  %v1180_v37 = vld [vmem:[#allocation2 + $0x370] sm:$0x3] }
  0xe2   :  { %2418 = vst [vmem:[%s3554_s1 + $0xda] sm:$0x3] %v1174_v36  ;;  %v1186_v38 = vld [vmem:[#allocation2 + $0x378] sm:$0x3]  ;;  %v1096_v39 = vld [vmem:[#allocation2 + $0x300] sm:$0x3] }
  0xe3   :  { %2419 = vst [vmem:[%s3554_s1 + $0xdc] sm:$0x3] %v1180_v37  ;;  %2420 = vst [vmem:[%s3554_s1 + $0xde] sm:$0x3] %v1186_v38  ;;  %v1102_v40 = vld [vmem:[#allocation2 + $0x308] sm:$0x3]  ;;  %v514_v38 = vpop.permute.xlu1 %513  }
  0xe4   :  { %2405 = vst [vmem:[%s3554_s1 + $0xc0] sm:$0x3] %v1096_v39  ;;  %v1108_v41 = vld [vmem:[#allocation2 + $0x310] sm:$0x3]  ;;  %v1114_v42 = vld [vmem:[#allocation2 + $0x318] sm:$0x3]  ;;  %v505_v39 = vpop.permute.xlu0 %504  }
  0xe5   :  { %2406 = vst [vmem:[%s3554_s1 + $0xc2] sm:$0x3] %v1102_v40  ;;  %2407 = vst [vmem:[%s3554_s1 + $0xc4] sm:$0x3] %v1108_v41  ;;  %v1120_v43 = vld [vmem:[#allocation2 + $0x320] sm:$0x3] }
  0xe6   :  { %2408 = vst [vmem:[%s3554_s1 + $0xc6] sm:$0x3] %v1114_v42  ;;  %v1126_v44 = vld [vmem:[#allocation2 + $0x328] sm:$0x3]  ;;  %v1132_v45 = vld [vmem:[#allocation2 + $0x330] sm:$0x3] }
  0xe7   :  { %2409 = vst [vmem:[%s3554_s1 + $0xc8] sm:$0x3] %v1120_v43  ;;  %2410 = vst [vmem:[%s3554_s1 + $0xca] sm:$0x3] %v1126_v44  ;;  %v1138_v48 = vld [vmem:[#allocation2 + $0x338] sm:$0x3] }
  0xe8   :  { %2411 = vst [vmem:[%s3554_s1 + $0xcc] sm:$0x3] %v1132_v45  ;;  %v1240_v49 = vld [vmem:[#allocation2 + $0x3c0] sm:$0x3]  ;;  %v1246_v50 = vld [vmem:[#allocation2 + $0x3c8] sm:$0x3] }
  0xe9   :  { %445 = vst.msk [vmem:[#allocation2 + $0x5c1] ss:$8 sm:$0xf] %vm13_vm0, %v442_v46   ;;  %447 = vst.msk [vmem:[#allocation2 + $0x5c1] ss:$8 sm:$0xf0] %vm13_vm0, %v442_v46  }
  0xea   :  { %436 = vst.msk [vmem:[#allocation2 + $0x581] ss:$8 sm:$0xf] %vm13_vm0, %v433_v47   ;;  %438 = vst.msk [vmem:[#allocation2 + $0x581] ss:$8 sm:$0xf0] %vm13_vm0, %v433_v47  }
  0xeb   :  { %2412 = vst [vmem:[%s3554_s1 + $0xce] sm:$0x3] %v1138_v48  ;;  %2429 = vst [vmem:[%s3554_s1 + $0xf0] sm:$0x3] %v1240_v49  ;;  %v1252_v51 = vld [vmem:[#allocation2 + $0x3d0] sm:$0x3] }
  0xec   :  { %2430 = vst [vmem:[%s3554_s1 + $0xf2] sm:$0x3] %v1246_v50  ;;  %v1258_v52 = vld [vmem:[#allocation2 + $0x3d8] sm:$0x3]  ;;  %v1264_v53 = vld [vmem:[#allocation2 + $0x3e0] sm:$0x3] }
  0xed   :  { %2431 = vst [vmem:[%s3554_s1 + $0xf4] sm:$0x3] %v1252_v51  ;;  %2432 = vst [vmem:[%s3554_s1 + $0xf6] sm:$0x3] %v1258_v52  ;;  %v1270_v54 = vld [vmem:[#allocation2 + $0x3e8] sm:$0x3] }
  0xee   :  { %2433 = vst [vmem:[%s3554_s1 + $0xf8] sm:$0x3] %v1264_v53  ;;  %v1276_v55 = vld [vmem:[#allocation2 + $0x3f0] sm:$0x3]  ;;  %v1282_v56 = vld [vmem:[#allocation2 + $0x3f8] sm:$0x3] }
  0xef   :  { %2434 = vst [vmem:[%s3554_s1 + $0xfa] sm:$0x3] %v1270_v54  ;;  %2435 = vst [vmem:[%s3554_s1 + $0xfc] sm:$0x3] %v1276_v55  ;;  %v1192_v57 = vld [vmem:[#allocation2 + $0x380] sm:$0x3] }
  0xf0   :  { %2436 = vst [vmem:[%s3554_s1 + $0xfe] sm:$0x3] %v1282_v56  ;;  %v1198_v58 = vld [vmem:[#allocation2 + $0x388] sm:$0x3]  ;;  %v1204_v59 = vld [vmem:[#allocation2 + $0x390] sm:$0x3] }
  0xf1   :  { %2421 = vst [vmem:[%s3554_s1 + $0xe0] sm:$0x3] %v1192_v57  ;;  %2422 = vst [vmem:[%s3554_s1 + $0xe2] sm:$0x3] %v1198_v58  ;;  %v1210_v62 = vld [vmem:[#allocation2 + $0x398] sm:$0x3] }
  0xf2   :  { %2423 = vst [vmem:[%s3554_s1 + $0xe4] sm:$0x3] %v1204_v59  ;;  %v1216_v63 = vld [vmem:[#allocation2 + $0x3a0] sm:$0x3]  ;;  %v1222_v0 = vld [vmem:[#allocation2 + $0x3a8] sm:$0x3] }
  0xf3   :  { %463 = vst.msk [vmem:[#allocation2 + $0x641] ss:$8 sm:$0xf] %vm13_vm0, %v460_v60   ;;  %465 = vst.msk [vmem:[#allocation2 + $0x641] ss:$8 sm:$0xf0] %vm13_vm0, %v460_v60  }
  0xf4   :  { %454 = vst.msk [vmem:[#allocation2 + $0x601] ss:$8 sm:$0xf] %vm13_vm0, %v451_v61   ;;  %456 = vst.msk [vmem:[#allocation2 + $0x601] ss:$8 sm:$0xf0] %vm13_vm0, %v451_v61  }
  0xf5   :  { %2424 = vst [vmem:[%s3554_s1 + $0xe6] sm:$0x3] %v1210_v62  ;;  %2425 = vst [vmem:[%s3554_s1 + $0xe8] sm:$0x3] %v1216_v63  ;;  %v1228_v1 = vld [vmem:[#allocation2 + $0x3b0] sm:$0x3] }
  0xf6   :  { %2426 = vst [vmem:[%s3554_s1 + $0xea] sm:$0x3] %v1222_v0  ;;  %v1234_v2 = vld [vmem:[#allocation2 + $0x3b8] sm:$0x3]  ;;  %v1336_v3 = vld [vmem:[#allocation2 + $0x440] sm:$0x3] }
  0xf7   :  { %2427 = vst [vmem:[%s3554_s1 + $0xec] sm:$0x3] %v1228_v1  ;;  %2428 = vst [vmem:[%s3554_s1 + $0xee] sm:$0x3] %v1234_v2  ;;  %v1342_v4 = vld [vmem:[#allocation2 + $0x448] sm:$0x3] }
  0xf8   :  { %2445 = vst [vmem:[%s3554_s1 + $0x110] sm:$0x3] %v1336_v3  ;;  %v1348_v5 = vld [vmem:[#allocation2 + $0x450] sm:$0x3]  ;;  %v1354_v6 = vld [vmem:[#allocation2 + $0x458] sm:$0x3] }
  0xf9   :  { %2446 = vst [vmem:[%s3554_s1 + $0x112] sm:$0x3] %v1342_v4  ;;  %2447 = vst [vmem:[%s3554_s1 + $0x114] sm:$0x3] %v1348_v5  ;;  %v1360_v7 = vld [vmem:[#allocation2 + $0x460] sm:$0x3] }
  0xfa   :  { %2448 = vst [vmem:[%s3554_s1 + $0x116] sm:$0x3] %v1354_v6  ;;  %v1366_v8 = vld [vmem:[#allocation2 + $0x468] sm:$0x3]  ;;  %v1372_v9 = vld [vmem:[#allocation2 + $0x470] sm:$0x3] }
  0xfb   :  { %2449 = vst [vmem:[%s3554_s1 + $0x118] sm:$0x3] %v1360_v7  ;;  %2450 = vst [vmem:[%s3554_s1 + $0x11a] sm:$0x3] %v1366_v8  ;;  %v1378_v12 = vld [vmem:[#allocation2 + $0x478] sm:$0x3] }
  0xfc   :  { %2451 = vst [vmem:[%s3554_s1 + $0x11c] sm:$0x3] %v1372_v9  ;;  %v1288_v13 = vld [vmem:[#allocation2 + $0x400] sm:$0x3]  ;;  %v1294_v14 = vld [vmem:[#allocation2 + $0x408] sm:$0x3] }
  0xfd   :  { %481 = vst.msk [vmem:[#allocation2 + $0x6c1] ss:$8 sm:$0xf] %vm13_vm0, %v478_v10   ;;  %483 = vst.msk [vmem:[#allocation2 + $0x6c1] ss:$8 sm:$0xf0] %vm13_vm0, %v478_v10  }
  0xfe   :  { %472 = vst.msk [vmem:[#allocation2 + $0x681] ss:$8 sm:$0xf] %vm13_vm0, %v469_v11   ;;  %474 = vst.msk [vmem:[#allocation2 + $0x681] ss:$8 sm:$0xf0] %vm13_vm0, %v469_v11  }
  0xff   :  { %2452 = vst [vmem:[%s3554_s1 + $0x11e] sm:$0x3] %v1378_v12  ;;  %2437 = vst [vmem:[%s3554_s1 + $0x100] sm:$0x3] %v1288_v13  ;;  %v1300_v15 = vld [vmem:[#allocation2 + $0x410] sm:$0x3] }
 0x100   :  { %2438 = vst [vmem:[%s3554_s1 + $0x102] sm:$0x3] %v1294_v14  ;;  %v1306_v16 = vld [vmem:[#allocation2 + $0x418] sm:$0x3]  ;;  %v1312_v17 = vld [vmem:[#allocation2 + $0x420] sm:$0x3] }
 0x101   :  { %2439 = vst [vmem:[%s3554_s1 + $0x104] sm:$0x3] %v1300_v15  ;;  %2440 = vst [vmem:[%s3554_s1 + $0x106] sm:$0x3] %v1306_v16  ;;  %v1318_v18 = vld [vmem:[#allocation2 + $0x428] sm:$0x3] }
 0x102   :  { %2441 = vst [vmem:[%s3554_s1 + $0x108] sm:$0x3] %v1312_v17  ;;  %v1324_v19 = vld [vmem:[#allocation2 + $0x430] sm:$0x3]  ;;  %v1330_v20 = vld [vmem:[#allocation2 + $0x438] sm:$0x3] }
 0x103   :  { %2442 = vst [vmem:[%s3554_s1 + $0x10a] sm:$0x3] %v1318_v18  ;;  %2443 = vst [vmem:[%s3554_s1 + $0x10c] sm:$0x3] %v1324_v19  ;;  %v1432_v21 = vld [vmem:[#allocation2 + $0x4c0] sm:$0x3] }
 0x104   :  { %2444 = vst [vmem:[%s3554_s1 + $0x10e] sm:$0x3] %v1330_v20  ;;  %v1438_v22 = vld [vmem:[#allocation2 + $0x4c8] sm:$0x3]  ;;  %v1444_v23 = vld [vmem:[#allocation2 + $0x4d0] sm:$0x3] }
 0x105   :  { %2461 = vst [vmem:[%s3554_s1 + $0x130] sm:$0x3] %v1432_v21  ;;  %2462 = vst [vmem:[%s3554_s1 + $0x132] sm:$0x3] %v1438_v22  ;;  %v1450_v26 = vld [vmem:[#allocation2 + $0x4d8] sm:$0x3] }
 0x106   :  { %2463 = vst [vmem:[%s3554_s1 + $0x134] sm:$0x3] %v1444_v23  ;;  %v1456_v27 = vld [vmem:[#allocation2 + $0x4e0] sm:$0x3]  ;;  %v1462_v28 = vld [vmem:[#allocation2 + $0x4e8] sm:$0x3] }
 0x107   :  { %499 = vst.msk [vmem:[#allocation2 + $0x741] ss:$8 sm:$0xf] %vm13_vm0, %v496_v24   ;;  %501 = vst.msk [vmem:[#allocation2 + $0x741] ss:$8 sm:$0xf0] %vm13_vm0, %v496_v24  }
 0x108   :  { %490 = vst.msk [vmem:[#allocation2 + $0x701] ss:$8 sm:$0xf] %vm13_vm0, %v487_v25   ;;  %492 = vst.msk [vmem:[#allocation2 + $0x701] ss:$8 sm:$0xf0] %vm13_vm0, %v487_v25  }
 0x109   :  { %2464 = vst [vmem:[%s3554_s1 + $0x136] sm:$0x3] %v1450_v26  ;;  %2465 = vst [vmem:[%s3554_s1 + $0x138] sm:$0x3] %v1456_v27  ;;  %v1468_v29 = vld [vmem:[#allocation2 + $0x4f0] sm:$0x3] }
 0x10a   :  { %2466 = vst [vmem:[%s3554_s1 + $0x13a] sm:$0x3] %v1462_v28  ;;  %v1474_v30 = vld [vmem:[#allocation2 + $0x4f8] sm:$0x3]  ;;  %v1384_v31 = vld [vmem:[#allocation2 + $0x480] sm:$0x3] }
 0x10b   :  { %2467 = vst [vmem:[%s3554_s1 + $0x13c] sm:$0x3] %v1468_v29  ;;  %2468 = vst [vmem:[%s3554_s1 + $0x13e] sm:$0x3] %v1474_v30  ;;  %v1390_v32 = vld [vmem:[#allocation2 + $0x488] sm:$0x3] }
 0x10c   :  { %2453 = vst [vmem:[%s3554_s1 + $0x120] sm:$0x3] %v1384_v31  ;;  %v1396_v33 = vld [vmem:[#allocation2 + $0x490] sm:$0x3]  ;;  %v1402_v34 = vld [vmem:[#allocation2 + $0x498] sm:$0x3] }
 0x10d   :  { %2454 = vst [vmem:[%s3554_s1 + $0x122] sm:$0x3] %v1390_v32  ;;  %2455 = vst [vmem:[%s3554_s1 + $0x124] sm:$0x3] %v1396_v33  ;;  %v1408_v35 = vld [vmem:[#allocation2 + $0x4a0] sm:$0x3] }
 0x10e   :  { %2456 = vst [vmem:[%s3554_s1 + $0x126] sm:$0x3] %v1402_v34  ;;  %v1414_v36 = vld [vmem:[#allocation2 + $0x4a8] sm:$0x3]  ;;  %v1420_v37 = vld [vmem:[#allocation2 + $0x4b0] sm:$0x3] }
 0x10f   :  { %2457 = vst [vmem:[%s3554_s1 + $0x128] sm:$0x3] %v1408_v35  ;;  %2458 = vst [vmem:[%s3554_s1 + $0x12a] sm:$0x3] %v1414_v36  ;;  %v1426_v40 = vld [vmem:[#allocation2 + $0x4b8] sm:$0x3] }
 0x110   :  { %2459 = vst [vmem:[%s3554_s1 + $0x12c] sm:$0x3] %v1420_v37  ;;  %v1528_v41 = vld [vmem:[#allocation2 + $0x540] sm:$0x3]  ;;  %v1534_v42 = vld [vmem:[#allocation2 + $0x548] sm:$0x3] }
 0x111   :  { %517 = vst.msk [vmem:[#allocation2 + $0x7c1] ss:$8 sm:$0xf] %vm13_vm0, %v514_v38   ;;  %519 = vst.msk [vmem:[#allocation2 + $0x7c1] ss:$8 sm:$0xf0] %vm13_vm0, %v514_v38  }
 0x112   :  { %508 = vst.msk [vmem:[#allocation2 + $0x781] ss:$8 sm:$0xf] %vm13_vm0, %v505_v39   ;;  %510 = vst.msk [vmem:[#allocation2 + $0x781] ss:$8 sm:$0xf0] %vm13_vm0, %v505_v39  }
 0x113   :  { %2460 = vst [vmem:[%s3554_s1 + $0x12e] sm:$0x3] %v1426_v40  ;;  %2477 = vst [vmem:[%s3554_s1 + $0x150] sm:$0x3] %v1528_v41  ;;  %v1540_v43 = vld [vmem:[#allocation2 + $0x550] sm:$0x3] }
 0x114   :  { %2478 = vst [vmem:[%s3554_s1 + $0x152] sm:$0x3] %v1534_v42  ;;  %v1546_v44 = vld [vmem:[#allocation2 + $0x558] sm:$0x3]  ;;  %v1552_v45 = vld [vmem:[#allocation2 + $0x560] sm:$0x3] }
 0x115   :  { %2479 = vst [vmem:[%s3554_s1 + $0x154] sm:$0x3] %v1540_v43  ;;  %2480 = vst [vmem:[%s3554_s1 + $0x156] sm:$0x3] %v1546_v44  ;;  %v1558_v46 = vld [vmem:[#allocation2 + $0x568] sm:$0x3] }
 0x116   :  { %2481 = vst [vmem:[%s3554_s1 + $0x158] sm:$0x3] %v1552_v45  ;;  %v1564_v47 = vld [vmem:[#allocation2 + $0x570] sm:$0x3]  ;;  %v1570_v48 = vld [vmem:[#allocation2 + $0x578] sm:$0x3] }
 0x117   :  { %2482 = vst [vmem:[%s3554_s1 + $0x15a] sm:$0x3] %v1558_v46  ;;  %2483 = vst [vmem:[%s3554_s1 + $0x15c] sm:$0x3] %v1564_v47  ;;  %v1480_v49 = vld [vmem:[#allocation2 + $0x500] sm:$0x3] }
 0x118   :  { %2484 = vst [vmem:[%s3554_s1 + $0x15e] sm:$0x3] %v1570_v48  ;;  %v1486_v50 = vld [vmem:[#allocation2 + $0x508] sm:$0x3]  ;;  %v1492_v51 = vld [vmem:[#allocation2 + $0x510] sm:$0x3] }
 0x119   :  { %2469 = vst [vmem:[%s3554_s1 + $0x140] sm:$0x3] %v1480_v49  ;;  %2470 = vst [vmem:[%s3554_s1 + $0x142] sm:$0x3] %v1486_v50  ;;  %v1498_v52 = vld [vmem:[#allocation2 + $0x518] sm:$0x3] }
 0x11a   :  { %2471 = vst [vmem:[%s3554_s1 + $0x144] sm:$0x3] %v1492_v51  ;;  %v1504_v53 = vld [vmem:[#allocation2 + $0x520] sm:$0x3]  ;;  %v1510_v54 = vld [vmem:[#allocation2 + $0x528] sm:$0x3] }
 0x11b   :  { %2472 = vst [vmem:[%s3554_s1 + $0x146] sm:$0x3] %v1498_v52  ;;  %2473 = vst [vmem:[%s3554_s1 + $0x148] sm:$0x3] %v1504_v53  ;;  %v1516_v55 = vld [vmem:[#allocation2 + $0x530] sm:$0x3] }
 0x11c   :  { %2474 = vst [vmem:[%s3554_s1 + $0x14a] sm:$0x3] %v1510_v54  ;;  %v1522_v56 = vld [vmem:[#allocation2 + $0x538] sm:$0x3]  ;;  %v1624_v57 = vld [vmem:[#allocation2 + $0x5c0] sm:$0x3] }
 0x11d   :  { %2475 = vst [vmem:[%s3554_s1 + $0x14c] sm:$0x3] %v1516_v55  ;;  %2476 = vst [vmem:[%s3554_s1 + $0x14e] sm:$0x3] %v1522_v56  ;;  %v1630_v58 = vld [vmem:[#allocation2 + $0x5c8] sm:$0x3] }
 0x11e   :  { %2493 = vst [vmem:[%s3554_s1 + $0x170] sm:$0x3] %v1624_v57  ;;  %v1636_v59 = vld [vmem:[#allocation2 + $0x5d0] sm:$0x3]  ;;  %v1642_v60 = vld [vmem:[#allocation2 + $0x5d8] sm:$0x3] }
 0x11f   :  { %2494 = vst [vmem:[%s3554_s1 + $0x172] sm:$0x3] %v1630_v58  ;;  %2495 = vst [vmem:[%s3554_s1 + $0x174] sm:$0x3] %v1636_v59  ;;  %v1648_v61 = vld [vmem:[#allocation2 + $0x5e0] sm:$0x3] }
 0x120   :  { %2496 = vst [vmem:[%s3554_s1 + $0x176] sm:$0x3] %v1642_v60  ;;  %v1654_v62 = vld [vmem:[#allocation2 + $0x5e8] sm:$0x3]  ;;  %v1660_v63 = vld [vmem:[#allocation2 + $0x5f0] sm:$0x3] }
 0x121   :  { %2497 = vst [vmem:[%s3554_s1 + $0x178] sm:$0x3] %v1648_v61  ;;  %2498 = vst [vmem:[%s3554_s1 + $0x17a] sm:$0x3] %v1654_v62  ;;  %v1666_v0 = vld [vmem:[#allocation2 + $0x5f8] sm:$0x3] }
 0x122   :  { %2499 = vst [vmem:[%s3554_s1 + $0x17c] sm:$0x3] %v1660_v63  ;;  %v1576_v1 = vld [vmem:[#allocation2 + $0x580] sm:$0x3]  ;;  %v1582_v2 = vld [vmem:[#allocation2 + $0x588] sm:$0x3] }
 0x123   :  { %2500 = vst [vmem:[%s3554_s1 + $0x17e] sm:$0x3] %v1666_v0  ;;  %2485 = vst [vmem:[%s3554_s1 + $0x160] sm:$0x3] %v1576_v1  ;;  %v1588_v3 = vld [vmem:[#allocation2 + $0x590] sm:$0x3] }
 0x124   :  { %2486 = vst [vmem:[%s3554_s1 + $0x162] sm:$0x3] %v1582_v2  ;;  %v1594_v4 = vld [vmem:[#allocation2 + $0x598] sm:$0x3]  ;;  %v1600_v5 = vld [vmem:[#allocation2 + $0x5a0] sm:$0x3] }
 0x125   :  { %2487 = vst [vmem:[%s3554_s1 + $0x164] sm:$0x3] %v1588_v3  ;;  %2488 = vst [vmem:[%s3554_s1 + $0x166] sm:$0x3] %v1594_v4  ;;  %v1606_v6 = vld [vmem:[#allocation2 + $0x5a8] sm:$0x3] }
 0x126   :  { %2489 = vst [vmem:[%s3554_s1 + $0x168] sm:$0x3] %v1600_v5  ;;  %v1612_v7 = vld [vmem:[#allocation2 + $0x5b0] sm:$0x3]  ;;  %v1618_v8 = vld [vmem:[#allocation2 + $0x5b8] sm:$0x3] }
 0x127   :  { %2490 = vst [vmem:[%s3554_s1 + $0x16a] sm:$0x3] %v1606_v6  ;;  %2491 = vst [vmem:[%s3554_s1 + $0x16c] sm:$0x3] %v1612_v7  ;;  %v1720_v9 = vld [vmem:[#allocation2 + $0x640] sm:$0x3] }
 0x128   :  { %2492 = vst [vmem:[%s3554_s1 + $0x16e] sm:$0x3] %v1618_v8  ;;  %v1726_v10 = vld [vmem:[#allocation2 + $0x648] sm:$0x3]  ;;  %v1732_v11 = vld [vmem:[#allocation2 + $0x650] sm:$0x3] }
 0x129   :  { %2509 = vst [vmem:[%s3554_s1 + $0x190] sm:$0x3] %v1720_v9  ;;  %2510 = vst [vmem:[%s3554_s1 + $0x192] sm:$0x3] %v1726_v10  ;;  %v1738_v12 = vld [vmem:[#allocation2 + $0x658] sm:$0x3] }
 0x12a   :  { %2511 = vst [vmem:[%s3554_s1 + $0x194] sm:$0x3] %v1732_v11  ;;  %v1744_v13 = vld [vmem:[#allocation2 + $0x660] sm:$0x3]  ;;  %v1750_v14 = vld [vmem:[#allocation2 + $0x668] sm:$0x3] }
 0x12b   :  { %2512 = vst [vmem:[%s3554_s1 + $0x196] sm:$0x3] %v1738_v12  ;;  %2513 = vst [vmem:[%s3554_s1 + $0x198] sm:$0x3] %v1744_v13  ;;  %v1756_v15 = vld [vmem:[#allocation2 + $0x670] sm:$0x3] }
 0x12c   :  { %2514 = vst [vmem:[%s3554_s1 + $0x19a] sm:$0x3] %v1750_v14  ;;  %v1762_v16 = vld [vmem:[#allocation2 + $0x678] sm:$0x3]  ;;  %v1672_v17 = vld [vmem:[#allocation2 + $0x600] sm:$0x3] }
 0x12d   :  { %2515 = vst [vmem:[%s3554_s1 + $0x19c] sm:$0x3] %v1756_v15  ;;  %2516 = vst [vmem:[%s3554_s1 + $0x19e] sm:$0x3] %v1762_v16  ;;  %v1678_v18 = vld [vmem:[#allocation2 + $0x608] sm:$0x3] }
 0x12e   :  { %2501 = vst [vmem:[%s3554_s1 + $0x180] sm:$0x3] %v1672_v17  ;;  %v1684_v19 = vld [vmem:[#allocation2 + $0x610] sm:$0x3]  ;;  %v1690_v20 = vld [vmem:[#allocation2 + $0x618] sm:$0x3] }
 0x12f   :  { %2502 = vst [vmem:[%s3554_s1 + $0x182] sm:$0x3] %v1678_v18  ;;  %2503 = vst [vmem:[%s3554_s1 + $0x184] sm:$0x3] %v1684_v19  ;;  %v1696_v21 = vld [vmem:[#allocation2 + $0x620] sm:$0x3] }
 0x130   :  { %2504 = vst [vmem:[%s3554_s1 + $0x186] sm:$0x3] %v1690_v20  ;;  %v1702_v22 = vld [vmem:[#allocation2 + $0x628] sm:$0x3]  ;;  %v1708_v23 = vld [vmem:[#allocation2 + $0x630] sm:$0x3] }
 0x131   :  { %2505 = vst [vmem:[%s3554_s1 + $0x188] sm:$0x3] %v1696_v21  ;;  %2506 = vst [vmem:[%s3554_s1 + $0x18a] sm:$0x3] %v1702_v22  ;;  %v1714_v24 = vld [vmem:[#allocation2 + $0x638] sm:$0x3] }
 0x132   :  { %2507 = vst [vmem:[%s3554_s1 + $0x18c] sm:$0x3] %v1708_v23  ;;  %v1816_v25 = vld [vmem:[#allocation2 + $0x6c0] sm:$0x3]  ;;  %v1822_v26 = vld [vmem:[#allocation2 + $0x6c8] sm:$0x3] }
 0x133   :  { %2508 = vst [vmem:[%s3554_s1 + $0x18e] sm:$0x3] %v1714_v24  ;;  %2525 = vst [vmem:[%s3554_s1 + $0x1b0] sm:$0x3] %v1816_v25  ;;  %v1828_v27 = vld [vmem:[#allocation2 + $0x6d0] sm:$0x3] }
 0x134   :  { %2526 = vst [vmem:[%s3554_s1 + $0x1b2] sm:$0x3] %v1822_v26  ;;  %v1834_v28 = vld [vmem:[#allocation2 + $0x6d8] sm:$0x3]  ;;  %v1840_v29 = vld [vmem:[#allocation2 + $0x6e0] sm:$0x3] }
 0x135   :  { %2527 = vst [vmem:[%s3554_s1 + $0x1b4] sm:$0x3] %v1828_v27  ;;  %2528 = vst [vmem:[%s3554_s1 + $0x1b6] sm:$0x3] %v1834_v28  ;;  %v1846_v30 = vld [vmem:[#allocation2 + $0x6e8] sm:$0x3] }
 0x136   :  { %2529 = vst [vmem:[%s3554_s1 + $0x1b8] sm:$0x3] %v1840_v29  ;;  %v1852_v31 = vld [vmem:[#allocation2 + $0x6f0] sm:$0x3]  ;;  %v1858_v32 = vld [vmem:[#allocation2 + $0x6f8] sm:$0x3] }
 0x137   :  { %2530 = vst [vmem:[%s3554_s1 + $0x1ba] sm:$0x3] %v1846_v30  ;;  %2531 = vst [vmem:[%s3554_s1 + $0x1bc] sm:$0x3] %v1852_v31  ;;  %v1768_v33 = vld [vmem:[#allocation2 + $0x680] sm:$0x3] }
 0x138   :  { %2532 = vst [vmem:[%s3554_s1 + $0x1be] sm:$0x3] %v1858_v32  ;;  %v1774_v34 = vld [vmem:[#allocation2 + $0x688] sm:$0x3]  ;;  %v1780_v35 = vld [vmem:[#allocation2 + $0x690] sm:$0x3] }
 0x139   :  { %2517 = vst [vmem:[%s3554_s1 + $0x1a0] sm:$0x3] %v1768_v33  ;;  %2518 = vst [vmem:[%s3554_s1 + $0x1a2] sm:$0x3] %v1774_v34  ;;  %v1786_v36 = vld [vmem:[#allocation2 + $0x698] sm:$0x3] }
 0x13a   :  { %2519 = vst [vmem:[%s3554_s1 + $0x1a4] sm:$0x3] %v1780_v35  ;;  %v1792_v37 = vld [vmem:[#allocation2 + $0x6a0] sm:$0x3]  ;;  %v1798_v38 = vld [vmem:[#allocation2 + $0x6a8] sm:$0x3] }
 0x13b   :  { %2520 = vst [vmem:[%s3554_s1 + $0x1a6] sm:$0x3] %v1786_v36  ;;  %2521 = vst [vmem:[%s3554_s1 + $0x1a8] sm:$0x3] %v1792_v37  ;;  %v1804_v39 = vld [vmem:[#allocation2 + $0x6b0] sm:$0x3] }
 0x13c   :  { %2522 = vst [vmem:[%s3554_s1 + $0x1aa] sm:$0x3] %v1798_v38  ;;  %v1810_v40 = vld [vmem:[#allocation2 + $0x6b8] sm:$0x3]  ;;  %v1912_v41 = vld [vmem:[#allocation2 + $0x740] sm:$0x3] }
 0x13d   :  { %2523 = vst [vmem:[%s3554_s1 + $0x1ac] sm:$0x3] %v1804_v39  ;;  %2524 = vst [vmem:[%s3554_s1 + $0x1ae] sm:$0x3] %v1810_v40  ;;  %v1918_v42 = vld [vmem:[#allocation2 + $0x748] sm:$0x3] }
 0x13e   :  { %2541 = vst [vmem:[%s3554_s1 + $0x1d0] sm:$0x3] %v1912_v41  ;;  %v1924_v43 = vld [vmem:[#allocation2 + $0x750] sm:$0x3]  ;;  %v1930_v44 = vld [vmem:[#allocation2 + $0x758] sm:$0x3] }
 0x13f   :  { %2542 = vst [vmem:[%s3554_s1 + $0x1d2] sm:$0x3] %v1918_v42  ;;  %2543 = vst [vmem:[%s3554_s1 + $0x1d4] sm:$0x3] %v1924_v43  ;;  %v1936_v45 = vld [vmem:[#allocation2 + $0x760] sm:$0x3] }
 0x140   :  { %2544 = vst [vmem:[%s3554_s1 + $0x1d6] sm:$0x3] %v1930_v44  ;;  %v1942_v46 = vld [vmem:[#allocation2 + $0x768] sm:$0x3]  ;;  %v1948_v47 = vld [vmem:[#allocation2 + $0x770] sm:$0x3] }
 0x141   :  { %2545 = vst [vmem:[%s3554_s1 + $0x1d8] sm:$0x3] %v1936_v45  ;;  %2546 = vst [vmem:[%s3554_s1 + $0x1da] sm:$0x3] %v1942_v46  ;;  %v1954_v48 = vld [vmem:[#allocation2 + $0x778] sm:$0x3] }
 0x142   :  { %2547 = vst [vmem:[%s3554_s1 + $0x1dc] sm:$0x3] %v1948_v47  ;;  %v1864_v49 = vld [vmem:[#allocation2 + $0x700] sm:$0x3]  ;;  %v1870_v50 = vld [vmem:[#allocation2 + $0x708] sm:$0x3] }
 0x143   :  { %2548 = vst [vmem:[%s3554_s1 + $0x1de] sm:$0x3] %v1954_v48  ;;  %2533 = vst [vmem:[%s3554_s1 + $0x1c0] sm:$0x3] %v1864_v49  ;;  %v1876_v51 = vld [vmem:[#allocation2 + $0x710] sm:$0x3] }
 0x144   :  { %2534 = vst [vmem:[%s3554_s1 + $0x1c2] sm:$0x3] %v1870_v50  ;;  %v1882_v52 = vld [vmem:[#allocation2 + $0x718] sm:$0x3]  ;;  %v1888_v53 = vld [vmem:[#allocation2 + $0x720] sm:$0x3] }
 0x145   :  { %2535 = vst [vmem:[%s3554_s1 + $0x1c4] sm:$0x3] %v1876_v51  ;;  %2536 = vst [vmem:[%s3554_s1 + $0x1c6] sm:$0x3] %v1882_v52  ;;  %v1894_v54 = vld [vmem:[#allocation2 + $0x728] sm:$0x3] }
 0x146   :  { %2537 = vst [vmem:[%s3554_s1 + $0x1c8] sm:$0x3] %v1888_v53  ;;  %v1900_v55 = vld [vmem:[#allocation2 + $0x730] sm:$0x3]  ;;  %v1906_v56 = vld [vmem:[#allocation2 + $0x738] sm:$0x3] }
 0x147   :  { %2538 = vst [vmem:[%s3554_s1 + $0x1ca] sm:$0x3] %v1894_v54  ;;  %2539 = vst [vmem:[%s3554_s1 + $0x1cc] sm:$0x3] %v1900_v55  ;;  %v2008_v57 = vld [vmem:[#allocation2 + $0x7c0] sm:$0x3] }
 0x148   :  { %2540 = vst [vmem:[%s3554_s1 + $0x1ce] sm:$0x3] %v1906_v56  ;;  %v2014_v58 = vld [vmem:[#allocation2 + $0x7c8] sm:$0x3]  ;;  %v2020_v59 = vld [vmem:[#allocation2 + $0x7d0] sm:$0x3] }
 0x149   :  { %2557 = vst [vmem:[%s3554_s1 + $0x1f0] sm:$0x3] %v2008_v57  ;;  %2558 = vst [vmem:[%s3554_s1 + $0x1f2] sm:$0x3] %v2014_v58  ;;  %v2026_v60 = vld [vmem:[#allocation2 + $0x7d8] sm:$0x3] }
 0x14a   :  { %2559 = vst [vmem:[%s3554_s1 + $0x1f4] sm:$0x3] %v2020_v59  ;;  %v2032_v61 = vld [vmem:[#allocation2 + $0x7e0] sm:$0x3]  ;;  %v2038_v62 = vld [vmem:[#allocation2 + $0x7e8] sm:$0x3] }
 0x14b   :  { %2560 = vst [vmem:[%s3554_s1 + $0x1f6] sm:$0x3] %v2026_v60  ;;  %2561 = vst [vmem:[%s3554_s1 + $0x1f8] sm:$0x3] %v2032_v61  ;;  %v2044_v63 = vld [vmem:[#allocation2 + $0x7f0] sm:$0x3] }
 0x14c   :  { %2562 = vst [vmem:[%s3554_s1 + $0x1fa] sm:$0x3] %v2038_v62  ;;  %v2050_v0 = vld [vmem:[#allocation2 + $0x7f8] sm:$0x3]  ;;  %v1960_v1 = vld [vmem:[#allocation2 + $0x780] sm:$0x3] }
 0x14d   :  { %2563 = vst [vmem:[%s3554_s1 + $0x1fc] sm:$0x3] %v2044_v63  ;;  %2564 = vst [vmem:[%s3554_s1 + $0x1fe] sm:$0x3] %v2050_v0  ;;  %v1966_v2 = vld [vmem:[#allocation2 + $0x788] sm:$0x3] }
 0x14e   :  { %2549 = vst [vmem:[%s3554_s1 + $0x1e0] sm:$0x3] %v1960_v1  ;;  %v1972_v3 = vld [vmem:[#allocation2 + $0x790] sm:$0x3]  ;;  %v1978_v4 = vld [vmem:[#allocation2 + $0x798] sm:$0x3] }
 0x14f   :  { %2550 = vst [vmem:[%s3554_s1 + $0x1e2] sm:$0x3] %v1966_v2  ;;  %2551 = vst [vmem:[%s3554_s1 + $0x1e4] sm:$0x3] %v1972_v3  ;;  %v1984_v5 = vld [vmem:[#allocation2 + $0x7a0] sm:$0x3] }
 0x150   :  { %2552 = vst [vmem:[%s3554_s1 + $0x1e6] sm:$0x3] %v1978_v4  ;;  %v1990_v6 = vld [vmem:[#allocation2 + $0x7a8] sm:$0x3]  ;;  %v1996_v7 = vld [vmem:[#allocation2 + $0x7b0] sm:$0x3] }
 0x151   :  { %2553 = vst [vmem:[%s3554_s1 + $0x1e8] sm:$0x3] %v1984_v5  ;;  %2554 = vst [vmem:[%s3554_s1 + $0x1ea] sm:$0x3] %v1990_v6  ;;  %v2002_v8 = vld [vmem:[#allocation2 + $0x7b8] sm:$0x3] }
 0x152   :  { %2555 = vst [vmem:[%s3554_s1 + $0x1ec] sm:$0x3] %v1996_v7  ;;  %2556 = vst [vmem:[%s3554_s1 + $0x1ee] sm:$0x3] %v2002_v8 }
 0x153   :  { %2055 = vsyncpa [#allocation1], 1 }

// kernel: merge_lstm_forward.2
= control target key start
LH: loop header
LB: loop body
LE: loop exit
PB: predicated region body
PF: predicated region fallthrough
CT: control target
= control target key end

     0   :  { %14 = vsyncpa [#allocation3], 0  ;;  %s7475_s0 = inlined_call_operand.vmem [shape: f32[16,1024], index: 0, kind: input, shape index: {}]   ;;  %s7476_s1 = inlined_call_operand.hbm [shape: bf16[1024,256], index: 1, kind: input, shape index: {}]   ;;  %s7477_s2 = inlined_call_operand.hbm [shape: f32[1,256], index: 2, kind: input, shape index: {}]   ;;  %s7478_s3 = inlined_call_operand.hbm [shape: bf16[256,2048], index: 3, kind: input, shape index: {}]   ;;  %s7479_s4 = inlined_call_operand.hbm [shape: f32[1,2048], index: 4, kind: input, shape index: {}]   ;;  %s7480_s5 = inlined_call_operand.hbm [shape: bf16[2048,256], index: 5, kind: input, shape index: {}]   ;;  %s7481_s6 = inlined_call_operand.hbm [shape: f32[1,256], index: 6, kind: input, shape index: {}]   ;;  %s7482_s7 = inlined_call_operand.hbm [shape: f32[8,16], index: 7, kind: input, shape index: {}]   ;;  %s7483_s8 = inlined_call_operand.hbm [shape: f32[8,1], index: 8, kind: input, shape index: {}]   ;;  %s7484_s9 = inlined_call_operand.vmem [shape: f32[8,256], index: 9, kind: output, shape index: {}]  }
   0x1   :  { %15 = vsyncpa [#allocation5], 0 }
   0x2   :  { %16 = vsyncpa [#allocation8], 0 }
   0x3   :  { %17 = vsyncpa [#allocation11], 0 }
   0x4   :  { %18 = vsyncpa [#allocation14], 0  ;;  %s7096_s30 = smov [#allocation4]   ;;  %s7097_s11 = smov [#allocation7]  }
   0x5   :  { %s39_s10 = sshll.u32 %s7096_s30, 4  ;;  %s61_s12 = sshll.u32 %s7097_s11, 4  ;;  %s40_s10 = int_to_ptr.vmem [resolvable:$true] %s39_s10  ;;  %s62_s12 = int_to_ptr.vmem [resolvable:$true] %s61_s12 }
   0x6   :  { %s6910_s15 = scalar_lea.hbm %s7477_s2, 32 }
   0x7   :  { %p6911_p0 = scmp.ne.s32.totalorder %s7477_s2, %s6910_s15  ;;  %p6914_p1 = scmp.lt.u32.totalorder %s6910_s15, %s7477_s2 }
   0x9   :  { %p6916_p2 = pnand %p6914_p1, %p6911_p0 }
   0xb   :  { %6919 = shalt.err (!%p6916_p2)
}
   0xc   :  { %s6920_s20 = scalar_lea.vmem %s40_s10, 32  ;;  %p6925_p4 = scmp.lt.s32.totalorder %s40_s10, %s40_s10 }
   0xd   :  { %p6921_p3 = scmp.ne.s32.totalorder %s40_s10, %s6920_s20  ;;  %p6926_p5 = scmp.lt.s32.totalorder %s6920_s20, %s6920_s20 }
   0xf   :  { %p6927_p6 = por %p6926_p5, %p6925_p4 }
  0x11   :  { %p6928_p7 = pnand %p6927_p6, %p6921_p3 }
  0x13   :  { %6931 = shalt.err (!%p6928_p7)
}
  0x14   :  { %42 = dma.hbm_to_vmem [thread:$0]  %s7477_s2, 32, %s40_s10, [#allocation5]  }
  0x15   :  { %s6932_s25 = scalar_lea.hbm %s7479_s4, 256 }
  0x16   :  { %p6933_p8 = scmp.ne.s32.totalorder %s7479_s4, %s6932_s25  ;;  %p6936_p9 = scmp.lt.u32.totalorder %s6932_s25, %s7479_s4 }
  0x18   :  { %p6938_p10 = pnand %p6936_p9, %p6933_p8 }
  0x1a   :  { %6941 = shalt.err (!%p6938_p10)
}
  0x1b   :  { %s6942_s30 = scalar_lea.vmem %s62_s12, 256  ;;  %p6947_p12 = scmp.lt.s32.totalorder %s62_s12, %s62_s12 }
  0x1c   :  { %p6943_p11 = scmp.ne.s32.totalorder %s62_s12, %s6942_s30  ;;  %p6948_p13 = scmp.lt.s32.totalorder %s6942_s30, %s6942_s30 }
  0x1e   :  { %p6949_p0 = por %p6948_p13, %p6947_p12 }
  0x20   :  { %p6950_p1 = pnand %p6949_p0, %p6943_p11 }
  0x22   :  { %6953 = shalt.err (!%p6950_p1)
}
  0x23   :  { %64 = dma.hbm_to_vmem [thread:$0]  %s7479_s4, 256, %s62_s12, [#allocation8]  }
  0x24   :  { %s7098_s11 = smov [#allocation10]   ;;  %s7099_s14 = smov [#allocation2]  }
  0x25   :  { %s83_s13 = sshll.u32 %s7098_s11, 4  ;;  %s26_s15 = sshll.u32 %s7099_s14, 4  ;;  %s84_s13 = int_to_ptr.vmem [resolvable:$true] %s83_s13  ;;  %s7184_s15 = int_to_ptr.vmem [resolvable:$true] %s26_s15 }
  0x26   :  { %s6954_s18 = scalar_lea.hbm %s7481_s6, 32 }
  0x27   :  { %p6955_p2 = scmp.ne.s32.totalorder %s7481_s6, %s6954_s18  ;;  %p6958_p3 = scmp.lt.u32.totalorder %s6954_s18, %s7481_s6 }
  0x29   :  { %p6960_p4 = pnand %p6958_p3, %p6955_p2 }
  0x2b   :  { %6963 = shalt.err (!%p6960_p4)
}
  0x2c   :  { %s6964_s4 = scalar_lea.vmem %s84_s13, 32  ;;  %p6969_p6 = scmp.lt.s32.totalorder %s84_s13, %s84_s13 }
  0x2d   :  { %p6965_p5 = scmp.ne.s32.totalorder %s84_s13, %s6964_s4  ;;  %p6970_p7 = scmp.lt.s32.totalorder %s6964_s4, %s6964_s4 }
  0x2f   :  { %p6971_p8 = por %p6970_p7, %p6969_p6 }
  0x31   :  { %p6972_p9 = pnand %p6971_p8, %p6965_p5 }
  0x33   :  { %6975 = shalt.err (!%p6972_p9)
}
  0x34   :  { %86 = dma.hbm_to_vmem [thread:$0]  %s7481_s6, 32, %s84_s13, [#allocation11]  }
  0x35   :  { %s6976_s26 = scalar_lea.hbm %s7476_s1, 16384 }
  0x36   :  { %p6977_p10 = scmp.ne.s32.totalorder %s7476_s1, %s6976_s26  ;;  %p6980_p11 = scmp.lt.u32.totalorder %s6976_s26, %s7476_s1 }
  0x38   :  { %p6982_p12 = pnand %p6980_p11, %p6977_p10 }
  0x3a   :  { %6985 = shalt.err (!%p6982_p12)
}
  0x3b   :  { %s6986_s2 = scalar_lea.vmem %s7184_s15, 16384  ;;  %p6991_p0 = scmp.lt.s32.totalorder %s7184_s15, %s7184_s15 }
  0x3c   :  { %p6987_p13 = scmp.ne.s32.totalorder %s7184_s15, %s6986_s2  ;;  %p6992_p1 = scmp.lt.s32.totalorder %s6986_s2, %s6986_s2 }
  0x3e   :  { %p6993_p2 = por %p6992_p1, %p6991_p0 }
  0x40   :  { %p6994_p3 = pnand %p6993_p2, %p6987_p13 }
  0x42   :  { %6997 = shalt.err (!%p6994_p3)
}
  0x43   :  { %s7100_s6 = smov 128   ;;  %s7101_s10 = smov 8  }
  0x44   :  { %32 = dma.hbm_to_vmem [thread:$0]  %s7476_s1, 16384, %s7184_s15, [#allocation3], %s7100_s6, %s7100_s6, %s7101_s10  }
  0x45   :  { %s7102_s14 = smov [#allocation6]   ;;  %s6998_s19 = scalar_lea.hbm %s7478_s3, 32768 }
  0x46   :  { %s48_s16 = sshll.u32 %s7102_s14, 4  ;;  %p6999_p4 = scmp.ne.s32.totalorder %s7478_s3, %s6998_s19  ;;  %s49_s16 = int_to_ptr.vmem [resolvable:$true] %s48_s16 }
  0x47   :  { %p7002_p5 = scmp.lt.u32.totalorder %s6998_s19, %s7478_s3 }
  0x49   :  { %p7004_p6 = pnand %p7002_p5, %p6999_p4 }
  0x4b   :  { %7007 = shalt.err (!%p7004_p6)
}
  0x4c   :  { %s7008_s12 = scalar_lea.vmem %s49_s16, 32768  ;;  %p7013_p8 = scmp.lt.s32.totalorder %s49_s16, %s49_s16 }
  0x4d   :  { %p7009_p7 = scmp.ne.s32.totalorder %s49_s16, %s7008_s12  ;;  %p7014_p9 = scmp.lt.s32.totalorder %s7008_s12, %s7008_s12 }
  0x4f   :  { %p7015_p10 = por %p7014_p9, %p7013_p8 }
  0x51   :  { %p7016_p11 = pnand %p7015_p10, %p7009_p7 }
  0x53   :  { %7019 = shalt.err (!%p7016_p11)
}
  0x54   :  { %s7103_s1 = smov 1024   ;;  %s7104_s15 = smov 64  }
  0x55   :  { %54 = dma.hbm_to_vmem [thread:$0]  %s7478_s3, 32768, %s49_s16, [#allocation5], %s7103_s1, %s7103_s1, %s7104_s15  }
  0x56   :  { %s7105_s25 = smov [#allocation9]   ;;  %s7106_s27 = smov [#allocation12]  }
  0x57   :  { %s70_s26 = sshll.u32 %s7105_s25, 4  ;;  %s93_s28 = sshll.u32 %s7106_s27, 4  ;;  %s71_s26 = int_to_ptr.vmem [resolvable:$true] %s70_s26  ;;  %s94_s28 = int_to_ptr.vmem [resolvable:$true] %s93_s28 }
  0x58   :  { %s7020_s2 = scalar_lea.hbm %s7480_s5, 32768 }
  0x59   :  { %p7021_p12 = scmp.ne.s32.totalorder %s7480_s5, %s7020_s2  ;;  %p7024_p13 = scmp.lt.u32.totalorder %s7020_s2, %s7480_s5 }
  0x5b   :  { %p7026_p0 = pnand %p7024_p13, %p7021_p12 }
  0x5d   :  { %7029 = shalt.err (!%p7026_p0)
}
  0x5e   :  { %s7030_s3 = scalar_lea.vmem %s71_s26, 32768  ;;  %p7035_p2 = scmp.lt.s32.totalorder %s71_s26, %s71_s26 }
  0x5f   :  { %p7031_p1 = scmp.ne.s32.totalorder %s71_s26, %s7030_s3  ;;  %p7036_p3 = scmp.lt.s32.totalorder %s7030_s3, %s7030_s3 }
  0x61   :  { %p7037_p4 = por %p7036_p3, %p7035_p2 }
  0x63   :  { %p7038_p5 = pnand %p7037_p4, %p7031_p1 }
  0x65   :  { %7041 = shalt.err (!%p7038_p5)
}
  0x66   :  { %76 = dma.hbm_to_vmem [thread:$0]  %s7480_s5, 32768, %s71_s26, [#allocation8], %s7100_s6, %s7100_s6, %s7101_s10  }
  0x67   :  { %s7042_s21 = scalar_lea.hbm %s7482_s7, 128 }
  0x68   :  { %p7043_p6 = scmp.ne.s32.totalorder %s7482_s7, %s7042_s21  ;;  %p7046_p7 = scmp.lt.u32.totalorder %s7042_s21, %s7482_s7 }
  0x6a   :  { %p7048_p8 = pnand %p7046_p7, %p7043_p6 }
  0x6c   :  { %7051 = shalt.err (!%p7048_p8)
}
  0x6d   :  { %s7052_s15 = scalar_lea.vmem %s94_s28, 128  ;;  %p7057_p10 = scmp.lt.s32.totalorder %s94_s28, %s94_s28 }
  0x6e   :  { %p7053_p9 = scmp.ne.s32.totalorder %s94_s28, %s7052_s15  ;;  %p7058_p11 = scmp.lt.s32.totalorder %s7052_s15, %s7052_s15 }
  0x70   :  { %p7059_p12 = por %p7058_p11, %p7057_p10 }
  0x72   :  { %p7060_p13 = pnand %p7059_p12, %p7053_p9 }
  0x74   :  { %7063 = shalt.err (!%p7060_p13)
}
  0x75   :  { %96 = dma.hbm_to_vmem [thread:$0]  %s7482_s7, 128, %s94_s28, [#allocation11]  }
  0x76   :  { %s7107_s10 = smov [#allocation13]   ;;  %s7064_s26 = scalar_lea.hbm %s7483_s8, 128 }
  0x77   :  { %s103_s23 = sshll.u32 %s7107_s10, 4  ;;  %p7065_p0 = scmp.ne.s32.totalorder %s7483_s8, %s7064_s26  ;;  %s104_s23 = int_to_ptr.vmem [resolvable:$true] %s103_s23 }
  0x78   :  { %p7068_p1 = scmp.lt.u32.totalorder %s7064_s26, %s7483_s8 }
  0x7a   :  { %p7070_p2 = pnand %p7068_p1, %p7065_p0 }
  0x7c   :  { %7073 = shalt.err (!%p7070_p2)
}
  0x7d   :  { %s7074_s11 = scalar_lea.vmem %s104_s23, 128  ;;  %p7079_p4 = scmp.lt.s32.totalorder %s104_s23, %s104_s23 }
  0x7e   :  { %p7075_p3 = scmp.ne.s32.totalorder %s104_s23, %s7074_s11  ;;  %p7080_p5 = scmp.lt.s32.totalorder %s7074_s11, %s7074_s11 }
  0x80   :  { %p7081_p6 = por %p7080_p5, %p7079_p4 }
  0x82   :  { %p7082_p7 = pnand %p7081_p6, %p7075_p3 }
  0x84   :  { %7085 = shalt.err (!%p7082_p7)
}
  0x85   :  { %106 = dma.hbm_to_vmem [thread:$0]  %s7483_s8, 128, %s104_s23, [#allocation14]  }
  0x86   :  { %7086 = dma.done.wait [#allocation3], 16384  }
  0x87   :  { %7087 = vsyncadd [#allocation3], 4294950912 }
  0x88   :  { %7088 = dma.done.wait [#allocation5], 32800  }
  0x89   :  { %7089 = vsyncadd [#allocation5], 4294934496 }
  0x8a   :  { %7090 = dma.done.wait [#allocation8], 33024  }
  0x8b   :  { %7091 = vsyncadd [#allocation8], 4294934272 }
  0x8c   :  { %7092 = dma.done.wait [#allocation11], 160  }
  0x8d   :  { %7093 = vsyncadd [#allocation11], 4294967136 }
  0x8e   :  { %7094 = dma.done.wait [#allocation14], 128  }
  0x8f   :  { %7095 = vsyncadd [#allocation14], 4294967168  ;;  %v6334_v0 = vld [vmem:[#allocation2 + $0x4] ss:$8 sps:$4 sm:$0xff]   ;;  %v6336_v1 = vld [vmem:[#allocation2] ss:$8 sps:$4 sm:$0xff]  }
  0x90   :  { %935 = vmatprep.subr.bf16.mxu1 %v6334_v0  ;;  %v6337_v2 = vld [vmem:[#allocation2 + $0x14] ss:$8 sps:$4 sm:$0xff]   ;;  %v6339_v3 = vld [vmem:[#allocation2 + $0x10] ss:$8 sps:$4 sm:$0xff]   ;;  %v6340_v4 = vld [vmem:[#allocation2 + $0x24] ss:$8 sps:$4 sm:$0xff]  }
  0x91   :  { %936 = vmatpush1.bf16.msra.mxu1 %v6336_v1  ;;  %v6342_v5 = vld [vmem:[#allocation2 + $0x20] ss:$8 sps:$4 sm:$0xff]   ;;  %v6343_v6 = vld [vmem:[#allocation2 + $0x34] ss:$8 sps:$4 sm:$0xff]   ;;  %v6345_v7 = vld [vmem:[#allocation2 + $0x30] ss:$8 sps:$4 sm:$0xff]  }
  0x92   :  { %937 = vmatprep.subr.bf16.mxu1 %v6337_v2  ;;  %v6346_v8 = vld [vmem:[#allocation2 + $0x44] ss:$8 sps:$4 sm:$0xff]   ;;  %v6348_v9 = vld [vmem:[#allocation2 + $0x40] ss:$8 sps:$4 sm:$0xff]   ;;  %v6349_v10 = vld [vmem:[#allocation2 + $0x54] ss:$8 sps:$4 sm:$0xff]  }
  0x93   :  { %v6351_v11 = vld [vmem:[#allocation2 + $0x50] ss:$8 sps:$4 sm:$0xff]   ;;  %v6352_v12 = vld [vmem:[#allocation2 + $0x64] ss:$8 sps:$4 sm:$0xff]   ;;  %v6354_v16 = vld [vmem:[#allocation2 + $0x60] ss:$8 sps:$4 sm:$0xff]  }
  0x94   :  { %v132_v13 = vld [vmem:[%s7475_s0 + $0x8] sm:$0xff]  ;;  %v6355_v17 = vld [vmem:[#allocation2 + $0x74] ss:$8 sps:$4 sm:$0xff]   ;;  %v6357_v18 = vld [vmem:[#allocation2 + $0x70] ss:$8 sps:$4 sm:$0xff]   ;;  %vm3110_vm0 = vcmask 130048  }
  0x95   :  { %938 = vmatpush1.bf16.msra.mxu1 %v6339_v3  ;;  %v140_v14 = vld [vmem:[%s7475_s0 + $0x48] sm:$0xff]  ;;  %v6361_v21 = vld [vmem:[#allocation2 + $0x94] ss:$8 sps:$4 sm:$0xff]   ;;  %v6363_v22 = vld [vmem:[#allocation2 + $0x90] ss:$8 sps:$4 sm:$0xff]  }
  0x96   :  { %939 = vmatprep.subr.bf16.mxu1 %v6340_v4  ;;  %v148_v15 = vpack.c.bf16 %v140_v14, %v132_v13  ;;  %v6358_v19 = vld [vmem:[#allocation2 + $0x84] ss:$8 sps:$4 sm:$0xff]   ;;  %v6360_v20 = vld [vmem:[#allocation2 + $0x80] ss:$8 sps:$4 sm:$0xff]   ;;  %v6367_v25 = vld [vmem:[#allocation2 + $0xb4] ss:$8 sps:$4 sm:$0xff]  }
  0x97   :  { %v6364_v23 = vld [vmem:[#allocation2 + $0xa4] ss:$8 sps:$4 sm:$0xff]   ;;  %v6366_v24 = vld [vmem:[#allocation2 + $0xa0] ss:$8 sps:$4 sm:$0xff]   ;;  %v6369_v26 = vld [vmem:[#allocation2 + $0xb0] ss:$8 sps:$4 sm:$0xff]  }
  0x98   :  { %967 = vmatprep.mubr.bf16.mxu1 %v148_v15  ;;  %v6370_v27 = vld [vmem:[#allocation2 + $0xc4] ss:$8 sps:$4 sm:$0xff]   ;;  %v6372_v28 = vld [vmem:[#allocation2 + $0xc0] ss:$8 sps:$4 sm:$0xff]   ;;  %v6373_v29 = vld [vmem:[#allocation2 + $0xd4] ss:$8 sps:$4 sm:$0xff]  }
  0x99   :  { %940 = vmatpush1.bf16.msra.mxu1 %v6342_v5  ;;  %v6375_v30 = vld [vmem:[#allocation2 + $0xd0] ss:$8 sps:$4 sm:$0xff]   ;;  %v6376_v31 = vld [vmem:[#allocation2 + $0xe4] ss:$8 sps:$4 sm:$0xff]   ;;  %v6378_v32 = vld [vmem:[#allocation2 + $0xe0] ss:$8 sps:$4 sm:$0xff]  }
  0x9a   :  { %941 = vmatprep.subr.bf16.mxu1 %v6343_v6  ;;  %v6379_v33 = vld [vmem:[#allocation2 + $0xf4] ss:$8 sps:$4 sm:$0xff]   ;;  %v6381_v34 = vld [vmem:[#allocation2 + $0xf0] ss:$8 sps:$4 sm:$0xff]   ;;  %v6384_v35 = vld [vmem:[#allocation2 + $0x104] ss:$8 sps:$4 sm:$0xff]  }
  0x9b   :  { %v131_v36 = vld [vmem:[%s7475_s0] sm:$0xff]  ;;  %v134_v38 = vld [vmem:[%s7475_s0 + $0x18] sm:$0xff]  ;;  %v144_v13 = vld [vmem:[%s7475_s0 + $0x68] sm:$0xff] }
  0x9c   :  { %v139_v37 = vld [vmem:[%s7475_s0 + $0x40] sm:$0xff]  ;;  %v142_v39 = vld [vmem:[%s7475_s0 + $0x58] sm:$0xff] }
  0x9d   :  { %942 = vmatpush1.bf16.msra.mxu1 %v6345_v7  ;;  %v147_v40 = vpack.c.bf16 %v139_v37, %v131_v36  ;;  %v6382_v41 = vld [vmem:[#allocation2 + $0x100] ss:$8 sps:$4 sm:$0xff]   ;;  %v150_v42 = vpack.c.bf16 %v142_v39, %v134_v38  ;;  %v6387_v43 = vld [vmem:[#allocation2 + $0x114] ss:$8 sps:$4 sm:$0xff]   ;;  %v6385_v44 = vld [vmem:[#allocation2 + $0x110] ss:$8 sps:$4 sm:$0xff]  }
  0x9e   :  { %943 = vmatprep.subr.bf16.mxu1 %v6346_v8  ;;  %v6390_v45 = vld [vmem:[#allocation2 + $0x124] ss:$8 sps:$4 sm:$0xff]   ;;  %v6388_v46 = vld [vmem:[#allocation2 + $0x120] ss:$8 sps:$4 sm:$0xff]   ;;  %v6393_v47 = vld [vmem:[#allocation2 + $0x134] ss:$8 sps:$4 sm:$0xff]  }
  0x9f   :  { %v6391_v48 = vld [vmem:[#allocation2 + $0x130] ss:$8 sps:$4 sm:$0xff]   ;;  %v6396_v49 = vld [vmem:[#allocation2 + $0x144] ss:$8 sps:$4 sm:$0xff]   ;;  %v6394_v50 = vld [vmem:[#allocation2 + $0x140] ss:$8 sps:$4 sm:$0xff]  }
  0xa0   :  { %v6399_v51 = vld [vmem:[#allocation2 + $0x154] ss:$8 sps:$4 sm:$0xff]   ;;  %v6397_v52 = vld [vmem:[#allocation2 + $0x150] ss:$8 sps:$4 sm:$0xff]   ;;  %v6402_v53 = vld [vmem:[#allocation2 + $0x164] ss:$8 sps:$4 sm:$0xff]  }
  0xa1   :  { %944 = vmatpush1.bf16.msra.mxu1 %v6348_v9  ;;  %v6400_v54 = vld [vmem:[#allocation2 + $0x160] ss:$8 sps:$4 sm:$0xff]   ;;  %v6405_v55 = vld [vmem:[#allocation2 + $0x174] ss:$8 sps:$4 sm:$0xff]   ;;  %v6403_v56 = vld [vmem:[#allocation2 + $0x170] ss:$8 sps:$4 sm:$0xff]  }
  0xa2   :  { %945 = vmatprep.subr.bf16.mxu1 %v6349_v10  ;;  %v6408_v57 = vld [vmem:[#allocation2 + $0x184] ss:$8 sps:$4 sm:$0xff]   ;;  %v6406_v58 = vld [vmem:[#allocation2 + $0x180] ss:$8 sps:$4 sm:$0xff]   ;;  %v6411_v59 = vld [vmem:[#allocation2 + $0x194] ss:$8 sps:$4 sm:$0xff]  }
  0xa3   :  { %v6409_v60 = vld [vmem:[#allocation2 + $0x190] ss:$8 sps:$4 sm:$0xff]   ;;  %v6414_v61 = vld [vmem:[#allocation2 + $0x1a4] ss:$8 sps:$4 sm:$0xff]   ;;  %v6412_v62 = vld [vmem:[#allocation2 + $0x1a0] ss:$8 sps:$4 sm:$0xff]  }
  0xa4   :  { %v6417_v63 = vld [vmem:[#allocation2 + $0x1b4] ss:$8 sps:$4 sm:$0xff]   ;;  %v6415_v0 = vld [vmem:[#allocation2 + $0x1b0] ss:$8 sps:$4 sm:$0xff]   ;;  %v6420_v1 = vld [vmem:[#allocation2 + $0x1c4] ss:$8 sps:$4 sm:$0xff]  }
  0xa5   :  { %946 = vmatpush1.bf16.msra.mxu1 %v6351_v11  ;;  %v6418_v2 = vld [vmem:[#allocation2 + $0x1c0] ss:$8 sps:$4 sm:$0xff]   ;;  %v6423_v3 = vld [vmem:[#allocation2 + $0x1d4] ss:$8 sps:$4 sm:$0xff]   ;;  %v6421_v4 = vld [vmem:[#allocation2 + $0x1d0] ss:$8 sps:$4 sm:$0xff]  }
  0xa6   :  { %947 = vmatprep.subr.bf16.mxu1 %v6352_v12  ;;  %v6426_v5 = vld [vmem:[#allocation2 + $0x1e4] ss:$8 sps:$4 sm:$0xff]   ;;  %v6424_v6 = vld [vmem:[#allocation2 + $0x1e0] ss:$8 sps:$4 sm:$0xff]   ;;  %v6429_v7 = vld [vmem:[#allocation2 + $0x1f4] ss:$8 sps:$4 sm:$0xff]  }
  0xa7   :  { %v6427_v8 = vld [vmem:[#allocation2 + $0x1f0] ss:$8 sps:$4 sm:$0xff]   ;;  %v6432_v11 = vld [vmem:[#allocation2 + $0x204] ss:$8 sps:$4 sm:$0xff]   ;;  %v6430_v15 = vld [vmem:[#allocation2 + $0x200] ss:$8 sps:$4 sm:$0xff]  }
  0xa8   :  { %v133_v9 = vld [vmem:[%s7475_s0 + $0x10] sm:$0xff]  ;;  %v136_v12 = vld [vmem:[%s7475_s0 + $0x28] sm:$0xff] }
  0xa9   :  { %948 = vmatpush1.bf16.msra.mxu1 %v6354_v16  ;;  %v141_v10 = vld [vmem:[%s7475_s0 + $0x50] sm:$0xff]  ;;  %v1165_v36 = vld [vmem:[#allocation6 + $0x1a0] sm:$0xff] }
  0xaa   :  { %949 = vmatprep.subr.bf16.mxu1 %v6355_v17  ;;  %v149_v14 = vpack.c.bf16 %v141_v10, %v133_v9  ;;  %v6435_v16 = vld [vmem:[#allocation2 + $0x214] ss:$8 sps:$4 sm:$0xff]   ;;  %v152_v17 = vpack.c.bf16 %v144_v13, %v136_v12  ;;  %v1173_v37 = vld [vmem:[#allocation6 + $0x1e0] sm:$0xff] }
  0xab   :  { %v5778_v38 = vcombine.high %v1165_v36, %v1173_v37  ;;  %v6442_v39 = vld [vmem:[#allocation2 + $0x240] ss:$8 sps:$4 sm:$0xff]   ;;  %v6465_v12 = vld [vmem:[#allocation2 + $0x2b4] ss:$8 sps:$4 sm:$0xff]  }
  0xac   :  { %v1269_v9 = vld [vmem:[#allocation6 + $0x4e0] sm:$0xff] }
  0xad   :  { %950 = vmatpush1.bf16.msra.mxu1 %v6357_v18  ;;  %v1117_v18 = vld [vmem:[#allocation6 + $0x20] sm:$0xff] }
  0xae   :  { %951 = vmatprep.subr.bf16.mxu1 %v6358_v19  ;;  %v6433_v19 = vld [vmem:[#allocation2 + $0x210] ss:$8 sps:$4 sm:$0xff]  }
  0xb1   :  { %952 = vmatpush1.bf16.msra.mxu1 %v6360_v20  ;;  %v6438_v20 = vld [vmem:[#allocation2 + $0x224] ss:$8 sps:$4 sm:$0xff]  }
  0xb2   :  { %953 = vmatprep.subr.bf16.mxu1 %v6361_v21  ;;  %v1125_v21 = vld [vmem:[#allocation6 + $0x60] sm:$0xff] }
  0xb5   :  { %954 = vmatpush1.bf16.msra.mxu1 %v6363_v22  ;;  %v5730_v22 = vcombine.high %v1117_v18, %v1125_v21 }
  0xb6   :  { %955 = vmatprep.subr.bf16.mxu1 %v6364_v23  ;;  %v5729_v23 = vcombine.low %v1117_v18, %v1125_v21  ;;  %v6468_v18 = vld [vmem:[#allocation2 + $0x2c4] ss:$8 sps:$4 sm:$0xff]  }
  0xb7   :  { %2905 = vmatprep.subr.bf16.mxu0 %v5730_v22  ;;  %v1301_v21 = vld [vmem:[#allocation6 + $0x5e0] sm:$0xff] }
  0xb8   :  { %2906 = vmatpush1.bf16.msra.mxu0 %v5729_v23  ;;  %v6466_v23 = vld [vmem:[#allocation2 + $0x2c0] ss:$8 sps:$4 sm:$0xff]  }
  0xb9   :  { %956 = vmatpush1.bf16.msra.mxu1 %v6366_v24  ;;  %v1133_v24 = vld [vmem:[#allocation6 + $0xa0] sm:$0xff] }
  0xba   :  { %957 = vmatprep.subr.bf16.mxu1 %v6367_v25  ;;  %v1141_v25 = vld [vmem:[#allocation6 + $0xe0] sm:$0xff] }
  0xbd   :  { %958 = vmatpush1.bf16.msra.mxu1 %v6369_v26  ;;  %v5746_v26 = vcombine.high %v1133_v24, %v1141_v25 }
  0xbe   :  { %959 = vmatprep.subr.bf16.mxu1 %v6370_v27  ;;  %v6436_v27 = vld [vmem:[#allocation2 + $0x220] ss:$8 sps:$4 sm:$0xff]  }
  0xbf   :  { %2907 = vmatprep.subr.bf16.mxu0 %v5746_v26  ;;  %v1309_v26 = vld [vmem:[#allocation6 + $0x620] sm:$0xff] }
  0xc1   :  { %960 = vmatpush1.bf16.msra.mxu1 %v6372_v28  ;;  %v6441_v28 = vld [vmem:[#allocation2 + $0x234] ss:$8 sps:$4 sm:$0xff]  }
  0xc2   :  { %961 = vmatprep.subr.bf16.mxu1 %v6373_v29  ;;  %v5745_v29 = vcombine.low %v1133_v24, %v1141_v25  ;;  %v6471_v24 = vld [vmem:[#allocation2 + $0x2d4] ss:$8 sps:$4 sm:$0xff]  }
  0xc4   :  { %2908 = vmatpush1.bf16.msra.mxu0 %v5745_v29  ;;  %v6469_v29 = vld [vmem:[#allocation2 + $0x2d0] ss:$8 sps:$4 sm:$0xff]  }
  0xc5   :  { %962 = vmatpush1.bf16.msra.mxu1 %v6375_v30  ;;  %v1149_v30 = vld [vmem:[#allocation6 + $0x120] sm:$0xff] }
  0xc6   :  { %963 = vmatprep.subr.bf16.mxu1 %v6376_v31  ;;  %v1157_v31 = vld [vmem:[#allocation6 + $0x160] sm:$0xff] }
  0xc9   :  { %964 = vmatpush1.bf16.msra.mxu1 %v6378_v32  ;;  %v5762_v32 = vcombine.high %v1149_v30, %v1157_v31 }
  0xca   :  { %965 = vmatprep.subr.bf16.mxu1 %v6379_v33  ;;  %v6439_v33 = vld [vmem:[#allocation2 + $0x230] ss:$8 sps:$4 sm:$0xff]  }
  0xcb   :  { %2909 = vmatprep.subr.bf16.mxu0 %v5762_v32  ;;  %v1325_v32 = vld [vmem:[#allocation6 + $0x6a0] sm:$0xff] }
  0xcd   :  { %966 = vmatpush1.bf16.msra.mxu1 %v6381_v34  ;;  %v6444_v34 = vld [vmem:[#allocation2 + $0x244] ss:$8 sps:$4 sm:$0xff]  }
  0xce   :  { %978 = vmatprep.subr.bf16.mxu1 %v6384_v35  ;;  %v5761_v35 = vcombine.low %v1149_v30, %v1157_v31  ;;  %v6474_v30 = vld [vmem:[#allocation2 + $0x2e4] ss:$8 sps:$4 sm:$0xff]  }
  0xd0   :  { %968 = vmatmul.mubr.bf16.vlgmr.msra.gmra.mrb[0].mxu1 %v147_v40  ;;  %v6447_v40 = vld [vmem:[#allocation2 + $0x254] ss:$8 sps:$4 sm:$0xff]   ;;  %2910 = vmatpush1.bf16.msra.mxu0 %v5761_v35 }
  0xd1   :  { %979 = vmatpush1.bf16.msra.mxu1 %v6382_v41  ;;  %1010 = vmatprep.mubr.bf16.mxu1 %v150_v42  ;;  %v5777_v41 = vcombine.low %v1165_v36, %v1173_v37  ;;  %v1181_v42 = vld [vmem:[#allocation6 + $0x220] sm:$0xff]  ;;  %v6477_v36 = vld [vmem:[#allocation2 + $0x2f4] ss:$8 sps:$4 sm:$0xff]  }
  0xd2   :  { %980 = vmatprep.subr.bf16.mxu1 %v6387_v43  ;;  %2911 = vmatprep.subr.bf16.mxu0 %v5778_v38  ;;  %v1189_v43 = vld [vmem:[#allocation6 + $0x260] sm:$0xff]  ;;  %v6475_v38 = vld [vmem:[#allocation2 + $0x2f0] ss:$8 sps:$4 sm:$0xff]  }
  0xd4   :  { %2912 = vmatpush1.bf16.msra.mxu0 %v5777_v41  ;;  %v6480_v41 = vld [vmem:[#allocation2 + $0x304] ss:$8 sps:$4 sm:$0xff]  }
  0xd5   :  { %981 = vmatpush1.bf16.msra.mxu1 %v6385_v44  ;;  %v5794_v44 = vcombine.high %v1181_v42, %v1189_v43 }
  0xd6   :  { %982 = vmatprep.subr.bf16.mxu1 %v6390_v45  ;;  %v6445_v45 = vld [vmem:[#allocation2 + $0x250] ss:$8 sps:$4 sm:$0xff]  }
  0xd7   :  { %2913 = vmatprep.subr.bf16.mxu0 %v5794_v44  ;;  %v6478_v44 = vld [vmem:[#allocation2 + $0x300] ss:$8 sps:$4 sm:$0xff]  }
  0xd9   :  { %983 = vmatpush1.bf16.msra.mxu1 %v6388_v46  ;;  %v6450_v46 = vld [vmem:[#allocation2 + $0x264] ss:$8 sps:$4 sm:$0xff]  }
  0xda   :  { %984 = vmatprep.subr.bf16.mxu1 %v6393_v47  ;;  %v5793_v47 = vcombine.low %v1181_v42, %v1189_v43  ;;  %v138_v42 = vld [vmem:[%s7475_s0 + $0x38] sm:$0xff] }
  0xdb   :  { %v146_v43 = vld [vmem:[%s7475_s0 + $0x78] sm:$0xff] }
  0xdc   :  { %2914 = vmatpush1.bf16.msra.mxu0 %v5793_v47  ;;  %v154_v47 = vpack.c.bf16 %v146_v43, %v138_v42  ;;  %v1225_v43 = vld [vmem:[#allocation6 + $0x380] sm:$0xff] }
  0xdd   :  { %985 = vmatpush1.bf16.msra.mxu1 %v6391_v48  ;;  %v1197_v48 = vld [vmem:[#allocation6 + $0x2a0] sm:$0xff] }
  0xde   :  { %986 = vmatprep.subr.bf16.mxu1 %v6396_v49  ;;  %v1205_v49 = vld [vmem:[#allocation6 + $0x2e0] sm:$0xff] }
  0xe1   :  { %987 = vmatpush1.bf16.msra.mxu1 %v6394_v50  ;;  %v5810_v50 = vcombine.high %v1197_v48, %v1205_v49 }
  0xe2   :  { %988 = vmatprep.subr.bf16.mxu1 %v6399_v51  ;;  %v6448_v51 = vld [vmem:[#allocation2 + $0x260] ss:$8 sps:$4 sm:$0xff]  }
  0xe3   :  { %2915 = vmatprep.subr.bf16.mxu0 %v5810_v50  ;;  %v6484_v50 = vld [vmem:[#allocation2 + $0x320] ss:$8 sps:$4 sm:$0xff]  }
  0xe5   :  { %989 = vmatpush1.bf16.msra.mxu1 %v6397_v52  ;;  %v6453_v52 = vld [vmem:[#allocation2 + $0x274] ss:$8 sps:$4 sm:$0xff]  }
  0xe6   :  { %990 = vmatprep.subr.bf16.mxu1 %v6402_v53  ;;  %v5809_v53 = vcombine.low %v1197_v48, %v1205_v49  ;;  %v6481_v48 = vld [vmem:[#allocation2 + $0x310] ss:$8 sps:$4 sm:$0xff]   ;;  %v6486_v49 = vld [vmem:[#allocation2 + $0x324] ss:$8 sps:$4 sm:$0xff]  }
  0xe8   :  { %2916 = vmatpush1.bf16.msra.mxu0 %v5809_v53  ;;  %v6492_v53 = vld [vmem:[#allocation2 + $0x344] ss:$8 sps:$4 sm:$0xff]  }
  0xe9   :  { %991 = vmatpush1.bf16.msra.mxu1 %v6400_v54  ;;  %v1213_v54 = vld [vmem:[#allocation6 + $0x320] sm:$0xff] }
  0xea   :  { %992 = vmatprep.subr.bf16.mxu1 %v6405_v55  ;;  %v1221_v55 = vld [vmem:[#allocation6 + $0x360] sm:$0xff] }
  0xed   :  { %993 = vmatpush1.bf16.msra.mxu1 %v6403_v56  ;;  %v5826_v56 = vcombine.high %v1213_v54, %v1221_v55 }
  0xee   :  { %994 = vmatprep.subr.bf16.mxu1 %v6408_v57  ;;  %v6451_v57 = vld [vmem:[#allocation2 + $0x270] ss:$8 sps:$4 sm:$0xff]  }
  0xef   :  { %2917 = vmatprep.subr.bf16.mxu0 %v5826_v56  ;;  %v6493_v56 = vld [vmem:[#allocation2 + $0x350] ss:$8 sps:$4 sm:$0xff]  }
  0xf1   :  { %995 = vmatpush1.bf16.msra.mxu1 %v6406_v58  ;;  %v6456_v58 = vld [vmem:[#allocation2 + $0x284] ss:$8 sps:$4 sm:$0xff]  }
  0xf2   :  { %996 = vmatprep.subr.bf16.mxu1 %v6411_v59  ;;  %v5825_v59 = vcombine.low %v1213_v54, %v1221_v55  ;;  %v6490_v54 = vld [vmem:[#allocation2 + $0x340] ss:$8 sps:$4 sm:$0xff]   ;;  %v6495_v55 = vld [vmem:[#allocation2 + $0x354] ss:$8 sps:$4 sm:$0xff]  }
  0xf4   :  { %2918 = vmatpush1.bf16.msra.mxu0 %v5825_v59  ;;  %v6501_v59 = vld [vmem:[#allocation2 + $0x374] ss:$8 sps:$4 sm:$0xff]  }
  0xf5   :  { %997 = vmatpush1.bf16.msra.mxu1 %v6409_v60  ;;  %v1229_v60 = vld [vmem:[#allocation6 + $0x3a0] sm:$0xff] }
  0xf6   :  { %998 = vmatprep.subr.bf16.mxu1 %v6414_v61  ;;  %v1237_v61 = vld [vmem:[#allocation6 + $0x3e0] sm:$0xff] }
  0xf9   :  { %999 = vmatpush1.bf16.msra.mxu1 %v6412_v62  ;;  %v5842_v62 = vcombine.high %v1229_v60, %v1237_v61 }
  0xfa   :  { %1000 = vmatprep.subr.bf16.mxu1 %v6417_v63  ;;  %v6454_v63 = vld [vmem:[#allocation2 + $0x280] ss:$8 sps:$4 sm:$0xff]  }
  0xfb   :  { %2919 = vmatprep.subr.bf16.mxu0 %v5842_v62  ;;  %v6502_v62 = vld [vmem:[#allocation2 + $0x380] ss:$8 sps:$4 sm:$0xff]  }
  0xfd   :  { %1001 = vmatpush1.bf16.msra.mxu1 %v6415_v0  ;;  %v6459_v0 = vld [vmem:[#allocation2 + $0x294] ss:$8 sps:$4 sm:$0xff]  }
  0xfe   :  { %1002 = vmatprep.subr.bf16.mxu1 %v6420_v1  ;;  %v5841_v1 = vcombine.low %v1229_v60, %v1237_v61  ;;  %v6499_v60 = vld [vmem:[#allocation2 + $0x370] ss:$8 sps:$4 sm:$0xff]   ;;  %v6504_v61 = vld [vmem:[#allocation2 + $0x384] ss:$8 sps:$4 sm:$0xff]  }
 0x100   :  { %2920 = vmatpush1.bf16.msra.mxu0 %v5841_v1  ;;  %v6510_v1 = vld [vmem:[#allocation2 + $0x3a4] ss:$8 sps:$4 sm:$0xff]  }
 0x101   :  { %1003 = vmatpush1.bf16.msra.mxu1 %v6418_v2  ;;  %v1245_v2 = vld [vmem:[#allocation6 + $0x420] sm:$0xff] }
 0x102   :  { %1004 = vmatprep.subr.bf16.mxu1 %v6423_v3  ;;  %v1253_v3 = vld [vmem:[#allocation6 + $0x460] sm:$0xff] }
 0x105   :  { %1005 = vmatpush1.bf16.msra.mxu1 %v6421_v4  ;;  %v5858_v4 = vcombine.high %v1245_v2, %v1253_v3 }
 0x106   :  { %1006 = vmatprep.subr.bf16.mxu1 %v6426_v5  ;;  %v6457_v5 = vld [vmem:[#allocation2 + $0x290] ss:$8 sps:$4 sm:$0xff]  }
 0x107   :  { %2921 = vmatprep.subr.bf16.mxu0 %v5858_v4  ;;  %v6511_v4 = vld [vmem:[#allocation2 + $0x3b0] ss:$8 sps:$4 sm:$0xff]  }
 0x109   :  { %1007 = vmatpush1.bf16.msra.mxu1 %v6424_v6  ;;  %v6462_v6 = vld [vmem:[#allocation2 + $0x2a4] ss:$8 sps:$4 sm:$0xff]  }
 0x10a   :  { %1008 = vmatprep.subr.bf16.mxu1 %v6429_v7  ;;  %v5857_v7 = vcombine.low %v1245_v2, %v1253_v3  ;;  %v6508_v2 = vld [vmem:[#allocation2 + $0x3a0] ss:$8 sps:$4 sm:$0xff]   ;;  %v6513_v3 = vld [vmem:[#allocation2 + $0x3b4] ss:$8 sps:$4 sm:$0xff]  }
 0x10c   :  { %2922 = vmatpush1.bf16.msra.mxu0 %v5857_v7  ;;  %v6519_v7 = vld [vmem:[#allocation2 + $0x3d4] ss:$8 sps:$4 sm:$0xff]  }
 0x10d   :  { %1009 = vmatpush1.bf16.msra.mxu1 %v6427_v8  ;;  %v1261_v8 = vld [vmem:[#allocation6 + $0x4a0] sm:$0xff] }
 0x10e   :  { %1021 = vmatprep.subr.bf16.mxu1 %v6432_v11  ;;  %v5874_v10 = vcombine.high %v1261_v8, %v1269_v9  ;;  %v6460_v11 = vld [vmem:[#allocation2 + $0x2a0] ss:$8 sps:$4 sm:$0xff]   ;;  %v5873_v13 = vcombine.low %v1261_v8, %v1269_v9  ;;  %v6517_v8 = vld [vmem:[#allocation2 + $0x3d0] ss:$8 sps:$4 sm:$0xff]   ;;  %v6522_v9 = vld [vmem:[#allocation2 + $0x3e4] ss:$8 sps:$4 sm:$0xff]  }
 0x110   :  { %1011 = vmatmul.mubr.bf16.vlgmr.msra.gmra.mrb[0].mxu1 %v149_v14  ;;  %2923 = vmatprep.subr.bf16.mxu0 %v5874_v10  ;;  %v1277_v14 = vld [vmem:[#allocation6 + $0x520] sm:$0xff] }
 0x111   :  { %1022 = vmatpush1.bf16.msra.mxu1 %v6430_v15  ;;  %1053 = vmatprep.mubr.bf16.mxu1 %v152_v17  ;;  %v1285_v15 = vld [vmem:[#allocation6 + $0x560] sm:$0xff]  ;;  %v6463_v17 = vld [vmem:[#allocation2 + $0x2b0] ss:$8 sps:$4 sm:$0xff]  }
 0x112   :  { %1023 = vmatprep.subr.bf16.mxu1 %v6435_v16  ;;  %v5890_v16 = vcombine.high %v1277_v14, %v1285_v15  ;;  %2924 = vmatpush1.bf16.msra.mxu0 %v5873_v13  ;;  %v6520_v10 = vld [vmem:[#allocation2 + $0x3e0] ss:$8 sps:$4 sm:$0xff]  }
 0x113   :  { %v1121_v13 = vld [vmem:[#allocation6 + $0x40] sm:$0xff] }
 0x114   :  { %2925 = vmatprep.subr.bf16.mxu0 %v5890_v16  ;;  %v145_v16 = vld [vmem:[%s7475_s0 + $0x70] sm:$0xff] }
 0x115   :  { %1024 = vmatpush1.bf16.msra.mxu1 %v6433_v19  ;;  %v5889_v19 = vcombine.low %v1277_v14, %v1285_v15  ;;  %v6523_v14 = vld [vmem:[#allocation2 + $0x3f0] ss:$8 sps:$4 sm:$0xff]  }
 0x116   :  { %1025 = vmatprep.subr.bf16.mxu1 %v6438_v20  ;;  %v1293_v20 = vld [vmem:[#allocation6 + $0x5a0] sm:$0xff]  ;;  %v137_v15 = vld [vmem:[%s7475_s0 + $0x30] sm:$0xff] }
 0x117   :  { %v5906_v22 = vcombine.high %v1293_v20, %v1301_v21  ;;  %2926 = vmatpush1.bf16.msra.mxu0 %v5889_v19  ;;  %v5905_v25 = vcombine.low %v1293_v20, %v1301_v21  ;;  %v1137_v19 = vld [vmem:[#allocation6 + $0xc0] sm:$0xff]  ;;  %v153_v20 = vpack.c.bf16 %v145_v16, %v137_v15 }
 0x118   :  { %v1353_v16 = vld [vmem:[#allocation6 + $0x780] sm:$0xff] }
 0x119   :  { %1026 = vmatpush1.bf16.msra.mxu1 %v6436_v27  ;;  %2927 = vmatprep.subr.bf16.mxu0 %v5906_v22  ;;  %v1317_v27 = vld [vmem:[#allocation6 + $0x660] sm:$0xff] }
 0x11a   :  { %1027 = vmatprep.subr.bf16.mxu1 %v6441_v28  ;;  %v5922_v28 = vcombine.high %v1309_v26, %v1317_v27  ;;  %v5921_v31 = vcombine.low %v1309_v26, %v1317_v27  ;;  %v1161_v27 = vld [vmem:[#allocation6 + $0x180] sm:$0xff] }
 0x11b   :  { %2928 = vmatpush1.bf16.msra.mxu0 %v5905_v25 }
 0x11c   :  { %2929 = vmatprep.subr.bf16.mxu0 %v5922_v28  ;;  %v1169_v28 = vld [vmem:[#allocation6 + $0x1c0] sm:$0xff] }
 0x11d   :  { %1028 = vmatpush1.bf16.msra.mxu1 %v6439_v33  ;;  %v1333_v33 = vld [vmem:[#allocation6 + $0x6e0] sm:$0xff] }
 0x11e   :  { %1029 = vmatprep.subr.bf16.mxu1 %v6444_v34  ;;  %v6472_v34 = vld [vmem:[#allocation2 + $0x2e0] ss:$8 sps:$4 sm:$0xff]   ;;  %v5938_v35 = vcombine.high %v1325_v32, %v1333_v33  ;;  %v5937_v37 = vcombine.low %v1325_v32, %v1333_v33  ;;  %v5769_v33 = vcombine.low %v1161_v27, %v1169_v28 }
 0x11f   :  { %2930 = vmatpush1.bf16.msra.mxu0 %v5921_v31  ;;  %v1177_v31 = vld [vmem:[#allocation6 + $0x200] sm:$0xff] }
 0x120   :  { %2931 = vmatprep.subr.bf16.mxu0 %v5938_v35  ;;  %v1185_v32 = vld [vmem:[#allocation6 + $0x240] sm:$0xff] }
 0x121   :  { %1030 = vmatpush1.bf16.msra.mxu1 %v6442_v39  ;;  %v135_v39 = vld [vmem:[%s7475_s0 + $0x20] sm:$0xff] }
 0x122   :  { %1031 = vmatprep.subr.bf16.mxu1 %v6447_v40  ;;  %v143_v40 = vld [vmem:[%s7475_s0 + $0x60] sm:$0xff] }
 0x123   :  { %2932 = vmatpush1.bf16.msra.mxu0 %v5937_v37  ;;  %v1193_v35 = vld [vmem:[#allocation6 + $0x280] sm:$0xff]  ;;  %v5785_v37 = vcombine.low %v1177_v31, %v1185_v32 }
 0x125   :  { %1032 = vmatpush1.bf16.msra.mxu1 %v6445_v45  ;;  %v151_v45 = vpack.c.bf16 %v143_v40, %v135_v39  ;;  %v1209_v39 = vld [vmem:[#allocation6 + $0x300] sm:$0xff] }
 0x126   :  { %1033 = vmatprep.subr.bf16.mxu1 %v6450_v46  ;;  %v6483_v46 = vld [vmem:[#allocation2 + $0x314] ss:$8 sps:$4 sm:$0xff]   ;;  %v1217_v40 = vld [vmem:[#allocation6 + $0x340] sm:$0xff] }
 0x127   :  { %v5818_v42 = vcombine.high %v1209_v39, %v1217_v40 }
 0x129   :  { %1034 = vmatpush1.bf16.msra.mxu1 %v6448_v51  ;;  %v6489_v51 = vld [vmem:[#allocation2 + $0x334] ss:$8 sps:$4 sm:$0xff]  }
 0x12a   :  { %1035 = vmatprep.subr.bf16.mxu1 %v6453_v52  ;;  %v6487_v52 = vld [vmem:[#allocation2 + $0x330] ss:$8 sps:$4 sm:$0xff]  }
 0x12d   :  { %1036 = vmatpush1.bf16.msra.mxu1 %v6451_v57  ;;  %v6498_v57 = vld [vmem:[#allocation2 + $0x364] ss:$8 sps:$4 sm:$0xff]  }
 0x12e   :  { %1037 = vmatprep.subr.bf16.mxu1 %v6456_v58  ;;  %v6496_v58 = vld [vmem:[#allocation2 + $0x360] ss:$8 sps:$4 sm:$0xff]  }
 0x131   :  { %1038 = vmatpush1.bf16.msra.mxu1 %v6454_v63  ;;  %v6507_v63 = vld [vmem:[#allocation2 + $0x394] ss:$8 sps:$4 sm:$0xff]  }
 0x132   :  { %1039 = vmatprep.subr.bf16.mxu1 %v6459_v0  ;;  %v6505_v0 = vld [vmem:[#allocation2 + $0x390] ss:$8 sps:$4 sm:$0xff]  }
 0x135   :  { %1040 = vmatpush1.bf16.msra.mxu1 %v6457_v5  ;;  %v6516_v5 = vld [vmem:[#allocation2 + $0x3c4] ss:$8 sps:$4 sm:$0xff]  }
 0x136   :  { %1041 = vmatprep.subr.bf16.mxu1 %v6462_v6  ;;  %v6514_v6 = vld [vmem:[#allocation2 + $0x3c0] ss:$8 sps:$4 sm:$0xff]  }
 0x139   :  { %1042 = vmatpush1.bf16.msra.mxu1 %v6460_v11  ;;  %v6525_v11 = vld [vmem:[#allocation2 + $0x3f4] ss:$8 sps:$4 sm:$0xff]  }
 0x13a   :  { %1043 = vmatprep.subr.bf16.mxu1 %v6465_v12  ;;  %v1113_v12 = vld [vmem:[#allocation6] sm:$0xff] }
 0x13b   :  { %v5721_v21 = vcombine.low %v1113_v12, %v1121_v13 }
 0x13d   :  { %1044 = vmatpush1.bf16.msra.mxu1 %v6463_v17  ;;  %v5722_v17 = vcombine.high %v1113_v12, %v1121_v13  ;;  %v1349_v12 = vld [vmem:[#allocation6 + $0x760] sm:$0xff] }
 0x13e   :  { %1045 = vmatprep.subr.bf16.mxu1 %v6468_v18  ;;  %v1129_v18 = vld [vmem:[#allocation6 + $0x80] sm:$0xff] }
 0x13f   :  { %v5738_v22 = vcombine.high %v1129_v18, %v1137_v19  ;;  %v5737_v25 = vcombine.low %v1129_v18, %v1137_v19  ;;  %v1357_v18 = vld [vmem:[#allocation6 + $0x7a0] sm:$0xff] }
 0x141   :  { %1046 = vmatpush1.bf16.msra.mxu1 %v6466_v23  ;;  %v1145_v23 = vld [vmem:[#allocation6 + $0x100] sm:$0xff] }
 0x142   :  { %1047 = vmatprep.subr.bf16.mxu1 %v6471_v24  ;;  %v1153_v24 = vld [vmem:[#allocation6 + $0x140] sm:$0xff] }
 0x143   :  { %v5754_v26 = vcombine.high %v1145_v23, %v1153_v24 }
 0x145   :  { %1048 = vmatpush1.bf16.msra.mxu1 %v6469_v29  ;;  %v5753_v29 = vcombine.low %v1145_v23, %v1153_v24  ;;  %v1114_v24 = vld [vmem:[#allocation6 + $0x8] sm:$0xff] }
 0x146   :  { %1049 = vmatprep.subr.bf16.mxu1 %v6474_v30  ;;  %v5770_v30 = vcombine.high %v1161_v27, %v1169_v28  ;;  %v1127_v28 = vld [vmem:[#allocation6 + $0x70] sm:$0xff] }
 0x149   :  { %1050 = vmatpush1.bf16.msra.mxu1 %v6472_v34  ;;  %v5786_v34 = vcombine.high %v1177_v31, %v1185_v32  ;;  %v285_v32 = vlaneseq }
 0x14a   :  { %1051 = vmatprep.subr.bf16.mxu1 %v6477_v36  ;;  %v1201_v36 = vld [vmem:[#allocation6 + $0x2c0] sm:$0xff] }
 0x14d   :  { %1052 = vmatpush1.bf16.msra.mxu1 %v6475_v38  ;;  %v5802_v38 = vcombine.high %v1193_v35, %v1201_v36 }
 0x14e   :  { %1064 = vmatprep.subr.bf16.mxu1 %v6480_v41  ;;  %v5801_v41 = vcombine.low %v1193_v35, %v1201_v36  ;;  %v283_v35 = vld [vmem:[#allocation4] sm:$0x3] }
 0x150   :  { %1054 = vmatmul.mubr.bf16.vlgmr.msra.gmra.mrb[0].mxu1 %v151_v45  ;;  %v5817_v45 = vcombine.low %v1209_v39, %v1217_v40 }
 0x151   :  { %1065 = vmatpush1.bf16.msra.mxu1 %v6478_v44  ;;  %1096 = vmatprep.mubr.bf16.mxu1 %v154_v47  ;;  %v1233_v44 = vld [vmem:[#allocation6 + $0x3c0] sm:$0xff] }
 0x152   :  { %1066 = vmatprep.subr.bf16.mxu1 %v6483_v46  ;;  %v5834_v46 = vcombine.high %v1225_v43, %v1233_v44  ;;  %v1241_v47 = vld [vmem:[#allocation6 + $0x400] sm:$0xff] }
 0x155   :  { %1067 = vmatpush1.bf16.msra.mxu1 %v6481_v48  ;;  %v1249_v48 = vld [vmem:[#allocation6 + $0x440] sm:$0xff] }
 0x156   :  { %1068 = vmatprep.subr.bf16.mxu1 %v6486_v49  ;;  %v5833_v49 = vcombine.low %v1225_v43, %v1233_v44 }
 0x159   :  { %1069 = vmatpush1.bf16.msra.mxu1 %v6484_v50  ;;  %v5850_v50 = vcombine.high %v1241_v47, %v1249_v48 }
 0x15a   :  { %1070 = vmatprep.subr.bf16.mxu1 %v6489_v51  ;;  %v1257_v51 = vld [vmem:[#allocation6 + $0x480] sm:$0xff] }
 0x15d   :  { %1071 = vmatpush1.bf16.msra.mxu1 %v6487_v52  ;;  %v1265_v52 = vld [vmem:[#allocation6 + $0x4c0] sm:$0xff] }
 0x15e   :  { %1072 = vmatprep.subr.bf16.mxu1 %v6492_v53  ;;  %v5849_v53 = vcombine.low %v1241_v47, %v1249_v48 }
 0x161   :  { %1073 = vmatpush1.bf16.msra.mxu1 %v6490_v54  ;;  %v5866_v54 = vcombine.high %v1257_v51, %v1265_v52 }
 0x162   :  { %1074 = vmatprep.subr.bf16.mxu1 %v6495_v55  ;;  %v1273_v55 = vld [vmem:[#allocation6 + $0x500] sm:$0xff] }
 0x165   :  { %1075 = vmatpush1.bf16.msra.mxu1 %v6493_v56  ;;  %v1281_v56 = vld [vmem:[#allocation6 + $0x540] sm:$0xff] }
 0x166   :  { %1076 = vmatprep.subr.bf16.mxu1 %v6498_v57  ;;  %v5865_v57 = vcombine.low %v1257_v51, %v1265_v52  ;;  %v1130_v51 = vld [vmem:[#allocation6 + $0x88] sm:$0xff] }
 0x169   :  { %1077 = vmatpush1.bf16.msra.mxu1 %v6496_v58  ;;  %v5882_v58 = vcombine.high %v1273_v55, %v1281_v56 }
 0x16a   :  { %1078 = vmatprep.subr.bf16.mxu1 %v6501_v59  ;;  %v1289_v59 = vld [vmem:[#allocation6 + $0x580] sm:$0xff] }
 0x16d   :  { %1079 = vmatpush1.bf16.msra.mxu1 %v6499_v60  ;;  %v1297_v60 = vld [vmem:[#allocation6 + $0x5c0] sm:$0xff] }
 0x16e   :  { %1080 = vmatprep.subr.bf16.mxu1 %v6504_v61  ;;  %v5881_v61 = vcombine.low %v1273_v55, %v1281_v56  ;;  %v1143_v55 = vld [vmem:[#allocation6 + $0xf0] sm:$0xff] }
 0x171   :  { %1081 = vmatpush1.bf16.msra.mxu1 %v6502_v62  ;;  %v5898_v62 = vcombine.high %v1289_v59, %v1297_v60 }
 0x172   :  { %1082 = vmatprep.subr.bf16.mxu1 %v6507_v63  ;;  %v1305_v63 = vld [vmem:[#allocation6 + $0x600] sm:$0xff] }
 0x175   :  { %1083 = vmatpush1.bf16.msra.mxu1 %v6505_v0  ;;  %v1313_v0 = vld [vmem:[#allocation6 + $0x640] sm:$0xff] }
 0x176   :  { %1084 = vmatprep.subr.bf16.mxu1 %v6510_v1  ;;  %v5897_v1 = vcombine.low %v1289_v59, %v1297_v60  ;;  %v1154_v60 = vld [vmem:[#allocation6 + $0x148] sm:$0xff] }
 0x179   :  { %1085 = vmatpush1.bf16.msra.mxu1 %v6508_v2  ;;  %v5914_v2 = vcombine.high %v1305_v63, %v1313_v0 }
 0x17a   :  { %1086 = vmatprep.subr.bf16.mxu1 %v6513_v3  ;;  %v1321_v3 = vld [vmem:[#allocation6 + $0x680] sm:$0xff] }
 0x17d   :  { %1087 = vmatpush1.bf16.msra.mxu1 %v6511_v4  ;;  %v1329_v4 = vld [vmem:[#allocation6 + $0x6c0] sm:$0xff] }
 0x17e   :  { %1088 = vmatprep.subr.bf16.mxu1 %v6516_v5  ;;  %v5913_v5 = vcombine.low %v1305_v63, %v1313_v0 }
 0x181   :  { %1089 = vmatpush1.bf16.msra.mxu1 %v6514_v6  ;;  %v5930_v6 = vcombine.high %v1321_v3, %v1329_v4 }
 0x182   :  { %1090 = vmatprep.subr.bf16.mxu1 %v6519_v7  ;;  %v5929_v7 = vcombine.low %v1321_v3, %v1329_v4  ;;  %v1162_v3 = vld [vmem:[#allocation6 + $0x188] sm:$0xff] }
 0x183   :  { %v1170_v4 = vld [vmem:[#allocation6 + $0x1c8] sm:$0xff] }
 0x185   :  { %1091 = vmatpush1.bf16.msra.mxu1 %v6517_v8  ;;  %v1337_v8 = vld [vmem:[#allocation6 + $0x700] sm:$0xff] }
 0x186   :  { %1092 = vmatprep.subr.bf16.mxu1 %v6522_v9  ;;  %v1345_v9 = vld [vmem:[#allocation6 + $0x740] sm:$0xff] }
 0x187   :  { %v5945_v13 = vcombine.low %v1337_v8, %v1345_v9 }
 0x189   :  { %1093 = vmatpush1.bf16.msra.mxu1 %v6520_v10  ;;  %v1341_v10 = vld [vmem:[#allocation6 + $0x720] sm:$0xff] }
 0x18a   :  { %1094 = vmatprep.subr.bf16.mxu1 %v6525_v11  ;;  %v5946_v11 = vcombine.high %v1337_v8, %v1345_v9  ;;  %v5953_v15 = vcombine.low %v1341_v10, %v1349_v12  ;;  %v5772_v9 = vcombine.high %v1162_v3, %v1170_v4 }
 0x18d   :  { %1095 = vmatpush1.bf16.msra.mxu1 %v6523_v14  ;;  %v5954_v14 = vcombine.high %v1341_v10, %v1349_v12  ;;  %v1186_v12 = vld [vmem:[#allocation6 + $0x248] sm:$0xff] }
 0x18e   :  { %2733 = vmatprep.subr.bf16.mxu1 %v5722_v17  ;;  %v1361_v17 = vld [vmem:[#allocation6 + $0x7c0] sm:$0xff] }
 0x18f   :  { %2933 = vmatprep.subr.bf16.mxu0 %v5954_v14  ;;  %v5962_v19 = vcombine.high %v1353_v16, %v1361_v17  ;;  %v1191_v14 = vld [vmem:[#allocation6 + $0x270] sm:$0xff] }
 0x190   :  { %1097 = vmatmul.mubr.bf16.vlgmr.msra.gmra.mrb[0].mxu1 %v153_v20  ;;  %2934 = vmatpush1.bf16.msra.mxu0 %v5953_v15  ;;  %v1365_v20 = vld [vmem:[#allocation6 + $0x7e0] sm:$0xff]  ;;  %v5771_v15 = vcombine.low %v1162_v3, %v1170_v4  ;;  %v1287_v3 = vld [vmem:[#allocation6 + $0x570] sm:$0xff] }
 0x191   :  { %2734 = vmatpush1.bf16.msra.mxu1 %v5721_v21  ;;  %v5961_v21 = vcombine.low %v1353_v16, %v1361_v17  ;;  %v5969_v23 = vcombine.low %v1357_v18, %v1365_v20 }
 0x192   :  { %2735 = vmatprep.subr.bf16.mxu1 %v5738_v22  ;;  %v5970_v22 = vcombine.high %v1357_v18, %v1365_v20  ;;  %v1202_v20 = vld [vmem:[#allocation6 + $0x2c8] sm:$0xff] }
 0x194   :  { %2935 = vmatprep.subr.bf16.mxu0 %v5970_v22  ;;  %v1207_v22 = vld [vmem:[#allocation6 + $0x2f0] sm:$0xff] }
 0x195   :  { %2736 = vmatpush1.bf16.msra.mxu1 %v5737_v25  ;;  %v1122_v25 = vld [vmem:[#allocation6 + $0x48] sm:$0xff]  ;;  %2936 = vmatpush1.bf16.msra.mxu0 %v5969_v23 }
 0x196   :  { %2737 = vmatprep.subr.bf16.mxu1 %v5754_v26  ;;  %v1119_v26 = vld [vmem:[#allocation6 + $0x30] sm:$0xff]  ;;  %v5724_v27 = vcombine.high %v1114_v24, %v1122_v25 }
 0x197   :  { %v5734_v31 = vcombine.high %v1119_v26, %v1127_v28 }
 0x199   :  { %2738 = vmatpush1.bf16.msra.mxu1 %v5753_v29  ;;  %v5723_v29 = vcombine.low %v1114_v24, %v1122_v25  ;;  %2991 = vmatprep.subr.bf16.mxu0 %v5734_v31 }
 0x19a   :  { %2739 = vmatprep.subr.bf16.mxu1 %v5770_v30  ;;  %v5733_v30 = vcombine.low %v1119_v26, %v1127_v28  ;;  %v1218_v28 = vld [vmem:[#allocation6 + $0x348] sm:$0xff] }
 0x19d   :  { %2740 = vmatpush1.bf16.msra.mxu1 %v5769_v33  ;;  %v7317_v33 = vshrl.u32 %v285_v32, 7 }
 0x19e   :  { %2741 = vmatprep.subr.bf16.mxu1 %v5786_v34 }
 0x19f   :  { %v7320_v34 = vsub.s32 0, %v7317_v33  ;;  %v7323_v36 = vsub.s32 1, %v7317_v33 }
 0x1a1   :  { %2742 = vmatpush1.bf16.msra.mxu1 %v5785_v37  ;;  %v288_v37 = vrot.slane %v283_v35, %v7320_v34 }
 0x1a2   :  { %2743 = vmatprep.subr.bf16.mxu1 %v5802_v38  ;;  %v292_v38 = vrot.slane %v283_v35, %v7323_v36 }
 0x1a5   :  { %2744 = vmatpush1.bf16.msra.mxu1 %v5801_v41 }
 0x1a6   :  { %2745 = vmatprep.subr.bf16.mxu1 %v5818_v42 }
 0x1a9   :  { %2746 = vmatpush1.bf16.msra.mxu1 %v5817_v45 }
 0x1aa   :  { %2747 = vmatprep.subr.bf16.mxu1 %v5834_v46 }
 0x1ad   :  { %2748 = vmatpush1.bf16.msra.mxu1 %v5833_v49 }
 0x1ae   :  { %2749 = vmatprep.subr.bf16.mxu1 %v5850_v50 }
 0x1b1   :  { %2750 = vmatpush1.bf16.msra.mxu1 %v5849_v53  ;;  %v1138_v53 = vld [vmem:[#allocation6 + $0xc8] sm:$0xff] }
 0x1b2   :  { %2751 = vmatprep.subr.bf16.mxu1 %v5866_v54  ;;  %v1135_v54 = vld [vmem:[#allocation6 + $0xb0] sm:$0xff]  ;;  %v5739_v63 = vcombine.low %v1130_v51, %v1138_v53 }
 0x1b3   :  { %v5750_v59 = vcombine.high %v1135_v54, %v1143_v55  ;;  %v5749_v0 = vcombine.low %v1135_v54, %v1143_v55  ;;  %v1258_v55 = vld [vmem:[#allocation6 + $0x488] sm:$0xff] }
 0x1b5   :  { %2752 = vmatpush1.bf16.msra.mxu1 %v5865_v57  ;;  %v1146_v57 = vld [vmem:[#allocation6 + $0x108] sm:$0xff] }
 0x1b6   :  { %2753 = vmatprep.subr.bf16.mxu1 %v5882_v58  ;;  %v5740_v58 = vcombine.high %v1130_v51, %v1138_v53 }
 0x1b9   :  { %2754 = vmatpush1.bf16.msra.mxu1 %v5881_v61  ;;  %v1151_v61 = vld [vmem:[#allocation6 + $0x130] sm:$0xff] }
 0x1ba   :  { %2755 = vmatprep.subr.bf16.mxu1 %v5898_v62  ;;  %v1159_v62 = vld [vmem:[#allocation6 + $0x170] sm:$0xff] }
 0x1bb   :  { %v5765_v8 = vcombine.low %v1151_v61, %v1159_v62 }
 0x1bd   :  { %2756 = vmatpush1.bf16.msra.mxu1 %v5897_v1  ;;  %v5756_v1 = vcombine.high %v1146_v57, %v1154_v60 }
 0x1be   :  { %2757 = vmatprep.subr.bf16.mxu1 %v5914_v2  ;;  %v5766_v2 = vcombine.high %v1151_v61, %v1159_v62 }
 0x1c1   :  { %2758 = vmatpush1.bf16.msra.mxu1 %v5913_v5  ;;  %v1167_v5 = vld [vmem:[#allocation6 + $0x1b0] sm:$0xff] }
 0x1c2   :  { %2759 = vmatprep.subr.bf16.mxu1 %v5930_v6  ;;  %v1175_v6 = vld [vmem:[#allocation6 + $0x1f0] sm:$0xff] }
 0x1c3   :  { %v5782_v10 = vcombine.high %v1167_v5, %v1175_v6  ;;  %v5781_v16 = vcombine.low %v1167_v5, %v1175_v6 }
 0x1c5   :  { %2760 = vmatpush1.bf16.msra.mxu1 %v5929_v7  ;;  %v5755_v7 = vcombine.low %v1146_v57, %v1154_v60  ;;  %v1266_v57 = vld [vmem:[#allocation6 + $0x4c8] sm:$0xff] }
 0x1c6   :  { %2761 = vmatprep.subr.bf16.mxu1 %v5946_v11  ;;  %v1178_v11 = vld [vmem:[#allocation6 + $0x208] sm:$0xff]  ;;  %v5868_v62 = vcombine.high %v1258_v55, %v1266_v57  ;;  %v5867_v4 = vcombine.low %v1258_v55, %v1266_v57 }
 0x1c7   :  { %v5788_v17 = vcombine.high %v1178_v11, %v1186_v12  ;;  %v5787_v23 = vcombine.low %v1178_v11, %v1186_v12  ;;  %v1303_v11 = vld [vmem:[#allocation6 + $0x5f0] sm:$0xff] }
 0x1c9   :  { %2762 = vmatpush1.bf16.msra.mxu1 %v5945_v13  ;;  %v1183_v13 = vld [vmem:[#allocation6 + $0x230] sm:$0xff] }
 0x1ca   :  { %2763 = vmatprep.subr.bf16.mxu1 %v5962_v19  ;;  %v5798_v18 = vcombine.high %v1183_v13, %v1191_v14  ;;  %v1194_v19 = vld [vmem:[#allocation6 + $0x288] sm:$0xff]  ;;  %v5797_v24 = vcombine.low %v1183_v13, %v1191_v14 }
 0x1cb   :  { %v5804_v25 = vcombine.high %v1194_v19, %v1202_v20  ;;  %v5803_v31 = vcombine.low %v1194_v19, %v1202_v20  ;;  %v1319_v19 = vld [vmem:[#allocation6 + $0x670] sm:$0xff] }
 0x1cd   :  { %2764 = vmatpush1.bf16.msra.mxu1 %v5961_v21  ;;  %v1199_v21 = vld [vmem:[#allocation6 + $0x2b0] sm:$0xff] }
 0x1ce   :  { %2776 = vmatprep.subr.bf16.mxu1 %v5724_v27  ;;  %v5814_v26 = vcombine.high %v1199_v21, %v1207_v22  ;;  %v1210_v27 = vld [vmem:[#allocation6 + $0x308] sm:$0xff]  ;;  %v5813_v32 = vcombine.low %v1199_v21, %v1207_v22 }
 0x1cf   :  { %v5820_v35 = vcombine.high %v1210_v27, %v1218_v28 }
 0x263   :  { %v1098_v39 = vpop.f32.mrb[0].mxu1 }
 0x264   :  { %v6273_v40 = vadd.f32 %v1098_v39, %v288_v37  ;;  %v1100_v41 = vpop.f32.mrb[1].mxu1  ;;  %v1234_v39 = vld [vmem:[#allocation6 + $0x3c8] sm:$0xff] }
 0x265   :  { %v6274_v42 = vadd.f32 %v1100_v41, %v292_v38  ;;  %v1102_v43 = vpop.f32.mrb[2].mxu1  ;;  %v1239_v41 = vld [vmem:[#allocation6 + $0x3f0] sm:$0xff] }
 0x266   :  { %v6275_v44 = vadd.f32 %v1102_v43, %v288_v37  ;;  %v1104_v45 = vpop.f32.mrb[3].mxu1  ;;  %v1107_v47 = vmax.f32 %v6273_v40, 0.0  ;;  %v1231_v40 = vld [vmem:[#allocation6 + $0x3b0] sm:$0xff] }
 0x267   :  { %v6276_v46 = vadd.f32 %v1104_v45, %v292_v38  ;;  %v1108_v49 = vmax.f32 %v6274_v42, 0.0  ;;  %v1226_v38 = vld [vmem:[#allocation6 + $0x388] sm:$0xff]  ;;  %v5819_v42 = vcombine.low %v1210_v27, %v1218_v28  ;;  %v5846_v45 = vcombine.high %v1231_v40, %v1239_v41  ;;  %v1335_v27 = vld [vmem:[#allocation6 + $0x6f0] sm:$0xff] }
 0x268   :  { %v1109_v48 = vmax.f32 %v6275_v44, 0.0  ;;  %v5836_v44 = vcombine.high %v1226_v38, %v1234_v39  ;;  %v5845_v51 = vcombine.low %v1231_v40, %v1239_v41 }
 0x269   :  { %v1110_v50 = vmax.f32 %v6276_v46, 0.0  ;;  %v1242_v46 = vld [vmem:[#allocation6 + $0x408] sm:$0xff] }
 0x26a   :  { %v7327_v52 = vpack.c.bf16 %v1109_v48, %v1107_v47  ;;  %v1250_v47 = vld [vmem:[#allocation6 + $0x448] sm:$0xff]  ;;  %v1247_v48 = vld [vmem:[#allocation6 + $0x430] sm:$0xff] }
 0x26b   :  { %v7329_v56 = vpack.c.bf16 %v1110_v50, %v1108_v49  ;;  %v1255_v49 = vld [vmem:[#allocation6 + $0x470] sm:$0xff]  ;;  %v5835_v50 = vcombine.low %v1226_v38, %v1234_v39  ;;  %v5852_v53 = vcombine.high %v1242_v46, %v1250_v47  ;;  %v5851_v60 = vcombine.low %v1242_v46, %v1250_v47 }
 0x26c   :  { %v5862_v54 = vcombine.high %v1247_v48, %v1255_v49  ;;  %v5861_v61 = vcombine.low %v1247_v48, %v1255_v49  ;;  %v1351_v38 = vld [vmem:[#allocation6 + $0x770] sm:$0xff] }
 0x26d   :  { %2765 = vmatprep.mubr.bf16.mxu1 %v7329_v56  ;;  %2937 = vmatprep.mubr.bf16.mxu0 %v7329_v56  ;;  %v1367_v46 = vld [vmem:[#allocation6 + $0x7f0] sm:$0xff] }
 0x26e   :  { %2766 = vmatmul.mubr.bf16.vlgmr.msra.gmra.mrb[4].mxu1 %v7327_v52  ;;  %2938 = vmatmul.mubr.bf16.vlgmr.msra.gmra.mrb[0].mxu0 %v7327_v52 }
 0x26f   :  { %2777 = vmatpush1.bf16.msra.mxu1 %v5723_v29  ;;  %2992 = vmatpush1.bf16.msra.mxu0 %v5733_v30  ;;  %v1215_v29 = vld [vmem:[#allocation6 + $0x330] sm:$0xff] }
 0x270   :  { %2808 = vmatprep.mubr.bf16.mxu1 %v7329_v56  ;;  %3023 = vmatprep.mubr.bf16.mxu0 %v7329_v56  ;;  %v1223_v30 = vld [vmem:[#allocation6 + $0x370] sm:$0xff] }
 0x271   :  { %2778 = vmatprep.subr.bf16.mxu1 %v5740_v58  ;;  %2993 = vmatprep.subr.bf16.mxu0 %v5750_v59  ;;  %v5830_v37 = vcombine.high %v1215_v29, %v1223_v30  ;;  %v5829_v43 = vcombine.low %v1215_v29, %v1223_v30  ;;  %v1263_v58 = vld [vmem:[#allocation6 + $0x4b0] sm:$0xff] }
 0x272   :  { %v1271_v59 = vld [vmem:[#allocation6 + $0x4f0] sm:$0xff] }
 0x273   :  { %2779 = vmatpush1.bf16.msra.mxu1 %v5739_v63  ;;  %2994 = vmatpush1.bf16.msra.mxu0 %v5749_v0  ;;  %v5878_v63 = vcombine.high %v1263_v58, %v1271_v59  ;;  %v1274_v0 = vld [vmem:[#allocation6 + $0x508] sm:$0xff]  ;;  %v5877_v5 = vcombine.low %v1263_v58, %v1271_v59  ;;  %v1131_v58 = vld [vmem:[#allocation6 + $0x90] sm:$0xff] }
 0x274   :  { %2780 = vmatprep.subr.bf16.mxu1 %v5756_v1  ;;  %2995 = vmatprep.subr.bf16.mxu0 %v5766_v2  ;;  %v1282_v1 = vld [vmem:[#allocation6 + $0x548] sm:$0xff]  ;;  %v1279_v2 = vld [vmem:[#allocation6 + $0x530] sm:$0xff] }
 0x275   :  { %v5884_v6 = vcombine.high %v1274_v0, %v1282_v1  ;;  %v5883_v12 = vcombine.low %v1274_v0, %v1282_v1  ;;  %v5893_v13 = vcombine.low %v1279_v2, %v1287_v3  ;;  %v1139_v59 = vld [vmem:[#allocation6 + $0xd0] sm:$0xff] }
 0x276   :  { %v5741_v0 = vcombine.low %v1131_v58, %v1139_v59 }
 0x277   :  { %2781 = vmatpush1.bf16.msra.mxu1 %v5755_v7  ;;  %2996 = vmatpush1.bf16.msra.mxu0 %v5765_v8  ;;  %v5894_v7 = vcombine.high %v1279_v2, %v1287_v3  ;;  %v1290_v8 = vld [vmem:[#allocation6 + $0x588] sm:$0xff]  ;;  %v1163_v2 = vld [vmem:[#allocation6 + $0x190] sm:$0xff] }
 0x278   :  { %2782 = vmatprep.subr.bf16.mxu1 %v5772_v9  ;;  %2997 = vmatprep.subr.bf16.mxu0 %v5782_v10  ;;  %v1298_v9 = vld [vmem:[#allocation6 + $0x5c8] sm:$0xff]  ;;  %v1295_v10 = vld [vmem:[#allocation6 + $0x5b0] sm:$0xff] }
 0x279   :  { %v5900_v14 = vcombine.high %v1290_v8, %v1298_v9  ;;  %v5899_v20 = vcombine.low %v1290_v8, %v1298_v9  ;;  %v5909_v21 = vcombine.low %v1295_v10, %v1303_v11  ;;  %v1171_v3 = vld [vmem:[#allocation6 + $0x1d0] sm:$0xff] }
 0x27a   :  { %v5773_v8 = vcombine.low %v1163_v2, %v1171_v3 }
 0x27b   :  { %2783 = vmatpush1.bf16.msra.mxu1 %v5771_v15  ;;  %2998 = vmatpush1.bf16.msra.mxu0 %v5781_v16  ;;  %v5910_v15 = vcombine.high %v1295_v10, %v1303_v11  ;;  %v1306_v16 = vld [vmem:[#allocation6 + $0x608] sm:$0xff]  ;;  %v1195_v10 = vld [vmem:[#allocation6 + $0x290] sm:$0xff] }
 0x27c   :  { %2784 = vmatprep.subr.bf16.mxu1 %v5788_v17  ;;  %2999 = vmatprep.subr.bf16.mxu0 %v5798_v18  ;;  %v1314_v17 = vld [vmem:[#allocation6 + $0x648] sm:$0xff]  ;;  %v1311_v18 = vld [vmem:[#allocation6 + $0x630] sm:$0xff] }
 0x27d   :  { %v5916_v22 = vcombine.high %v1306_v16, %v1314_v17  ;;  %v5915_v28 = vcombine.low %v1306_v16, %v1314_v17  ;;  %v5925_v29 = vcombine.low %v1311_v18, %v1319_v19  ;;  %v1203_v11 = vld [vmem:[#allocation6 + $0x2d0] sm:$0xff] }
 0x27e   :  { %v5805_v16 = vcombine.low %v1195_v10, %v1203_v11 }
 0x27f   :  { %2785 = vmatpush1.bf16.msra.mxu1 %v5787_v23  ;;  %3000 = vmatpush1.bf16.msra.mxu0 %v5797_v24  ;;  %v5926_v23 = vcombine.high %v1311_v18, %v1319_v19  ;;  %v1322_v24 = vld [vmem:[#allocation6 + $0x688] sm:$0xff]  ;;  %v1227_v18 = vld [vmem:[#allocation6 + $0x390] sm:$0xff] }
 0x280   :  { %2786 = vmatprep.subr.bf16.mxu1 %v5804_v25  ;;  %3001 = vmatprep.subr.bf16.mxu0 %v5814_v26  ;;  %v1330_v25 = vld [vmem:[#allocation6 + $0x6c8] sm:$0xff]  ;;  %v1327_v26 = vld [vmem:[#allocation6 + $0x6b0] sm:$0xff] }
 0x281   :  { %v5932_v30 = vcombine.high %v1322_v24, %v1330_v25  ;;  %v5931_v39 = vcombine.low %v1322_v24, %v1330_v25  ;;  %v5941_v40 = vcombine.low %v1327_v26, %v1335_v27  ;;  %v1235_v19 = vld [vmem:[#allocation6 + $0x3d0] sm:$0xff] }
 0x282   :  { %v5837_v24 = vcombine.low %v1227_v18, %v1235_v19 }
 0x283   :  { %2787 = vmatpush1.bf16.msra.mxu1 %v5803_v31  ;;  %3002 = vmatpush1.bf16.msra.mxu0 %v5813_v32  ;;  %v5942_v31 = vcombine.high %v1327_v26, %v1335_v27  ;;  %v1338_v32 = vld [vmem:[#allocation6 + $0x708] sm:$0xff]  ;;  %v1259_v26 = vld [vmem:[#allocation6 + $0x490] sm:$0xff] }
 0x284   :  { %2788 = vmatprep.subr.bf16.mxu1 %v5820_v35  ;;  %3003 = vmatprep.subr.bf16.mxu0 %v5830_v37  ;;  %v1346_v35 = vld [vmem:[#allocation6 + $0x748] sm:$0xff]  ;;  %v1343_v37 = vld [vmem:[#allocation6 + $0x730] sm:$0xff] }
 0x285   :  { %v5948_v41 = vcombine.high %v1338_v32, %v1346_v35  ;;  %v5947_v47 = vcombine.low %v1338_v32, %v1346_v35  ;;  %v5957_v48 = vcombine.low %v1343_v37, %v1351_v38  ;;  %v1267_v27 = vld [vmem:[#allocation6 + $0x4d0] sm:$0xff] }
 0x286   :  { %v5869_v32 = vcombine.low %v1259_v26, %v1267_v27 }
 0x287   :  { %2789 = vmatpush1.bf16.msra.mxu1 %v5819_v42  ;;  %3004 = vmatpush1.bf16.msra.mxu0 %v5829_v43  ;;  %v5958_v42 = vcombine.high %v1343_v37, %v1351_v38  ;;  %v1354_v43 = vld [vmem:[#allocation6 + $0x788] sm:$0xff]  ;;  %v1291_v37 = vld [vmem:[#allocation6 + $0x590] sm:$0xff] }
 0x288   :  { %2790 = vmatprep.subr.bf16.mxu1 %v5836_v44  ;;  %3005 = vmatprep.subr.bf16.mxu0 %v5846_v45  ;;  %v1362_v44 = vld [vmem:[#allocation6 + $0x7c8] sm:$0xff]  ;;  %v1359_v45 = vld [vmem:[#allocation6 + $0x7b0] sm:$0xff] }
 0x289   :  { %v5964_v49 = vcombine.high %v1354_v43, %v1362_v44  ;;  %v5973_v55 = vcombine.low %v1359_v45, %v1367_v46  ;;  %v1299_v38 = vld [vmem:[#allocation6 + $0x5d0] sm:$0xff] }
 0x28b   :  { %2791 = vmatpush1.bf16.msra.mxu1 %v5835_v50  ;;  %3006 = vmatpush1.bf16.msra.mxu0 %v5845_v51  ;;  %v5974_v50 = vcombine.high %v1359_v45, %v1367_v46  ;;  %v1115_v51 = vld [vmem:[#allocation6 + $0x10] sm:$0xff] }
 0x28c   :  { %2792 = vmatprep.subr.bf16.mxu1 %v5852_v53  ;;  %3007 = vmatprep.subr.bf16.mxu0 %v5862_v54  ;;  %v1123_v53 = vld [vmem:[#allocation6 + $0x50] sm:$0xff]  ;;  %v5963_v54 = vcombine.low %v1354_v43, %v1362_v44  ;;  %v5901_v43 = vcombine.low %v1291_v37, %v1299_v38 }
 0x28d   :  { %v5726_v57 = vcombine.high %v1115_v51, %v1123_v53  ;;  %v1323_v45 = vld [vmem:[#allocation6 + $0x690] sm:$0xff] }
 0x28e   :  { %v1331_v46 = vld [vmem:[#allocation6 + $0x6d0] sm:$0xff] }
 0x28f   :  { %2793 = vmatpush1.bf16.msra.mxu1 %v5851_v60  ;;  %3008 = vmatpush1.bf16.msra.mxu0 %v5861_v61  ;;  %v5725_v60 = vcombine.low %v1115_v51, %v1123_v53  ;;  %v5742_v61 = vcombine.high %v1131_v58, %v1139_v59  ;;  %v5933_v51 = vcombine.low %v1323_v45, %v1331_v46  ;;  %v1116_v59 = vld [vmem:[#allocation6 + $0x18] sm:$0xff] }
 0x290   :  { %2794 = vmatprep.subr.bf16.mxu1 %v5868_v62  ;;  %3009 = vmatprep.subr.bf16.mxu0 %v5878_v63  ;;  %v1147_v62 = vld [vmem:[#allocation6 + $0x110] sm:$0xff] }
 0x291   :  { %v1155_v63 = vld [vmem:[#allocation6 + $0x150] sm:$0xff] }
 0x292   :  { %v5758_v1 = vcombine.high %v1147_v62, %v1155_v63 }
 0x293   :  { %2795 = vmatpush1.bf16.msra.mxu1 %v5867_v4  ;;  %3010 = vmatpush1.bf16.msra.mxu0 %v5877_v5  ;;  %v5757_v4 = vcombine.low %v1147_v62, %v1155_v63  ;;  %v5774_v5 = vcombine.high %v1163_v2, %v1171_v3  ;;  %v1132_v63 = vld [vmem:[#allocation6 + $0x98] sm:$0xff] }
 0x294   :  { %2796 = vmatprep.subr.bf16.mxu1 %v5884_v6  ;;  %3011 = vmatprep.subr.bf16.mxu0 %v5894_v7  ;;  %v1179_v6 = vld [vmem:[#allocation6 + $0x210] sm:$0xff]  ;;  %v1148_v3 = vld [vmem:[#allocation6 + $0x118] sm:$0xff] }
 0x295   :  { %v1187_v7 = vld [vmem:[#allocation6 + $0x250] sm:$0xff] }
 0x296   :  { %v5790_v9 = vcombine.high %v1179_v6, %v1187_v7 }
 0x297   :  { %2797 = vmatpush1.bf16.msra.mxu1 %v5883_v12  ;;  %3012 = vmatpush1.bf16.msra.mxu0 %v5893_v13  ;;  %v5789_v12 = vcombine.low %v1179_v6, %v1187_v7  ;;  %v5806_v13 = vcombine.high %v1195_v10, %v1203_v11  ;;  %v1164_v7 = vld [vmem:[#allocation6 + $0x198] sm:$0xff]  ;;  %v7108_v10 = vmov 0.0  }
 0x298   :  { %2798 = vmatprep.subr.bf16.mxu1 %v5900_v14  ;;  %3013 = vmatprep.subr.bf16.mxu0 %v5910_v15  ;;  %v1211_v14 = vld [vmem:[#allocation6 + $0x310] sm:$0xff] }
 0x299   :  { %v1219_v15 = vld [vmem:[#allocation6 + $0x350] sm:$0xff] }
 0x29a   :  { %v5822_v17 = vcombine.high %v1211_v14, %v1219_v15 }
 0x29b   :  { %2799 = vmatpush1.bf16.msra.mxu1 %v5899_v20  ;;  %3014 = vmatpush1.bf16.msra.mxu0 %v5909_v21  ;;  %v5821_v20 = vcombine.low %v1211_v14, %v1219_v15  ;;  %v5838_v21 = vcombine.high %v1227_v18, %v1235_v19 }
 0x29c   :  { %2800 = vmatprep.subr.bf16.mxu1 %v5916_v22  ;;  %3015 = vmatprep.subr.bf16.mxu0 %v5926_v23  ;;  %v1243_v22 = vld [vmem:[#allocation6 + $0x410] sm:$0xff] }
 0x29d   :  { %v1251_v23 = vld [vmem:[#allocation6 + $0x450] sm:$0xff] }
 0x29e   :  { %v5854_v25 = vcombine.high %v1243_v22, %v1251_v23 }
 0x29f   :  { %2801 = vmatpush1.bf16.msra.mxu1 %v5915_v28  ;;  %3016 = vmatpush1.bf16.msra.mxu0 %v5925_v29  ;;  %v5853_v28 = vcombine.low %v1243_v22, %v1251_v23  ;;  %v5870_v29 = vcombine.high %v1259_v26, %v1267_v27 }
 0x2a0   :  { %2802 = vmatprep.subr.bf16.mxu1 %v5932_v30  ;;  %3017 = vmatprep.subr.bf16.mxu0 %v5942_v31  ;;  %v1275_v30 = vld [vmem:[#allocation6 + $0x510] sm:$0xff] }
 0x2a1   :  { %v1283_v31 = vld [vmem:[#allocation6 + $0x550] sm:$0xff] }
 0x2a2   :  { %v5886_v35 = vcombine.high %v1275_v30, %v1283_v31 }
 0x2a3   :  { %2803 = vmatpush1.bf16.msra.mxu1 %v5931_v39  ;;  %3018 = vmatpush1.bf16.msra.mxu0 %v5941_v40  ;;  %v5885_v39 = vcombine.low %v1275_v30, %v1283_v31  ;;  %v5902_v40 = vcombine.high %v1291_v37, %v1299_v38 }
 0x2a4   :  { %2804 = vmatprep.subr.bf16.mxu1 %v5948_v41  ;;  %3019 = vmatprep.subr.bf16.mxu0 %v5958_v42  ;;  %v1307_v41 = vld [vmem:[#allocation6 + $0x610] sm:$0xff] }
 0x2a5   :  { %v1315_v42 = vld [vmem:[#allocation6 + $0x650] sm:$0xff] }
 0x2a6   :  { %v5918_v44 = vcombine.high %v1307_v41, %v1315_v42 }
 0x2a7   :  { %2805 = vmatpush1.bf16.msra.mxu1 %v5947_v47  ;;  %3020 = vmatpush1.bf16.msra.mxu0 %v5957_v48  ;;  %v5917_v47 = vcombine.low %v1307_v41, %v1315_v42  ;;  %v5934_v48 = vcombine.high %v1323_v45, %v1331_v46 }
 0x2a8   :  { %2806 = vmatprep.subr.bf16.mxu1 %v5964_v49  ;;  %3021 = vmatprep.subr.bf16.mxu0 %v5974_v50  ;;  %v1339_v49 = vld [vmem:[#allocation6 + $0x710] sm:$0xff] }
 0x2a9   :  { %v1347_v50 = vld [vmem:[#allocation6 + $0x750] sm:$0xff] }
 0x2aa   :  { %v5950_v53 = vcombine.high %v1339_v49, %v1347_v50 }
 0x2ab   :  { %2807 = vmatpush1.bf16.msra.mxu1 %v5963_v54  ;;  %3022 = vmatpush1.bf16.msra.mxu0 %v5973_v55  ;;  %v1355_v54 = vld [vmem:[#allocation6 + $0x790] sm:$0xff] }
 0x2ac   :  { %2819 = vmatprep.subr.bf16.mxu1 %v5726_v57  ;;  %v1363_v55 = vld [vmem:[#allocation6 + $0x7d0] sm:$0xff]  ;;  %v5949_v57 = vcombine.low %v1339_v49, %v1347_v50 }
 0x2ad   :  { %v5966_v58 = vcombine.high %v1355_v54, %v1363_v55 }
 0x2ae   :  { %2809 = vmatmul.mubr.bf16.vlgmr.msra.gmra.mrb[8].mxu1 %v7327_v52  ;;  %3024 = vmatmul.mubr.bf16.vlgmr.msra.gmra.mrb[4].mxu0 %v7327_v52 }
 0x2af   :  { %2820 = vmatpush1.bf16.msra.mxu1 %v5725_v60  ;;  %2851 = vmatprep.mubr.bf16.mxu1 %v7329_v56  ;;  %v1124_v60 = vld [vmem:[#allocation6 + $0x58] sm:$0xff] }
 0x2b0   :  { %2821 = vmatprep.subr.bf16.mxu1 %v5742_v61  ;;  %v5965_v61 = vcombine.low %v1355_v54, %v1363_v55  ;;  %v5728_v62 = vcombine.high %v1116_v59, %v1124_v60  ;;  %3178 = vmatprep.mubr.f32.mxu0 %v7108_v10 }
 0x2b3   :  { %2822 = vmatpush1.bf16.msra.mxu1 %v5741_v0  ;;  %v1140_v0 = vld [vmem:[#allocation6 + $0xd8] sm:$0xff] }
 0x2b4   :  { %2823 = vmatprep.subr.bf16.mxu1 %v5758_v1  ;;  %v5727_v1 = vcombine.low %v1116_v59, %v1124_v60  ;;  %v5744_v2 = vcombine.high %v1132_v63, %v1140_v0 }
 0x2b7   :  { %2824 = vmatpush1.bf16.msra.mxu1 %v5757_v4  ;;  %v1156_v4 = vld [vmem:[#allocation6 + $0x158] sm:$0xff] }
 0x2b8   :  { %2825 = vmatprep.subr.bf16.mxu1 %v5774_v5  ;;  %v5743_v5 = vcombine.low %v1132_v63, %v1140_v0  ;;  %v5760_v6 = vcombine.high %v1148_v3, %v1156_v4 }
 0x2bb   :  { %2826 = vmatpush1.bf16.msra.mxu1 %v5773_v8  ;;  %v1172_v8 = vld [vmem:[#allocation6 + $0x1d8] sm:$0xff] }
 0x2bc   :  { %2827 = vmatprep.subr.bf16.mxu1 %v5790_v9  ;;  %v5759_v9 = vcombine.low %v1148_v3, %v1156_v4  ;;  %v5776_v11 = vcombine.high %v1164_v7, %v1172_v8  ;;  %v5775_v14 = vcombine.low %v1164_v7, %v1172_v8 }
 0x2bf   :  { %2828 = vmatpush1.bf16.msra.mxu1 %v5789_v12  ;;  %v1180_v12 = vld [vmem:[#allocation6 + $0x218] sm:$0xff] }
 0x2c0   :  { %2829 = vmatprep.subr.bf16.mxu1 %v5806_v13  ;;  %v1188_v13 = vld [vmem:[#allocation6 + $0x258] sm:$0xff] }
 0x2c1   :  { %v5792_v15 = vcombine.high %v1180_v12, %v1188_v13  ;;  %v5791_v18 = vcombine.low %v1180_v12, %v1188_v13 }
 0x2c3   :  { %2830 = vmatpush1.bf16.msra.mxu1 %v5805_v16  ;;  %v1196_v16 = vld [vmem:[#allocation6 + $0x298] sm:$0xff] }
 0x2c4   :  { %2831 = vmatprep.subr.bf16.mxu1 %v5822_v17  ;;  %v1204_v17 = vld [vmem:[#allocation6 + $0x2d8] sm:$0xff] }
 0x2c5   :  { %v5808_v19 = vcombine.high %v1196_v16, %v1204_v17  ;;  %v5807_v22 = vcombine.low %v1196_v16, %v1204_v17 }
 0x2c7   :  { %2832 = vmatpush1.bf16.msra.mxu1 %v5821_v20  ;;  %v1212_v20 = vld [vmem:[#allocation6 + $0x318] sm:$0xff] }
 0x2c8   :  { %2833 = vmatprep.subr.bf16.mxu1 %v5838_v21  ;;  %v1220_v21 = vld [vmem:[#allocation6 + $0x358] sm:$0xff] }
 0x2c9   :  { %v5824_v23 = vcombine.high %v1212_v20, %v1220_v21  ;;  %v5823_v26 = vcombine.low %v1212_v20, %v1220_v21 }
 0x2cb   :  { %2834 = vmatpush1.bf16.msra.mxu1 %v5837_v24  ;;  %v1228_v24 = vld [vmem:[#allocation6 + $0x398] sm:$0xff] }
 0x2cc   :  { %2835 = vmatprep.subr.bf16.mxu1 %v5854_v25  ;;  %v1236_v25 = vld [vmem:[#allocation6 + $0x3d8] sm:$0xff] }
 0x2cd   :  { %v5840_v27 = vcombine.high %v1228_v24, %v1236_v25  ;;  %v5839_v30 = vcombine.low %v1228_v24, %v1236_v25  ;;  %v7345_v25 = vld [vmem:[#allocation7] sm:$0xff] }
 0x2cf   :  { %2836 = vmatpush1.bf16.msra.mxu1 %v5853_v28  ;;  %v1244_v28 = vld [vmem:[#allocation6 + $0x418] sm:$0xff] }
 0x2d0   :  { %2837 = vmatprep.subr.bf16.mxu1 %v5870_v29  ;;  %v1252_v29 = vld [vmem:[#allocation6 + $0x458] sm:$0xff] }
 0x2d1   :  { %v5856_v31 = vcombine.high %v1244_v28, %v1252_v29  ;;  %v5855_v37 = vcombine.low %v1244_v28, %v1252_v29  ;;  %v1214_v28 = vld [vmem:[#allocation6 + $0x328] sm:$0xff] }
 0x2d2   :  { %v1222_v29 = vld [vmem:[#allocation6 + $0x368] sm:$0xff] }
 0x2d3   :  { %2838 = vmatpush1.bf16.msra.mxu1 %v5869_v32  ;;  %v1260_v32 = vld [vmem:[#allocation6 + $0x498] sm:$0xff] }
 0x2d4   :  { %2839 = vmatprep.subr.bf16.mxu1 %v5886_v35  ;;  %v1268_v35 = vld [vmem:[#allocation6 + $0x4d8] sm:$0xff] }
 0x2d5   :  { %v5872_v38 = vcombine.high %v1260_v32, %v1268_v35  ;;  %v5871_v41 = vcombine.low %v1260_v32, %v1268_v35  ;;  %v1380_v35 = vrot.slane %v7345_v25, %v7323_v36 }
 0x2d7   :  { %2840 = vmatpush1.bf16.msra.mxu1 %v5885_v39  ;;  %v1276_v39 = vld [vmem:[#allocation6 + $0x518] sm:$0xff] }
 0x2d8   :  { %2841 = vmatprep.subr.bf16.mxu1 %v5902_v40  ;;  %v1284_v40 = vld [vmem:[#allocation6 + $0x558] sm:$0xff] }
 0x2d9   :  { %v5888_v42 = vcombine.high %v1276_v39, %v1284_v40  ;;  %v5887_v45 = vcombine.low %v1276_v39, %v1284_v40 }
 0x2db   :  { %2842 = vmatpush1.bf16.msra.mxu1 %v5901_v43  ;;  %v1292_v43 = vld [vmem:[#allocation6 + $0x598] sm:$0xff] }
 0x2dc   :  { %2843 = vmatprep.subr.bf16.mxu1 %v5918_v44  ;;  %v1300_v44 = vld [vmem:[#allocation6 + $0x5d8] sm:$0xff] }
 0x2dd   :  { %v5904_v46 = vcombine.high %v1292_v43, %v1300_v44  ;;  %v5903_v49 = vcombine.low %v1292_v43, %v1300_v44 }
 0x2df   :  { %2844 = vmatpush1.bf16.msra.mxu1 %v5917_v47  ;;  %v1308_v47 = vld [vmem:[#allocation6 + $0x618] sm:$0xff] }
 0x2e0   :  { %2845 = vmatprep.subr.bf16.mxu1 %v5934_v48  ;;  %v1316_v48 = vld [vmem:[#allocation6 + $0x658] sm:$0xff] }
 0x2e1   :  { %v5920_v50 = vcombine.high %v1308_v47, %v1316_v48  ;;  %v5919_v54 = vcombine.low %v1308_v47, %v1316_v48 }
 0x2e3   :  { %2846 = vmatpush1.bf16.msra.mxu1 %v5933_v51  ;;  %v1324_v51 = vld [vmem:[#allocation6 + $0x698] sm:$0xff] }
 0x2e4   :  { %2847 = vmatprep.subr.bf16.mxu1 %v5950_v53  ;;  %v1332_v53 = vld [vmem:[#allocation6 + $0x6d8] sm:$0xff] }
 0x2e5   :  { %v5936_v55 = vcombine.high %v1324_v51, %v1332_v53  ;;  %v5935_v59 = vcombine.low %v1324_v51, %v1332_v53  ;;  %v5827_v51 = vcombine.low %v1214_v28, %v1222_v29 }
 0x2e7   :  { %2848 = vmatpush1.bf16.msra.mxu1 %v5949_v57  ;;  %v1340_v57 = vld [vmem:[#allocation6 + $0x718] sm:$0xff] }
 0x2e8   :  { %2849 = vmatprep.subr.bf16.mxu1 %v5966_v58  ;;  %v1348_v58 = vld [vmem:[#allocation6 + $0x758] sm:$0xff] }
 0x2e9   :  { %v5952_v60 = vcombine.high %v1340_v57, %v1348_v58  ;;  %v5951_v63 = vcombine.low %v1340_v57, %v1348_v58 }
 0x2eb   :  { %2850 = vmatpush1.bf16.msra.mxu1 %v5965_v61  ;;  %v1356_v61 = vld [vmem:[#allocation6 + $0x798] sm:$0xff] }
 0x2ec   :  { %2862 = vmatprep.subr.bf16.mxu1 %v5728_v62  ;;  %v1364_v62 = vld [vmem:[#allocation6 + $0x7d8] sm:$0xff] }
 0x2ed   :  { %v5968_v0 = vcombine.high %v1356_v61, %v1364_v62  ;;  %v5967_v3 = vcombine.low %v1356_v61, %v1364_v62  ;;  %v1246_v62 = vld [vmem:[#allocation6 + $0x428] sm:$0xff] }
 0x2ee   :  { %2852 = vmatmul.mubr.bf16.vlgmr.msra.gmra.mrb[12].mxu1 %v7327_v52 }
 0x2ef   :  { %2863 = vmatpush1.bf16.msra.mxu1 %v5727_v1  ;;  %2894 = vmatprep.mubr.bf16.mxu1 %v7329_v56  ;;  %v1118_v1 = vld [vmem:[#allocation6 + $0x28] sm:$0xff] }
 0x2f0   :  { %2864 = vmatprep.subr.bf16.mxu1 %v5744_v2  ;;  %v1126_v2 = vld [vmem:[#allocation6 + $0x68] sm:$0xff] }
 0x2f1   :  { %v5732_v4 = vcombine.high %v1118_v1, %v1126_v2  ;;  %v5731_v7 = vcombine.low %v1118_v1, %v1126_v2 }
 0x2f3   :  { %2865 = vmatpush1.bf16.msra.mxu1 %v5743_v5  ;;  %v1134_v5 = vld [vmem:[#allocation6 + $0xa8] sm:$0xff] }
 0x2f4   :  { %2866 = vmatprep.subr.bf16.mxu1 %v5760_v6  ;;  %v1142_v6 = vld [vmem:[#allocation6 + $0xe8] sm:$0xff] }
 0x2f5   :  { %v5748_v8 = vcombine.high %v1134_v5, %v1142_v6  ;;  %v5747_v12 = vcombine.low %v1134_v5, %v1142_v6 }
 0x2f7   :  { %2867 = vmatpush1.bf16.msra.mxu1 %v5759_v9  ;;  %v1150_v9 = vld [vmem:[#allocation6 + $0x128] sm:$0xff] }
 0x2f8   :  { %2868 = vmatprep.subr.bf16.mxu1 %v5776_v11  ;;  %v1158_v11 = vld [vmem:[#allocation6 + $0x168] sm:$0xff] }
 0x2f9   :  { %v5764_v13 = vcombine.high %v1150_v9, %v1158_v11  ;;  %v5763_v16 = vcombine.low %v1150_v9, %v1158_v11 }
 0x2fb   :  { %2869 = vmatpush1.bf16.msra.mxu1 %v5775_v14  ;;  %v1166_v14 = vld [vmem:[#allocation6 + $0x1a8] sm:$0xff] }
 0x2fc   :  { %2870 = vmatprep.subr.bf16.mxu1 %v5792_v15  ;;  %v1174_v15 = vld [vmem:[#allocation6 + $0x1e8] sm:$0xff] }
 0x2fd   :  { %v5780_v17 = vcombine.high %v1166_v14, %v1174_v15  ;;  %v5779_v20 = vcombine.low %v1166_v14, %v1174_v15  ;;  %v1262_v14 = vld [vmem:[#allocation6 + $0x4a8] sm:$0xff] }
 0x2fe   :  { %v1270_v15 = vld [vmem:[#allocation6 + $0x4e8] sm:$0xff] }
 0x2ff   :  { %2871 = vmatpush1.bf16.msra.mxu1 %v5791_v18  ;;  %v1182_v18 = vld [vmem:[#allocation6 + $0x228] sm:$0xff] }
 0x300   :  { %2872 = vmatprep.subr.bf16.mxu1 %v5808_v19  ;;  %v1190_v19 = vld [vmem:[#allocation6 + $0x268] sm:$0xff] }
 0x301   :  { %v5796_v21 = vcombine.high %v1182_v18, %v1190_v19  ;;  %v5795_v24 = vcombine.low %v1182_v18, %v1190_v19  ;;  %v7361_v18 = vld [vmem:[#allocation12] sm:$0xff]  ;;  %v1278_v19 = vld [vmem:[#allocation6 + $0x528] sm:$0xff] }
 0x303   :  { %2873 = vmatpush1.bf16.msra.mxu1 %v5807_v22  ;;  %v1198_v22 = vld [vmem:[#allocation6 + $0x2a8] sm:$0xff] }
 0x304   :  { %2874 = vmatprep.subr.bf16.mxu1 %v5824_v23  ;;  %v1206_v23 = vld [vmem:[#allocation6 + $0x2e8] sm:$0xff] }
 0x305   :  { %v5811_v32 = vcombine.low %v1198_v22, %v1206_v23 }
 0x307   :  { %2875 = vmatpush1.bf16.msra.mxu1 %v5823_v26  ;;  %v7347_v26 = vld [vmem:[#allocation7 + $0x8] sm:$0xff] }
 0x308   :  { %2876 = vmatprep.subr.bf16.mxu1 %v5840_v27  ;;  %v5812_v27 = vcombine.high %v1198_v22, %v1206_v23  ;;  %v1294_v23 = vld [vmem:[#allocation6 + $0x5a8] sm:$0xff] }
 0x30b   :  { %2877 = vmatpush1.bf16.msra.mxu1 %v5839_v30  ;;  %v1376_v30 = vrot.slane %v7345_v25, %v7320_v34 }
 0x30c   :  { %2878 = vmatprep.subr.bf16.mxu1 %v5856_v31  ;;  %v1408_v31 = vrot.slane %v7347_v26, %v7320_v34 }
 0x30f   :  { %2879 = vmatpush1.bf16.msra.mxu1 %v5855_v37  ;;  %v1412_v37 = vrot.slane %v7347_v26, %v7323_v36 }
 0x310   :  { %2880 = vmatprep.subr.bf16.mxu1 %v5872_v38  ;;  %v5828_v38 = vcombine.high %v1214_v28, %v1222_v29  ;;  %v1310_v29 = vld [vmem:[#allocation6 + $0x628] sm:$0xff] }
 0x313   :  { %2881 = vmatpush1.bf16.msra.mxu1 %v5871_v41  ;;  %v1230_v41 = vld [vmem:[#allocation6 + $0x3a8] sm:$0xff] }
 0x314   :  { %2882 = vmatprep.subr.bf16.mxu1 %v5888_v42  ;;  %v1238_v42 = vld [vmem:[#allocation6 + $0x3e8] sm:$0xff] }
 0x315   :  { %v5844_v58 = vcombine.high %v1230_v41, %v1238_v42  ;;  %v5843_v61 = vcombine.low %v1230_v41, %v1238_v42  ;;  %v1350_v41 = vld [vmem:[#allocation6 + $0x768] sm:$0xff] }
 0x317   :  { %2883 = vmatpush1.bf16.msra.mxu1 %v5887_v45 }
 0x318   :  { %2884 = vmatprep.subr.bf16.mxu1 %v5904_v46 }
 0x31b   :  { %2885 = vmatpush1.bf16.msra.mxu1 %v5903_v49 }
 0x31c   :  { %2886 = vmatprep.subr.bf16.mxu1 %v5920_v50 }
 0x31f   :  { %2887 = vmatpush1.bf16.msra.mxu1 %v5919_v54 }
 0x320   :  { %2888 = vmatprep.subr.bf16.mxu1 %v5936_v55 }
 0x323   :  { %2889 = vmatpush1.bf16.msra.mxu1 %v5935_v59 }
 0x324   :  { %2890 = vmatprep.subr.bf16.mxu1 %v5952_v60 }
 0x327   :  { %2891 = vmatpush1.bf16.msra.mxu1 %v5951_v63  ;;  %v1254_v63 = vld [vmem:[#allocation6 + $0x468] sm:$0xff] }
 0x328   :  { %2892 = vmatprep.subr.bf16.mxu1 %v5968_v0  ;;  %v5860_v11 = vcombine.high %v1246_v62, %v1254_v63 }
 0x32b   :  { %2893 = vmatpush1.bf16.msra.mxu1 %v5967_v3 }
 0x32c   :  { %2948 = vmatprep.subr.bf16.mxu1 %v5732_v4 }
 0x32e   :  { %2895 = vmatmul.mubr.bf16.vlgmr.msra.gmra.mrb[16].mxu1 %v7327_v52 }
 0x32f   :  { %2949 = vmatpush1.bf16.msra.mxu1 %v5731_v7  ;;  %2980 = vmatprep.mubr.bf16.mxu1 %v7329_v56 }
 0x330   :  { %2950 = vmatprep.subr.bf16.mxu1 %v5748_v8 }
 0x333   :  { %2951 = vmatpush1.bf16.msra.mxu1 %v5747_v12 }
 0x334   :  { %2952 = vmatprep.subr.bf16.mxu1 %v5764_v13 }
 0x337   :  { %2953 = vmatpush1.bf16.msra.mxu1 %v5763_v16  ;;  %v5859_v16 = vcombine.low %v1246_v62, %v1254_v63  ;;  %v1168_v62 = vld [vmem:[#allocation6 + $0x1b8] sm:$0xff] }
 0x338   :  { %2954 = vmatprep.subr.bf16.mxu1 %v5780_v17  ;;  %v5876_v17 = vcombine.high %v1262_v14, %v1270_v15  ;;  %v1176_v63 = vld [vmem:[#allocation6 + $0x1f8] sm:$0xff] }
 0x33b   :  { %2955 = vmatpush1.bf16.msra.mxu1 %v5779_v20  ;;  %v1286_v20 = vld [vmem:[#allocation6 + $0x568] sm:$0xff] }
 0x33c   :  { %2956 = vmatprep.subr.bf16.mxu1 %v5796_v21  ;;  %v5875_v21 = vcombine.low %v1262_v14, %v1270_v15  ;;  %v5892_v22 = vcombine.high %v1278_v19, %v1286_v20  ;;  %v1395_v14 = vsub.s32 5, %v7317_v33 }
 0x33f   :  { %2957 = vmatpush1.bf16.msra.mxu1 %v5795_v24  ;;  %v1302_v24 = vld [vmem:[#allocation6 + $0x5e8] sm:$0xff] }
 0x340   :  { %2958 = vmatprep.subr.bf16.mxu1 %v5812_v27  ;;  %v5891_v27 = vcombine.low %v1278_v19, %v1286_v20  ;;  %v5908_v28 = vcombine.high %v1294_v23, %v1302_v24 }
 0x341   :  { %v2767_v39 = vpop.f32.mrb[4].mxu1  ;;  %v2939_v40 = vpop.f32.mrb[0].mxu0 }
 0x342   :  { %v2768_v43 = vadd.f32 %v2767_v39, %v1376_v30  ;;  %v2940_v44 = vadd.f32 %v2939_v40, %v1408_v31  ;;  %v2769_v45 = vpop.f32.mrb[5].mxu1  ;;  %v2941_v46 = vpop.f32.mrb[1].mxu0  ;;  %v1342_v40 = vld [vmem:[#allocation6 + $0x728] sm:$0xff] }
 0x343   :  { %v2770_v47 = vadd.f32 %v2769_v45, %v1380_v35  ;;  %v2942_v48 = vadd.f32 %v2941_v46, %v1412_v37  ;;  %2959 = vmatpush1.bf16.msra.mxu1 %v5811_v32  ;;  %v2771_v49 = vpop.f32.mrb[6].mxu1  ;;  %v2943_v50 = vpop.f32.mrb[2].mxu0  ;;  %v1366_v45 = vld [vmem:[#allocation6 + $0x7e8] sm:$0xff]  ;;  %v5955_v46 = vcombine.low %v1342_v40, %v1350_v41 }
 0x344   :  { %v2772_v53 = vadd.f32 %v2771_v49, %v1376_v30  ;;  %v2944_v54 = vadd.f32 %v2943_v50, %v1408_v31  ;;  %v2773_v55 = vpop.f32.mrb[7].mxu1  ;;  %v2945_v57 = vpop.f32.mrb[3].mxu0  ;;  %2960 = vmatprep.subr.bf16.mxu1 %v5828_v38  ;;  %v3077_v0 = vmax.f32 %v2768_v43, 0.0  ;;  %v3085_v1 = vmax.f32 %v2940_v44, 0.0  ;;  %v1318_v30 = vld [vmem:[#allocation6 + $0x668] sm:$0xff]  ;;  %v1128_v49 = vld [vmem:[#allocation6 + $0x78] sm:$0xff] }
 0x345   :  { %v2774_v59 = vadd.f32 %v2773_v55, %v1380_v35  ;;  %v2946_v60 = vadd.f32 %v2945_v57, %v1412_v37  ;;  %v3078_v4 = vmax.f32 %v2770_v47, 0.0  ;;  %v3086_v5 = vmax.f32 %v2942_v48, 0.0  ;;  %v1326_v35 = vld [vmem:[#allocation6 + $0x6a8] sm:$0xff]  ;;  %v1120_v48 = vld [vmem:[#allocation6 + $0x38] sm:$0xff] }
 0x346   :  { %v3093_v2 = vmax.f32 %v2772_v53, 0.0  ;;  %v3101_v3 = vmax.f32 %v2944_v54, 0.0  ;;  %v5907_v31 = vcombine.low %v1294_v23, %v1302_v24  ;;  %v5924_v32 = vcombine.high %v1310_v29, %v1318_v30  ;;  %v1334_v37 = vld [vmem:[#allocation6 + $0x6e8] sm:$0xff]  ;;  %v1136_v53 = vld [vmem:[#allocation6 + $0xb8] sm:$0xff] }
 0x347   :  { %v3094_v6 = vmax.f32 %v2774_v59, 0.0  ;;  %v3102_v7 = vmax.f32 %v2946_v60, 0.0  ;;  %2961 = vmatpush1.bf16.msra.mxu1 %v5827_v51  ;;  %v5923_v38 = vcombine.low %v1310_v29, %v1318_v30  ;;  %v5940_v39 = vcombine.high %v1326_v35, %v1334_v37  ;;  %v1358_v44 = vld [vmem:[#allocation6 + $0x7a8] sm:$0xff]  ;;  %v1144_v54 = vld [vmem:[#allocation6 + $0xf8] sm:$0xff] }
 0x348   :  { %v6243_v8 = vpack.c.bf16 %v3093_v2, %v3077_v0  ;;  %v7357_v9 = vpack.c.bf16 %v3101_v3, %v3085_v1  ;;  %2962 = vmatprep.subr.bf16.mxu1 %v5844_v58  ;;  %v5939_v42 = vcombine.low %v1326_v35, %v1334_v37  ;;  %v5956_v43 = vcombine.high %v1342_v40, %v1350_v41  ;;  %v1152_v58 = vld [vmem:[#allocation6 + $0x138] sm:$0xff] }
 0x349   :  { %v6241_v12 = vpack.c.bf16 %v3094_v6, %v3078_v4  ;;  %v7359_v13 = vpack.c.bf16 %v3102_v7, %v3086_v5  ;;  %v5972_v47 = vcombine.high %v1358_v44, %v1366_v45  ;;  %v5971_v50 = vcombine.low %v1358_v44, %v1366_v45  ;;  %v1160_v59 = vld [vmem:[#allocation6 + $0x178] sm:$0xff] }
 0x34a   :  { %v5736_v51 = vcombine.high %v1120_v48, %v1128_v49  ;;  %v5735_v55 = vcombine.low %v1120_v48, %v1128_v49  ;;  %v5752_v57 = vcombine.high %v1136_v53, %v1144_v54  ;;  %v5751_v60 = vcombine.low %v1136_v53, %v1144_v54  ;;  %v1184_v2 = vld [vmem:[#allocation6 + $0x238] sm:$0xff] }
 0x34b   :  { %2963 = vmatpush1.bf16.msra.mxu1 %v5843_v61  ;;  %6242 = vmatprep.subr.bf16.mxu0 %v6241_v12  ;;  %v5768_v61 = vcombine.high %v1152_v58, %v1160_v59  ;;  %v5767_v0 = vcombine.low %v1152_v58, %v1160_v59  ;;  %v5784_v1 = vcombine.high %v1168_v62, %v1176_v63  ;;  %v1192_v3 = vld [vmem:[#allocation6 + $0x278] sm:$0xff]  ;;  %v1387_v12 = vsub.s32 3, %v7317_v33 }
 0x34c   :  { %6244 = vmatpush1.bf16.msra.mxu0 %v6243_v8  ;;  %2964 = vmatprep.subr.bf16.mxu1 %v5860_v11  ;;  %v5783_v4 = vcombine.low %v1168_v62, %v1176_v63  ;;  %v5800_v5 = vcombine.high %v1184_v2, %v1192_v3  ;;  %v1200_v6 = vld [vmem:[#allocation6 + $0x2b8] sm:$0xff]  ;;  %v1383_v8 = vsub.s32 2, %v7317_v33  ;;  %v5799_v11 = vcombine.low %v1184_v2, %v1192_v3 }
 0x34d   :  { %v1208_v7 = vld [vmem:[#allocation6 + $0x2f8] sm:$0xff] }
 0x34e   :  { %v5816_v15 = vcombine.high %v1200_v6, %v1208_v7  ;;  %v1384_v19 = vrot.slane %v7345_v25, %v1383_v8  ;;  %v5815_v23 = vcombine.low %v1200_v6, %v1208_v7  ;;  %v1232_v29 = vld [vmem:[#allocation6 + $0x3b8] sm:$0xff] }
 0x34f   :  { %2965 = vmatpush1.bf16.msra.mxu1 %v5859_v16  ;;  %5977 = vmatmul.mubr.msk.f32.vlgmr.msra.gmra.mrb[8].mxu0 %vm3110_vm0, %v7361_v18  ;;  %v1216_v16 = vld [vmem:[#allocation6 + $0x338] sm:$0xff] }
 0x350   :  { %2966 = vmatprep.subr.bf16.mxu1 %v5876_v17  ;;  %3320 = vmatprep.mubr.f32.mxu0 %v7108_v10  ;;  %v1224_v17 = vld [vmem:[#allocation6 + $0x378] sm:$0xff] }
 0x351   :  { %v5832_v24 = vcombine.high %v1216_v16, %v1224_v17  ;;  %v1240_v30 = vld [vmem:[#allocation6 + $0x3f8] sm:$0xff] }
 0x352   :  { %v1256_v53 = vld [vmem:[#allocation6 + $0x478] sm:$0xff] }
 0x353   :  { %2967 = vmatpush1.bf16.msra.mxu1 %v5875_v21  ;;  %v1388_v21 = vrot.slane %v7345_v25, %v1387_v12 }
 0x354   :  { %2968 = vmatprep.subr.bf16.mxu1 %v5892_v22  ;;  %v1428_v22 = vrot.slane %v7347_v26, %v1395_v14 }
 0x357   :  { %2969 = vmatpush1.bf16.msra.mxu1 %v5891_v27 }
 0x358   :  { %2970 = vmatprep.subr.bf16.mxu1 %v5908_v28 }
 0x35b   :  { %2971 = vmatpush1.bf16.msra.mxu1 %v5907_v31 }
 0x35c   :  { %2972 = vmatprep.subr.bf16.mxu1 %v5924_v32 }
 0x35f   :  { %2973 = vmatpush1.bf16.msra.mxu1 %v5923_v38 }
 0x360   :  { %2974 = vmatprep.subr.bf16.mxu1 %v5940_v39 }
 0x363   :  { %2975 = vmatpush1.bf16.msra.mxu1 %v5939_v42  ;;  %v5831_v42 = vcombine.low %v1216_v16, %v1224_v17 }
 0x364   :  { %2976 = vmatprep.subr.bf16.mxu1 %v5956_v43 }
 0x367   :  { %2977 = vmatpush1.bf16.msra.mxu1 %v5955_v46 }
 0x368   :  { %2978 = vmatprep.subr.bf16.mxu1 %v5972_v47  ;;  %v5848_v47 = vcombine.high %v1232_v29, %v1240_v30 }
 0x36b   :  { %2979 = vmatpush1.bf16.msra.mxu1 %v5971_v50  ;;  %v5847_v50 = vcombine.low %v1232_v29, %v1240_v30  ;;  %v1328_v29 = vld [vmem:[#allocation6 + $0x6b8] sm:$0xff] }
 0x36c   :  { %3034 = vmatprep.subr.bf16.mxu1 %v5736_v51  ;;  %v1248_v51 = vld [vmem:[#allocation6 + $0x438] sm:$0xff] }
 0x36d   :  { %v5863_v6 = vcombine.low %v1248_v51, %v1256_v53  ;;  %v1336_v30 = vld [vmem:[#allocation6 + $0x6f8] sm:$0xff] }
 0x36e   :  { %2981 = vmatmul.mubr.bf16.vlgmr.msra.gmra.mrb[20].mxu1 %v7327_v52 }
 0x36f   :  { %3035 = vmatpush1.bf16.msra.mxu1 %v5735_v55  ;;  %3066 = vmatprep.mubr.bf16.mxu1 %v7329_v56  ;;  %v1391_v56 = vsub.s32 4, %v7317_v33 }
 0x370   :  { %3036 = vmatprep.subr.bf16.mxu1 %v5752_v57 }
 0x371   :  { %v1424_v20 = vrot.slane %v7347_v26, %v1391_v56 }
 0x373   :  { %3037 = vmatpush1.bf16.msra.mxu1 %v5751_v60 }
 0x374   :  { %3038 = vmatprep.subr.bf16.mxu1 %v5768_v61 }
 0x377   :  { %3039 = vmatpush1.bf16.msra.mxu1 %v5767_v0 }
 0x378   :  { %3040 = vmatprep.subr.bf16.mxu1 %v5784_v1  ;;  %v5864_v1 = vcombine.high %v1248_v51, %v1256_v53 }
 0x37b   :  { %3041 = vmatpush1.bf16.msra.mxu1 %v5783_v4  ;;  %v1264_v4 = vld [vmem:[#allocation6 + $0x4b8] sm:$0xff] }
 0x37c   :  { %3042 = vmatprep.subr.bf16.mxu1 %v5800_v5  ;;  %v1272_v5 = vld [vmem:[#allocation6 + $0x4f8] sm:$0xff] }
 0x37d   :  { %v5880_v7 = vcombine.high %v1264_v4, %v1272_v5  ;;  %v5879_v16 = vcombine.low %v1264_v4, %v1272_v5  ;;  %v6543_v4 = vld [vmem:[#allocation9 + $0x54] ss:$8 sps:$4 sm:$0xff]   ;;  %v6541_v5 = vld [vmem:[#allocation9 + $0x50] ss:$8 sps:$4 sm:$0xff]  }
 0x37f   :  { %3043 = vmatpush1.bf16.msra.mxu1 %v5799_v11  ;;  %v1280_v11 = vld [vmem:[#allocation6 + $0x538] sm:$0xff] }
 0x380   :  { %3044 = vmatprep.subr.bf16.mxu1 %v5816_v15  ;;  %v1288_v15 = vld [vmem:[#allocation6 + $0x578] sm:$0xff] }
 0x381   :  { %v2810_v27 = vpop.f32.mrb[8].mxu1  ;;  %v3025_v28 = vpop.f32.mrb[4].mxu0  ;;  %v5896_v17 = vcombine.high %v1280_v11, %v1288_v15 }
 0x382   :  { %v2811_v31 = vadd.f32 %v2810_v27, %v1384_v19  ;;  %v3026_v32 = vadd.f32 %v3025_v28, %v1424_v20  ;;  %v2812_v35 = vpop.f32.mrb[9].mxu1  ;;  %v3027_v37 = vpop.f32.mrb[5].mxu0 }
 0x383   :  { %v2813_v38 = vadd.f32 %v2812_v35, %v1388_v21  ;;  %v3028_v39 = vadd.f32 %v3027_v37, %v1428_v22  ;;  %v2814_v40 = vpop.f32.mrb[10].mxu1  ;;  %v3029_v41 = vpop.f32.mrb[6].mxu0  ;;  %3045 = vmatpush1.bf16.msra.mxu1 %v5815_v23  ;;  %v1312_v23 = vld [vmem:[#allocation6 + $0x638] sm:$0xff] }
 0x384   :  { %v2815_v43 = vadd.f32 %v2814_v40, %v1384_v19  ;;  %v3030_v44 = vadd.f32 %v3029_v41, %v1424_v20  ;;  %v2816_v45 = vpop.f32.mrb[11].mxu1  ;;  %v3031_v46 = vpop.f32.mrb[7].mxu0  ;;  %3046 = vmatprep.subr.bf16.mxu1 %v5832_v24  ;;  %v3079_v54 = vmax.f32 %v2811_v31, 0.0  ;;  %v3089_v55 = vmax.f32 %v3026_v32, 0.0  ;;  %v1296_v19 = vld [vmem:[#allocation6 + $0x5b8] sm:$0xff] }
 0x385   :  { %v2817_v48 = vadd.f32 %v2816_v45, %v1388_v21  ;;  %v3032_v49 = vadd.f32 %v3031_v46, %v1428_v22  ;;  %v3080_v59 = vmax.f32 %v2813_v38, 0.0  ;;  %v3090_v60 = vmax.f32 %v3028_v39, 0.0  ;;  %v1304_v20 = vld [vmem:[#allocation6 + $0x5f8] sm:$0xff] }
 0x386   :  { %v3095_v57 = vmax.f32 %v2815_v43, 0.0  ;;  %v3105_v58 = vmax.f32 %v3030_v44, 0.0  ;;  %v5895_v21 = vcombine.low %v1280_v11, %v1288_v15  ;;  %v5912_v22 = vcombine.high %v1296_v19, %v1304_v20  ;;  %v1320_v24 = vld [vmem:[#allocation6 + $0x678] sm:$0xff]  ;;  %v6549_v11 = vld [vmem:[#allocation9 + $0x74] ss:$8 sps:$4 sm:$0xff]  }
 0x387   :  { %v3096_v61 = vmax.f32 %v2817_v48, 0.0  ;;  %v3106_v62 = vmax.f32 %v3032_v49, 0.0  ;;  %3047 = vmatpush1.bf16.msra.mxu1 %v5831_v42  ;;  %v5911_v27 = vcombine.low %v1296_v19, %v1304_v20  ;;  %v5928_v28 = vcombine.high %v1312_v23, %v1320_v24  ;;  %v1344_v35 = vld [vmem:[#allocation6 + $0x738] sm:$0xff]  ;;  %v6547_v15 = vld [vmem:[#allocation9 + $0x70] ss:$8 sps:$4 sm:$0xff]  }
 0x388   :  { %v6247_v63 = vpack.c.bf16 %v3095_v57, %v3079_v54  ;;  %v7384_v0 = vpack.c.bf16 %v3105_v58, %v3089_v55  ;;  %3048 = vmatprep.subr.bf16.mxu1 %v5848_v47  ;;  %v5927_v31 = vcombine.low %v1312_v23, %v1320_v24  ;;  %v5944_v32 = vcombine.high %v1328_v29, %v1336_v30  ;;  %v1352_v37 = vld [vmem:[#allocation6 + $0x778] sm:$0xff]  ;;  %v6555_v19 = vld [vmem:[#allocation9 + $0x94] ss:$8 sps:$4 sm:$0xff]   ;;  %v6553_v20 = vld [vmem:[#allocation9 + $0x90] ss:$8 sps:$4 sm:$0xff]  }
 0x389   :  { %v6245_v2 = vpack.c.bf16 %v3096_v61, %v3080_v59  ;;  %v7386_v3 = vpack.c.bf16 %v3106_v62, %v3090_v60  ;;  %v5943_v38 = vcombine.low %v1328_v29, %v1336_v30  ;;  %v5960_v39 = vcombine.high %v1344_v35, %v1352_v37  ;;  %v1360_v40 = vld [vmem:[#allocation6 + $0x7b8] sm:$0xff]  ;;  %v6559_v30 = vld [vmem:[#allocation9 + $0xb0] ss:$8 sps:$4 sm:$0xff]  }
 0x38a   :  { %v1368_v41 = vld [vmem:[#allocation6 + $0x7f8] sm:$0xff]  ;;  %v5959_v42 = vcombine.low %v1344_v35, %v1352_v37  ;;  %v1392_v45 = vrot.slane %v7345_v25, %v1391_v56  ;;  %v1396_v46 = vrot.slane %v7345_v25, %v1395_v14  ;;  %v1403_v23 = vsub.s32 7, %v7317_v33 }
 0x38b   :  { %3049 = vmatpush1.bf16.msra.mxu1 %v5847_v50  ;;  %v5976_v43 = vcombine.high %v1360_v40, %v1368_v41  ;;  %v5975_v44 = vcombine.low %v1360_v40, %v1368_v41  ;;  %v6528_v56 = vld [vmem:[#allocation9 + $0x4] ss:$8 sps:$4 sm:$0xff]   ;;  %v6526_v14 = vld [vmem:[#allocation9] ss:$8 sps:$4 sm:$0xff]  }
 0x38c   :  { %3050 = vmatprep.subr.bf16.mxu1 %v5864_v1  ;;  %v6534_v62 = vld [vmem:[#allocation9 + $0x24] ss:$8 sps:$4 sm:$0xff]   ;;  %v6537_v1 = vld [vmem:[#allocation9 + $0x34] ss:$8 sps:$4 sm:$0xff]   ;;  %v6556_v24 = vld [vmem:[#allocation9 + $0xa0] ss:$8 sps:$4 sm:$0xff]   ;;  %v1404_v29 = vrot.slane %v7345_v25, %v1403_v23 }
 0x38f   :  { %3051 = vmatpush1.bf16.msra.mxu1 %v5863_v6  ;;  %v6546_v6 = vld [vmem:[#allocation9 + $0x64] ss:$8 sps:$4 sm:$0xff]  }
 0x390   :  { %3052 = vmatprep.subr.bf16.mxu1 %v5880_v7  ;;  %v6544_v7 = vld [vmem:[#allocation9 + $0x60] ss:$8 sps:$4 sm:$0xff]  }
 0x393   :  { %3053 = vmatpush1.bf16.msra.mxu1 %v5879_v16  ;;  %v6552_v16 = vld [vmem:[#allocation9 + $0x84] ss:$8 sps:$4 sm:$0xff]  }
 0x394   :  { %3054 = vmatprep.subr.bf16.mxu1 %v5896_v17  ;;  %v6550_v17 = vld [vmem:[#allocation9 + $0x80] ss:$8 sps:$4 sm:$0xff]  }
 0x397   :  { %3055 = vmatpush1.bf16.msra.mxu1 %v5895_v21  ;;  %v6558_v21 = vld [vmem:[#allocation9 + $0xa4] ss:$8 sps:$4 sm:$0xff]  }
 0x398   :  { %3056 = vmatprep.subr.bf16.mxu1 %v5912_v22  ;;  %v1399_v22 = vsub.s32 6, %v7317_v33  ;;  %v6622_v33 = vld [vmem:[#allocation9 + $0x200] ss:$8 sps:$4 sm:$0xff]  }
 0x39b   :  { %3057 = vmatpush1.bf16.msra.mxu1 %v5911_v27  ;;  %v6561_v27 = vld [vmem:[#allocation9 + $0xb4] ss:$8 sps:$4 sm:$0xff]  }
 0x39c   :  { %3058 = vmatprep.subr.bf16.mxu1 %v5928_v28  ;;  %v1400_v28 = vrot.slane %v7345_v25, %v1399_v22 }
 0x39f   :  { %3059 = vmatpush1.bf16.msra.mxu1 %v5927_v31 }
 0x3a0   :  { %3060 = vmatprep.subr.bf16.mxu1 %v5944_v32  ;;  %v6564_v32 = vld [vmem:[#allocation9 + $0xc4] ss:$8 sps:$4 sm:$0xff]  }
 0x3a3   :  { %3061 = vmatpush1.bf16.msra.mxu1 %v5943_v38 }
 0x3a4   :  { %3062 = vmatprep.subr.bf16.mxu1 %v5960_v39 }
 0x3a7   :  { %3063 = vmatpush1.bf16.msra.mxu1 %v5959_v42  ;;  %v6562_v42 = vld [vmem:[#allocation9 + $0xc0] ss:$8 sps:$4 sm:$0xff]  }
 0x3a8   :  { %3064 = vmatprep.subr.bf16.mxu1 %v5976_v43 }
 0x3ab   :  { %3065 = vmatpush1.bf16.msra.mxu1 %v5975_v44  ;;  %v6567_v44 = vld [vmem:[#allocation9 + $0xd4] ss:$8 sps:$4 sm:$0xff]  }
 0x3ac   :  { %6246 = vmatprep.subr.bf16.mxu1 %v6245_v2  ;;  %v6535_v2 = vld [vmem:[#allocation9 + $0x30] ss:$8 sps:$4 sm:$0xff]  }
 0x3ae   :  { %3067 = vmatmul.mubr.bf16.vlgmr.msra.gmra.mrb[24].mxu1 %v7327_v52 }
 0x3af   :  { %6248 = vmatpush1.bf16.msra.mxu1 %v6247_v63  ;;  %3249 = vmatprep.mubr.f32.mxu1 %v7108_v10  ;;  %v6532_v63 = vld [vmem:[#allocation9 + $0x20] ss:$8 sps:$4 sm:$0xff]  }
 0x3b6   :  { %5978 = vmatmul.mubr.msk.f32.vlgmr.msra.gmra.mrb[28].mxu1 %vm3110_vm0, %v7361_v18 }
 0x3b7   :  { %3391 = vmatprep.mubr.f32.mxu1 %v7108_v10 }
 0x3c1   :  { %v2853_v47 = vpop.f32.mrb[12].mxu1 }
 0x3c2   :  { %v2854_v48 = vadd.f32 %v2853_v47, %v1392_v45  ;;  %v2855_v49 = vpop.f32.mrb[13].mxu1 }
 0x3c3   :  { %v2856_v52 = vadd.f32 %v2855_v49, %v1396_v46  ;;  %v2857_v50 = vpop.f32.mrb[14].mxu1  ;;  %v6565_v49 = vld [vmem:[#allocation9 + $0xd0] ss:$8 sps:$4 sm:$0xff]  }
 0x3c4   :  { %v2858_v51 = vadd.f32 %v2857_v50, %v1392_v45  ;;  %v2859_v53 = vpop.f32.mrb[15].mxu1  ;;  %v3081_v55 = vmax.f32 %v2854_v48, 0.0  ;;  %v6570_v50 = vld [vmem:[#allocation9 + $0xe4] ss:$8 sps:$4 sm:$0xff]  }
 0x3c5   :  { %v2860_v54 = vadd.f32 %v2859_v53, %v1396_v46  ;;  %v3082_v58 = vmax.f32 %v2856_v52, 0.0  ;;  %v6573_v53 = vld [vmem:[#allocation9 + $0xf4] ss:$8 sps:$4 sm:$0xff]  }
 0x3c6   :  { %v3097_v57 = vmax.f32 %v2858_v51, 0.0  ;;  %v6568_v51 = vld [vmem:[#allocation9 + $0xe0] ss:$8 sps:$4 sm:$0xff]  }
 0x3c7   :  { %v3098_v59 = vmax.f32 %v2860_v54, 0.0  ;;  %v6571_v54 = vld [vmem:[#allocation9 + $0xf0] ss:$8 sps:$4 sm:$0xff]  }
 0x3c8   :  { %v6251_v60 = vpack.c.bf16 %v3097_v57, %v3081_v55  ;;  %v6576_v55 = vld [vmem:[#allocation9 + $0x104] ss:$8 sps:$4 sm:$0xff]  }
 0x3c9   :  { %v6249_v61 = vpack.c.bf16 %v3098_v59, %v3082_v58 }
 0x3cb   :  { %6250 = vmatprep.subr.bf16.mxu0 %v6249_v61  ;;  %v6574_v61 = vld [vmem:[#allocation9 + $0x100] ss:$8 sps:$4 sm:$0xff]  }
 0x3cc   :  { %6252 = vmatpush1.bf16.msra.mxu0 %v6251_v60 }
 0x3cd   :  { %6258 = vmatprep.subr.bf16.mxu0 %v7359_v13  ;;  %v6531_v13 = vld [vmem:[#allocation9 + $0x14] ss:$8 sps:$4 sm:$0xff]  }
 0x3cf   :  { %5979 = vmatmul.mubr.msk.f32.vlgmr.msra.gmra.mrb[10].mxu0 %vm3110_vm0, %v7361_v18 }
 0x3d0   :  { %6260 = vmatpush1.bf16.msra.mxu0 %v7357_v9  ;;  %3462 = vmatprep.mubr.f32.mxu0 %v7108_v10  ;;  %v6529_v9 = vld [vmem:[#allocation9 + $0x10] ss:$8 sps:$4 sm:$0xff]  }
 0x3d1   :  { %6266 = vmatprep.subr.bf16.mxu0 %v7386_v3  ;;  %v6538_v3 = vld [vmem:[#allocation9 + $0x40] ss:$8 sps:$4 sm:$0xff]  }
 0x3d3   :  { %5981 = vmatmul.mubr.msk.f32.vlgmr.msra.gmra.mrb[12].mxu0 %vm3110_vm0, %v7361_v18 }
 0x3d4   :  { %6268 = vmatpush1.bf16.msra.mxu0 %v7384_v0  ;;  %3604 = vmatprep.mubr.f32.mxu0 %v7108_v10  ;;  %v6540_v0 = vld [vmem:[#allocation9 + $0x44] ss:$8 sps:$4 sm:$0xff]  }
 0x3d5   :  { %5254 = vmatprep.subr.bf16.mxu0 %v6528_v56  ;;  %v6579_v56 = vld [vmem:[#allocation9 + $0x114] ss:$8 sps:$4 sm:$0xff]  }
 0x3d7   :  { %5983 = vmatmul.mubr.msk.f32.vlgmr.msra.gmra.mrb[14].mxu0 %vm3110_vm0, %v7361_v18 }
 0x3d8   :  { %5255 = vmatpush1.bf16.msra.mxu0 %v6526_v14  ;;  %v6577_v14 = vld [vmem:[#allocation9 + $0x110] ss:$8 sps:$4 sm:$0xff]  }
 0x3d9   :  { %5256 = vmatprep.subr.bf16.mxu0 %v6531_v13  ;;  %v6582_v13 = vld [vmem:[#allocation9 + $0x124] ss:$8 sps:$4 sm:$0xff]  }
 0x3dc   :  { %5257 = vmatpush1.bf16.msra.mxu0 %v6529_v9  ;;  %v6580_v9 = vld [vmem:[#allocation9 + $0x120] ss:$8 sps:$4 sm:$0xff]  }
 0x3dd   :  { %5258 = vmatprep.subr.bf16.mxu0 %v6534_v62  ;;  %v6585_v62 = vld [vmem:[#allocation9 + $0x134] ss:$8 sps:$4 sm:$0xff]  }
 0x3e0   :  { %5259 = vmatpush1.bf16.msra.mxu0 %v6532_v63  ;;  %v6583_v63 = vld [vmem:[#allocation9 + $0x130] ss:$8 sps:$4 sm:$0xff]  }
 0x3e1   :  { %5260 = vmatprep.subr.bf16.mxu0 %v6537_v1  ;;  %v6588_v1 = vld [vmem:[#allocation9 + $0x144] ss:$8 sps:$4 sm:$0xff]  }
 0x3e4   :  { %5261 = vmatpush1.bf16.msra.mxu0 %v6535_v2  ;;  %v6586_v2 = vld [vmem:[#allocation9 + $0x140] ss:$8 sps:$4 sm:$0xff]  }
 0x3e5   :  { %5262 = vmatprep.subr.bf16.mxu0 %v6540_v0  ;;  %v6591_v0 = vld [vmem:[#allocation9 + $0x154] ss:$8 sps:$4 sm:$0xff]  }
 0x3e8   :  { %5263 = vmatpush1.bf16.msra.mxu0 %v6538_v3  ;;  %v6589_v3 = vld [vmem:[#allocation9 + $0x150] ss:$8 sps:$4 sm:$0xff]  }
 0x3e9   :  { %5264 = vmatprep.subr.bf16.mxu0 %v6543_v4  ;;  %v6594_v4 = vld [vmem:[#allocation9 + $0x164] ss:$8 sps:$4 sm:$0xff]  }
 0x3ec   :  { %5265 = vmatpush1.bf16.msra.mxu0 %v6541_v5  ;;  %v6592_v5 = vld [vmem:[#allocation9 + $0x160] ss:$8 sps:$4 sm:$0xff]  }
 0x3ed   :  { %5266 = vmatprep.subr.bf16.mxu0 %v6546_v6  ;;  %v6597_v6 = vld [vmem:[#allocation9 + $0x174] ss:$8 sps:$4 sm:$0xff]  }
 0x3f0   :  { %5267 = vmatpush1.bf16.msra.mxu0 %v6544_v7  ;;  %v1416_v7 = vrot.slane %v7347_v26, %v1383_v8  ;;  %v6603_v8 = vld [vmem:[#allocation9 + $0x194] ss:$8 sps:$4 sm:$0xff]  }
 0x3f1   :  { %5268 = vmatprep.subr.bf16.mxu0 %v6549_v11  ;;  %v1420_v11 = vrot.slane %v7347_v26, %v1387_v12 }
 0x3f4   :  { %5269 = vmatpush1.bf16.msra.mxu0 %v6547_v15  ;;  %v6595_v15 = vld [vmem:[#allocation9 + $0x170] ss:$8 sps:$4 sm:$0xff]  }
 0x3f5   :  { %5270 = vmatprep.subr.bf16.mxu0 %v6552_v16 }
 0x3f8   :  { %5271 = vmatpush1.bf16.msra.mxu0 %v6550_v17  ;;  %v6600_v17 = vld [vmem:[#allocation9 + $0x184] ss:$8 sps:$4 sm:$0xff]  }
 0x3f9   :  { %5272 = vmatprep.subr.bf16.mxu0 %v6555_v19 }
 0x3fc   :  { %5273 = vmatpush1.bf16.msra.mxu0 %v6553_v20 }
 0x3fd   :  { %5274 = vmatprep.subr.bf16.mxu0 %v6558_v21 }
 0x400   :  { %5275 = vmatpush1.bf16.msra.mxu0 %v6556_v24 }
 0x401   :  { %v2896_v31 = vpop.f32.mrb[16].mxu1  ;;  %5276 = vmatprep.subr.bf16.mxu0 %v6561_v27 }
 0x402   :  { %v2897_v35 = vadd.f32 %v2896_v31, %v1400_v28  ;;  %v2898_v37 = vpop.f32.mrb[17].mxu1 }
 0x403   :  { %v2899_v38 = vadd.f32 %v2898_v37, %v1404_v29  ;;  %v2900_v39 = vpop.f32.mrb[18].mxu1 }
 0x404   :  { %v2901_v40 = vadd.f32 %v2900_v39, %v1400_v28  ;;  %v2902_v41 = vpop.f32.mrb[19].mxu1  ;;  %5277 = vmatpush1.bf16.msra.mxu0 %v6559_v30  ;;  %v3083_v45 = vmax.f32 %v2897_v35, 0.0 }
 0x405   :  { %v2903_v43 = vadd.f32 %v2902_v41, %v1404_v29  ;;  %5278 = vmatprep.subr.bf16.mxu0 %v6564_v32  ;;  %v3084_v47 = vmax.f32 %v2899_v38, 0.0  ;;  %v6598_v29 = vld [vmem:[#allocation9 + $0x180] ss:$8 sps:$4 sm:$0xff]   ;;  %v6601_v38 = vld [vmem:[#allocation9 + $0x190] ss:$8 sps:$4 sm:$0xff]  }
 0x406   :  { %v3099_v46 = vmax.f32 %v2901_v40, 0.0  ;;  %v6606_v40 = vld [vmem:[#allocation9 + $0x1a4] ss:$8 sps:$4 sm:$0xff]   ;;  %v6604_v41 = vld [vmem:[#allocation9 + $0x1a0] ss:$8 sps:$4 sm:$0xff]  }
 0x407   :  { %v3100_v25 = vmax.f32 %v2903_v43, 0.0  ;;  %v6607_v43 = vld [vmem:[#allocation9 + $0x1b0] ss:$8 sps:$4 sm:$0xff]  }
 0x408   :  { %v6255_v48 = vpack.c.bf16 %v3099_v46, %v3083_v45  ;;  %5279 = vmatpush1.bf16.msra.mxu0 %v6562_v42  ;;  %v6609_v42 = vld [vmem:[#allocation9 + $0x1b4] ss:$8 sps:$4 sm:$0xff]   ;;  %v6610_v45 = vld [vmem:[#allocation9 + $0x1c0] ss:$8 sps:$4 sm:$0xff]  }
 0x409   :  { %v6253_v52 = vpack.c.bf16 %v3100_v25, %v3084_v47  ;;  %5280 = vmatprep.subr.bf16.mxu0 %v6567_v44  ;;  %v6612_v44 = vld [vmem:[#allocation9 + $0x1c4] ss:$8 sps:$4 sm:$0xff]   ;;  %v6615_v46 = vld [vmem:[#allocation9 + $0x1d4] ss:$8 sps:$4 sm:$0xff]   ;;  %v6613_v47 = vld [vmem:[#allocation9 + $0x1d0] ss:$8 sps:$4 sm:$0xff]  }
 0x40a   :  { %v6618_v25 = vld [vmem:[#allocation9 + $0x1e4] ss:$8 sps:$4 sm:$0xff]  }
 0x40b   :  { %6254 = vmatprep.subr.bf16.mxu1 %v6253_v52  ;;  %v6619_v52 = vld [vmem:[#allocation9 + $0x1f0] ss:$8 sps:$4 sm:$0xff]  }
 0x40c   :  { %6256 = vmatpush1.bf16.msra.mxu1 %v6255_v48  ;;  %5281 = vmatpush1.bf16.msra.mxu0 %v6565_v49  ;;  %v6616_v48 = vld [vmem:[#allocation9 + $0x1e0] ss:$8 sps:$4 sm:$0xff]   ;;  %v6621_v49 = vld [vmem:[#allocation9 + $0x1f4] ss:$8 sps:$4 sm:$0xff]  }
 0x40d   :  { %5282 = vmatprep.subr.bf16.mxu0 %v6570_v50  ;;  %v6624_v50 = vld [vmem:[#allocation9 + $0x204] ss:$8 sps:$4 sm:$0xff]  }
 0x40f   :  { %5980 = vmatmul.mubr.msk.f32.vlgmr.msra.gmra.mrb[30].mxu1 %vm3110_vm0, %v7361_v18 }
 0x410   :  { %5283 = vmatpush1.bf16.msra.mxu0 %v6568_v51  ;;  %3533 = vmatprep.mubr.f32.mxu1 %v7108_v10  ;;  %v1436_v51 = vrot.slane %v7347_v26, %v1403_v23  ;;  %v6627_v23 = vld [vmem:[#allocation9 + $0x214] ss:$8 sps:$4 sm:$0xff]  }
 0x411   :  { %5284 = vmatprep.subr.bf16.mxu0 %v6573_v53 }
 0x414   :  { %5285 = vmatpush1.bf16.msra.mxu0 %v6571_v54 }
 0x415   :  { %5295 = vmatprep.subr.bf16.mxu0 %v6576_v55 }
 0x422   :  { %v3180_v57 = vpop.f32.mrb[8].mxu0 }
 0x423   :  { %v3682_v58 = vpack.c.bf16 %v3180_v57, %v3180_v57  ;;  %v3182_v59 = vpop.f32.mrb[9].mxu0 }
 0x424   :  { %v3683_v60 = vpack.c.bf16 %v3182_v59, %v3182_v59 }
 0x426   :  { %5286 = vmatprep.mubr.bf16.mxu0 %v3683_v60 }
 0x427   :  { %5287 = vmatmul.mubr.bf16.vlgmr.msra.gmra.mrb[16].mxu0 %v3682_v58 }
 0x428   :  { %5296 = vmatpush1.bf16.msra.mxu0 %v6574_v61 }
 0x429   :  { %5297 = vmatprep.subr.bf16.mxu0 %v6579_v56 }
 0x42c   :  { %5298 = vmatpush1.bf16.msra.mxu0 %v6577_v14 }
 0x42d   :  { %5299 = vmatprep.subr.bf16.mxu0 %v6582_v13 }
 0x430   :  { %5300 = vmatpush1.bf16.msra.mxu0 %v6580_v9 }
 0x431   :  { %5301 = vmatprep.subr.bf16.mxu0 %v6585_v62 }
 0x434   :  { %5302 = vmatpush1.bf16.msra.mxu0 %v6583_v63 }
 0x435   :  { %5303 = vmatprep.subr.bf16.mxu0 %v6588_v1 }
 0x438   :  { %5304 = vmatpush1.bf16.msra.mxu0 %v6586_v2 }
 0x439   :  { %5305 = vmatprep.subr.bf16.mxu0 %v6591_v0  ;;  %v6625_v0 = vld [vmem:[#allocation9 + $0x210] ss:$8 sps:$4 sm:$0xff]  }
 0x43c   :  { %5306 = vmatpush1.bf16.msra.mxu0 %v6589_v3  ;;  %v6630_v3 = vld [vmem:[#allocation9 + $0x224] ss:$8 sps:$4 sm:$0xff]  }
 0x43d   :  { %5307 = vmatprep.subr.bf16.mxu0 %v6594_v4  ;;  %v6628_v4 = vld [vmem:[#allocation9 + $0x220] ss:$8 sps:$4 sm:$0xff]  }
 0x440   :  { %5308 = vmatpush1.bf16.msra.mxu0 %v6592_v5  ;;  %v6633_v5 = vld [vmem:[#allocation9 + $0x234] ss:$8 sps:$4 sm:$0xff]  }
 0x441   :  { %v2982_v16 = vpop.f32.mrb[20].mxu1  ;;  %5309 = vmatprep.subr.bf16.mxu0 %v6597_v6  ;;  %v6631_v6 = vld [vmem:[#allocation9 + $0x230] ss:$8 sps:$4 sm:$0xff]  }
 0x442   :  { %v2983_v19 = vadd.f32 %v2982_v16, %v1416_v7  ;;  %v2984_v20 = vpop.f32.mrb[21].mxu1  ;;  %v6637_v16 = vld [vmem:[#allocation9 + $0x250] ss:$8 sps:$4 sm:$0xff]  }
 0x443   :  { %v2985_v21 = vadd.f32 %v2984_v20, %v1420_v11  ;;  %v2986_v24 = vpop.f32.mrb[22].mxu1 }
 0x444   :  { %v2987_v27 = vadd.f32 %v2986_v24, %v1416_v7  ;;  %v2988_v28 = vpop.f32.mrb[23].mxu1  ;;  %5310 = vmatpush1.bf16.msra.mxu0 %v6595_v15  ;;  %v3087_v31 = vmax.f32 %v2983_v19, 0.0  ;;  %v6636_v7 = vld [vmem:[#allocation9 + $0x244] ss:$8 sps:$4 sm:$0xff]   ;;  %v6639_v15 = vld [vmem:[#allocation9 + $0x254] ss:$8 sps:$4 sm:$0xff]  }
 0x445   :  { %v2989_v30 = vadd.f32 %v2988_v28, %v1420_v11  ;;  %5311 = vmatprep.subr.bf16.mxu0 %v6600_v17  ;;  %v3088_v35 = vmax.f32 %v2985_v21, 0.0  ;;  %v6634_v11 = vld [vmem:[#allocation9 + $0x240] ss:$8 sps:$4 sm:$0xff]   ;;  %v6642_v17 = vld [vmem:[#allocation9 + $0x264] ss:$8 sps:$4 sm:$0xff]  }
 0x446   :  { %v3103_v32 = vmax.f32 %v2987_v27, 0.0  ;;  %v6645_v21 = vld [vmem:[#allocation9 + $0x274] ss:$8 sps:$4 sm:$0xff]   ;;  %v6643_v28 = vld [vmem:[#allocation9 + $0x270] ss:$8 sps:$4 sm:$0xff]  }
 0x447   :  { %v3104_v12 = vmax.f32 %v2989_v30, 0.0  ;;  %v6648_v30 = vld [vmem:[#allocation9 + $0x284] ss:$8 sps:$4 sm:$0xff]  }
 0x448   :  { %v6263_v37 = vpack.c.bf16 %v3103_v32, %v3087_v31  ;;  %5312 = vmatpush1.bf16.msra.mxu0 %v6598_v29  ;;  %v6646_v31 = vld [vmem:[#allocation9 + $0x280] ss:$8 sps:$4 sm:$0xff]  }
 0x449   :  { %v6261_v39 = vpack.c.bf16 %v3104_v12, %v3088_v35  ;;  %5313 = vmatprep.subr.bf16.mxu0 %v6603_v8  ;;  %v6651_v35 = vld [vmem:[#allocation9 + $0x294] ss:$8 sps:$4 sm:$0xff]   ;;  %v6649_v12 = vld [vmem:[#allocation9 + $0x290] ss:$8 sps:$4 sm:$0xff]  }
 0x44b   :  { %6262 = vmatprep.subr.bf16.mxu1 %v6261_v39  ;;  %v6657_v39 = vld [vmem:[#allocation9 + $0x2b4] ss:$8 sps:$4 sm:$0xff]  }
 0x44c   :  { %6264 = vmatpush1.bf16.msra.mxu1 %v6263_v37  ;;  %5314 = vmatpush1.bf16.msra.mxu0 %v6601_v38  ;;  %v6654_v37 = vld [vmem:[#allocation9 + $0x2a4] ss:$8 sps:$4 sm:$0xff]   ;;  %v6652_v38 = vld [vmem:[#allocation9 + $0x2a0] ss:$8 sps:$4 sm:$0xff]  }
 0x44d   :  { %5315 = vmatprep.subr.bf16.mxu0 %v6606_v40  ;;  %v6655_v40 = vld [vmem:[#allocation9 + $0x2b0] ss:$8 sps:$4 sm:$0xff]  }
 0x44f   :  { %5982 = vmatmul.mubr.msk.f32.vlgmr.msra.gmra.mrb[32].mxu1 %vm3110_vm0, %v7361_v18 }
 0x450   :  { %5316 = vmatpush1.bf16.msra.mxu0 %v6604_v41  ;;  %3675 = vmatprep.mubr.f32.mxu1 %v7108_v10  ;;  %v1432_v10 = vrot.slane %v7347_v26, %v1399_v22  ;;  %v6660_v41 = vld [vmem:[#allocation9 + $0x2c4] ss:$8 sps:$4 sm:$0xff]  }
 0x451   :  { %5317 = vmatprep.subr.bf16.mxu0 %v6609_v42  ;;  %v6658_v42 = vld [vmem:[#allocation9 + $0x2c0] ss:$8 sps:$4 sm:$0xff]  }
 0x454   :  { %5318 = vmatpush1.bf16.msra.mxu0 %v6607_v43  ;;  %v6663_v43 = vld [vmem:[#allocation9 + $0x2d4] ss:$8 sps:$4 sm:$0xff]  }
 0x455   :  { %5319 = vmatprep.subr.bf16.mxu0 %v6612_v44  ;;  %v6661_v44 = vld [vmem:[#allocation9 + $0x2d0] ss:$8 sps:$4 sm:$0xff]  }
 0x458   :  { %5320 = vmatpush1.bf16.msra.mxu0 %v6610_v45  ;;  %v6666_v45 = vld [vmem:[#allocation9 + $0x2e4] ss:$8 sps:$4 sm:$0xff]  }
 0x459   :  { %5321 = vmatprep.subr.bf16.mxu0 %v6615_v46  ;;  %v6664_v46 = vld [vmem:[#allocation9 + $0x2e0] ss:$8 sps:$4 sm:$0xff]  }
 0x45c   :  { %5322 = vmatpush1.bf16.msra.mxu0 %v6613_v47  ;;  %v6669_v47 = vld [vmem:[#allocation9 + $0x2f4] ss:$8 sps:$4 sm:$0xff]  }
 0x45d   :  { %5323 = vmatprep.subr.bf16.mxu0 %v6618_v25  ;;  %v6667_v25 = vld [vmem:[#allocation9 + $0x2f0] ss:$8 sps:$4 sm:$0xff]  }
 0x460   :  { %5324 = vmatpush1.bf16.msra.mxu0 %v6616_v48  ;;  %v6672_v48 = vld [vmem:[#allocation9 + $0x304] ss:$8 sps:$4 sm:$0xff]  }
 0x461   :  { %5325 = vmatprep.subr.bf16.mxu0 %v6621_v49 }
 0x464   :  { %5326 = vmatpush1.bf16.msra.mxu0 %v6619_v52  ;;  %v6670_v52 = vld [vmem:[#allocation9 + $0x300] ss:$8 sps:$4 sm:$0xff]  }
 0x465   :  { %5336 = vmatprep.subr.bf16.mxu0 %v6624_v50  ;;  %v6675_v50 = vld [vmem:[#allocation9 + $0x314] ss:$8 sps:$4 sm:$0xff]  }
 0x481   :  { %v3068_v53 = vpop.f32.mrb[24].mxu1 }
 0x482   :  { %v3069_v54 = vadd.f32 %v3068_v53, %v1432_v10  ;;  %v3070_v55 = vpop.f32.mrb[25].mxu1  ;;  %v6676_v53 = vld [vmem:[#allocation9 + $0x320] ss:$8 sps:$4 sm:$0xff]  }
 0x483   :  { %v3071_v57 = vadd.f32 %v3070_v55, %v1436_v51  ;;  %v3072_v58 = vpop.f32.mrb[26].mxu1  ;;  %v6679_v55 = vld [vmem:[#allocation9 + $0x330] ss:$8 sps:$4 sm:$0xff]  }
 0x484   :  { %v3073_v59 = vadd.f32 %v3072_v58, %v1432_v10  ;;  %v3074_v60 = vpop.f32.mrb[27].mxu1  ;;  %v3091_v56 = vmax.f32 %v3069_v54, 0.0  ;;  %v6673_v10 = vld [vmem:[#allocation9 + $0x310] ss:$8 sps:$4 sm:$0xff]   ;;  %v6681_v54 = vld [vmem:[#allocation9 + $0x334] ss:$8 sps:$4 sm:$0xff]  }
 0x485   :  { %v3075_v61 = vadd.f32 %v3074_v60, %v1436_v51  ;;  %v3092_v13 = vmax.f32 %v3071_v57, 0.0  ;;  %v6678_v51 = vld [vmem:[#allocation9 + $0x324] ss:$8 sps:$4 sm:$0xff]   ;;  %v6682_v58 = vld [vmem:[#allocation9 + $0x340] ss:$8 sps:$4 sm:$0xff]  }
 0x486   :  { %v3107_v14 = vmax.f32 %v3073_v59, 0.0  ;;  %v6684_v57 = vld [vmem:[#allocation9 + $0x344] ss:$8 sps:$4 sm:$0xff]   ;;  %v6687_v59 = vld [vmem:[#allocation9 + $0x354] ss:$8 sps:$4 sm:$0xff]  }
 0x487   :  { %v3108_v9 = vmax.f32 %v3075_v61, 0.0  ;;  %v6685_v60 = vld [vmem:[#allocation9 + $0x350] ss:$8 sps:$4 sm:$0xff]   ;;  %v6690_v61 = vld [vmem:[#allocation9 + $0x364] ss:$8 sps:$4 sm:$0xff]  }
 0x488   :  { %v6271_v62 = vpack.c.bf16 %v3107_v14, %v3091_v56  ;;  %v6688_v14 = vld [vmem:[#allocation9 + $0x360] ss:$8 sps:$4 sm:$0xff]  }
 0x489   :  { %v6269_v63 = vpack.c.bf16 %v3108_v9, %v3092_v13  ;;  %v3251_v1 = vpop.f32.mrb[28].mxu1  ;;  %v6693_v9 = vld [vmem:[#allocation9 + $0x374] ss:$8 sps:$4 sm:$0xff]  }
 0x48a   :  { %v3253_v22 = vpop.f32.mrb[29].mxu1  ;;  %v3684_v26 = vpack.c.bf16 %v3251_v1, %v3251_v1  ;;  %v6696_v1 = vld [vmem:[#allocation9 + $0x384] ss:$8 sps:$4 sm:$0xff]  }
 0x48b   :  { %v3685_v2 = vpack.c.bf16 %v3253_v22, %v3253_v22  ;;  %6270 = vmatprep.subr.bf16.mxu1 %v6269_v63  ;;  %v6691_v63 = vld [vmem:[#allocation9 + $0x370] ss:$8 sps:$4 sm:$0xff]   ;;  %v6694_v22 = vld [vmem:[#allocation9 + $0x380] ss:$8 sps:$4 sm:$0xff]  }
 0x48c   :  { %6272 = vmatpush1.bf16.msra.mxu1 %v6271_v62 }
 0x48d   :  { %5327 = vmatprep.mubr.bf16.mxu0 %v3685_v2  ;;  %v6699_v2 = vld [vmem:[#allocation9 + $0x394] ss:$8 sps:$4 sm:$0xff]  }
 0x48e   :  { %5328 = vmatmul.mubr.bf16.vlgmr.msra.gmra.mrb[16].mxu0 %v3684_v26  ;;  %v6702_v26 = vld [vmem:[#allocation9 + $0x3a4] ss:$8 sps:$4 sm:$0xff]  }
 0x48f   :  { %5337 = vmatpush1.bf16.msra.mxu0 %v6622_v33  ;;  %5984 = vmatmul.mubr.msk.f32.vlgmr.msra.gmra.mrb[34].mxu1 %vm3110_vm0, %v7361_v18  ;;  %v6640_v18 = vld [vmem:[#allocation9 + $0x260] ss:$8 sps:$4 sm:$0xff]   ;;  %v6697_v33 = vld [vmem:[#allocation9 + $0x390] ss:$8 sps:$4 sm:$0xff]  }
 0x490   :  { %5338 = vmatprep.subr.bf16.mxu0 %v6627_v23  ;;  %v6700_v23 = vld [vmem:[#allocation9 + $0x3a0] ss:$8 sps:$4 sm:$0xff]  }
 0x493   :  { %5339 = vmatpush1.bf16.msra.mxu0 %v6625_v0  ;;  %v6705_v0 = vld [vmem:[#allocation9 + $0x3b4] ss:$8 sps:$4 sm:$0xff]  }
 0x494   :  { %5340 = vmatprep.subr.bf16.mxu0 %v6630_v3  ;;  %v6703_v3 = vld [vmem:[#allocation9 + $0x3b0] ss:$8 sps:$4 sm:$0xff]  }
 0x497   :  { %5341 = vmatpush1.bf16.msra.mxu0 %v6628_v4  ;;  %v6708_v4 = vld [vmem:[#allocation9 + $0x3c4] ss:$8 sps:$4 sm:$0xff]  }
 0x498   :  { %5342 = vmatprep.subr.bf16.mxu0 %v6633_v5  ;;  %v6706_v5 = vld [vmem:[#allocation9 + $0x3c0] ss:$8 sps:$4 sm:$0xff]  }
 0x49b   :  { %5343 = vmatpush1.bf16.msra.mxu0 %v6631_v6  ;;  %v6711_v6 = vld [vmem:[#allocation9 + $0x3d4] ss:$8 sps:$4 sm:$0xff]  }
 0x49c   :  { %5344 = vmatprep.subr.bf16.mxu0 %v6636_v7  ;;  %v6709_v7 = vld [vmem:[#allocation9 + $0x3d0] ss:$8 sps:$4 sm:$0xff]  }
 0x49f   :  { %5345 = vmatpush1.bf16.msra.mxu0 %v6634_v11  ;;  %v6714_v11 = vld [vmem:[#allocation9 + $0x3e4] ss:$8 sps:$4 sm:$0xff]  }
 0x4a0   :  { %5346 = vmatprep.subr.bf16.mxu0 %v6639_v15  ;;  %v6712_v15 = vld [vmem:[#allocation9 + $0x3e0] ss:$8 sps:$4 sm:$0xff]  }
 0x4a2   :  { %v3322_v19 = vpop.f32.mrb[10].mxu0 }
 0x4a3   :  { %5347 = vmatpush1.bf16.msra.mxu0 %v6637_v16  ;;  %v3324_v20 = vpop.f32.mrb[11].mxu0  ;;  %v3686_v49 = vpack.c.bf16 %v3322_v19, %v3322_v19  ;;  %v6717_v16 = vld [vmem:[#allocation9 + $0x3f4] ss:$8 sps:$4 sm:$0xff]   ;;  %v6720_v19 = vld [vmem:[#allocation9 + $0x404] ss:$8 sps:$4 sm:$0xff]  }
 0x4a4   :  { %5348 = vmatprep.subr.bf16.mxu0 %v6642_v17  ;;  %v3687_v24 = vpack.c.bf16 %v3324_v20, %v3324_v20  ;;  %v6715_v17 = vld [vmem:[#allocation9 + $0x3f0] ss:$8 sps:$4 sm:$0xff]   ;;  %v6718_v20 = vld [vmem:[#allocation9 + $0x400] ss:$8 sps:$4 sm:$0xff]  }
 0x4a6   :  { %5368 = vmatprep.mubr.bf16.mxu0 %v3687_v24  ;;  %v7439_v27 = vpop.f32.mrb[12].mxu0 }
 0x4a7   :  { %5349 = vmatpush1.bf16.msra.mxu0 %v6640_v18  ;;  %v7441_v29 = vpop.f32.mrb[13].mxu0 }
 0x4a8   :  { %5350 = vmatprep.subr.bf16.mxu0 %v6645_v21  ;;  %v6723_v21 = vld [vmem:[#allocation9 + $0x414] ss:$8 sps:$4 sm:$0xff]   ;;  %v3691_v24 = vpack.c.bf16 %v7441_v29, %v7441_v29  ;;  %v6733_v29 = vld [vmem:[#allocation9 + $0x450] ss:$8 sps:$4 sm:$0xff]  }
 0x4aa   :  { %v7443_v8 = vpop.f32.mrb[14].mxu0 }
 0x4ab   :  { %5351 = vmatpush1.bf16.msra.mxu0 %v6643_v28  ;;  %v7445_v32 = vpop.f32.mrb[15].mxu0  ;;  %v6721_v28 = vld [vmem:[#allocation9 + $0x410] ss:$8 sps:$4 sm:$0xff]  }
 0x4ac   :  { %5352 = vmatprep.subr.bf16.mxu0 %v6648_v30  ;;  %v6726_v30 = vld [vmem:[#allocation9 + $0x424] ss:$8 sps:$4 sm:$0xff]  }
 0x4af   :  { %5353 = vmatpush1.bf16.msra.mxu0 %v6646_v31  ;;  %v6724_v31 = vld [vmem:[#allocation9 + $0x420] ss:$8 sps:$4 sm:$0xff]  }
 0x4b0   :  { %5354 = vmatprep.subr.bf16.mxu0 %v6651_v35  ;;  %v6729_v35 = vld [vmem:[#allocation9 + $0x434] ss:$8 sps:$4 sm:$0xff]  }
 0x4b3   :  { %5355 = vmatpush1.bf16.msra.mxu0 %v6649_v12  ;;  %v6727_v12 = vld [vmem:[#allocation9 + $0x430] ss:$8 sps:$4 sm:$0xff]  }
 0x4b4   :  { %5356 = vmatprep.subr.bf16.mxu0 %v6654_v37  ;;  %v6732_v37 = vld [vmem:[#allocation9 + $0x444] ss:$8 sps:$4 sm:$0xff]  }
 0x4b7   :  { %5357 = vmatpush1.bf16.msra.mxu0 %v6652_v38  ;;  %v6730_v38 = vld [vmem:[#allocation9 + $0x440] ss:$8 sps:$4 sm:$0xff]  }
 0x4b8   :  { %5358 = vmatprep.subr.bf16.mxu0 %v6657_v39  ;;  %v6735_v39 = vld [vmem:[#allocation9 + $0x454] ss:$8 sps:$4 sm:$0xff]  }
 0x4bb   :  { %5359 = vmatpush1.bf16.msra.mxu0 %v6655_v40  ;;  %v6738_v40 = vld [vmem:[#allocation9 + $0x464] ss:$8 sps:$4 sm:$0xff]  }
 0x4bc   :  { %5360 = vmatprep.subr.bf16.mxu0 %v6660_v41 }
 0x4bf   :  { %5361 = vmatpush1.bf16.msra.mxu0 %v6658_v42  ;;  %v6736_v42 = vld [vmem:[#allocation9 + $0x460] ss:$8 sps:$4 sm:$0xff]  }
 0x4c0   :  { %5362 = vmatprep.subr.bf16.mxu0 %v6663_v43 }
 0x4c3   :  { %5363 = vmatpush1.bf16.msra.mxu0 %v6661_v44  ;;  %v6741_v44 = vld [vmem:[#allocation9 + $0x474] ss:$8 sps:$4 sm:$0xff]  }
 0x4c4   :  { %5364 = vmatprep.subr.bf16.mxu0 %v6666_v45  ;;  %v6739_v45 = vld [vmem:[#allocation9 + $0x470] ss:$8 sps:$4 sm:$0xff]  }
 0x4c7   :  { %5365 = vmatpush1.bf16.msra.mxu0 %v6664_v46  ;;  %v6744_v46 = vld [vmem:[#allocation9 + $0x484] ss:$8 sps:$4 sm:$0xff]  }
 0x4c8   :  { %5366 = vmatprep.subr.bf16.mxu0 %v6669_v47  ;;  %v6742_v47 = vld [vmem:[#allocation9 + $0x480] ss:$8 sps:$4 sm:$0xff]  }
 0x4cb   :  { %5367 = vmatpush1.bf16.msra.mxu0 %v6667_v25  ;;  %v6747_v25 = vld [vmem:[#allocation9 + $0x494] ss:$8 sps:$4 sm:$0xff]  }
 0x4cc   :  { %5377 = vmatprep.subr.bf16.mxu0 %v6672_v48  ;;  %v6745_v48 = vld [vmem:[#allocation9 + $0x490] ss:$8 sps:$4 sm:$0xff]  }
 0x4ce   :  { %5369 = vmatmul.mubr.bf16.vlgmr.msra.gmra.mrb[16].mxu0 %v3686_v49  ;;  %v6750_v49 = vld [vmem:[#allocation9 + $0x4a4] ss:$8 sps:$4 sm:$0xff]  }
 0x4cf   :  { %5378 = vmatpush1.bf16.msra.mxu0 %v6670_v52  ;;  %v6748_v52 = vld [vmem:[#allocation9 + $0x4a0] ss:$8 sps:$4 sm:$0xff]  }
 0x4d0   :  { %5379 = vmatprep.subr.bf16.mxu0 %v6675_v50  ;;  %v6753_v50 = vld [vmem:[#allocation9 + $0x4b4] ss:$8 sps:$4 sm:$0xff]  }
 0x4d3   :  { %5380 = vmatpush1.bf16.msra.mxu0 %v6673_v10  ;;  %v6751_v10 = vld [vmem:[#allocation9 + $0x4b0] ss:$8 sps:$4 sm:$0xff]  }
 0x4d4   :  { %5381 = vmatprep.subr.bf16.mxu0 %v6678_v51  ;;  %v6756_v51 = vld [vmem:[#allocation9 + $0x4c4] ss:$8 sps:$4 sm:$0xff]  }
 0x4d7   :  { %5382 = vmatpush1.bf16.msra.mxu0 %v6676_v53  ;;  %v6754_v53 = vld [vmem:[#allocation9 + $0x4c0] ss:$8 sps:$4 sm:$0xff]  }
 0x4d8   :  { %5383 = vmatprep.subr.bf16.mxu0 %v6681_v54  ;;  %v6759_v54 = vld [vmem:[#allocation9 + $0x4d4] ss:$8 sps:$4 sm:$0xff]  }
 0x4db   :  { %5384 = vmatpush1.bf16.msra.mxu0 %v6679_v55  ;;  %v6757_v55 = vld [vmem:[#allocation9 + $0x4d0] ss:$8 sps:$4 sm:$0xff]  }
 0x4dc   :  { %5385 = vmatprep.subr.bf16.mxu0 %v6684_v57  ;;  %v6762_v57 = vld [vmem:[#allocation9 + $0x4e4] ss:$8 sps:$4 sm:$0xff]  }
 0x4df   :  { %5386 = vmatpush1.bf16.msra.mxu0 %v6682_v58  ;;  %v6760_v58 = vld [vmem:[#allocation9 + $0x4e0] ss:$8 sps:$4 sm:$0xff]  }
 0x4e0   :  { %5387 = vmatprep.subr.bf16.mxu0 %v6687_v59  ;;  %v6765_v59 = vld [vmem:[#allocation9 + $0x4f4] ss:$8 sps:$4 sm:$0xff]  }
 0x4e2   :  { %v3393_v56 = vpop.f32.mrb[30].mxu1 }
 0x4e3   :  { %5388 = vmatpush1.bf16.msra.mxu0 %v6685_v60  ;;  %v3395_v13 = vpop.f32.mrb[31].mxu1  ;;  %v3688_v18 = vpack.c.bf16 %v3393_v56, %v3393_v56  ;;  %v6763_v60 = vld [vmem:[#allocation9 + $0x4f0] ss:$8 sps:$4 sm:$0xff]   ;;  %v6766_v56 = vld [vmem:[#allocation9 + $0x500] ss:$8 sps:$4 sm:$0xff]  }
 0x4e4   :  { %5389 = vmatprep.subr.bf16.mxu0 %v6690_v61  ;;  %v3689_v62 = vpack.c.bf16 %v3395_v13, %v3395_v13  ;;  %v6768_v61 = vld [vmem:[#allocation9 + $0x504] ss:$8 sps:$4 sm:$0xff]   ;;  %v3690_v13 = vpack.c.bf16 %v7439_v27, %v7439_v27  ;;  %v6783_v27 = vld [vmem:[#allocation9 + $0x554] ss:$8 sps:$4 sm:$0xff]  }
 0x4e6   :  { %5409 = vmatprep.mubr.bf16.mxu0 %v3689_v62  ;;  %v6769_v62 = vld [vmem:[#allocation9 + $0x510] ss:$8 sps:$4 sm:$0xff]  }
 0x4e7   :  { %5390 = vmatpush1.bf16.msra.mxu0 %v6688_v14 }
 0x4e8   :  { %5391 = vmatprep.subr.bf16.mxu0 %v6693_v9  ;;  %v6771_v9 = vld [vmem:[#allocation9 + $0x514] ss:$8 sps:$4 sm:$0xff]  }
 0x4eb   :  { %5392 = vmatpush1.bf16.msra.mxu0 %v6691_v63  ;;  %v6774_v63 = vld [vmem:[#allocation9 + $0x524] ss:$8 sps:$4 sm:$0xff]  }
 0x4ec   :  { %5393 = vmatprep.subr.bf16.mxu0 %v6696_v1  ;;  %v6772_v1 = vld [vmem:[#allocation9 + $0x520] ss:$8 sps:$4 sm:$0xff]  }
 0x4ef   :  { %5394 = vmatpush1.bf16.msra.mxu0 %v6694_v22  ;;  %v6777_v22 = vld [vmem:[#allocation9 + $0x534] ss:$8 sps:$4 sm:$0xff]  }
 0x4f0   :  { %5395 = vmatprep.subr.bf16.mxu0 %v6699_v2  ;;  %v6775_v2 = vld [vmem:[#allocation9 + $0x530] ss:$8 sps:$4 sm:$0xff]  }
 0x4f3   :  { %5396 = vmatpush1.bf16.msra.mxu0 %v6697_v33  ;;  %v6780_v33 = vld [vmem:[#allocation9 + $0x544] ss:$8 sps:$4 sm:$0xff]  }
 0x4f4   :  { %5397 = vmatprep.subr.bf16.mxu0 %v6702_v26  ;;  %v6778_v26 = vld [vmem:[#allocation9 + $0x540] ss:$8 sps:$4 sm:$0xff]  }
 0x4f7   :  { %5398 = vmatpush1.bf16.msra.mxu0 %v6700_v23  ;;  %v6781_v23 = vld [vmem:[#allocation9 + $0x550] ss:$8 sps:$4 sm:$0xff]  }
 0x4f8   :  { %5399 = vmatprep.subr.bf16.mxu0 %v6705_v0  ;;  %v6786_v0 = vld [vmem:[#allocation9 + $0x564] ss:$8 sps:$4 sm:$0xff]  }
 0x4fb   :  { %5400 = vmatpush1.bf16.msra.mxu0 %v6703_v3  ;;  %v6784_v3 = vld [vmem:[#allocation9 + $0x560] ss:$8 sps:$4 sm:$0xff]  }
 0x4fc   :  { %5401 = vmatprep.subr.bf16.mxu0 %v6708_v4  ;;  %v6789_v4 = vld [vmem:[#allocation9 + $0x574] ss:$8 sps:$4 sm:$0xff]  }
 0x4ff   :  { %5402 = vmatpush1.bf16.msra.mxu0 %v6706_v5  ;;  %v6787_v5 = vld [vmem:[#allocation9 + $0x570] ss:$8 sps:$4 sm:$0xff]  }
 0x500   :  { %5403 = vmatprep.subr.bf16.mxu0 %v6711_v6  ;;  %v6792_v6 = vld [vmem:[#allocation9 + $0x584] ss:$8 sps:$4 sm:$0xff]  }
 0x503   :  { %5404 = vmatpush1.bf16.msra.mxu0 %v6709_v7  ;;  %v6790_v7 = vld [vmem:[#allocation9 + $0x580] ss:$8 sps:$4 sm:$0xff]  }
 0x504   :  { %5405 = vmatprep.subr.bf16.mxu0 %v6714_v11  ;;  %v6795_v11 = vld [vmem:[#allocation9 + $0x594] ss:$8 sps:$4 sm:$0xff]  }
 0x507   :  { %5406 = vmatpush1.bf16.msra.mxu0 %v6712_v15  ;;  %v6793_v15 = vld [vmem:[#allocation9 + $0x590] ss:$8 sps:$4 sm:$0xff]  }
 0x508   :  { %5407 = vmatprep.subr.bf16.mxu0 %v6717_v16  ;;  %v6798_v16 = vld [vmem:[#allocation9 + $0x5a4] ss:$8 sps:$4 sm:$0xff]  }
 0x50b   :  { %5408 = vmatpush1.bf16.msra.mxu0 %v6715_v17  ;;  %v6796_v17 = vld [vmem:[#allocation9 + $0x5a0] ss:$8 sps:$4 sm:$0xff]  }
 0x50c   :  { %5418 = vmatprep.subr.bf16.mxu0 %v6720_v19  ;;  %v6801_v19 = vld [vmem:[#allocation9 + $0x5b4] ss:$8 sps:$4 sm:$0xff]  }
 0x50e   :  { %5410 = vmatmul.mubr.bf16.vlgmr.msra.gmra.mrb[16].mxu0 %v3688_v18  ;;  %v6799_v18 = vld [vmem:[#allocation9 + $0x5b0] ss:$8 sps:$4 sm:$0xff]  }
 0x50f   :  { %5419 = vmatpush1.bf16.msra.mxu0 %v6718_v20  ;;  %5450 = vmatprep.mubr.bf16.mxu0 %v3691_v24  ;;  %v6804_v20 = vld [vmem:[#allocation9 + $0x5c4] ss:$8 sps:$4 sm:$0xff]   ;;  %v6807_v24 = vld [vmem:[#allocation9 + $0x5d4] ss:$8 sps:$4 sm:$0xff]  }
 0x510   :  { %5420 = vmatprep.subr.bf16.mxu0 %v6723_v21  ;;  %v6802_v21 = vld [vmem:[#allocation9 + $0x5c0] ss:$8 sps:$4 sm:$0xff]  }
 0x513   :  { %5421 = vmatpush1.bf16.msra.mxu0 %v6721_v28  ;;  %v6805_v28 = vld [vmem:[#allocation9 + $0x5d0] ss:$8 sps:$4 sm:$0xff]  }
 0x514   :  { %5422 = vmatprep.subr.bf16.mxu0 %v6726_v30  ;;  %v6810_v30 = vld [vmem:[#allocation9 + $0x5e4] ss:$8 sps:$4 sm:$0xff]  }
 0x517   :  { %5423 = vmatpush1.bf16.msra.mxu0 %v6724_v31  ;;  %v6808_v31 = vld [vmem:[#allocation9 + $0x5e0] ss:$8 sps:$4 sm:$0xff]  }
 0x518   :  { %5424 = vmatprep.subr.bf16.mxu0 %v6729_v35  ;;  %v6813_v35 = vld [vmem:[#allocation9 + $0x5f4] ss:$8 sps:$4 sm:$0xff]  }
 0x51b   :  { %5425 = vmatpush1.bf16.msra.mxu0 %v6727_v12  ;;  %v6811_v12 = vld [vmem:[#allocation9 + $0x5f0] ss:$8 sps:$4 sm:$0xff]  }
 0x51c   :  { %5426 = vmatprep.subr.bf16.mxu0 %v6732_v37 }
 0x51f   :  { %5427 = vmatpush1.bf16.msra.mxu0 %v6730_v38  ;;  %v6816_v38 = vld [vmem:[#allocation9 + $0x604] ss:$8 sps:$4 sm:$0xff]  }
 0x520   :  { %5428 = vmatprep.subr.bf16.mxu0 %v6735_v39 }
 0x522   :  { %v7449_v41 = vpop.f32.mrb[32].mxu1 }
 0x523   :  { %5429 = vmatpush1.bf16.msra.mxu0 %v6733_v29  ;;  %v3537_v43 = vpop.f32.mrb[33].mxu1  ;;  %v3692_v29 = vpack.c.bf16 %v7449_v41, %v7449_v41  ;;  %v6825_v41 = vld [vmem:[#allocation9 + $0x634] ss:$8 sps:$4 sm:$0xff]  }
 0x524   :  { %5430 = vmatprep.subr.bf16.mxu0 %v6738_v40  ;;  %v3693_v14 = vpack.c.bf16 %v3537_v43, %v3537_v43  ;;  %v6814_v40 = vld [vmem:[#allocation9 + $0x600] ss:$8 sps:$4 sm:$0xff]   ;;  %v3695_v43 = vpack.c.bf16 %v7445_v32, %v7445_v32 }
 0x525   :  { %v6826_v32 = vld [vmem:[#allocation9 + $0x640] ss:$8 sps:$4 sm:$0xff]  }
 0x527   :  { %5431 = vmatpush1.bf16.msra.mxu0 %v6736_v42  ;;  %v6819_v42 = vld [vmem:[#allocation9 + $0x614] ss:$8 sps:$4 sm:$0xff]  }
 0x528   :  { %5432 = vmatprep.subr.bf16.mxu0 %v6741_v44  ;;  %v3954_v44 = vld [vmem:[#allocation13] sm:$0xff] }
 0x52b   :  { %5433 = vmatpush1.bf16.msra.mxu0 %v6739_v45  ;;  %v6817_v45 = vld [vmem:[#allocation9 + $0x610] ss:$8 sps:$4 sm:$0xff]  }
 0x52c   :  { %5434 = vmatprep.subr.bf16.mxu0 %v6744_v46  ;;  %v6822_v46 = vld [vmem:[#allocation9 + $0x624] ss:$8 sps:$4 sm:$0xff]  }
 0x52f   :  { %5435 = vmatpush1.bf16.msra.mxu0 %v6742_v47  ;;  %v7109_v47 = vmov 0  }
 0x530   :  { %5436 = vmatprep.subr.bf16.mxu0 %v6747_v25  ;;  %6333 = vset.pattern.permute.xlu0 %v7109_v47  ;;  %v6820_v25 = vld [vmem:[#allocation9 + $0x620] ss:$8 sps:$4 sm:$0xff]   ;;  %v6907_v47 = vld [vmem:[#allocation9 + $0x7f0] ss:$8 sps:$4 sm:$0xff]  }
 0x531   :  { %3958 = vperm.xlu0 %6333, %v3954_v44   ;;  %v6906_v44 = vld [vmem:[#allocation9 + $0x7e4] ss:$8 sps:$4 sm:$0xff]  }
 0x533   :  { %5437 = vmatpush1.bf16.msra.mxu0 %v6745_v48  ;;  %v6823_v48 = vld [vmem:[#allocation9 + $0x630] ss:$8 sps:$4 sm:$0xff]  }
 0x534   :  { %5438 = vmatprep.subr.bf16.mxu0 %v6750_v49  ;;  %v6828_v49 = vld [vmem:[#allocation9 + $0x644] ss:$8 sps:$4 sm:$0xff]  }
 0x537   :  { %5439 = vmatpush1.bf16.msra.mxu0 %v6748_v52  ;;  %v6831_v52 = vld [vmem:[#allocation9 + $0x654] ss:$8 sps:$4 sm:$0xff]  }
 0x538   :  { %5440 = vmatprep.subr.bf16.mxu0 %v6753_v50  ;;  %v6829_v50 = vld [vmem:[#allocation9 + $0x650] ss:$8 sps:$4 sm:$0xff]  }
 0x53b   :  { %5441 = vmatpush1.bf16.msra.mxu0 %v6751_v10  ;;  %v6834_v10 = vld [vmem:[#allocation9 + $0x664] ss:$8 sps:$4 sm:$0xff]  }
 0x53c   :  { %5442 = vmatprep.subr.bf16.mxu0 %v6756_v51  ;;  %v6832_v51 = vld [vmem:[#allocation9 + $0x660] ss:$8 sps:$4 sm:$0xff]  }
 0x53f   :  { %5443 = vmatpush1.bf16.msra.mxu0 %v6754_v53  ;;  %v6837_v53 = vld [vmem:[#allocation9 + $0x674] ss:$8 sps:$4 sm:$0xff]  }
 0x540   :  { %5444 = vmatprep.subr.bf16.mxu0 %v6759_v54  ;;  %v6835_v54 = vld [vmem:[#allocation9 + $0x670] ss:$8 sps:$4 sm:$0xff]  }
 0x543   :  { %5445 = vmatpush1.bf16.msra.mxu0 %v6757_v55  ;;  %v6840_v55 = vld [vmem:[#allocation9 + $0x684] ss:$8 sps:$4 sm:$0xff]  }
 0x544   :  { %5446 = vmatprep.subr.bf16.mxu0 %v6762_v57  ;;  %v6838_v57 = vld [vmem:[#allocation9 + $0x680] ss:$8 sps:$4 sm:$0xff]  }
 0x547   :  { %5447 = vmatpush1.bf16.msra.mxu0 %v6760_v58  ;;  %v6843_v58 = vld [vmem:[#allocation9 + $0x694] ss:$8 sps:$4 sm:$0xff]  }
 0x548   :  { %5448 = vmatprep.subr.bf16.mxu0 %v6765_v59  ;;  %v6841_v59 = vld [vmem:[#allocation9 + $0x690] ss:$8 sps:$4 sm:$0xff]  }
 0x54b   :  { %5449 = vmatpush1.bf16.msra.mxu0 %v6763_v60  ;;  %v6846_v60 = vld [vmem:[#allocation9 + $0x6a4] ss:$8 sps:$4 sm:$0xff]  }
 0x54c   :  { %5459 = vmatprep.subr.bf16.mxu0 %v6768_v61  ;;  %v6844_v61 = vld [vmem:[#allocation9 + $0x6a0] ss:$8 sps:$4 sm:$0xff]  }
 0x54e   :  { %5451 = vmatmul.mubr.bf16.vlgmr.msra.gmra.mrb[16].mxu0 %v3690_v13  ;;  %v6852_v13 = vld [vmem:[#allocation9 + $0x6c4] ss:$8 sps:$4 sm:$0xff]  }
 0x54f   :  { %5460 = vmatpush1.bf16.msra.mxu0 %v6766_v56  ;;  %5491 = vmatprep.mubr.bf16.mxu0 %v3693_v14  ;;  %v6849_v56 = vld [vmem:[#allocation9 + $0x6b4] ss:$8 sps:$4 sm:$0xff]   ;;  %v6847_v14 = vld [vmem:[#allocation9 + $0x6b0] ss:$8 sps:$4 sm:$0xff]  }
 0x550   :  { %5461 = vmatprep.subr.bf16.mxu0 %v6771_v9  ;;  %v6850_v9 = vld [vmem:[#allocation9 + $0x6c0] ss:$8 sps:$4 sm:$0xff]  }
 0x553   :  { %5462 = vmatpush1.bf16.msra.mxu0 %v6769_v62  ;;  %v6855_v62 = vld [vmem:[#allocation9 + $0x6d4] ss:$8 sps:$4 sm:$0xff]  }
 0x554   :  { %5463 = vmatprep.subr.bf16.mxu0 %v6774_v63  ;;  %v6853_v63 = vld [vmem:[#allocation9 + $0x6d0] ss:$8 sps:$4 sm:$0xff]  }
 0x557   :  { %5464 = vmatpush1.bf16.msra.mxu0 %v6772_v1  ;;  %v6858_v1 = vld [vmem:[#allocation9 + $0x6e4] ss:$8 sps:$4 sm:$0xff]  }
 0x558   :  { %5465 = vmatprep.subr.bf16.mxu0 %v6777_v22  ;;  %v6856_v22 = vld [vmem:[#allocation9 + $0x6e0] ss:$8 sps:$4 sm:$0xff]  }
 0x55b   :  { %5466 = vmatpush1.bf16.msra.mxu0 %v6775_v2  ;;  %v6861_v2 = vld [vmem:[#allocation9 + $0x6f4] ss:$8 sps:$4 sm:$0xff]  }
 0x55c   :  { %5467 = vmatprep.subr.bf16.mxu0 %v6780_v33  ;;  %v6859_v33 = vld [vmem:[#allocation9 + $0x6f0] ss:$8 sps:$4 sm:$0xff]  }
 0x55f   :  { %5468 = vmatpush1.bf16.msra.mxu0 %v6778_v26  ;;  %v6864_v26 = vld [vmem:[#allocation9 + $0x704] ss:$8 sps:$4 sm:$0xff]  }
 0x560   :  { %5469 = vmatprep.subr.bf16.mxu0 %v6783_v27  ;;  %v6862_v27 = vld [vmem:[#allocation9 + $0x700] ss:$8 sps:$4 sm:$0xff]  }
 0x562   :  { %v7453_v37 = vpop.f32.mrb[34].mxu1 }
 0x563   :  { %5470 = vmatpush1.bf16.msra.mxu0 %v6781_v23  ;;  %v7455_v39 = vpop.f32.mrb[35].mxu1 }
 0x564   :  { %5471 = vmatprep.subr.bf16.mxu0 %v6786_v0  ;;  %v3697_v23 = vpack.c.bf16 %v7455_v39, %v7455_v39  ;;  %v3694_v0 = vpack.c.bf16 %v7443_v8, %v7443_v8  ;;  %v6879_v8 = vld [vmem:[#allocation9 + $0x754] ss:$8 sps:$4 sm:$0xff]   ;;  %v6895_v39 = vld [vmem:[#allocation9 + $0x7b0] ss:$8 sps:$4 sm:$0xff]  }
 0x567   :  { %5472 = vmatpush1.bf16.msra.mxu0 %v6784_v3  ;;  %v6867_v3 = vld [vmem:[#allocation9 + $0x714] ss:$8 sps:$4 sm:$0xff]  }
 0x568   :  { %5473 = vmatprep.subr.bf16.mxu0 %v6789_v4  ;;  %v6865_v4 = vld [vmem:[#allocation9 + $0x710] ss:$8 sps:$4 sm:$0xff]  }
 0x56b   :  { %5474 = vmatpush1.bf16.msra.mxu0 %v6787_v5  ;;  %v6870_v5 = vld [vmem:[#allocation9 + $0x724] ss:$8 sps:$4 sm:$0xff]  }
 0x56c   :  { %5475 = vmatprep.subr.bf16.mxu0 %v6792_v6  ;;  %v6868_v6 = vld [vmem:[#allocation9 + $0x720] ss:$8 sps:$4 sm:$0xff]  }
 0x56f   :  { %5476 = vmatpush1.bf16.msra.mxu0 %v6790_v7  ;;  %v6873_v7 = vld [vmem:[#allocation9 + $0x734] ss:$8 sps:$4 sm:$0xff]  }
 0x570   :  { %5477 = vmatprep.subr.bf16.mxu0 %v6795_v11  ;;  %v6871_v11 = vld [vmem:[#allocation9 + $0x730] ss:$8 sps:$4 sm:$0xff]  }
 0x573   :  { %5478 = vmatpush1.bf16.msra.mxu0 %v6793_v15  ;;  %v6876_v15 = vld [vmem:[#allocation9 + $0x744] ss:$8 sps:$4 sm:$0xff]  }
 0x574   :  { %5479 = vmatprep.subr.bf16.mxu0 %v6798_v16  ;;  %v6874_v16 = vld [vmem:[#allocation9 + $0x740] ss:$8 sps:$4 sm:$0xff]  }
 0x577   :  { %5480 = vmatpush1.bf16.msra.mxu0 %v6796_v17  ;;  %v6877_v17 = vld [vmem:[#allocation9 + $0x750] ss:$8 sps:$4 sm:$0xff]  }
 0x578   :  { %5481 = vmatprep.subr.bf16.mxu0 %v6801_v19  ;;  %v6882_v19 = vld [vmem:[#allocation9 + $0x764] ss:$8 sps:$4 sm:$0xff]  }
 0x57b   :  { %5482 = vmatpush1.bf16.msra.mxu0 %v6799_v18  ;;  %v6880_v18 = vld [vmem:[#allocation9 + $0x760] ss:$8 sps:$4 sm:$0xff]  }
 0x57c   :  { %5483 = vmatprep.subr.bf16.mxu0 %v6804_v20  ;;  %v6885_v20 = vld [vmem:[#allocation9 + $0x774] ss:$8 sps:$4 sm:$0xff]  }
 0x57f   :  { %5484 = vmatpush1.bf16.msra.mxu0 %v6802_v21  ;;  %v6883_v21 = vld [vmem:[#allocation9 + $0x770] ss:$8 sps:$4 sm:$0xff]  }
 0x580   :  { %5485 = vmatprep.subr.bf16.mxu0 %v6807_v24  ;;  %v6888_v24 = vld [vmem:[#allocation9 + $0x784] ss:$8 sps:$4 sm:$0xff]  }
 0x583   :  { %5486 = vmatpush1.bf16.msra.mxu0 %v6805_v28  ;;  %v6886_v28 = vld [vmem:[#allocation9 + $0x780] ss:$8 sps:$4 sm:$0xff]  }
 0x584   :  { %5487 = vmatprep.subr.bf16.mxu0 %v6810_v30  ;;  %v6891_v30 = vld [vmem:[#allocation9 + $0x794] ss:$8 sps:$4 sm:$0xff]  }
 0x587   :  { %5488 = vmatpush1.bf16.msra.mxu0 %v6808_v31  ;;  %v6889_v31 = vld [vmem:[#allocation9 + $0x790] ss:$8 sps:$4 sm:$0xff]  }
 0x588   :  { %5489 = vmatprep.subr.bf16.mxu0 %v6813_v35  ;;  %v6894_v35 = vld [vmem:[#allocation9 + $0x7a4] ss:$8 sps:$4 sm:$0xff]  }
 0x58b   :  { %5490 = vmatpush1.bf16.msra.mxu0 %v6811_v12  ;;  %v6892_v12 = vld [vmem:[#allocation9 + $0x7a0] ss:$8 sps:$4 sm:$0xff]  }
 0x58c   :  { %5500 = vmatprep.subr.bf16.mxu0 %v6816_v38  ;;  %v6897_v38 = vld [vmem:[#allocation9 + $0x7b4] ss:$8 sps:$4 sm:$0xff]  }
 0x58e   :  { %5492 = vmatmul.mubr.bf16.vlgmr.msra.gmra.mrb[16].mxu0 %v3692_v29  ;;  %v6900_v29 = vld [vmem:[#allocation9 + $0x7c4] ss:$8 sps:$4 sm:$0xff]  }
 0x58f   :  { %5501 = vmatpush1.bf16.msra.mxu0 %v6814_v40  ;;  %5532 = vmatprep.mubr.bf16.mxu0 %v3695_v43  ;;  %v6898_v40 = vld [vmem:[#allocation9 + $0x7c0] ss:$8 sps:$4 sm:$0xff]   ;;  %v6901_v43 = vld [vmem:[#allocation9 + $0x7d0] ss:$8 sps:$4 sm:$0xff]  }
 0x590   :  { %5502 = vmatprep.subr.bf16.mxu0 %v6819_v42  ;;  %v6903_v42 = vld [vmem:[#allocation9 + $0x7d4] ss:$8 sps:$4 sm:$0xff]  }
 0x593   :  { %5503 = vmatpush1.bf16.msra.mxu0 %v6817_v45  ;;  %v6904_v45 = vld [vmem:[#allocation9 + $0x7e0] ss:$8 sps:$4 sm:$0xff]  }
 0x594   :  { %5504 = vmatprep.subr.bf16.mxu0 %v6822_v46  ;;  %v6909_v46 = vld [vmem:[#allocation9 + $0x7f4] ss:$8 sps:$4 sm:$0xff]  }
 0x597   :  { %5505 = vmatpush1.bf16.msra.mxu0 %v6820_v25  ;;  %v3696_v25 = vpack.c.bf16 %v7453_v37, %v7453_v37 }
 0x598   :  { %5506 = vmatprep.subr.bf16.mxu0 %v6825_v41  ;;  %v3955_v41 = vld [vmem:[#allocation10] sm:$0x3] }
 0x59b   :  { %5507 = vmatpush1.bf16.msra.mxu0 %v6823_v48  ;;  %v3965_v48 = vrot.slane %v3955_v41, %v7320_v34 }
 0x59c   :  { %5508 = vmatprep.subr.bf16.mxu0 %v6828_v49  ;;  %v3969_v49 = vrot.slane %v3955_v41, %v7323_v36 }
 0x59f   :  { %5509 = vmatpush1.bf16.msra.mxu0 %v6826_v32 }
 0x5a0   :  { %5510 = vmatprep.subr.bf16.mxu0 %v6831_v52 }
 0x5a3   :  { %5511 = vmatpush1.bf16.msra.mxu0 %v6829_v50 }
 0x5a4   :  { %5512 = vmatprep.subr.bf16.mxu0 %v6834_v10 }
 0x5a7   :  { %5513 = vmatpush1.bf16.msra.mxu0 %v6832_v51 }
 0x5a8   :  { %5514 = vmatprep.subr.bf16.mxu0 %v6837_v53 }
 0x5ab   :  { %5515 = vmatpush1.bf16.msra.mxu0 %v6835_v54 }
 0x5ac   :  { %5516 = vmatprep.subr.bf16.mxu0 %v6840_v55 }
 0x5af   :  { %5517 = vmatpush1.bf16.msra.mxu0 %v6838_v57 }
 0x5b0   :  { %5518 = vmatprep.subr.bf16.mxu0 %v6843_v58  ;;  %v3959_v32 = vpop.permute.xlu0 %3958 }
 0x5b1   :  { %v3972_v52 = vmul.f32 %v3965_v48, %v3959_v32  ;;  %v3973_v50 = vmul.f32 %v3969_v49, %v3959_v32 }
 0x5b3   :  { %5519 = vmatpush1.bf16.msra.mxu0 %v6841_v59 }
 0x5b4   :  { %5520 = vmatprep.subr.bf16.mxu0 %v6846_v60 }
 0x5b7   :  { %5521 = vmatpush1.bf16.msra.mxu0 %v6844_v61 }
 0x5b8   :  { %5522 = vmatprep.subr.bf16.mxu0 %v6849_v56 }
 0x5bb   :  { %5523 = vmatpush1.bf16.msra.mxu0 %v6847_v14 }
 0x5bc   :  { %5524 = vmatprep.subr.bf16.mxu0 %v6852_v13 }
 0x5bf   :  { %5525 = vmatpush1.bf16.msra.mxu0 %v6850_v9 }
 0x5c0   :  { %5526 = vmatprep.subr.bf16.mxu0 %v6855_v62 }
 0x5c3   :  { %5527 = vmatpush1.bf16.msra.mxu0 %v6853_v63 }
 0x5c4   :  { %5528 = vmatprep.subr.bf16.mxu0 %v6858_v1 }
 0x5c7   :  { %5529 = vmatpush1.bf16.msra.mxu0 %v6856_v22 }
 0x5c8   :  { %5530 = vmatprep.subr.bf16.mxu0 %v6861_v2 }
 0x5cb   :  { %5531 = vmatpush1.bf16.msra.mxu0 %v6859_v33 }
 0x5cc   :  { %5541 = vmatprep.subr.bf16.mxu0 %v6864_v26 }
 0x5ce   :  { %5533 = vmatmul.mubr.bf16.vlgmr.msra.gmra.mrb[16].mxu0 %v3694_v0 }
 0x5cf   :  { %5542 = vmatpush1.bf16.msra.mxu0 %v6862_v27  ;;  %5573 = vmatprep.mubr.bf16.mxu0 %v3697_v23 }
 0x5d0   :  { %5543 = vmatprep.subr.bf16.mxu0 %v6867_v3 }
 0x5d3   :  { %5544 = vmatpush1.bf16.msra.mxu0 %v6865_v4 }
 0x5d4   :  { %5545 = vmatprep.subr.bf16.mxu0 %v6870_v5 }
 0x5d7   :  { %5546 = vmatpush1.bf16.msra.mxu0 %v6868_v6 }
 0x5d8   :  { %5547 = vmatprep.subr.bf16.mxu0 %v6873_v7 }
 0x5db   :  { %5548 = vmatpush1.bf16.msra.mxu0 %v6871_v11 }
 0x5dc   :  { %5549 = vmatprep.subr.bf16.mxu0 %v6876_v15 }
 0x5df   :  { %5550 = vmatpush1.bf16.msra.mxu0 %v6874_v16 }
 0x5e0   :  { %5551 = vmatprep.subr.bf16.mxu0 %v6879_v8 }
 0x5e3   :  { %5552 = vmatpush1.bf16.msra.mxu0 %v6877_v17 }
 0x5e4   :  { %5553 = vmatprep.subr.bf16.mxu0 %v6882_v19 }
 0x5e7   :  { %5554 = vmatpush1.bf16.msra.mxu0 %v6880_v18 }
 0x5e8   :  { %5555 = vmatprep.subr.bf16.mxu0 %v6885_v20 }
 0x5eb   :  { %5556 = vmatpush1.bf16.msra.mxu0 %v6883_v21 }
 0x5ec   :  { %5557 = vmatprep.subr.bf16.mxu0 %v6888_v24 }
 0x5ef   :  { %5558 = vmatpush1.bf16.msra.mxu0 %v6886_v28 }
 0x5f0   :  { %5559 = vmatprep.subr.bf16.mxu0 %v6891_v30 }
 0x5f3   :  { %5560 = vmatpush1.bf16.msra.mxu0 %v6889_v31 }
 0x5f4   :  { %5561 = vmatprep.subr.bf16.mxu0 %v6894_v35 }
 0x5f7   :  { %5562 = vmatpush1.bf16.msra.mxu0 %v6892_v12 }
 0x5f8   :  { %5563 = vmatprep.subr.bf16.mxu0 %v6897_v38 }
 0x5fb   :  { %5564 = vmatpush1.bf16.msra.mxu0 %v6895_v39 }
 0x5fc   :  { %5565 = vmatprep.subr.bf16.mxu0 %v6900_v29 }
 0x5ff   :  { %5566 = vmatpush1.bf16.msra.mxu0 %v6898_v40 }
 0x600   :  { %5567 = vmatprep.subr.bf16.mxu0 %v6903_v42 }
 0x603   :  { %5568 = vmatpush1.bf16.msra.mxu0 %v6901_v43 }
 0x604   :  { %5569 = vmatprep.subr.bf16.mxu0 %v6906_v44 }
 0x607   :  { %5570 = vmatpush1.bf16.msra.mxu0 %v6904_v45 }
 0x608   :  { %5571 = vmatprep.subr.bf16.mxu0 %v6909_v46 }
 0x60b   :  { %5572 = vmatpush1.bf16.msra.mxu0 %v6907_v47 }
 0x60e   :  { %5574 = vmatmul.mubr.bf16.vlgmr.msra.gmra.mrb[16].mxu0 %v3696_v25 }
 0x6e1   :  { %v5575_v10 = vpop.f32.mrb[16].mxu0 }
 0x6e2   :  { %v6277_v51 = vadd.f32 %v5575_v10, %v3972_v52  ;;  %v5577_v53 = vpop.f32.mrb[17].mxu0 }
 0x6e3   :  { %v6278_v54 = vadd.f32 %v5577_v53, %v3973_v50  ;;  %v5579_v55 = vpop.f32.mrb[18].mxu0 }
 0x6e4   :  { %5582 = vst [vmem:[%s7484_s9] sm:$0xff] %v6277_v51  ;;  %v5580_v57 = vpop.f32.mrb[19].mxu0 }
 0x6e5   :  { %5583 = vst [vmem:[%s7484_s9 + $0x8] sm:$0xff] %v6278_v54 }
 0x6e6   :  { %5588 = vsyncpa [#allocation3], 1 }
 0x6e7   :  { %5589 = vsyncpa [#allocation5], 1 }
 0x6e8   :  { %5590 = vsyncpa [#allocation8], 1 }
 0x6e9   :  { %5591 = vsyncpa [#allocation11], 1 }
 0x6ea   :  { %5592 = vsyncpa [#allocation14], 1 }

// kernel: merge_lstm_forward.3
= control target key start
LH: loop header
LB: loop body
LE: loop exit
PB: predicated region body
PF: predicated region fallthrough
CT: control target
= control target key end

     0   :  { %s15578_s0 = inlined_call_operand.vmem [shape: f32[8,256], index: 0, kind: input, shape index: {}]   ;;  %s15579_s1 = inlined_call_operand.vmem [shape: bf16[6,24,256,32], index: 1, kind: input, shape index: {}]   ;;  %s15580_s2 = inlined_call_operand.vmem [shape: f32[6,24,1,32], index: 2, kind: input, shape index: {}]   ;;  %s15581_s3 = inlined_call_operand.vmem [shape: bf16[6,8,32,256], index: 3, kind: input, shape index: {}]   ;;  %s15582_s4 = inlined_call_operand.vmem [shape: f32[6,1,256], index: 4, kind: input, shape index: {}]   ;;  %s15583_s5 = inlined_call_operand.vmem [shape: f32[6,1,256], index: 5, kind: input, shape index: {}]   ;;  %s15584_s6 = inlined_call_operand.vmem [shape: f32[6,1,256], index: 6, kind: input, shape index: {}]   ;;  %s15585_s7 = inlined_call_operand.vmem [shape: bf16[6,256,2048], index: 7, kind: input, shape index: {}]   ;;  %s15586_s8 = inlined_call_operand.vmem [shape: f32[6,1,2048], index: 8, kind: input, shape index: {}]   ;;  %s15587_s9 = inlined_call_operand.vmem [shape: bf16[6,2048,256], index: 9, kind: input, shape index: {}]   ;;  %s15588_s10 = inlined_call_operand.vmem [shape: f32[6,1,256], index: 10, kind: input, shape index: {}]   ;;  %s15589_s11 = inlined_call_operand.vmem [shape: f32[6,1,256], index: 11, kind: input, shape index: {}]   ;;  %s15590_s12 = inlined_call_operand.vmem [shape: f32[6,1,256], index: 12, kind: input, shape index: {}]   ;;  %s15591_s13 = inlined_call_operand.vmem [shape: f32[256,128], index: 13, kind: input, shape index: {}]   ;;  %s15592_s14 = inlined_call_operand.vmem [shape: f32[1,128], index: 14, kind: input, shape index: {}]   ;;  %s15593_s15 = inlined_call_operand.vmem [shape: f32[128,1], index: 15, kind: input, shape index: {}]   ;;  %s15594_s16 = inlined_call_operand.<no memory space> [shape: f32[1,1], index: 16, kind: input, shape index: {}]   ;;  %s15595_s17 = inlined_call_operand.hbm [shape: f32[1,1], index: 17, kind: output, shape index: {}]  }
   0x1   :  { %15601 = sst [smem:[#allocation8_spill]] %s15578_s0  ;;  %v22_v0 = vstv %s15594_s16 }
   0x2   :  { %15602 = sst [smem:[#allocation9_spill]] %s15579_s1  ;;  %23 = vst [vmem:[#allocation3] sm:$0x1] %v22_v0 }
   0x3   :  { %15603 = sst [smem:[#allocation10_spill]] %s15580_s2 }
   0x4   :  { %15604 = sst [smem:[#allocation11_spill]] %s15581_s3 }
   0x5   :  { %15605 = sst [smem:[#allocation12_spill]] %s15585_s7 }
   0x6   :  { %15606 = sst [smem:[#allocation13_spill]] %s15591_s13 }
   0x7   :  { %15607 = sst [smem:[#allocation14_spill]] %s15592_s14 }
   0x8   :  { %15608 = sst [smem:[#allocation15_spill]] %s15593_s15 }
   0x9   :  { %15609 = sst [smem:[#allocation16_spill]] %s15595_s17 }
   0xa   :  { %24 = vsyncpa [#allocation5], 0  ;;  %s13967_s26 = smov 0  }
   0xb LB: > { %15610 = sst [smem:[#allocation7_spill]] %s13864_s26  ;;  %s13973_s27 = sadd.s32 4294967295, %s13864_s26   ;;  %s13864_s26 = sphi %s13967_s26, %s30_s26  }
   0xc   : > { %p11159_p0 = scmp.ge.s32.totalorder %s13864_s26, 1  ;;  %p587_p1 = scmp.lt.s32.totalorder %s13864_s26, 7 }
   0xe   : > { %p588_p2 = pnand %p11159_p0, %p587_p1 }
   0xf   : > { %p681_p3 = scmp.lt.s32.totalorder (!%p588_p2), %s13973_s27, 5  ;;  %s15611_s3 = sld [smem:[#allocation11_spill]] (!%p588_p2) }
  0x10   : > { %591 = sbr.rel (%p588_p2) target bundleno = 3255 (0xcb7), region = 88  ;;  %s15612_s21 = sld [smem:[#allocation9_spill]] (!%p588_p2) }
  0x11   : > { %s15613_s2 = sld [smem:[#allocation10_spill]] (!%p588_p2)  ;;  %s15614_s7 = sld [smem:[#allocation12_spill]] (!%p588_p2) }
  0x12   : > { %p11174_p4 = scmp.ne.s32.totalorder (!%p588_p2), %s13973_s27, 0 }
  0x17   : > { %s682_s16 = scalar_select %p681_p3, %s13973_s27, 5 }
  0x18   : > { %s15615_s18 = sld [smem:[#allocation8_spill]] (!%p11174_p4) }
  0x19   : > { %s12950_s28 = smul.u32 3072, %s682_s16  ;;  %s12164_s29 = sshll.u32 %s682_s16, 8 }
  0x1a   : > { %s12951_s0 = smul.u32 24, %s682_s16  ;;  %s13982_s19 = scalar_lea.vmem %s15611_s3, %s12164_s29 }
  0x1b   : > { %s13987_s22 = scalar_lea.vmem %s15612_s21, %s12950_s28  ;;  %s13989_s23 = sshll.u32 %s682_s16, 1 }
  0x1c   : > { %s13994_s26 = scalar_lea.vmem %s15613_s2, %s12951_s0  ;;  %s12165_s25 = sshll.u32 %s682_s16, 11 }
  0x1d   : > { %s11168_s17 = sshll.u32 %s682_s16, 4  ;;  %s14011_s13 = scalar_lea.vmem %s15614_s7, %s12165_s25 }
  0x1e   : > { %s14016_s29 = scalar_lea.vmem %s15586_s8, %s11168_s17  ;;  %s14021_s1 = scalar_lea.vmem %s15587_s9, %s12165_s25  ;;  %v738_v1 = vld [vmem:[%s15615_s18] sm:$0xff] (!%p11174_p4)  ;;  %v739_v2 = vld [vmem:[%s15615_s18 + $0x8] sm:$0xff] (!%p11174_p4) }
  0x1f   : > { %s724_s21 = scalar_lea.vmem %s15588_s10, %s13989_s23  ;;  %s728_s14 = scalar_lea.vmem %s15589_s11, %s13989_s23  ;;  %740 = vst [vmem:[#allocation2] sm:$0xff] (!%p11174_p4), %v738_v1  ;;  %741 = vst [vmem:[#allocation2 + $0x8] sm:$0xff] (!%p11174_p4), %v739_v2 }
  0x20   : > { %s732_s7 = scalar_lea.vmem %s15590_s12, %s13989_s23  ;;  %737 = sbr.rel (%p11174_p4) target bundleno = 39 (0x27), region = 92 }
  0x27 PF: > { %v12974_v3 = vld [vmem:[%s13987_s22 + $0x40] sm:$0xff]   ;;  %v12978_v7 = vld [vmem:[%s13987_s22 + $0x48] sm:$0xff]   ;;  %v12982_v11 = vld [vmem:[%s13987_s22 + $0x50] sm:$0xff]   ;;  %vm13867_vm0 = vmmov 0   ;;  %vm4950_vm1 = vcmask 261120   ;;  %vm5575_vm3 = vcmask 64512   ;;  %s15617_s30 = scalar_lea.vmem %s15583_s5, %s13989_s23  ;;  %s15618_s16 = scalar_lea.vmem %s15584_s6, %s13989_s23 }
  0x28   : > { %v12975_v4 = vld [vmem:[%s13987_s22 + $0xc0] sm:$0xff]   ;;  %12167 = vmatprep.subr.bf16.mxu0 %v12974_v3  ;;  %v12979_v8 = vld [vmem:[%s13987_s22 + $0xc8] sm:$0xff]   ;;  %v12983_v12 = vld [vmem:[%s13987_s22 + $0xd0] sm:$0xff]   ;;  %p12159_p5 = scmp.ne.s32.totalorder %s13973_s27, 5 }
  0x29   : > { %v12976_v5 = vld [vmem:[%s13987_s22] sm:$0xff]   ;;  %12189 = vmatprep.subr.bf16.mxu1 %v12975_v4  ;;  %v12980_v9 = vld [vmem:[%s13987_s22 + $0x8] sm:$0xff]   ;;  %v12984_v13 = vld [vmem:[%s13987_s22 + $0x10] sm:$0xff]   ;;  %s15620_s15 = sld [smem:[#allocation15_spill]] (!%p12159_p5)  ;;  %vm13871_vm4 = vmmov (!%p12159_p5), 0   ;;  %s15621_s17 = sld [smem:[#allocation14_spill]] (!%p12159_p5) }
  0x2a   : > { %v12977_v6 = vld [vmem:[%s13987_s22 + $0x80] sm:$0xff]   ;;  %12168 = vmatpush3.bf16.msra.mxu0 %v12976_v5  ;;  %v12981_v10 = vld [vmem:[%s13987_s22 + $0x88] sm:$0xff]   ;;  %v12985_v14 = vld [vmem:[%s13987_s22 + $0x90] sm:$0xff]   ;;  %vm10976_vm5 = vcmask (!%p12159_p5), 0  }
  0x2b   : > { %12190 = vmatpush3.bf16.msra.mxu1 %v12977_v6  ;;  %12169 = vmatprep.subr.bf16.mxu0 %v12978_v7  ;;  %v12986_v15 = vld [vmem:[%s13987_s22 + $0x58] sm:$0xff]   ;;  %v12990_v19 = vld [vmem:[%s13987_s22 + $0x60] sm:$0xff]   ;;  %v12994_v23 = vld [vmem:[%s13987_s22 + $0x68] sm:$0xff]  }
  0x2c   : > { %12191 = vmatprep.subr.bf16.mxu1 %v12979_v8  ;;  %v12987_v16 = vld [vmem:[%s13987_s22 + $0xd8] sm:$0xff]   ;;  %v12991_v20 = vld [vmem:[%s13987_s22 + $0xe0] sm:$0xff]   ;;  %v12995_v24 = vld [vmem:[%s13987_s22 + $0xe8] sm:$0xff]  }
  0x2d   : > { %v12988_v17 = vld [vmem:[%s13987_s22 + $0x18] sm:$0xff]   ;;  %v12992_v21 = vld [vmem:[%s13987_s22 + $0x20] sm:$0xff]   ;;  %v12996_v25 = vld [vmem:[%s13987_s22 + $0x28] sm:$0xff]  }
  0x2e   : > { %12170 = vmatpush3.bf16.msra.mxu0 %v12980_v9  ;;  %v12989_v18 = vld [vmem:[%s13987_s22 + $0x98] sm:$0xff]   ;;  %v12993_v22 = vld [vmem:[%s13987_s22 + $0xa0] sm:$0xff]   ;;  %v12997_v26 = vld [vmem:[%s13987_s22 + $0xa8] sm:$0xff]  }
  0x2f   : > { %12192 = vmatpush3.bf16.msra.mxu1 %v12981_v10  ;;  %12171 = vmatprep.subr.bf16.mxu0 %v12982_v11  ;;  %v12998_v27 = vld [vmem:[%s13987_s22 + $0x70] sm:$0xff]   ;;  %v13002_v31 = vld [vmem:[%s13987_s22 + $0x78] sm:$0xff]   ;;  %v743_v35 = vld [vmem:[#allocation2 + $0x8] sm:$0xff] }
  0x30   : > { %12193 = vmatprep.subr.bf16.mxu1 %v12983_v12  ;;  %v12999_v28 = vld [vmem:[%s13987_s22 + $0xf0] sm:$0xff]   ;;  %v13003_v32 = vld [vmem:[%s13987_s22 + $0xf8] sm:$0xff]   ;;  %v742_v36 = vld [vmem:[#allocation2] sm:$0xff]  ;;  %v14074_v37 = vpack.c.bf16 %v743_v35, %v743_v35 }
  0x31   : > { %v13000_v29 = vld [vmem:[%s13987_s22 + $0x30] sm:$0xff]   ;;  %v13004_v33 = vld [vmem:[%s13987_s22 + $0x38] sm:$0xff]   ;;  %v14076_v38 = vpack.c.bf16 %v742_v36, %v742_v36  ;;  %v13006_v39 = vld [vmem:[%s13987_s22 + $0x140] sm:$0xff]  }
  0x32   : > { %12172 = vmatpush3.bf16.msra.mxu0 %v12984_v13  ;;  %v13001_v30 = vld [vmem:[%s13987_s22 + $0xb0] sm:$0xff]   ;;  %v13005_v34 = vld [vmem:[%s13987_s22 + $0xb8] sm:$0xff]   ;;  %v13007_v40 = vld [vmem:[%s13987_s22 + $0x1c0] sm:$0xff]   ;;  %1810 = vmatprep.mubr.bf16.mxu0 %v14074_v37 }
  0x33   : > { %12194 = vmatpush3.bf16.msra.mxu1 %v12985_v14  ;;  %12173 = vmatprep.subr.bf16.mxu0 %v12986_v15  ;;  %v13008_v41 = vld [vmem:[%s13987_s22 + $0x100] sm:$0xff]   ;;  %v13010_v43 = vld [vmem:[%s13987_s22 + $0x148] sm:$0xff]   ;;  %v13014_v47 = vld [vmem:[%s13987_s22 + $0x150] sm:$0xff]  }
  0x34   : > { %12195 = vmatprep.subr.bf16.mxu1 %v12987_v16  ;;  %1946 = vmatprep.mubr.bf16.mxu1 %v14074_v37  ;;  %v13009_v42 = vld [vmem:[%s13987_s22 + $0x180] sm:$0xff]   ;;  %v13011_v44 = vld [vmem:[%s13987_s22 + $0x1c8] sm:$0xff]   ;;  %v13015_v48 = vld [vmem:[%s13987_s22 + $0x1d0] sm:$0xff]  }
  0x35   : > { %v13012_v45 = vld [vmem:[%s13987_s22 + $0x108] sm:$0xff]   ;;  %v13016_v49 = vld [vmem:[%s13987_s22 + $0x110] sm:$0xff]   ;;  %v13018_v51 = vld [vmem:[%s13987_s22 + $0x158] sm:$0xff]  }
  0x36   : > { %12174 = vmatpush3.bf16.msra.mxu0 %v12988_v17  ;;  %v13013_v46 = vld [vmem:[%s13987_s22 + $0x188] sm:$0xff]   ;;  %v13017_v50 = vld [vmem:[%s13987_s22 + $0x190] sm:$0xff]   ;;  %v13019_v52 = vld [vmem:[%s13987_s22 + $0x1d8] sm:$0xff]  }
  0x37   : > { %12196 = vmatpush3.bf16.msra.mxu1 %v12989_v18  ;;  %12175 = vmatprep.subr.bf16.mxu0 %v12990_v19  ;;  %v13020_v53 = vld [vmem:[%s13987_s22 + $0x118] sm:$0xff]   ;;  %v13022_v55 = vld [vmem:[%s13987_s22 + $0x160] sm:$0xff]   ;;  %v13026_v59 = vld [vmem:[%s13987_s22 + $0x168] sm:$0xff]  }
  0x38   : > { %12197 = vmatprep.subr.bf16.mxu1 %v12991_v20  ;;  %v13021_v54 = vld [vmem:[%s13987_s22 + $0x198] sm:$0xff]   ;;  %v13023_v56 = vld [vmem:[%s13987_s22 + $0x1e0] sm:$0xff]   ;;  %v13027_v60 = vld [vmem:[%s13987_s22 + $0x1e8] sm:$0xff]  }
  0x39   : > { %v13024_v57 = vld [vmem:[%s13987_s22 + $0x120] sm:$0xff]   ;;  %v13028_v61 = vld [vmem:[%s13987_s22 + $0x128] sm:$0xff]   ;;  %v13030_v63 = vld [vmem:[%s13987_s22 + $0x170] sm:$0xff]  }
  0x3a   : > { %12176 = vmatpush3.bf16.msra.mxu0 %v12992_v21  ;;  %v13025_v58 = vld [vmem:[%s13987_s22 + $0x1a0] sm:$0xff]   ;;  %v13029_v62 = vld [vmem:[%s13987_s22 + $0x1a8] sm:$0xff]   ;;  %v13031_v0 = vld [vmem:[%s13987_s22 + $0x1f0] sm:$0xff]  }
  0x3b   : > { %12198 = vmatpush3.bf16.msra.mxu1 %v12993_v22  ;;  %12177 = vmatprep.subr.bf16.mxu0 %v12994_v23  ;;  %v13032_v1 = vld [vmem:[%s13987_s22 + $0x130] sm:$0xff]   ;;  %v13034_v3 = vld [vmem:[%s13987_s22 + $0x178] sm:$0xff]   ;;  %v13038_v7 = vld [vmem:[%s13987_s22 + $0x240] sm:$0xff]  }
  0x3c   : > { %12199 = vmatprep.subr.bf16.mxu1 %v12995_v24  ;;  %v13033_v2 = vld [vmem:[%s13987_s22 + $0x1b0] sm:$0xff]   ;;  %v13035_v4 = vld [vmem:[%s13987_s22 + $0x1f8] sm:$0xff]   ;;  %v13039_v8 = vld [vmem:[%s13987_s22 + $0x2c0] sm:$0xff]  }
  0x3d   : > { %v13036_v5 = vld [vmem:[%s13987_s22 + $0x138] sm:$0xff]   ;;  %v13040_v9 = vld [vmem:[%s13987_s22 + $0x200] sm:$0xff]   ;;  %v13042_v11 = vld [vmem:[%s13987_s22 + $0x248] sm:$0xff]  }
  0x3e   : > { %12178 = vmatpush3.bf16.msra.mxu0 %v12996_v25  ;;  %v13037_v6 = vld [vmem:[%s13987_s22 + $0x1b8] sm:$0xff]   ;;  %v13041_v10 = vld [vmem:[%s13987_s22 + $0x280] sm:$0xff]   ;;  %v13043_v12 = vld [vmem:[%s13987_s22 + $0x2c8] sm:$0xff]  }
  0x3f   : > { %12200 = vmatpush3.bf16.msra.mxu1 %v12997_v26  ;;  %12179 = vmatprep.subr.bf16.mxu0 %v12998_v27  ;;  %v13044_v13 = vld [vmem:[%s13987_s22 + $0x208] sm:$0xff]   ;;  %v13046_v15 = vld [vmem:[%s13987_s22 + $0x250] sm:$0xff]   ;;  %v13050_v19 = vld [vmem:[%s13987_s22 + $0x258] sm:$0xff]  }
  0x40   : > { %12201 = vmatprep.subr.bf16.mxu1 %v12999_v28  ;;  %v13045_v14 = vld [vmem:[%s13987_s22 + $0x288] sm:$0xff]   ;;  %v13047_v16 = vld [vmem:[%s13987_s22 + $0x2d0] sm:$0xff]   ;;  %v13051_v20 = vld [vmem:[%s13987_s22 + $0x2d8] sm:$0xff]  }
  0x41   : > { %v13048_v17 = vld [vmem:[%s13987_s22 + $0x210] sm:$0xff]   ;;  %v13052_v21 = vld [vmem:[%s13987_s22 + $0x218] sm:$0xff]   ;;  %v13054_v23 = vld [vmem:[%s13987_s22 + $0x260] sm:$0xff]  }
  0x42   : > { %12180 = vmatpush3.bf16.msra.mxu0 %v13000_v29  ;;  %v13049_v18 = vld [vmem:[%s13987_s22 + $0x290] sm:$0xff]   ;;  %v13053_v22 = vld [vmem:[%s13987_s22 + $0x298] sm:$0xff]   ;;  %v13055_v24 = vld [vmem:[%s13987_s22 + $0x2e0] sm:$0xff]  }
  0x43   : > { %12202 = vmatpush3.bf16.msra.mxu1 %v13001_v30  ;;  %12181 = vmatprep.subr.bf16.mxu0 %v13002_v31  ;;  %v13056_v25 = vld [vmem:[%s13987_s22 + $0x220] sm:$0xff]   ;;  %v13058_v27 = vld [vmem:[%s13987_s22 + $0x268] sm:$0xff]   ;;  %v13062_v31 = vld [vmem:[%s13987_s22 + $0x270] sm:$0xff]  }
  0x44   : > { %12203 = vmatprep.subr.bf16.mxu1 %v13003_v32  ;;  %v13057_v26 = vld [vmem:[%s13987_s22 + $0x2a0] sm:$0xff]   ;;  %v13059_v28 = vld [vmem:[%s13987_s22 + $0x2e8] sm:$0xff]   ;;  %v13063_v32 = vld [vmem:[%s13987_s22 + $0x2f0] sm:$0xff]  }
  0x45   : > { %v13060_v29 = vld [vmem:[%s13987_s22 + $0x228] sm:$0xff]   ;;  %v13066_v35 = vld [vmem:[%s13987_s22 + $0x278] sm:$0xff]  }
  0x46   : > { %12182 = vmatpush3.bf16.msra.mxu0 %v13004_v33  ;;  %v13061_v30 = vld [vmem:[%s13987_s22 + $0x2a8] sm:$0xff]   ;;  %v13064_v33 = vld [vmem:[%s13987_s22 + $0x230] sm:$0xff]   ;;  %v13067_v36 = vld [vmem:[%s13987_s22 + $0x2f8] sm:$0xff]  }
  0x47   : > { %12204 = vmatpush3.bf16.msra.mxu1 %v13005_v34  ;;  %12211 = vmatprep.subr.bf16.mxu0 %v13006_v39  ;;  %v13065_v34 = vld [vmem:[%s13987_s22 + $0x2b0] sm:$0xff]   ;;  %v13068_v39 = vld [vmem:[%s13987_s22 + $0x238] sm:$0xff]  }
  0x48   : > { %12233 = vmatprep.subr.bf16.mxu1 %v13007_v40  ;;  %v13069_v40 = vld [vmem:[%s13987_s22 + $0x2b8] sm:$0xff]  }
  0x49   : > { %1811 = vmatmul.mubr.bf16.vlgmr.msra.gmra.mrb[0].mxu0 %v14076_v38 }
  0x4a   : > { %1947 = vmatmul.mubr.bf16.vlgmr.msra.gmra.mrb[0].mxu1 %v14076_v38  ;;  %12212 = vmatpush3.bf16.msra.mxu0 %v13008_v41  ;;  %v13070_v41 = vld [vmem:[%s13987_s22 + $0x340] sm:$0xff]  }
  0x4b   : > { %12234 = vmatpush3.bf16.msra.mxu1 %v13009_v42  ;;  %12213 = vmatprep.subr.bf16.mxu0 %v13010_v43  ;;  %v13071_v42 = vld [vmem:[%s13987_s22 + $0x3c0] sm:$0xff]  }
  0x4c   : > { %2082 = vmatprep.mubr.bf16.mxu0 %v14074_v37  ;;  %12235 = vmatprep.subr.bf16.mxu1 %v13011_v44  ;;  %v13072_v43 = vld [vmem:[%s13987_s22 + $0x300] sm:$0xff]  }
  0x4d   : > { %2218 = vmatprep.mubr.bf16.mxu1 %v14074_v37  ;;  %v13073_v44 = vld [vmem:[%s13987_s22 + $0x380] sm:$0xff]  }
  0x4e   : > { %12214 = vmatpush3.bf16.msra.mxu0 %v13012_v45  ;;  %v13074_v45 = vld [vmem:[%s13987_s22 + $0x348] sm:$0xff]  }
  0x4f   : > { %12236 = vmatpush3.bf16.msra.mxu1 %v13013_v46  ;;  %12215 = vmatprep.subr.bf16.mxu0 %v13014_v47  ;;  %v13075_v46 = vld [vmem:[%s13987_s22 + $0x3c8] sm:$0xff]  }
  0x50   : > { %12237 = vmatprep.subr.bf16.mxu1 %v13015_v48  ;;  %v13076_v47 = vld [vmem:[%s13987_s22 + $0x308] sm:$0xff]  }
  0x51   : > { %v13077_v48 = vld [vmem:[%s13987_s22 + $0x388] sm:$0xff]  }
  0x52   : > { %12216 = vmatpush3.bf16.msra.mxu0 %v13016_v49  ;;  %v13078_v49 = vld [vmem:[%s13987_s22 + $0x350] sm:$0xff]  }
  0x53   : > { %12238 = vmatpush3.bf16.msra.mxu1 %v13017_v50  ;;  %12217 = vmatprep.subr.bf16.mxu0 %v13018_v51  ;;  %v13079_v50 = vld [vmem:[%s13987_s22 + $0x3d0] sm:$0xff]  }
  0x54   : > { %12239 = vmatprep.subr.bf16.mxu1 %v13019_v52  ;;  %v13080_v51 = vld [vmem:[%s13987_s22 + $0x310] sm:$0xff]  }
  0x55   : > { %v13081_v52 = vld [vmem:[%s13987_s22 + $0x390] sm:$0xff]  }
  0x56   : > { %12218 = vmatpush3.bf16.msra.mxu0 %v13020_v53  ;;  %v13082_v53 = vld [vmem:[%s13987_s22 + $0x358] sm:$0xff]  }
  0x57   : > { %12240 = vmatpush3.bf16.msra.mxu1 %v13021_v54  ;;  %12219 = vmatprep.subr.bf16.mxu0 %v13022_v55  ;;  %v13083_v54 = vld [vmem:[%s13987_s22 + $0x3d8] sm:$0xff]  }
  0x58   : > { %12241 = vmatprep.subr.bf16.mxu1 %v13023_v56  ;;  %v13084_v55 = vld [vmem:[%s13987_s22 + $0x318] sm:$0xff]  }
  0x59   : > { %v13085_v56 = vld [vmem:[%s13987_s22 + $0x398] sm:$0xff]  }
  0x5a   : > { %12220 = vmatpush3.bf16.msra.mxu0 %v13024_v57  ;;  %v13086_v57 = vld [vmem:[%s13987_s22 + $0x360] sm:$0xff]  }
  0x5b   : > { %12242 = vmatpush3.bf16.msra.mxu1 %v13025_v58  ;;  %12221 = vmatprep.subr.bf16.mxu0 %v13026_v59  ;;  %v13087_v58 = vld [vmem:[%s13987_s22 + $0x3e0] sm:$0xff]  }
  0x5c   : > { %12243 = vmatprep.subr.bf16.mxu1 %v13027_v60  ;;  %v13088_v59 = vld [vmem:[%s13987_s22 + $0x320] sm:$0xff]  }
  0x5d   : > { %v13089_v60 = vld [vmem:[%s13987_s22 + $0x3a0] sm:$0xff]  }
  0x5e   : > { %12222 = vmatpush3.bf16.msra.mxu0 %v13028_v61  ;;  %v13090_v61 = vld [vmem:[%s13987_s22 + $0x368] sm:$0xff]  }
  0x5f   : > { %12244 = vmatpush3.bf16.msra.mxu1 %v13029_v62  ;;  %12223 = vmatprep.subr.bf16.mxu0 %v13030_v63  ;;  %v13091_v62 = vld [vmem:[%s13987_s22 + $0x3e8] sm:$0xff]  }
  0x60   : > { %12245 = vmatprep.subr.bf16.mxu1 %v13031_v0  ;;  %v13092_v63 = vld [vmem:[%s13987_s22 + $0x328] sm:$0xff]  }
  0x61   : > { %v13093_v0 = vld [vmem:[%s13987_s22 + $0x3a8] sm:$0xff]  }
  0x62   : > { %12224 = vmatpush3.bf16.msra.mxu0 %v13032_v1  ;;  %v13094_v1 = vld [vmem:[%s13987_s22 + $0x370] sm:$0xff]  }
  0x63   : > { %12246 = vmatpush3.bf16.msra.mxu1 %v13033_v2  ;;  %12225 = vmatprep.subr.bf16.mxu0 %v13034_v3  ;;  %v13095_v2 = vld [vmem:[%s13987_s22 + $0x3f0] sm:$0xff]  }
  0x64   : > { %12247 = vmatprep.subr.bf16.mxu1 %v13035_v4  ;;  %v13096_v3 = vld [vmem:[%s13987_s22 + $0x330] sm:$0xff]  }
  0x65   : > { %v13097_v4 = vld [vmem:[%s13987_s22 + $0x3b0] sm:$0xff]  }
  0x66   : > { %12226 = vmatpush3.bf16.msra.mxu0 %v13036_v5  ;;  %v13098_v5 = vld [vmem:[%s13987_s22 + $0x378] sm:$0xff]  }
  0x67   : > { %12248 = vmatpush3.bf16.msra.mxu1 %v13037_v6  ;;  %12255 = vmatprep.subr.bf16.mxu0 %v13038_v7  ;;  %v13099_v6 = vld [vmem:[%s13987_s22 + $0x3f8] sm:$0xff]  }
  0x68   : > { %12277 = vmatprep.subr.bf16.mxu1 %v13039_v8  ;;  %v13100_v7 = vld [vmem:[%s13987_s22 + $0x338] sm:$0xff]  }
  0x69   : > { %2083 = vmatmul.mubr.bf16.vlgmr.msra.gmra.mrb[4].mxu0 %v14076_v38  ;;  %v13101_v8 = vld [vmem:[%s13987_s22 + $0x3b8] sm:$0xff]  }
  0x6a   : > { %2219 = vmatmul.mubr.bf16.vlgmr.msra.gmra.mrb[4].mxu1 %v14076_v38  ;;  %12256 = vmatpush3.bf16.msra.mxu0 %v13040_v9  ;;  %v13102_v9 = vld [vmem:[%s13987_s22 + $0x440] sm:$0xff]  }
  0x6b   : > { %12278 = vmatpush3.bf16.msra.mxu1 %v13041_v10  ;;  %12257 = vmatprep.subr.bf16.mxu0 %v13042_v11  ;;  %v13103_v10 = vld [vmem:[%s13987_s22 + $0x4c0] sm:$0xff]  }
  0x6c   : > { %2354 = vmatprep.mubr.bf16.mxu0 %v14074_v37  ;;  %12279 = vmatprep.subr.bf16.mxu1 %v13043_v12  ;;  %v13104_v11 = vld [vmem:[%s13987_s22 + $0x400] sm:$0xff]  }
  0x6d   : > { %2490 = vmatprep.mubr.bf16.mxu1 %v14074_v37  ;;  %v13105_v12 = vld [vmem:[%s13987_s22 + $0x480] sm:$0xff]  }
  0x6e   : > { %12258 = vmatpush3.bf16.msra.mxu0 %v13044_v13  ;;  %v13106_v13 = vld [vmem:[%s13987_s22 + $0x448] sm:$0xff]  }
  0x6f   : > { %12280 = vmatpush3.bf16.msra.mxu1 %v13045_v14  ;;  %12259 = vmatprep.subr.bf16.mxu0 %v13046_v15  ;;  %v13107_v14 = vld [vmem:[%s13987_s22 + $0x4c8] sm:$0xff]  }
  0x70   : > { %12281 = vmatprep.subr.bf16.mxu1 %v13047_v16  ;;  %v13108_v15 = vld [vmem:[%s13987_s22 + $0x408] sm:$0xff]  }
  0x71   : > { %v13109_v16 = vld [vmem:[%s13987_s22 + $0x488] sm:$0xff]  }
  0x72   : > { %12260 = vmatpush3.bf16.msra.mxu0 %v13048_v17  ;;  %v13110_v17 = vld [vmem:[%s13987_s22 + $0x450] sm:$0xff]  }
  0x73   : > { %12282 = vmatpush3.bf16.msra.mxu1 %v13049_v18  ;;  %12261 = vmatprep.subr.bf16.mxu0 %v13050_v19  ;;  %v13111_v18 = vld [vmem:[%s13987_s22 + $0x4d0] sm:$0xff]  }
  0x74   : > { %12283 = vmatprep.subr.bf16.mxu1 %v13051_v20  ;;  %v13112_v19 = vld [vmem:[%s13987_s22 + $0x410] sm:$0xff]  }
  0x75   : > { %v13113_v20 = vld [vmem:[%s13987_s22 + $0x490] sm:$0xff]  }
  0x76   : > { %12262 = vmatpush3.bf16.msra.mxu0 %v13052_v21  ;;  %v13114_v21 = vld [vmem:[%s13987_s22 + $0x458] sm:$0xff]  }
  0x77   : > { %12284 = vmatpush3.bf16.msra.mxu1 %v13053_v22  ;;  %12263 = vmatprep.subr.bf16.mxu0 %v13054_v23  ;;  %v13115_v22 = vld [vmem:[%s13987_s22 + $0x4d8] sm:$0xff]  }
  0x78   : > { %12285 = vmatprep.subr.bf16.mxu1 %v13055_v24  ;;  %v13116_v23 = vld [vmem:[%s13987_s22 + $0x418] sm:$0xff]  }
  0x79   : > { %v13117_v24 = vld [vmem:[%s13987_s22 + $0x498] sm:$0xff]  }
  0x7a   : > { %12264 = vmatpush3.bf16.msra.mxu0 %v13056_v25  ;;  %v13118_v25 = vld [vmem:[%s13987_s22 + $0x460] sm:$0xff]  }
  0x7b   : > { %12286 = vmatpush3.bf16.msra.mxu1 %v13057_v26  ;;  %12265 = vmatprep.subr.bf16.mxu0 %v13058_v27  ;;  %v13119_v26 = vld [vmem:[%s13987_s22 + $0x4e0] sm:$0xff]  }
  0x7c   : > { %12287 = vmatprep.subr.bf16.mxu1 %v13059_v28  ;;  %v13120_v27 = vld [vmem:[%s13987_s22 + $0x420] sm:$0xff]  }
  0x7d   : > { %v13121_v28 = vld [vmem:[%s13987_s22 + $0x4a0] sm:$0xff]  }
  0x7e   : > { %12266 = vmatpush3.bf16.msra.mxu0 %v13060_v29  ;;  %v13122_v29 = vld [vmem:[%s13987_s22 + $0x468] sm:$0xff]  }
  0x7f   : > { %12288 = vmatpush3.bf16.msra.mxu1 %v13061_v30  ;;  %12267 = vmatprep.subr.bf16.mxu0 %v13062_v31  ;;  %v13123_v30 = vld [vmem:[%s13987_s22 + $0x4e8] sm:$0xff]  }
  0x80   : > { %12289 = vmatprep.subr.bf16.mxu1 %v13063_v32  ;;  %v13124_v31 = vld [vmem:[%s13987_s22 + $0x428] sm:$0xff]  }
  0x81   : > { %v13125_v32 = vld [vmem:[%s13987_s22 + $0x4a8] sm:$0xff]  }
  0x82   : > { %12268 = vmatpush3.bf16.msra.mxu0 %v13064_v33  ;;  %v13126_v33 = vld [vmem:[%s13987_s22 + $0x470] sm:$0xff]  }
  0x83   : > { %12290 = vmatpush3.bf16.msra.mxu1 %v13065_v34  ;;  %12269 = vmatprep.subr.bf16.mxu0 %v13066_v35  ;;  %v13127_v34 = vld [vmem:[%s13987_s22 + $0x4f0] sm:$0xff]  }
  0x84   : > { %12291 = vmatprep.subr.bf16.mxu1 %v13067_v36  ;;  %v13128_v35 = vld [vmem:[%s13987_s22 + $0x430] sm:$0xff]  }
  0x85   : > { %v13129_v36 = vld [vmem:[%s13987_s22 + $0x4b0] sm:$0xff]  }
  0x86   : > { %12270 = vmatpush3.bf16.msra.mxu0 %v13068_v39  ;;  %v13130_v39 = vld [vmem:[%s13987_s22 + $0x478] sm:$0xff]  }
  0x87   : > { %12292 = vmatpush3.bf16.msra.mxu1 %v13069_v40  ;;  %12299 = vmatprep.subr.bf16.mxu0 %v13070_v41  ;;  %v13131_v40 = vld [vmem:[%s13987_s22 + $0x4f8] sm:$0xff]  }
  0x88   : > { %12321 = vmatprep.subr.bf16.mxu1 %v13071_v42  ;;  %v13132_v41 = vld [vmem:[%s13987_s22 + $0x438] sm:$0xff]  }
  0x89   : > { %2355 = vmatmul.mubr.bf16.vlgmr.msra.gmra.mrb[8].mxu0 %v14076_v38  ;;  %v13133_v42 = vld [vmem:[%s13987_s22 + $0x4b8] sm:$0xff]  }
  0x8a   : > { %2491 = vmatmul.mubr.bf16.vlgmr.msra.gmra.mrb[8].mxu1 %v14076_v38  ;;  %12300 = vmatpush3.bf16.msra.mxu0 %v13072_v43  ;;  %v13134_v43 = vld [vmem:[%s13987_s22 + $0x540] sm:$0xff]  }
  0x8b   : > { %12322 = vmatpush3.bf16.msra.mxu1 %v13073_v44  ;;  %12301 = vmatprep.subr.bf16.mxu0 %v13074_v45  ;;  %v13135_v44 = vld [vmem:[%s13987_s22 + $0x5c0] sm:$0xff]  }
  0x8c   : > { %2626 = vmatprep.mubr.bf16.mxu0 %v14074_v37  ;;  %12323 = vmatprep.subr.bf16.mxu1 %v13075_v46  ;;  %v13136_v45 = vld [vmem:[%s13987_s22 + $0x500] sm:$0xff]  }
  0x8d   : > { %2762 = vmatprep.mubr.bf16.mxu1 %v14074_v37  ;;  %v13137_v46 = vld [vmem:[%s13987_s22 + $0x580] sm:$0xff]  }
  0x8e   : > { %12302 = vmatpush3.bf16.msra.mxu0 %v13076_v47  ;;  %v13138_v47 = vld [vmem:[%s13987_s22 + $0x548] sm:$0xff]  }
  0x8f   : > { %12324 = vmatpush3.bf16.msra.mxu1 %v13077_v48  ;;  %12303 = vmatprep.subr.bf16.mxu0 %v13078_v49  ;;  %v13139_v48 = vld [vmem:[%s13987_s22 + $0x5c8] sm:$0xff]  }
  0x90   : > { %12325 = vmatprep.subr.bf16.mxu1 %v13079_v50  ;;  %v13140_v49 = vld [vmem:[%s13987_s22 + $0x508] sm:$0xff]  }
  0x91   : > { %v13141_v50 = vld [vmem:[%s13987_s22 + $0x588] sm:$0xff]  }
  0x92   : > { %12304 = vmatpush3.bf16.msra.mxu0 %v13080_v51  ;;  %v13142_v51 = vld [vmem:[%s13987_s22 + $0x550] sm:$0xff]  }
  0x93   : > { %12326 = vmatpush3.bf16.msra.mxu1 %v13081_v52  ;;  %12305 = vmatprep.subr.bf16.mxu0 %v13082_v53  ;;  %v13143_v52 = vld [vmem:[%s13987_s22 + $0x5d0] sm:$0xff]  }
  0x94   : > { %12327 = vmatprep.subr.bf16.mxu1 %v13083_v54  ;;  %v13144_v53 = vld [vmem:[%s13987_s22 + $0x510] sm:$0xff]  }
  0x95   : > { %v13145_v54 = vld [vmem:[%s13987_s22 + $0x590] sm:$0xff]  }
  0x96   : > { %12306 = vmatpush3.bf16.msra.mxu0 %v13084_v55  ;;  %v13146_v55 = vld [vmem:[%s13987_s22 + $0x558] sm:$0xff]  }
  0x97   : > { %12328 = vmatpush3.bf16.msra.mxu1 %v13085_v56  ;;  %12307 = vmatprep.subr.bf16.mxu0 %v13086_v57  ;;  %v13147_v56 = vld [vmem:[%s13987_s22 + $0x5d8] sm:$0xff]  }
  0x98   : > { %12329 = vmatprep.subr.bf16.mxu1 %v13087_v58  ;;  %v13148_v57 = vld [vmem:[%s13987_s22 + $0x518] sm:$0xff]  }
  0x99   : > { %v13149_v58 = vld [vmem:[%s13987_s22 + $0x598] sm:$0xff]  }
  0x9a   : > { %12308 = vmatpush3.bf16.msra.mxu0 %v13088_v59  ;;  %v13150_v59 = vld [vmem:[%s13987_s22 + $0x560] sm:$0xff]  }
  0x9b   : > { %12330 = vmatpush3.bf16.msra.mxu1 %v13089_v60  ;;  %12309 = vmatprep.subr.bf16.mxu0 %v13090_v61  ;;  %v13151_v60 = vld [vmem:[%s13987_s22 + $0x5e0] sm:$0xff]  }
  0x9c   : > { %12331 = vmatprep.subr.bf16.mxu1 %v13091_v62  ;;  %v13152_v61 = vld [vmem:[%s13987_s22 + $0x520] sm:$0xff]  }
  0x9d   : > { %v13153_v62 = vld [vmem:[%s13987_s22 + $0x5a0] sm:$0xff]  }
  0x9e   : > { %12310 = vmatpush3.bf16.msra.mxu0 %v13092_v63  ;;  %v13154_v63 = vld [vmem:[%s13987_s22 + $0x568] sm:$0xff]  }
  0x9f   : > { %12332 = vmatpush3.bf16.msra.mxu1 %v13093_v0  ;;  %12311 = vmatprep.subr.bf16.mxu0 %v13094_v1  ;;  %v13155_v0 = vld [vmem:[%s13987_s22 + $0x5e8] sm:$0xff]  }
  0xa0   : > { %12333 = vmatprep.subr.bf16.mxu1 %v13095_v2  ;;  %v13156_v1 = vld [vmem:[%s13987_s22 + $0x528] sm:$0xff]  }
  0xa1   : > { %v13157_v2 = vld [vmem:[%s13987_s22 + $0x5a8] sm:$0xff]  }
  0xa2   : > { %12312 = vmatpush3.bf16.msra.mxu0 %v13096_v3  ;;  %v13158_v3 = vld [vmem:[%s13987_s22 + $0x570] sm:$0xff]  }
  0xa3   : > { %12334 = vmatpush3.bf16.msra.mxu1 %v13097_v4  ;;  %12313 = vmatprep.subr.bf16.mxu0 %v13098_v5  ;;  %v13159_v4 = vld [vmem:[%s13987_s22 + $0x5f0] sm:$0xff]  }
  0xa4   : > { %12335 = vmatprep.subr.bf16.mxu1 %v13099_v6  ;;  %v13160_v5 = vld [vmem:[%s13987_s22 + $0x530] sm:$0xff]  }
  0xa5   : > { %v13161_v6 = vld [vmem:[%s13987_s22 + $0x5b0] sm:$0xff]  }
  0xa6   : > { %12314 = vmatpush3.bf16.msra.mxu0 %v13100_v7  ;;  %v13162_v7 = vld [vmem:[%s13987_s22 + $0x578] sm:$0xff]  }
  0xa7   : > { %12336 = vmatpush3.bf16.msra.mxu1 %v13101_v8  ;;  %12343 = vmatprep.subr.bf16.mxu0 %v13102_v9  ;;  %v13163_v8 = vld [vmem:[%s13987_s22 + $0x5f8] sm:$0xff]  }
  0xa8   : > { %12365 = vmatprep.subr.bf16.mxu1 %v13103_v10  ;;  %v13164_v9 = vld [vmem:[%s13987_s22 + $0x538] sm:$0xff]  }
  0xa9   : > { %2627 = vmatmul.mubr.bf16.vlgmr.msra.gmra.mrb[12].mxu0 %v14076_v38  ;;  %v13165_v10 = vld [vmem:[%s13987_s22 + $0x5b8] sm:$0xff]  }
  0xaa   : > { %2763 = vmatmul.mubr.bf16.vlgmr.msra.gmra.mrb[12].mxu1 %v14076_v38  ;;  %12344 = vmatpush3.bf16.msra.mxu0 %v13104_v11  ;;  %v13166_v11 = vld [vmem:[%s13987_s22 + $0x640] sm:$0xff]  }
  0xab   : > { %12366 = vmatpush3.bf16.msra.mxu1 %v13105_v12  ;;  %12345 = vmatprep.subr.bf16.mxu0 %v13106_v13  ;;  %v13167_v12 = vld [vmem:[%s13987_s22 + $0x6c0] sm:$0xff]  }
  0xac   : > { %2898 = vmatprep.mubr.bf16.mxu0 %v14074_v37  ;;  %12367 = vmatprep.subr.bf16.mxu1 %v13107_v14  ;;  %v13168_v13 = vld [vmem:[%s13987_s22 + $0x600] sm:$0xff]  }
  0xad   : > { %3034 = vmatprep.mubr.bf16.mxu1 %v14074_v37  ;;  %v13169_v14 = vld [vmem:[%s13987_s22 + $0x680] sm:$0xff]  }
  0xae   : > { %12346 = vmatpush3.bf16.msra.mxu0 %v13108_v15  ;;  %v13170_v15 = vld [vmem:[%s13987_s22 + $0x648] sm:$0xff]  }
  0xaf   : > { %12368 = vmatpush3.bf16.msra.mxu1 %v13109_v16  ;;  %12347 = vmatprep.subr.bf16.mxu0 %v13110_v17  ;;  %v13171_v16 = vld [vmem:[%s13987_s22 + $0x6c8] sm:$0xff]  }
  0xb0   : > { %12369 = vmatprep.subr.bf16.mxu1 %v13111_v18  ;;  %v13172_v17 = vld [vmem:[%s13987_s22 + $0x608] sm:$0xff]  }
  0xb1   : > { %v13173_v18 = vld [vmem:[%s13987_s22 + $0x688] sm:$0xff]  }
  0xb2   : > { %12348 = vmatpush3.bf16.msra.mxu0 %v13112_v19  ;;  %v13174_v19 = vld [vmem:[%s13987_s22 + $0x650] sm:$0xff]  }
  0xb3   : > { %12370 = vmatpush3.bf16.msra.mxu1 %v13113_v20  ;;  %12349 = vmatprep.subr.bf16.mxu0 %v13114_v21  ;;  %v13175_v20 = vld [vmem:[%s13987_s22 + $0x6d0] sm:$0xff]  }
  0xb4   : > { %12371 = vmatprep.subr.bf16.mxu1 %v13115_v22  ;;  %v13176_v21 = vld [vmem:[%s13987_s22 + $0x610] sm:$0xff]  }
  0xb5   : > { %v13177_v22 = vld [vmem:[%s13987_s22 + $0x690] sm:$0xff]  }
  0xb6   : > { %12350 = vmatpush3.bf16.msra.mxu0 %v13116_v23  ;;  %v13178_v23 = vld [vmem:[%s13987_s22 + $0x658] sm:$0xff]  }
  0xb7   : > { %12372 = vmatpush3.bf16.msra.mxu1 %v13117_v24  ;;  %12351 = vmatprep.subr.bf16.mxu0 %v13118_v25  ;;  %v13179_v24 = vld [vmem:[%s13987_s22 + $0x6d8] sm:$0xff]  }
  0xb8   : > { %12373 = vmatprep.subr.bf16.mxu1 %v13119_v26  ;;  %v13180_v25 = vld [vmem:[%s13987_s22 + $0x618] sm:$0xff]  }
  0xb9   : > { %v13181_v26 = vld [vmem:[%s13987_s22 + $0x698] sm:$0xff]  }
  0xba   : > { %12352 = vmatpush3.bf16.msra.mxu0 %v13120_v27  ;;  %v13182_v27 = vld [vmem:[%s13987_s22 + $0x660] sm:$0xff]  }
  0xbb   : > { %12374 = vmatpush3.bf16.msra.mxu1 %v13121_v28  ;;  %12353 = vmatprep.subr.bf16.mxu0 %v13122_v29  ;;  %v13183_v28 = vld [vmem:[%s13987_s22 + $0x6e0] sm:$0xff]  }
  0xbc   : > { %12375 = vmatprep.subr.bf16.mxu1 %v13123_v30  ;;  %v13184_v29 = vld [vmem:[%s13987_s22 + $0x620] sm:$0xff]  }
  0xbd   : > { %v13185_v30 = vld [vmem:[%s13987_s22 + $0x6a0] sm:$0xff]  }
  0xbe   : > { %12354 = vmatpush3.bf16.msra.mxu0 %v13124_v31  ;;  %v13186_v31 = vld [vmem:[%s13987_s22 + $0x668] sm:$0xff]  }
  0xbf   : > { %12376 = vmatpush3.bf16.msra.mxu1 %v13125_v32  ;;  %12355 = vmatprep.subr.bf16.mxu0 %v13126_v33  ;;  %v13187_v32 = vld [vmem:[%s13987_s22 + $0x6e8] sm:$0xff]  }
  0xc0   : > { %12377 = vmatprep.subr.bf16.mxu1 %v13127_v34  ;;  %v13188_v33 = vld [vmem:[%s13987_s22 + $0x628] sm:$0xff]  }
  0xc1   : > { %v13189_v34 = vld [vmem:[%s13987_s22 + $0x6a8] sm:$0xff]  }
  0xc2   : > { %12356 = vmatpush3.bf16.msra.mxu0 %v13128_v35  ;;  %v13190_v35 = vld [vmem:[%s13987_s22 + $0x670] sm:$0xff]  }
  0xc3   : > { %12378 = vmatpush3.bf16.msra.mxu1 %v13129_v36  ;;  %12357 = vmatprep.subr.bf16.mxu0 %v13130_v39  ;;  %v13191_v36 = vld [vmem:[%s13987_s22 + $0x6f0] sm:$0xff]  }
  0xc4   : > { %12379 = vmatprep.subr.bf16.mxu1 %v13131_v40  ;;  %v13192_v39 = vld [vmem:[%s13987_s22 + $0x630] sm:$0xff]  }
  0xc5   : > { %v13193_v40 = vld [vmem:[%s13987_s22 + $0x6b0] sm:$0xff]  }
  0xc6   : > { %12358 = vmatpush3.bf16.msra.mxu0 %v13132_v41  ;;  %v13194_v41 = vld [vmem:[%s13987_s22 + $0x678] sm:$0xff]  }
  0xc7   : > { %12380 = vmatpush3.bf16.msra.mxu1 %v13133_v42  ;;  %12387 = vmatprep.subr.bf16.mxu0 %v13134_v43  ;;  %v13195_v42 = vld [vmem:[%s13987_s22 + $0x6f8] sm:$0xff]  }
  0xc8   : > { %12409 = vmatprep.subr.bf16.mxu1 %v13135_v44  ;;  %v13196_v43 = vld [vmem:[%s13987_s22 + $0x638] sm:$0xff]  }
  0xc9   : > { %2899 = vmatmul.mubr.bf16.vlgmr.msra.gmra.mrb[16].mxu0 %v14076_v38  ;;  %v13197_v44 = vld [vmem:[%s13987_s22 + $0x6b8] sm:$0xff]  }
  0xca   : > { %3035 = vmatmul.mubr.bf16.vlgmr.msra.gmra.mrb[16].mxu1 %v14076_v38  ;;  %12388 = vmatpush3.bf16.msra.mxu0 %v13136_v45  ;;  %v13198_v45 = vld [vmem:[%s13987_s22 + $0x740] sm:$0xff]  }
  0xcb   : > { %12410 = vmatpush3.bf16.msra.mxu1 %v13137_v46  ;;  %12389 = vmatprep.subr.bf16.mxu0 %v13138_v47  ;;  %v13199_v46 = vld [vmem:[%s13987_s22 + $0x7c0] sm:$0xff]  }
  0xcc   : > { %3170 = vmatprep.mubr.bf16.mxu0 %v14074_v37  ;;  %12411 = vmatprep.subr.bf16.mxu1 %v13139_v48  ;;  %v13200_v47 = vld [vmem:[%s13987_s22 + $0x700] sm:$0xff]  }
  0xcd   : > { %3306 = vmatprep.mubr.bf16.mxu1 %v14074_v37  ;;  %v13201_v48 = vld [vmem:[%s13987_s22 + $0x780] sm:$0xff]  }
  0xce   : > { %12390 = vmatpush3.bf16.msra.mxu0 %v13140_v49  ;;  %v13202_v49 = vld [vmem:[%s13987_s22 + $0x748] sm:$0xff]  }
  0xcf   : > { %12412 = vmatpush3.bf16.msra.mxu1 %v13141_v50  ;;  %12391 = vmatprep.subr.bf16.mxu0 %v13142_v51  ;;  %v13203_v50 = vld [vmem:[%s13987_s22 + $0x7c8] sm:$0xff]  }
  0xd0   : > { %12413 = vmatprep.subr.bf16.mxu1 %v13143_v52  ;;  %v13204_v51 = vld [vmem:[%s13987_s22 + $0x708] sm:$0xff]  }
  0xd1   : > { %v13205_v52 = vld [vmem:[%s13987_s22 + $0x788] sm:$0xff]  }
  0xd2   : > { %12392 = vmatpush3.bf16.msra.mxu0 %v13144_v53  ;;  %v13206_v53 = vld [vmem:[%s13987_s22 + $0x750] sm:$0xff]  }
  0xd3   : > { %12414 = vmatpush3.bf16.msra.mxu1 %v13145_v54  ;;  %12393 = vmatprep.subr.bf16.mxu0 %v13146_v55  ;;  %v13207_v54 = vld [vmem:[%s13987_s22 + $0x7d0] sm:$0xff]  }
  0xd4   : > { %12415 = vmatprep.subr.bf16.mxu1 %v13147_v56  ;;  %v13208_v55 = vld [vmem:[%s13987_s22 + $0x710] sm:$0xff]  }
  0xd5   : > { %v13209_v56 = vld [vmem:[%s13987_s22 + $0x790] sm:$0xff]  }
  0xd6   : > { %12394 = vmatpush3.bf16.msra.mxu0 %v13148_v57  ;;  %v13210_v57 = vld [vmem:[%s13987_s22 + $0x758] sm:$0xff]  }
  0xd7   : > { %12416 = vmatpush3.bf16.msra.mxu1 %v13149_v58  ;;  %12395 = vmatprep.subr.bf16.mxu0 %v13150_v59  ;;  %v13211_v58 = vld [vmem:[%s13987_s22 + $0x7d8] sm:$0xff]  }
  0xd8   : > { %12417 = vmatprep.subr.bf16.mxu1 %v13151_v60  ;;  %v13212_v59 = vld [vmem:[%s13987_s22 + $0x718] sm:$0xff]  }
  0xd9   : > { %v13213_v60 = vld [vmem:[%s13987_s22 + $0x798] sm:$0xff]  }
  0xda   : > { %12396 = vmatpush3.bf16.msra.mxu0 %v13152_v61  ;;  %v13214_v61 = vld [vmem:[%s13987_s22 + $0x760] sm:$0xff]  }
  0xdb   : > { %12418 = vmatpush3.bf16.msra.mxu1 %v13153_v62  ;;  %12397 = vmatprep.subr.bf16.mxu0 %v13154_v63  ;;  %v13215_v62 = vld [vmem:[%s13987_s22 + $0x7e0] sm:$0xff]  }
  0xdc   : > { %12419 = vmatprep.subr.bf16.mxu1 %v13155_v0  ;;  %v13216_v63 = vld [vmem:[%s13987_s22 + $0x720] sm:$0xff]  }
  0xdd   : > { %v13217_v0 = vld [vmem:[%s13987_s22 + $0x7a0] sm:$0xff]  }
  0xde   : > { %12398 = vmatpush3.bf16.msra.mxu0 %v13156_v1  ;;  %v13218_v1 = vld [vmem:[%s13987_s22 + $0x768] sm:$0xff]  }
  0xdf   : > { %12420 = vmatpush3.bf16.msra.mxu1 %v13157_v2  ;;  %12399 = vmatprep.subr.bf16.mxu0 %v13158_v3 }
  0xe0   : > { %12421 = vmatprep.subr.bf16.mxu1 %v13159_v4  ;;  %v13219_v4 = vld [vmem:[%s13987_s22 + $0x7e8] sm:$0xff]  }
  0xe2   : > { %12400 = vmatpush3.bf16.msra.mxu0 %v13160_v5  ;;  %v13220_v5 = vld [vmem:[%s13987_s22 + $0x728] sm:$0xff]  }
  0xe3   : > { %12422 = vmatpush3.bf16.msra.mxu1 %v13161_v6  ;;  %12401 = vmatprep.subr.bf16.mxu0 %v13162_v7 }
  0xe4   : > { %12423 = vmatprep.subr.bf16.mxu1 %v13163_v8 }
  0xe6   : > { %12402 = vmatpush3.bf16.msra.mxu0 %v13164_v9 }
  0xe7   : > { %12424 = vmatpush3.bf16.msra.mxu1 %v13165_v10  ;;  %12431 = vmatprep.subr.bf16.mxu0 %v13166_v11 }
  0xe8   : > { %12453 = vmatprep.subr.bf16.mxu1 %v13167_v12  ;;  %v13221_v12 = vld [vmem:[%s13987_s22 + $0x7a8] sm:$0xff]  }
  0xe9   : > { %3171 = vmatmul.mubr.bf16.vlgmr.msra.gmra.mrb[20].mxu0 %v14076_v38 }
  0xea   : > { %3307 = vmatmul.mubr.bf16.vlgmr.msra.gmra.mrb[20].mxu1 %v14076_v38  ;;  %12432 = vmatpush3.bf16.msra.mxu0 %v13168_v13  ;;  %v13222_v13 = vld [vmem:[%s13987_s22 + $0x770] sm:$0xff]  }
  0xeb   : > { %12454 = vmatpush3.bf16.msra.mxu1 %v13169_v14  ;;  %12433 = vmatprep.subr.bf16.mxu0 %v13170_v15 }
  0xec   : > { %3442 = vmatprep.mubr.bf16.mxu0 %v14074_v37  ;;  %12455 = vmatprep.subr.bf16.mxu1 %v13171_v16  ;;  %v13223_v16 = vld [vmem:[%s13987_s22 + $0x7f0] sm:$0xff]  }
  0xed   : > { %3578 = vmatprep.mubr.bf16.mxu1 %v14074_v37 }
  0xee   : > { %12434 = vmatpush3.bf16.msra.mxu0 %v13172_v17  ;;  %v13224_v17 = vld [vmem:[%s13987_s22 + $0x730] sm:$0xff]  }
  0xef   : > { %12456 = vmatpush3.bf16.msra.mxu1 %v13173_v18  ;;  %12435 = vmatprep.subr.bf16.mxu0 %v13174_v19  ;;  %v13225_v18 = vld [vmem:[%s13987_s22 + $0x7b0] sm:$0xff]   ;;  %v13226_v19 = vld [vmem:[%s13987_s22 + $0x778] sm:$0xff]  }
  0xf0   : > { %12457 = vmatprep.subr.bf16.mxu1 %v13175_v20  ;;  %v13227_v20 = vld [vmem:[%s13987_s22 + $0x7f8] sm:$0xff]  }
  0xf2   : > { %12436 = vmatpush3.bf16.msra.mxu0 %v13176_v21  ;;  %v13228_v21 = vld [vmem:[%s13987_s22 + $0x738] sm:$0xff]  }
  0xf3   : > { %12458 = vmatpush3.bf16.msra.mxu1 %v13177_v22  ;;  %12437 = vmatprep.subr.bf16.mxu0 %v13178_v23  ;;  %v13229_v22 = vld [vmem:[%s13987_s22 + $0x7b8] sm:$0xff]   ;;  %v13230_v23 = vld [vmem:[%s13987_s22 + $0x840] sm:$0xff]  }
  0xf4   : > { %12459 = vmatprep.subr.bf16.mxu1 %v13179_v24  ;;  %v13231_v24 = vld [vmem:[%s13987_s22 + $0x8c0] sm:$0xff]  }
  0xf6   : > { %12438 = vmatpush3.bf16.msra.mxu0 %v13180_v25  ;;  %v13232_v25 = vld [vmem:[%s13987_s22 + $0x800] sm:$0xff]  }
  0xf7   : > { %12460 = vmatpush3.bf16.msra.mxu1 %v13181_v26  ;;  %12439 = vmatprep.subr.bf16.mxu0 %v13182_v27  ;;  %v13233_v26 = vld [vmem:[%s13987_s22 + $0x880] sm:$0xff]   ;;  %v13234_v27 = vld [vmem:[%s13987_s22 + $0x848] sm:$0xff]  }
  0xf8   : > { %12461 = vmatprep.subr.bf16.mxu1 %v13183_v28  ;;  %v13235_v28 = vld [vmem:[%s13987_s22 + $0x8c8] sm:$0xff]  }
  0xfa   : > { %12440 = vmatpush3.bf16.msra.mxu0 %v13184_v29  ;;  %v13236_v29 = vld [vmem:[%s13987_s22 + $0x808] sm:$0xff]  }
  0xfb   : > { %12462 = vmatpush3.bf16.msra.mxu1 %v13185_v30  ;;  %12441 = vmatprep.subr.bf16.mxu0 %v13186_v31  ;;  %v13237_v30 = vld [vmem:[%s13987_s22 + $0x888] sm:$0xff]   ;;  %v13238_v31 = vld [vmem:[%s13987_s22 + $0x850] sm:$0xff]  }
  0xfc   : > { %12463 = vmatprep.subr.bf16.mxu1 %v13187_v32  ;;  %v13239_v32 = vld [vmem:[%s13987_s22 + $0x8d0] sm:$0xff]  }
  0xfe   : > { %12442 = vmatpush3.bf16.msra.mxu0 %v13188_v33  ;;  %v13240_v33 = vld [vmem:[%s13987_s22 + $0x810] sm:$0xff]  }
  0xff   : > { %12464 = vmatpush3.bf16.msra.mxu1 %v13189_v34  ;;  %12443 = vmatprep.subr.bf16.mxu0 %v13190_v35  ;;  %v13241_v34 = vld [vmem:[%s13987_s22 + $0x890] sm:$0xff]   ;;  %v13242_v35 = vld [vmem:[%s13987_s22 + $0x858] sm:$0xff]  }
 0x100   : > { %12465 = vmatprep.subr.bf16.mxu1 %v13191_v36  ;;  %v13243_v36 = vld [vmem:[%s13987_s22 + $0x8d8] sm:$0xff]  }
 0x102   : > { %12444 = vmatpush3.bf16.msra.mxu0 %v13192_v39  ;;  %v13244_v39 = vld [vmem:[%s13987_s22 + $0x818] sm:$0xff]  }
 0x103   : > { %12466 = vmatpush3.bf16.msra.mxu1 %v13193_v40  ;;  %12445 = vmatprep.subr.bf16.mxu0 %v13194_v41  ;;  %v13245_v40 = vld [vmem:[%s13987_s22 + $0x898] sm:$0xff]   ;;  %v13246_v41 = vld [vmem:[%s13987_s22 + $0x860] sm:$0xff]  }
 0x104   : > { %12467 = vmatprep.subr.bf16.mxu1 %v13195_v42  ;;  %v13247_v42 = vld [vmem:[%s13987_s22 + $0x8e0] sm:$0xff]  }
 0x106   : > { %12446 = vmatpush3.bf16.msra.mxu0 %v13196_v43  ;;  %v13248_v43 = vld [vmem:[%s13987_s22 + $0x820] sm:$0xff]  }
 0x107   : > { %12468 = vmatpush3.bf16.msra.mxu1 %v13197_v44  ;;  %12475 = vmatprep.subr.bf16.mxu0 %v13198_v45  ;;  %v13249_v44 = vld [vmem:[%s13987_s22 + $0x8a0] sm:$0xff]   ;;  %v13250_v45 = vld [vmem:[%s13987_s22 + $0x868] sm:$0xff]  }
 0x108   : > { %12497 = vmatprep.subr.bf16.mxu1 %v13199_v46 }
 0x109   : > { %3443 = vmatmul.mubr.bf16.vlgmr.msra.gmra.mrb[24].mxu0 %v14076_v38 }
 0x10a   : > { %3579 = vmatmul.mubr.bf16.vlgmr.msra.gmra.mrb[24].mxu1 %v14076_v38  ;;  %12476 = vmatpush3.bf16.msra.mxu0 %v13200_v47 }
 0x10b   : > { %12498 = vmatpush3.bf16.msra.mxu1 %v13201_v48  ;;  %12477 = vmatprep.subr.bf16.mxu0 %v13202_v49  ;;  %v13251_v48 = vld [vmem:[%s13987_s22 + $0x8e8] sm:$0xff]  }
 0x10c   : > { %3714 = vmatprep.mubr.bf16.mxu0 %v14074_v37  ;;  %12499 = vmatprep.subr.bf16.mxu1 %v13203_v50  ;;  %v13252_v49 = vld [vmem:[%s13987_s22 + $0x828] sm:$0xff]  }
 0x10d   : > { %3850 = vmatprep.mubr.bf16.mxu1 %v14074_v37 }
 0x10e   : > { %12478 = vmatpush3.bf16.msra.mxu0 %v13204_v51 }
 0x10f   : > { %12500 = vmatpush3.bf16.msra.mxu1 %v13205_v52  ;;  %12479 = vmatprep.subr.bf16.mxu0 %v13206_v53 }
 0x110   : > { %12501 = vmatprep.subr.bf16.mxu1 %v13207_v54 }
 0x112   : > { %12480 = vmatpush3.bf16.msra.mxu0 %v13208_v55 }
 0x113   : > { %12502 = vmatpush3.bf16.msra.mxu1 %v13209_v56  ;;  %12481 = vmatprep.subr.bf16.mxu0 %v13210_v57  ;;  %v13253_v56 = vld [vmem:[%s13987_s22 + $0x8a8] sm:$0xff]  }
 0x114   : > { %12503 = vmatprep.subr.bf16.mxu1 %v13211_v58 }
 0x116   : > { %12482 = vmatpush3.bf16.msra.mxu0 %v13212_v59  ;;  %v13254_v59 = vld [vmem:[%s13987_s22 + $0x870] sm:$0xff]  }
 0x117   : > { %12504 = vmatpush3.bf16.msra.mxu1 %v13213_v60  ;;  %12483 = vmatprep.subr.bf16.mxu0 %v13214_v61  ;;  %v13255_v60 = vld [vmem:[%s13987_s22 + $0x8f0] sm:$0xff]  }
 0x118   : > { %12505 = vmatprep.subr.bf16.mxu1 %v13215_v62  ;;  %v13256_v61 = vld [vmem:[%s13987_s22 + $0x830] sm:$0xff]  }
 0x119   : > { %v13257_v62 = vld [vmem:[%s13987_s22 + $0x8b0] sm:$0xff]  }
 0x11a   : > { %12484 = vmatpush3.bf16.msra.mxu0 %v13216_v63  ;;  %v13258_v63 = vld [vmem:[%s13987_s22 + $0x878] sm:$0xff]  }
 0x11b   : > { %12506 = vmatpush3.bf16.msra.mxu1 %v13217_v0  ;;  %12485 = vmatprep.subr.bf16.mxu0 %v13218_v1  ;;  %v13259_v0 = vld [vmem:[%s13987_s22 + $0x8f8] sm:$0xff]  }
 0x11c   : > { %v12183_v2 = vpop.f32.mrb[0].mxu0  ;;  %12507 = vmatprep.subr.bf16.mxu1 %v13219_v4  ;;  %v13260_v1 = vld [vmem:[%s13987_s22 + $0x838] sm:$0xff]   ;;  %v13263_v4 = vld [vmem:[%s13987_s22 + $0x9c0] sm:$0xff]  }
 0x11d   : > { %v12205_v3 = vpop.f32.mrb[0].mxu1  ;;  %v12184_v6 = vpop.f32.mrb[1].mxu0 }
 0x11e   : > { %v12206_v7 = vpop.f32.mrb[1].mxu1  ;;  %v14323_v8 = vadd.f32 %v12184_v6, %v12183_v2  ;;  %v12186_v10 = vpop.f32.mrb[2].mxu0  ;;  %12486 = vmatpush3.bf16.msra.mxu0 %v13220_v5  ;;  %v13261_v2 = vld [vmem:[%s13987_s22 + $0x8b8] sm:$0xff]   ;;  %v13264_v5 = vld [vmem:[%s13987_s22 + $0x900] sm:$0xff]  }
 0x11f   : > { %v14325_v9 = vadd.f32 %v12206_v7, %v12205_v3  ;;  %v12208_v11 = vpop.f32.mrb[2].mxu1  ;;  %v12187_v14 = vpop.f32.mrb[3].mxu0  ;;  %12508 = vmatpush3.bf16.msra.mxu1 %v13221_v12  ;;  %12487 = vmatprep.subr.bf16.mxu0 %v13222_v13  ;;  %v13262_v3 = vld [vmem:[%s13987_s22 + $0x940] sm:$0xff]   ;;  %v13266_v7 = vld [vmem:[%s13987_s22 + $0x948] sm:$0xff]   ;;  %v13270_v13 = vld [vmem:[%s13987_s22 + $0x950] sm:$0xff]  }
 0x120   : > { %v12209_v15 = vpop.f32.mrb[3].mxu1  ;;  %12509 = vmatprep.subr.bf16.mxu1 %v13223_v16  ;;  %v13265_v6 = vld [vmem:[%s13987_s22 + $0x980] sm:$0xff]   ;;  %v13267_v10 = vld [vmem:[%s13987_s22 + $0x9c8] sm:$0xff]   ;;  %v13271_v14 = vld [vmem:[%s13987_s22 + $0x9d0] sm:$0xff]  }
 0x121   : > { %v13268_v11 = vld [vmem:[%s13987_s22 + $0x908] sm:$0xff]   ;;  %v13272_v15 = vld [vmem:[%s13987_s22 + $0x910] sm:$0xff]  }
 0x122   : > { %12488 = vmatpush3.bf16.msra.mxu0 %v13224_v17  ;;  %v13269_v12 = vld [vmem:[%s13987_s22 + $0x988] sm:$0xff]   ;;  %v13273_v16 = vld [vmem:[%s13987_s22 + $0x990] sm:$0xff]   ;;  %v13274_v17 = vld [vmem:[%s13987_s22 + $0x958] sm:$0xff]  }
 0x123   : > { %12510 = vmatpush3.bf16.msra.mxu1 %v13225_v18  ;;  %12489 = vmatprep.subr.bf16.mxu0 %v13226_v19  ;;  %v13275_v18 = vld [vmem:[%s13987_s22 + $0x9d8] sm:$0xff]  }
 0x124   : > { %12511 = vmatprep.subr.bf16.mxu1 %v13227_v20  ;;  %v13276_v19 = vld [vmem:[%s13987_s22 + $0x918] sm:$0xff]  }
 0x125   : > { %v13277_v20 = vld [vmem:[%s13987_s22 + $0x998] sm:$0xff]  }
 0x126   : > { %12490 = vmatpush3.bf16.msra.mxu0 %v13228_v21  ;;  %v13278_v21 = vld [vmem:[%s13987_s22 + $0x960] sm:$0xff]  }
 0x127   : > { %12512 = vmatpush3.bf16.msra.mxu1 %v13229_v22  ;;  %12519 = vmatprep.subr.bf16.mxu0 %v13230_v23  ;;  %v13279_v22 = vld [vmem:[%s13987_s22 + $0x9e0] sm:$0xff]  }
 0x128   : > { %12541 = vmatprep.subr.bf16.mxu1 %v13231_v24  ;;  %v13280_v23 = vld [vmem:[%s13987_s22 + $0x920] sm:$0xff]  }
 0x129   : > { %3715 = vmatmul.mubr.bf16.vlgmr.msra.gmra.mrb[28].mxu0 %v14076_v38  ;;  %v13281_v24 = vld [vmem:[%s13987_s22 + $0x9a0] sm:$0xff]  }
 0x12a   : > { %3851 = vmatmul.mubr.bf16.vlgmr.msra.gmra.mrb[28].mxu1 %v14076_v38  ;;  %12520 = vmatpush3.bf16.msra.mxu0 %v13232_v25 }
 0x12b   : > { %12542 = vmatpush3.bf16.msra.mxu1 %v13233_v26  ;;  %3986 = vmatprep.mubr.bf16.mxu0 %v14074_v37 }
 0x12c   : > { %12521 = vmatprep.subr.bf16.mxu0 %v13234_v27  ;;  %4122 = vmatprep.mubr.bf16.mxu1 %v14074_v37 }
 0x12d   : > { %12543 = vmatprep.subr.bf16.mxu1 %v13235_v28 }
 0x12e   : > { %12522 = vmatpush3.bf16.msra.mxu0 %v13236_v29  ;;  %v13282_v29 = vld [vmem:[%s13987_s22 + $0x968] sm:$0xff]  }
 0x12f   : > { %12544 = vmatpush3.bf16.msra.mxu1 %v13237_v30  ;;  %12523 = vmatprep.subr.bf16.mxu0 %v13238_v31  ;;  %v13283_v30 = vld [vmem:[%s13987_s22 + $0x9e8] sm:$0xff]  }
 0x130   : > { %12545 = vmatprep.subr.bf16.mxu1 %v13239_v32 }
 0x132   : > { %12524 = vmatpush3.bf16.msra.mxu0 %v13240_v33 }
 0x133   : > { %12546 = vmatpush3.bf16.msra.mxu1 %v13241_v34  ;;  %12525 = vmatprep.subr.bf16.mxu0 %v13242_v35  ;;  %v13284_v35 = vld [vmem:[%s13987_s22 + $0x928] sm:$0xff]  }
 0x134   : > { %12547 = vmatprep.subr.bf16.mxu1 %v13243_v36 }
 0x136   : > { %12526 = vmatpush3.bf16.msra.mxu0 %v13244_v39  ;;  %v13285_v39 = vld [vmem:[%s13987_s22 + $0x9a8] sm:$0xff]  }
 0x137   : > { %12548 = vmatpush3.bf16.msra.mxu1 %v13245_v40  ;;  %12527 = vmatprep.subr.bf16.mxu0 %v13246_v41  ;;  %v13286_v41 = vld [vmem:[%s13987_s22 + $0x970] sm:$0xff]  }
 0x138   : > { %12549 = vmatprep.subr.bf16.mxu1 %v13247_v42  ;;  %v13287_v42 = vld [vmem:[%s13987_s22 + $0x9f0] sm:$0xff]  }
 0x13a   : > { %12528 = vmatpush3.bf16.msra.mxu0 %v13248_v43  ;;  %v13288_v43 = vld [vmem:[%s13987_s22 + $0x930] sm:$0xff]  }
 0x13b   : > { %12550 = vmatpush3.bf16.msra.mxu1 %v13249_v44  ;;  %12529 = vmatprep.subr.bf16.mxu0 %v13250_v45  ;;  %v13289_v44 = vld [vmem:[%s13987_s22 + $0x9b0] sm:$0xff]   ;;  %v13290_v45 = vld [vmem:[%s13987_s22 + $0x978] sm:$0xff]  }
 0x13c   : > { %v12227_v46 = vpop.f32.mrb[4].mxu0  ;;  %12551 = vmatprep.subr.bf16.mxu1 %v13251_v48  ;;  %v13293_v48 = vld [vmem:[%s13987_s22 + $0x9b8] sm:$0xff]  }
 0x13d   : > { %v12249_v47 = vpop.f32.mrb[4].mxu1  ;;  %v12228_v50 = vpop.f32.mrb[5].mxu0 }
 0x13e   : > { %v12250_v51 = vpop.f32.mrb[5].mxu1  ;;  %v14363_v52 = vadd.f32 %v12228_v50, %v12227_v46  ;;  %v12230_v54 = vpop.f32.mrb[6].mxu0  ;;  %12530 = vmatpush3.bf16.msra.mxu0 %v13252_v49  ;;  %v13291_v46 = vld [vmem:[%s13987_s22 + $0x9f8] sm:$0xff]   ;;  %v13294_v49 = vld [vmem:[%s13987_s22 + $0xa40] sm:$0xff]  }
 0x13f   : > { %v14365_v53 = vadd.f32 %v12250_v51, %v12249_v47  ;;  %v12252_v55 = vpop.f32.mrb[6].mxu1  ;;  %v12231_v57 = vpop.f32.mrb[7].mxu0  ;;  %12552 = vmatpush3.bf16.msra.mxu1 %v13253_v56  ;;  %12531 = vmatprep.subr.bf16.mxu0 %v13254_v59  ;;  %v13292_v47 = vld [vmem:[%s13987_s22 + $0x938] sm:$0xff]   ;;  %v13295_v50 = vld [vmem:[%s13987_s22 + $0xac0] sm:$0xff]   ;;  %v13299_v56 = vld [vmem:[%s13987_s22 + $0xac8] sm:$0xff]  }
 0x140   : > { %v12253_v58 = vpop.f32.mrb[7].mxu1  ;;  %12553 = vmatprep.subr.bf16.mxu1 %v13255_v60  ;;  %v13296_v51 = vld [vmem:[%s13987_s22 + $0xa00] sm:$0xff]   ;;  %v13298_v55 = vld [vmem:[%s13987_s22 + $0xa48] sm:$0xff]   ;;  %v13302_v59 = vld [vmem:[%s13987_s22 + $0xa50] sm:$0xff]  }
 0x141   : > { %v13297_v54 = vld [vmem:[%s13987_s22 + $0xa80] sm:$0xff]   ;;  %v13300_v57 = vld [vmem:[%s13987_s22 + $0xa08] sm:$0xff]   ;;  %v13303_v60 = vld [vmem:[%s13987_s22 + $0xad0] sm:$0xff]  }
 0x142   : > { %12532 = vmatpush3.bf16.msra.mxu0 %v13256_v61  ;;  %v13301_v58 = vld [vmem:[%s13987_s22 + $0xa88] sm:$0xff]   ;;  %v13304_v61 = vld [vmem:[%s13987_s22 + $0xa10] sm:$0xff]  }
 0x143   : > { %12554 = vmatpush3.bf16.msra.mxu1 %v13257_v62  ;;  %12533 = vmatprep.subr.bf16.mxu0 %v13258_v63  ;;  %v13305_v62 = vld [vmem:[%s13987_s22 + $0xa90] sm:$0xff]   ;;  %v13306_v63 = vld [vmem:[%s13987_s22 + $0xa58] sm:$0xff]  }
 0x144   : > { %12555 = vmatprep.subr.bf16.mxu1 %v13259_v0  ;;  %v13307_v0 = vld [vmem:[%s13987_s22 + $0xad8] sm:$0xff]  }
 0x146   : > { %12534 = vmatpush3.bf16.msra.mxu0 %v13260_v1  ;;  %v13308_v1 = vld [vmem:[%s13987_s22 + $0xa18] sm:$0xff]  }
 0x147   : > { %12556 = vmatpush3.bf16.msra.mxu1 %v13261_v2  ;;  %12563 = vmatprep.subr.bf16.mxu0 %v13262_v3  ;;  %v13309_v2 = vld [vmem:[%s13987_s22 + $0xa98] sm:$0xff]   ;;  %v13310_v3 = vld [vmem:[%s13987_s22 + $0xa60] sm:$0xff]  }
 0x148   : > { %12585 = vmatprep.subr.bf16.mxu1 %v13263_v4  ;;  %v13311_v4 = vld [vmem:[%s13987_s22 + $0xae0] sm:$0xff]  }
 0x149   : > { %3987 = vmatmul.mubr.bf16.vlgmr.msra.gmra.mrb[32].mxu0 %v14076_v38 }
 0x14a   : > { %4123 = vmatmul.mubr.bf16.vlgmr.msra.gmra.mrb[32].mxu1 %v14076_v38  ;;  %12564 = vmatpush3.bf16.msra.mxu0 %v13264_v5  ;;  %v13312_v5 = vld [vmem:[%s13987_s22 + $0xa20] sm:$0xff]  }
 0x14b   : > { %12586 = vmatpush3.bf16.msra.mxu1 %v13265_v6  ;;  %4258 = vmatprep.mubr.bf16.mxu0 %v14074_v37  ;;  %v13313_v6 = vld [vmem:[%s13987_s22 + $0xaa0] sm:$0xff]  }
 0x14c   : > { %12565 = vmatprep.subr.bf16.mxu0 %v13266_v7  ;;  %4394 = vmatprep.mubr.bf16.mxu1 %v14074_v37 }
 0x14d   : > { %12587 = vmatprep.subr.bf16.mxu1 %v13267_v10 }
 0x14e   : > { %12566 = vmatpush3.bf16.msra.mxu0 %v13268_v11  ;;  %v13314_v11 = vld [vmem:[%s13987_s22 + $0xa68] sm:$0xff]  }
 0x14f   : > { %12588 = vmatpush3.bf16.msra.mxu1 %v13269_v12  ;;  %12567 = vmatprep.subr.bf16.mxu0 %v13270_v13 }
 0x150   : > { %12589 = vmatprep.subr.bf16.mxu1 %v13271_v14 }
 0x152   : > { %12568 = vmatpush3.bf16.msra.mxu0 %v13272_v15 }
 0x153   : > { %12590 = vmatpush3.bf16.msra.mxu1 %v13273_v16  ;;  %12569 = vmatprep.subr.bf16.mxu0 %v13274_v17  ;;  %v13315_v16 = vld [vmem:[%s13987_s22 + $0xae8] sm:$0xff]  }
 0x154   : > { %12591 = vmatprep.subr.bf16.mxu1 %v13275_v18 }
 0x156   : > { %12570 = vmatpush3.bf16.msra.mxu0 %v13276_v19  ;;  %v13316_v19 = vld [vmem:[%s13987_s22 + $0xa28] sm:$0xff]  }
 0x157   : > { %12592 = vmatpush3.bf16.msra.mxu1 %v13277_v20  ;;  %12571 = vmatprep.subr.bf16.mxu0 %v13278_v21  ;;  %v13317_v20 = vld [vmem:[%s13987_s22 + $0xaa8] sm:$0xff]  }
 0x158   : > { %12593 = vmatprep.subr.bf16.mxu1 %v13279_v22 }
 0x15a   : > { %12572 = vmatpush3.bf16.msra.mxu0 %v13280_v23  ;;  %v13318_v23 = vld [vmem:[%s13987_s22 + $0xa70] sm:$0xff]  }
 0x15b   : > { %12594 = vmatpush3.bf16.msra.mxu1 %v13281_v24  ;;  %12573 = vmatprep.subr.bf16.mxu0 %v13282_v29  ;;  %v13319_v24 = vld [vmem:[%s13987_s22 + $0xaf0] sm:$0xff]   ;;  %v13324_v29 = vld [vmem:[%s13987_s22 + $0xa38] sm:$0xff]  }
 0x15c   : > { %v12271_v25 = vpop.f32.mrb[8].mxu0  ;;  %12595 = vmatprep.subr.bf16.mxu1 %v13283_v30  ;;  %v13325_v30 = vld [vmem:[%s13987_s22 + $0xab8] sm:$0xff]  }
 0x15d   : > { %v12293_v26 = vpop.f32.mrb[8].mxu1  ;;  %v12272_v27 = vpop.f32.mrb[9].mxu0 }
 0x15e   : > { %v12294_v28 = vpop.f32.mrb[9].mxu1  ;;  %v14402_v31 = vadd.f32 %v12272_v27, %v12271_v25  ;;  %v12274_v33 = vpop.f32.mrb[10].mxu0  ;;  %12574 = vmatpush3.bf16.msra.mxu0 %v13284_v35  ;;  %v13320_v25 = vld [vmem:[%s13987_s22 + $0xa30] sm:$0xff]   ;;  %v13322_v27 = vld [vmem:[%s13987_s22 + $0xa78] sm:$0xff]   ;;  %v13328_v35 = vld [vmem:[%s13987_s22 + $0xb00] sm:$0xff]  }
 0x15f   : > { %v14404_v32 = vadd.f32 %v12294_v28, %v12293_v26  ;;  %v12296_v34 = vpop.f32.mrb[10].mxu1  ;;  %v12275_v36 = vpop.f32.mrb[11].mxu0  ;;  %12596 = vmatpush3.bf16.msra.mxu1 %v13285_v39  ;;  %12575 = vmatprep.subr.bf16.mxu0 %v13286_v41  ;;  %v13321_v26 = vld [vmem:[%s13987_s22 + $0xab0] sm:$0xff]   ;;  %v13323_v28 = vld [vmem:[%s13987_s22 + $0xaf8] sm:$0xff]   ;;  %v13326_v33 = vld [vmem:[%s13987_s22 + $0xb40] sm:$0xff]  }
 0x160   : > { %v12297_v40 = vpop.f32.mrb[11].mxu1  ;;  %12597 = vmatprep.subr.bf16.mxu1 %v13287_v42  ;;  %v13327_v34 = vld [vmem:[%s13987_s22 + $0xbc0] sm:$0xff]   ;;  %v13330_v39 = vld [vmem:[%s13987_s22 + $0xb48] sm:$0xff]  }
 0x161   : > { %v13329_v36 = vld [vmem:[%s13987_s22 + $0xb80] sm:$0xff]   ;;  %v13331_v40 = vld [vmem:[%s13987_s22 + $0xbc8] sm:$0xff]  }
 0x162   : > { %12576 = vmatpush3.bf16.msra.mxu0 %v13288_v43  ;;  %v13332_v41 = vld [vmem:[%s13987_s22 + $0xb08] sm:$0xff]   ;;  %v13334_v43 = vld [vmem:[%s13987_s22 + $0xb50] sm:$0xff]  }
 0x163   : > { %12598 = vmatpush3.bf16.msra.mxu1 %v13289_v44  ;;  %12577 = vmatprep.subr.bf16.mxu0 %v13290_v45  ;;  %v13333_v42 = vld [vmem:[%s13987_s22 + $0xb88] sm:$0xff]   ;;  %v13335_v44 = vld [vmem:[%s13987_s22 + $0xbd0] sm:$0xff]  }
 0x164   : > { %12599 = vmatprep.subr.bf16.mxu1 %v13291_v46  ;;  %v13336_v45 = vld [vmem:[%s13987_s22 + $0xb10] sm:$0xff]  }
 0x165   : > { %v13337_v46 = vld [vmem:[%s13987_s22 + $0xb90] sm:$0xff]  }
 0x166   : > { %12578 = vmatpush3.bf16.msra.mxu0 %v13292_v47  ;;  %v13338_v47 = vld [vmem:[%s13987_s22 + $0xb58] sm:$0xff]  }
 0x167   : > { %12600 = vmatpush3.bf16.msra.mxu1 %v13293_v48  ;;  %12607 = vmatprep.subr.bf16.mxu0 %v13294_v49  ;;  %v13340_v48 = vld [vmem:[%s13987_s22 + $0xb18] sm:$0xff]  }
 0x168   : > { %12629 = vmatprep.subr.bf16.mxu1 %v13295_v50  ;;  %v13341_v49 = vld [vmem:[%s13987_s22 + $0xb98] sm:$0xff]   ;;  %v13342_v50 = vld [vmem:[%s13987_s22 + $0xb60] sm:$0xff]  }
 0x169   : > { %4259 = vmatmul.mubr.bf16.vlgmr.msra.gmra.mrb[36].mxu0 %v14076_v38 }
 0x16a   : > { %4395 = vmatmul.mubr.bf16.vlgmr.msra.gmra.mrb[36].mxu1 %v14076_v38  ;;  %12608 = vmatpush3.bf16.msra.mxu0 %v13296_v51  ;;  %v13343_v51 = vld [vmem:[%s13987_s22 + $0xbe0] sm:$0xff]  }
 0x16b   : > { %12630 = vmatpush3.bf16.msra.mxu1 %v13297_v54  ;;  %4530 = vmatprep.mubr.bf16.mxu0 %v14074_v37  ;;  %v13344_v54 = vld [vmem:[%s13987_s22 + $0xb20] sm:$0xff]  }
 0x16c   : > { %12609 = vmatprep.subr.bf16.mxu0 %v13298_v55  ;;  %4666 = vmatprep.mubr.bf16.mxu1 %v14074_v37 }
 0x16d   : > { %12631 = vmatprep.subr.bf16.mxu1 %v13299_v56  ;;  %v13345_v56 = vld [vmem:[%s13987_s22 + $0xba0] sm:$0xff]  }
 0x16e   : > { %12610 = vmatpush3.bf16.msra.mxu0 %v13300_v57 }
 0x16f   : > { %12632 = vmatpush3.bf16.msra.mxu1 %v13301_v58  ;;  %12611 = vmatprep.subr.bf16.mxu0 %v13302_v59 }
 0x170   : > { %12633 = vmatprep.subr.bf16.mxu1 %v13303_v60 }
 0x172   : > { %12612 = vmatpush3.bf16.msra.mxu0 %v13304_v61 }
 0x173   : > { %12634 = vmatpush3.bf16.msra.mxu1 %v13305_v62  ;;  %12613 = vmatprep.subr.bf16.mxu0 %v13306_v63  ;;  %v13346_v62 = vld [vmem:[%s13987_s22 + $0xb68] sm:$0xff]  }
 0x174   : > { %12635 = vmatprep.subr.bf16.mxu1 %v13307_v0  ;;  %v13347_v0 = vld [vmem:[%s13987_s22 + $0xbe8] sm:$0xff]  }
 0x176   : > { %12614 = vmatpush3.bf16.msra.mxu0 %v13308_v1 }
 0x177   : > { %12636 = vmatpush3.bf16.msra.mxu1 %v13309_v2  ;;  %12615 = vmatprep.subr.bf16.mxu0 %v13310_v3  ;;  %v13348_v2 = vld [vmem:[%s13987_s22 + $0xb28] sm:$0xff]  }
 0x178   : > { %12637 = vmatprep.subr.bf16.mxu1 %v13311_v4  ;;  %v13349_v4 = vld [vmem:[%s13987_s22 + $0xba8] sm:$0xff]  }
 0x17a   : > { %12616 = vmatpush3.bf16.msra.mxu0 %v13312_v5 }
 0x17b   : > { %12638 = vmatpush3.bf16.msra.mxu1 %v13313_v6  ;;  %12617 = vmatprep.subr.bf16.mxu0 %v13314_v11  ;;  %v13350_v6 = vld [vmem:[%s13987_s22 + $0xb70] sm:$0xff]  }
 0x17c   : > { %v12315_v7 = vpop.f32.mrb[12].mxu0  ;;  %12639 = vmatprep.subr.bf16.mxu1 %v13315_v16  ;;  %v13353_v11 = vld [vmem:[%s13987_s22 + $0xbb0] sm:$0xff]   ;;  %v13356_v16 = vld [vmem:[%s13987_s22 + $0xb38] sm:$0xff]  }
 0x17d   : > { %v12337_v10 = vpop.f32.mrb[12].mxu1  ;;  %v12316_v12 = vpop.f32.mrb[13].mxu0 }
 0x17e   : > { %v12338_v13 = vpop.f32.mrb[13].mxu1  ;;  %v14441_v14 = vadd.f32 %v12316_v12, %v12315_v7  ;;  %v12318_v17 = vpop.f32.mrb[14].mxu0  ;;  %12618 = vmatpush3.bf16.msra.mxu0 %v13316_v19  ;;  %v13351_v7 = vld [vmem:[%s13987_s22 + $0xbf0] sm:$0xff]   ;;  %v13354_v12 = vld [vmem:[%s13987_s22 + $0xb78] sm:$0xff]   ;;  %v11183_v19 = vld [vmem:[%s13994_s26 + $0x8] ss:$0 sm:$0xff] }
 0x17f   : > { %v14443_v15 = vadd.f32 %v12338_v13, %v12337_v10  ;;  %v12340_v18 = vpop.f32.mrb[14].mxu1  ;;  %v12319_v21 = vpop.f32.mrb[15].mxu0  ;;  %12640 = vmatpush3.bf16.msra.mxu1 %v13317_v20  ;;  %12619 = vmatprep.subr.bf16.mxu0 %v13318_v23  ;;  %v13352_v10 = vld [vmem:[%s13987_s22 + $0xb30] sm:$0xff]   ;;  %v13355_v13 = vld [vmem:[%s13987_s22 + $0xbf8] sm:$0xff]   ;;  %v11184_v20 = vld [vmem:[%s13994_s26 + $0x9] ss:$0 sm:$0xff] }
 0x180   : > { %v12341_v22 = vpop.f32.mrb[15].mxu1  ;;  %12641 = vmatprep.subr.bf16.mxu1 %v13319_v24  ;;  %v13357_v17 = vld [vmem:[%s13987_s22 + $0xbb8] sm:$0xff]   ;;  %v13866_v18 = vmov 0.0   ;;  %v11175_v21 = vld [vmem:[%s13994_s26] ss:$0 sm:$0xff] }
 0x181   : > { %v11176_v22 = vld [vmem:[%s13994_s26 + $0x1] ss:$0 sm:$0xff] }
 0x182   : > { %12620 = vmatpush3.bf16.msra.mxu0 %v13320_v25  ;;  %v1813_v25 = vadd.f32 %v14323_v8, %v11175_v21  ;;  %v11185_v8 = vld [vmem:[%s13994_s26 + $0xa] ss:$0 sm:$0xff] }
 0x183   : > { %12642 = vmatpush3.bf16.msra.mxu1 %v13321_v26  ;;  %12621 = vmatprep.subr.bf16.mxu0 %v13322_v27  ;;  %v11186_v26 = vld [vmem:[%s13994_s26 + $0xb] ss:$0 sm:$0xff] }
 0x184   : > { %12643 = vmatprep.subr.bf16.mxu1 %v13323_v28 }
 0x186   : > { %12622 = vmatpush3.bf16.msra.mxu0 %v13324_v29 }
 0x187   : > { %12644 = vmatpush3.bf16.msra.mxu1 %v13325_v30  ;;  %12651 = vmatprep.subr.bf16.mxu0 %v13326_v33 }
 0x188   : > { %12673 = vmatprep.subr.bf16.mxu1 %v13327_v34 }
 0x189   : > { %4531 = vmatmul.mubr.bf16.vlgmr.msra.gmra.mrb[40].mxu0 %v14076_v38 }
 0x18a   : > { %4667 = vmatmul.mubr.bf16.vlgmr.msra.gmra.mrb[40].mxu1 %v14076_v38  ;;  %12652 = vmatpush3.bf16.msra.mxu0 %v13328_v35 }
 0x18b   : > { %12674 = vmatpush3.bf16.msra.mxu1 %v13329_v36  ;;  %4802 = vmatprep.mubr.bf16.mxu0 %v14074_v37 }
 0x18c   : > { %12653 = vmatprep.subr.bf16.mxu0 %v13330_v39  ;;  %4938 = vmatprep.mubr.bf16.mxu1 %v14074_v37  ;;  %v13339_v37 = vld [vmem:[%s13987_s22 + $0xbd8] sm:$0xff]   ;;  %v11178_v39 = vld [vmem:[%s13994_s26 + $0x3] ss:$0 sm:$0xff]  ;;  %s15616_s22 = scalar_lea.vmem %s15582_s4, %s13989_s23 }
 0x18d   : > { %12675 = vmatprep.subr.bf16.mxu1 %v13331_v40 }
 0x18e   : > { %12654 = vmatpush3.bf16.msra.mxu0 %v13332_v41 }
 0x18f   : > { %12676 = vmatpush3.bf16.msra.mxu1 %v13333_v42  ;;  %12655 = vmatprep.subr.bf16.mxu0 %v13334_v43 }
 0x190   : > { %12677 = vmatprep.subr.bf16.mxu1 %v13335_v44 }
 0x192   : > { %12656 = vmatpush3.bf16.msra.mxu0 %v13336_v45  ;;  %v2221_v45 = vadd.f32 %v14365_v53, %v11178_v39 }
 0x193   : > { %12678 = vmatpush3.bf16.msra.mxu1 %v13337_v46  ;;  %12657 = vmatprep.subr.bf16.mxu0 %v13338_v47  ;;  %v11187_v46 = vld [vmem:[%s13994_s26 + $0xc] ss:$0 sm:$0xff]  ;;  %v11188_v47 = vld [vmem:[%s13994_s26 + $0xd] ss:$0 sm:$0xff] }
 0x194   : > { %12679 = vmatprep.subr.bf16.mxu1 %v13339_v37 }
 0x196   : > { %12658 = vmatpush3.bf16.msra.mxu0 %v13340_v48 }
 0x197   : > { %12680 = vmatpush3.bf16.msra.mxu1 %v13341_v49  ;;  %12659 = vmatprep.subr.bf16.mxu0 %v13342_v50  ;;  %v11179_v49 = vld [vmem:[%s13994_s26 + $0x4] ss:$0 sm:$0xff]  ;;  %v11180_v50 = vld [vmem:[%s13994_s26 + $0x5] ss:$0 sm:$0xff] }
 0x198   : > { %12681 = vmatprep.subr.bf16.mxu1 %v13343_v51 }
 0x19a   : > { %12660 = vmatpush3.bf16.msra.mxu0 %v13344_v54 }
 0x19b   : > { %12682 = vmatpush3.bf16.msra.mxu1 %v13345_v56  ;;  %12661 = vmatprep.subr.bf16.mxu0 %v13346_v62  ;;  %v2493_v62 = vadd.f32 %v14404_v32, %v11180_v50  ;;  %v4946_v50 = vlaneseq }
 0x19c   : > { %v12359_v55 = vpop.f32.mrb[16].mxu0  ;;  %12683 = vmatprep.subr.bf16.mxu1 %v13347_v0 }
 0x19d   : > { %v12381_v57 = vpop.f32.mrb[16].mxu1  ;;  %v12360_v58 = vpop.f32.mrb[17].mxu0 }
 0x19e   : > { %v12382_v59 = vpop.f32.mrb[17].mxu1  ;;  %v12361_v60 = vadd.f32 %v12360_v58, %v12359_v55  ;;  %v12362_v63 = vpop.f32.mrb[18].mxu0  ;;  %12662 = vmatpush3.bf16.msra.mxu0 %v13348_v2  ;;  %v11181_v2 = vld [vmem:[%s13994_s26 + $0x6] ss:$0 sm:$0xff] }
 0x19f   : > { %v12383_v61 = vadd.f32 %v12382_v59, %v12381_v57  ;;  %v12384_v1 = vpop.f32.mrb[18].mxu1  ;;  %v12363_v3 = vpop.f32.mrb[19].mxu0  ;;  %12684 = vmatpush3.bf16.msra.mxu1 %v13349_v4  ;;  %12663 = vmatprep.subr.bf16.mxu0 %v13350_v6  ;;  %v11189_v63 = vld [vmem:[%s13994_s26 + $0xe] ss:$0 sm:$0xff]  ;;  %v11182_v6 = vld [vmem:[%s13994_s26 + $0x7] ss:$0 sm:$0xff] }
 0x1a0   : > { %v12385_v5 = vpop.f32.mrb[19].mxu1  ;;  %12685 = vmatprep.subr.bf16.mxu1 %v13351_v7  ;;  %v2901_v23 = vadd.f32 %v12361_v60, %v11183_v19  ;;  %v2765_v19 = vadd.f32 %v14443_v15, %v11182_v6 }
 0x1a1   : > { %v3037_v24 = vadd.f32 %v12383_v61, %v11184_v20  ;;  %v2357_v61 = vadd.f32 %v14402_v31, %v11179_v49  ;;  %v11190_v31 = vld [vmem:[%s13994_s26 + $0xf] ss:$0 sm:$0xff] }
 0x1a2   : > { %12664 = vmatpush3.bf16.msra.mxu0 %v13352_v10 }
 0x1a3   : > { %12686 = vmatpush3.bf16.msra.mxu1 %v13353_v11  ;;  %12665 = vmatprep.subr.bf16.mxu0 %v13354_v12 }
 0x1a4   : > { %12687 = vmatprep.subr.bf16.mxu1 %v13355_v13 }
 0x1a6   : > { %12666 = vmatpush3.bf16.msra.mxu0 %v13356_v16 }
 0x1a7   : > { %12688 = vmatpush3.bf16.msra.mxu1 %v13357_v17  ;;  %12779 = vmatprep.subr.mxu0 %v13866_v18  ;;  %v2629_v17 = vadd.f32 %v14441_v14, %v11181_v2  ;;  %v11191_v14 = vld [vmem:[%s13994_s26 + $0x10] ss:$0 sm:$0xff] }
 0x1a8   : > { %12784 = vmatprep.subr.mxu1 %v13866_v18 }
 0x1a9   : > { %4803 = vmatmul.mubr.bf16.vlgmr.msra.gmra.mrb[44].mxu0 %v14076_v38 }
 0x1aa   : > { %4939 = vmatmul.mubr.bf16.vlgmr.msra.gmra.mrb[44].mxu1 %v14076_v38  ;;  %12781 = vmatprep.mubr.msk.f32.mxu0 %vm13867_vm0, %v13866_v18  ;;  %v1949_v38 = vadd.f32 %v14325_v9, %v11176_v22  ;;  %v11177_v9 = vld [vmem:[%s13994_s26 + $0x2] ss:$0 sm:$0xff] }
 0x1ab   : > { %12786 = vmatprep.mubr.msk.f32.mxu1 %vm13867_vm0, %v13866_v18  ;;  %v2085_v44 = vadd.f32 %v14363_v52, %v11177_v9 }
 0x1af   : > { %12780 = vmatpush3.xpose.msk.msra.mxu0 %vm4950_vm1, %v2901_v23 }
 0x1b0   : > { %12785 = vmatpush3.xpose.msk.msra.mxu1 %vm4950_vm1, %v3037_v24  ;;  %12789 = vmatprep.subr.mxu0 %v13866_v18 }
 0x1b1   : > { %12794 = vmatprep.subr.mxu1 %v13866_v18 }
 0x1b2   : > { %12782 = vmatmul.mubr.msk.f32.vlgmr.msra.gmra.mrb[48].mxu0 %vm4950_vm1, %v1813_v25  ;;  %v11192_v25 = vld [vmem:[%s13994_s26 + $0x11] ss:$0 sm:$0xff] }
 0x1b3   : > { %12787 = vmatmul.mubr.msk.f32.vlgmr.msra.gmra.mrb[48].mxu1 %vm4950_vm1, %v1949_v38  ;;  %12791 = vmatprep.mubr.msk.f32.mxu0 %vm13867_vm0, %v13866_v18 }
 0x1b4   : > { %12796 = vmatprep.mubr.msk.f32.mxu1 %vm13867_vm0, %v13866_v18 }
 0x1bc   : > { %v12403_v27 = vpop.f32.mrb[20].mxu0 }
 0x1bd   : > { %v12425_v28 = vpop.f32.mrb[20].mxu1  ;;  %v12404_v29 = vpop.f32.mrb[21].mxu0 }
 0x1be   : > { %v12426_v30 = vpop.f32.mrb[21].mxu1  ;;  %v12405_v33 = vadd.f32 %v12404_v29, %v12403_v27  ;;  %v12406_v35 = vpop.f32.mrb[22].mxu0 }
 0x1bf   : > { %v12427_v34 = vadd.f32 %v12426_v30, %v12425_v28  ;;  %v12428_v36 = vpop.f32.mrb[22].mxu1  ;;  %v12407_v40 = vpop.f32.mrb[23].mxu0 }
 0x1c0   : > { %v12429_v41 = vpop.f32.mrb[23].mxu1  ;;  %v3173_v42 = vadd.f32 %v12405_v33, %v11185_v8 }
 0x1c1   : > { %v3309_v43 = vadd.f32 %v12427_v34, %v11186_v26 }
 0x1c2   : > { %12790 = vmatpush3.xpose.msk.msra.mxu0 %vm4950_vm1, %v3173_v42 }
 0x1c3   : > { %12795 = vmatpush3.xpose.msk.msra.mxu1 %vm4950_vm1, %v3309_v43  ;;  %12799 = vmatprep.subr.mxu0 %v13866_v18 }
 0x1c4   : > { %12804 = vmatprep.subr.mxu1 %v13866_v18 }
 0x1c5   : > { %12792 = vmatmul.mubr.msk.f32.vlgmr.msra.gmra.mrb[50].mxu0 %vm4950_vm1, %v2085_v44 }
 0x1c6   : > { %12797 = vmatmul.mubr.msk.f32.vlgmr.msra.gmra.mrb[50].mxu1 %vm4950_vm1, %v2221_v45  ;;  %12801 = vmatprep.mubr.msk.f32.mxu0 %vm13867_vm0, %v13866_v18 }
 0x1c7   : > { %12806 = vmatprep.mubr.msk.f32.mxu1 %vm13867_vm0, %v13866_v18 }
 0x1dc   : > { %v12447_v37 = vpop.f32.mrb[24].mxu0 }
 0x1dd   : > { %v12469_v52 = vpop.f32.mrb[24].mxu1  ;;  %v12448_v48 = vpop.f32.mrb[25].mxu0 }
 0x1de   : > { %v12470_v53 = vpop.f32.mrb[25].mxu1  ;;  %v12449_v51 = vadd.f32 %v12448_v48, %v12447_v37  ;;  %v12450_v55 = vpop.f32.mrb[26].mxu0 }
 0x1df   : > { %v12471_v54 = vadd.f32 %v12470_v53, %v12469_v52  ;;  %v12472_v56 = vpop.f32.mrb[26].mxu1  ;;  %v12451_v57 = vpop.f32.mrb[27].mxu0 }
 0x1e0   : > { %v12473_v58 = vpop.f32.mrb[27].mxu1  ;;  %v3445_v59 = vadd.f32 %v12449_v51, %v11187_v46 }
 0x1e1   : > { %v3581_v60 = vadd.f32 %v12471_v54, %v11188_v47 }
 0x1e2   : > { %12800 = vmatpush3.xpose.msk.msra.mxu0 %vm4950_vm1, %v3445_v59  ;;  %v4947_v59 = vand.u32 127, %v4946_v50 }
 0x1e3   : > { %12805 = vmatpush3.xpose.msk.msra.mxu1 %vm4950_vm1, %v3581_v60  ;;  %12809 = vmatprep.subr.mxu0 %v13866_v18 }
 0x1e4   : > { %12814 = vmatprep.subr.mxu1 %v13866_v18  ;;  %vm4948_vm2 = vcmp.lt.s32.totalorder %v4947_v59, 5 }
 0x1e5   : > { %12802 = vmatmul.mubr.msk.f32.vlgmr.msra.gmra.mrb[52].mxu0 %vm4950_vm1, %v2357_v61 }
 0x1e6   : > { %12807 = vmatmul.mubr.msk.f32.vlgmr.msra.gmra.mrb[52].mxu1 %vm4950_vm1, %v2493_v62  ;;  %12811 = vmatprep.mubr.msk.f32.mxu0 %vm13867_vm0, %v13866_v18 }
 0x1e7   : > { %12816 = vmatprep.mubr.msk.f32.mxu1 %vm13867_vm0, %v13866_v18 }
 0x1fc   : > { %v12491_v0 = vpop.f32.mrb[28].mxu0 }
 0x1fd   : > { %v12513_v1 = vpop.f32.mrb[28].mxu1  ;;  %v12492_v32 = vpop.f32.mrb[29].mxu0 }
 0x1fe   : > { %v12493_v3 = vadd.f32 %v12492_v32, %v12491_v0  ;;  %v12514_v4 = vpop.f32.mrb[29].mxu1  ;;  %v12494_v5 = vpop.f32.mrb[30].mxu0 }
 0x1ff   : > { %v12515_v7 = vadd.f32 %v12514_v4, %v12513_v1  ;;  %v12516_v10 = vpop.f32.mrb[30].mxu1  ;;  %v12495_v11 = vpop.f32.mrb[31].mxu0 }
 0x200   : > { %v3717_v12 = vadd.f32 %v12493_v3, %v11189_v63  ;;  %v12517_v13 = vpop.f32.mrb[31].mxu1 }
 0x201   : > { %v3853_v16 = vadd.f32 %v12515_v7, %v11190_v31  ;;  %v13868_v31 = vmov -1e+30  }
 0x202   : > { %12810 = vmatpush3.xpose.msk.msra.mxu0 %vm4950_vm1, %v3717_v12  ;;  %v4949_v1 = vsel %vm4948_vm2, 0.0, %v13868_v31 }
 0x203   : > { %12815 = vmatpush3.xpose.msk.msra.mxu1 %vm4950_vm1, %v3853_v16  ;;  %12819 = vmatprep.subr.mxu0 %v13866_v18 }
 0x204   : > { %12824 = vmatprep.subr.mxu1 %v13866_v18 }
 0x205   : > { %12812 = vmatmul.mubr.msk.f32.vlgmr.msra.gmra.mrb[54].mxu0 %vm4950_vm1, %v2629_v17 }
 0x206   : > { %12817 = vmatmul.mubr.msk.f32.vlgmr.msra.gmra.mrb[54].mxu1 %vm4950_vm1, %v2765_v19  ;;  %12821 = vmatprep.mubr.msk.f32.mxu0 %vm13867_vm0, %v13866_v18 }
 0x207   : > { %12826 = vmatprep.mubr.msk.f32.mxu1 %vm13867_vm0, %v13866_v18 }
 0x21c   : > { %v12535_v20 = vpop.f32.mrb[32].mxu0 }
 0x21d   : > { %v12536_v21 = vpop.f32.mrb[33].mxu0  ;;  %v12557_v22 = vpop.f32.mrb[32].mxu1 }
 0x21e   : > { %v12537_v23 = vadd.f32 %v12536_v21, %v12535_v20  ;;  %v12538_v24 = vpop.f32.mrb[34].mxu0  ;;  %v12558_v15 = vpop.f32.mrb[33].mxu1 }
 0x21f   : > { %v12539_v38 = vpop.f32.mrb[35].mxu0  ;;  %v12559_v8 = vadd.f32 %v12558_v15, %v12557_v22  ;;  %v12560_v26 = vpop.f32.mrb[34].mxu1 }
 0x220   : > { %v3989_v27 = vadd.f32 %v12537_v23, %v11191_v14  ;;  %v12561_v28 = vpop.f32.mrb[35].mxu1 }
 0x221   : > { %v4125_v29 = vadd.f32 %v12559_v8, %v11192_v25 }
 0x222   : > { %12820 = vmatpush3.msra.mxu0 %v3989_v27 }
 0x223   : > { %12825 = vmatpush3.msra.mxu1 %v4125_v29  ;;  %12829 = vmatprep.subr.mxu0 %v13866_v18 }
 0x224   : > { %12834 = vmatprep.subr.mxu1 %v13866_v18 }
 0x23c   : > { %v12579_v30 = vpop.f32.mrb[36].mxu0 }
 0x23d   : > { %v12580_v9 = vpop.f32.mrb[37].mxu0  ;;  %v12601_v33 = vpop.f32.mrb[36].mxu1 }
 0x23e   : > { %v14568_v34 = vadd.f32 %v12580_v9, %v12579_v30  ;;  %v12582_v35 = vpop.f32.mrb[38].mxu0  ;;  %v12602_v36 = vpop.f32.mrb[37].mxu1 }
 0x23f   : > { %v12583_v39 = vpop.f32.mrb[39].mxu0  ;;  %v14570_v40 = vadd.f32 %v12602_v36, %v12601_v33  ;;  %v12604_v41 = vpop.f32.mrb[38].mxu1 }
 0x240   : > { %v12605_v42 = vpop.f32.mrb[39].mxu1 }
 0x25c   : > { %v12623_v43 = vpop.f32.mrb[40].mxu0 }
 0x25d   : > { %v12645_v44 = vpop.f32.mrb[40].mxu1  ;;  %v12624_v45 = vpop.f32.mrb[41].mxu0 }
 0x25e   : > { %v14572_v46 = vadd.f32 %v12624_v45, %v12623_v43  ;;  %v12646_v47 = vpop.f32.mrb[41].mxu1  ;;  %v12626_v37 = vpop.f32.mrb[42].mxu0 }
 0x25f   : > { %v14574_v52 = vadd.f32 %v12646_v47, %v12645_v44  ;;  %v12648_v48 = vpop.f32.mrb[42].mxu1  ;;  %v12627_v53 = vpop.f32.mrb[43].mxu0 }
 0x260   : > { %v12649_v49 = vpop.f32.mrb[43].mxu1 }
 0x27c   : > { %v12667_v51 = vpop.f32.mrb[44].mxu0 }
 0x27d   : > { %v12689_v54 = vpop.f32.mrb[44].mxu1  ;;  %v12668_v55 = vpop.f32.mrb[45].mxu0 }
 0x27e   : > { %v14576_v56 = vadd.f32 %v12668_v55, %v12667_v51  ;;  %v12690_v57 = vpop.f32.mrb[45].mxu1  ;;  %v12670_v58 = vpop.f32.mrb[46].mxu0 }
 0x27f   : > { %v14579_v60 = vadd.f32 %v12690_v57, %v12689_v54  ;;  %v12692_v61 = vpop.f32.mrb[46].mxu1  ;;  %v12671_v62 = vpop.f32.mrb[47].mxu0 }
 0x280   : > { %v12693_v63 = vpop.f32.mrb[47].mxu1 }
 0x285   : > { %v5023_v0 = vpop.f32.mrb[48].mxu0 }
 0x286   : > { %v5559_v32 = vmul.f32 0.17677669, %v5023_v0  ;;  %v5099_v2 = vpop.f32.mrb[48].mxu1  ;;  %v12783_v3 = vpop.f32.mrb[49].mxu0 }
 0x287   : > { %v5560_v4 = vmul.f32 0.17677669, %v5099_v2  ;;  %v12788_v5 = vpop.f32.mrb[49].mxu1 }
 0x288   : > { %v5567_v6 = vadd.f32 %v5559_v32, %v4949_v1 }
 0x289   : > { %v5568_v10 = vadd.f32 %v5560_v4, %v4949_v1 }
 0x28a   : > { %v5576_v7 = vsel %vm5575_vm3, %v5567_v6, -inf }
 0x28b   : > { %5577 = vmax.xlane.f32.xlu0 %v5576_v7  ;;  %v5579_v11 = vsel %vm5575_vm3, %v5568_v10, -inf }
 0x28f   : > { %5580 = vmax.xlane.f32.xlu0 %v5579_v11 }
 0x298   : > { %v5175_v12 = vpop.f32.mrb[50].mxu0 }
 0x299   : > { %v5251_v13 = vpop.f32.mrb[50].mxu1  ;;  %v5561_v16 = vmul.f32 0.17677669, %v5175_v12  ;;  %v12793_v19 = vpop.f32.mrb[51].mxu0 }
 0x29a   : > { %v5562_v17 = vmul.f32 0.17677669, %v5251_v13  ;;  %v12798_v20 = vpop.f32.mrb[51].mxu1 }
 0x29b   : > { %v5569_v14 = vadd.f32 %v5561_v16, %v4949_v1 }
 0x29c   : > { %v5570_v22 = vadd.f32 %v5562_v17, %v4949_v1 }
 0x29d   : > { %v5582_v21 = vsel %vm5575_vm3, %v5569_v14, -inf }
 0x29e   : > { %5583 = vmax.xlane.f32.xlu1 %v5582_v21  ;;  %v5585_v23 = vsel %vm5575_vm3, %v5570_v22, -inf }
 0x2a2   : > { %5586 = vmax.xlane.f32.xlu1 %v5585_v23 }
 0x2b8   : > { %v5327_v24 = vpop.f32.mrb[52].mxu0 }
 0x2b9   : > { %v5403_v25 = vpop.f32.mrb[52].mxu1  ;;  %v5563_v15 = vmul.f32 0.17677669, %v5327_v24  ;;  %v12803_v8 = vpop.f32.mrb[53].mxu0 }
 0x2ba   : > { %v5564_v38 = vmul.f32 0.17677669, %v5403_v25  ;;  %v12808_v26 = vpop.f32.mrb[53].mxu1 }
 0x2bb   : > { %v5571_v28 = vadd.f32 %v5563_v15, %v4949_v1 }
 0x2bc   : > { %v5572_v27 = vadd.f32 %v5564_v38, %v4949_v1 }
 0x2bd   : > { %v5588_v30 = vsel %vm5575_vm3, %v5571_v28, -inf }
 0x2be   : > { %v5591_v29 = vsel %vm5575_vm3, %v5572_v27, -inf  ;;  %5589 = vmax.xlane.f32.xlu0 %v5588_v30 }
 0x2bf   : > { %5592 = vmax.xlane.f32.xlu1 %v5591_v29 }
 0x2d8   : > { %v5479_v9 = vpop.f32.mrb[54].mxu0 }
 0x2d9   : > { %v5565_v33 = vmul.f32 0.17677669, %v5479_v9  ;;  %v5555_v35 = vpop.f32.mrb[54].mxu1  ;;  %v12813_v36 = vpop.f32.mrb[55].mxu0  ;;  %v11194_v9 = vld [vmem:[%s13994_s26 + $0x13] ss:$0 sm:$0xff] }
 0x2da   : > { %v5566_v39 = vmul.f32 0.17677669, %v5555_v35  ;;  %v12818_v41 = vpop.f32.mrb[55].mxu1 }
 0x2db   : > { %v5573_v42 = vadd.f32 %v5565_v33, %v4949_v1  ;;  %v11195_v41 = vld [vmem:[%s13994_s26 + $0x14] ss:$0 sm:$0xff] }
 0x2dc   : > { %v5574_v43 = vadd.f32 %v5566_v39, %v4949_v1  ;;  %v4397_v39 = vadd.f32 %v14570_v40, %v11194_v9 }
 0x2dd   : > { %v5594_v44 = vsel %vm5575_vm3, %v5573_v42, -inf }
 0x2de   : > { %v5597_v45 = vsel %vm5575_vm3, %v5574_v43, -inf  ;;  %5595 = vmax.xlane.f32.xlu0 %v5594_v44  ;;  %v4533_v44 = vadd.f32 %v14572_v46, %v11195_v41 }
 0x2df   : > { %5598 = vmax.xlane.f32.xlu1 %v5597_v45  ;;  %v11196_v45 = vld [vmem:[%s13994_s26 + $0x15] ss:$0 sm:$0xff] }
 0x318   : > { %v5578_v47 = vpop.xlane.xlu0 %5577 }
 0x319   : > { %v5600_v37 = vsub.f32 %v5567_v6, %v5578_v47 }
 0x31b   : > { %v5608_v48 = vmul.f32 1.442695, %v5600_v37  ;;  %v4669_v37 = vadd.f32 %v14574_v52, %v11196_v45 }
 0x31c   : > { %v5581_v53 = vpop.xlane.xlu0 %5580 }
 0x31d   : > { %13790 = vpow2.f32 %v5608_v48  ;;  %v5601_v49 = vsub.f32 %v5568_v10, %v5581_v53  ;;  %v11198_v53 = vld [vmem:[%s13994_s26 + $0x17] ss:$0 sm:$0xff] }
 0x31f   : > { %v5610_v51 = vmul.f32 1.442695, %v5601_v49 }
 0x321   : > { %13792 = vpow2.f32 %v5610_v51  ;;  %v11197_v51 = vld [vmem:[%s13994_s26 + $0x16] ss:$0 sm:$0xff] }
 0x327   : > { %v13791_v55 = vpop.eup %13790 }
 0x328   : > { %v5624_v58 = vsel %vm5575_vm3, %v13791_v55, 0.0 }
 0x329   : > { %5625 = vadd.xlane.f32.xlu0 %v5624_v58  ;;  %v13360_v58 = vld [vmem:[%s13982_s19 + $0x4] ss:$8 sps:$4 sm:$0xff]  }
 0x32b   : > { %v5584_v54 = vpop.xlane.xlu1 %5583  ;;  %v13793_v62 = vpop.eup %13792 }
 0x32c   : > { %v5602_v57 = vsub.f32 %v5569_v14, %v5584_v54  ;;  %v5627_v0 = vsel %vm5575_vm3, %v13793_v62, 0.0 }
 0x32d   : > { %5628 = vadd.xlane.f32.xlu1 %v5627_v0 }
 0x32e   : > { %v5612_v59 = vmul.f32 1.442695, %v5602_v57 }
 0x32f   : > { %v5587_v61 = vpop.xlane.xlu1 %5586 }
 0x330   : > { %13794 = vpow2.f32 %v5612_v59  ;;  %v5603_v63 = vsub.f32 %v5570_v22, %v5587_v61  ;;  %v4805_v59 = vadd.f32 %v14576_v56, %v11197_v51  ;;  %v13366_v61 = vld [vmem:[%s13982_s19 + $0x24] ss:$8 sps:$4 sm:$0xff]  }
 0x332   : > { %v5614_v31 = vmul.f32 1.442695, %v5603_v63  ;;  %v13358_v63 = vld [vmem:[%s13982_s19] ss:$8 sps:$4 sm:$0xff]  }
 0x334   : > { %13796 = vpow2.f32 %v5614_v31 }
 0x33a   : > { %v13795_v1 = vpop.eup %13794 }
 0x33b   : > { %v5630_v32 = vsel %vm5575_vm3, %v13795_v1, 0.0 }
 0x33c   : > { %5631 = vadd.xlane.f32.xlu0 %v5630_v32  ;;  %v13364_v32 = vld [vmem:[%s13982_s19 + $0x20] ss:$8 sps:$4 sm:$0xff]  }
 0x33e   : > { %v14592_v2 = vpop.eup %13796 }
 0x33f   : > { %v5633_v3 = vsel %vm5575_vm3, %v14592_v2, 0.0 }
 0x340   : > { %5634 = vadd.xlane.f32.xlu1 %v5633_v3  ;;  %v13869_v3 = vmov 0  }
 0x34b   : > { %v5590_v5 = vpop.xlane.xlu0 %5589 }
 0x34c   : > { %v5593_v4 = vpop.xlane.xlu1 %5592  ;;  %v5604_v7 = vsub.f32 %v5571_v28, %v5590_v5  ;;  %v13367_v5 = vld [vmem:[%s13982_s19 + $0x30] ss:$8 sps:$4 sm:$0xff]  }
 0x34d   : > { %v5605_v6 = vsub.f32 %v5572_v27, %v5593_v4  ;;  %v11193_v27 = vld [vmem:[%s13994_s26 + $0x12] ss:$0 sm:$0xff]  ;;  %v13369_v4 = vld [vmem:[%s13982_s19 + $0x34] ss:$8 sps:$4 sm:$0xff]  }
 0x34e   : > { %v5616_v11 = vmul.f32 1.442695, %v5604_v7  ;;  %v4261_v30 = vadd.f32 %v14568_v34, %v11193_v27  ;;  %v13378_v7 = vld [vmem:[%s13982_s19 + $0x64] ss:$8 sps:$4 sm:$0xff]   ;;  %v13390_v27 = vld [vmem:[%s13982_s19 + $0x94] ss:$8 sps:$4 sm:$0xff]  }
 0x34f   : > { %v5618_v10 = vmul.f32 1.442695, %v5605_v6  ;;  %v13372_v6 = vld [vmem:[%s13982_s19 + $0x44] ss:$8 sps:$4 sm:$0xff]  }
 0x351   : > { %13798 = vpow2.f32 %v5618_v10 }
 0x352   : > { %13800 = vpow2.f32 %v5616_v11  ;;  %v13370_v11 = vld [vmem:[%s13982_s19 + $0x40] ss:$8 sps:$4 sm:$0xff]  }
 0x35b   : > { %v14596_v12 = vpop.eup %13798 }
 0x35c   : > { %v14598_v13 = vpop.eup %13800  ;;  %v5639_v16 = vsel %vm5575_vm3, %v14596_v12, 0.0 }
 0x35d   : > { %5640 = vadd.xlane.f32.xlu1 %v5639_v16  ;;  %v5636_v17 = vsel %vm5575_vm3, %v14598_v13, 0.0  ;;  %v13375_v16 = vld [vmem:[%s13982_s19 + $0x54] ss:$8 sps:$4 sm:$0xff]  }
 0x35e   : > { %5637 = vadd.xlane.f32.xlu0 %v5636_v17 }
 0x36b   : > { %v5596_v19 = vpop.xlane.xlu0 %5595 }
 0x36c   : > { %v5599_v20 = vpop.xlane.xlu1 %5598  ;;  %v5606_v14 = vsub.f32 %v5573_v42, %v5596_v19  ;;  %v13373_v19 = vld [vmem:[%s13982_s19 + $0x50] ss:$8 sps:$4 sm:$0xff]  }
 0x36d   : > { %v5607_v21 = vsub.f32 %v5574_v43, %v5599_v20  ;;  %v13376_v20 = vld [vmem:[%s13982_s19 + $0x60] ss:$8 sps:$4 sm:$0xff]  }
 0x36e   : > { %v5620_v22 = vmul.f32 1.442695, %v5606_v14 }
 0x36f   : > { %v5622_v23 = vmul.f32 1.442695, %v5607_v21 }
 0x370   : > { %13802 = vpow2.f32 %v5620_v22  ;;  %v13381_v22 = vld [vmem:[%s13982_s19 + $0x74] ss:$8 sps:$4 sm:$0xff]  }
 0x371   : > { %13804 = vpow2.f32 %v5622_v23  ;;  %v13384_v23 = vld [vmem:[%s13982_s19 + $0x84] ss:$8 sps:$4 sm:$0xff]  }
 0x37a   : > { %v14604_v24 = vpop.eup %13802 }
 0x37b   : > { %v14606_v25 = vpop.eup %13804  ;;  %v5642_v15 = vsel %vm5575_vm3, %v14604_v24, 0.0 }
 0x37c   : > { %v5645_v38 = vsel %vm5575_vm3, %v14606_v25, 0.0  ;;  %5643 = vadd.xlane.f32.xlu0 %v5642_v15 }
 0x37d   : > { %5646 = vadd.xlane.f32.xlu1 %v5645_v38  ;;  %v13382_v38 = vld [vmem:[%s13982_s19 + $0x80] ss:$8 sps:$4 sm:$0xff]  }
 0x3b6   : > { %v5626_v8 = vpop.xlane.xlu0 %5625 }
 0x3b7   : > { %13806 = vrcp.f32 %v5626_v8 }
 0x3ba   : > { %v5629_v26 = vpop.xlane.xlu1 %5628 }
 0x3bb   : > { %13808 = vrcp.f32 %v5629_v26 }
 0x3c1   : > { %v13807_v28 = vpop.eup %13806 }
 0x3c2   : > { %v5656_v29 = vmul.f32 %v13807_v28, %v13791_v55  ;;  %v4941_v55 = vadd.f32 %v14579_v60, %v11198_v53  ;;  %v13403_v53 = vld [vmem:[%s13982_s19 + $0xf0] ss:$8 sps:$4 sm:$0xff]  }
 0x3c4   : > { %12822 = vmatmul.mubr.msk.f32.vlgmr.msra.gmra.mrb[56].mxu0 %vm5575_vm3, %v5656_v29  ;;  %v13385_v29 = vld [vmem:[%s13982_s19 + $0xa0] ss:$8 sps:$4 sm:$0xff]  }
 0x3c5   : > { %v13809_v35 = vpop.eup %13808  ;;  %12830 = vmatpush3.msra.mxu0 %v4261_v30  ;;  %12831 = vmatprep.mubr.msk.f32.mxu0 %vm13867_vm0, %v13866_v18  ;;  %v13388_v30 = vld [vmem:[%s13982_s19 + $0x90] ss:$8 sps:$4 sm:$0xff]  }
 0x3c6   : > { %v5657_v36 = vmul.f32 %v13809_v35, %v13793_v62  ;;  %12839 = vmatprep.subr.mxu0 %v13866_v18  ;;  %v13393_v35 = vld [vmem:[%s13982_s19 + $0xb4] ss:$8 sps:$4 sm:$0xff]  }
 0x3c8   : > { %12827 = vmatmul.mubr.msk.f32.vlgmr.msra.gmra.mrb[56].mxu1 %vm5575_vm3, %v5657_v36  ;;  %v13396_v36 = vld [vmem:[%s13982_s19 + $0xc4] ss:$8 sps:$4 sm:$0xff]  }
 0x3c9   : > { %v5632_v33 = vpop.xlane.xlu0 %5631  ;;  %12835 = vmatpush3.msra.mxu1 %v4397_v39  ;;  %12836 = vmatprep.mubr.msk.f32.mxu1 %vm13867_vm0, %v13866_v18  ;;  %v13391_v39 = vld [vmem:[%s13982_s19 + $0xb0] ss:$8 sps:$4 sm:$0xff]  }
 0x3ca   : > { %13810 = vrcp.f32 %v5632_v33  ;;  %12844 = vmatprep.subr.mxu1 %v13866_v18 }
 0x3cd   : > { %v5635_v34 = vpop.xlane.xlu1 %5634 }
 0x3ce   : > { %13812 = vrcp.f32 %v5635_v34  ;;  %v13399_v34 = vld [vmem:[%s13982_s19 + $0xe4] ss:$8 sps:$4 sm:$0xff]  }
 0x3d4   : > { %v13811_v42 = vpop.eup %13810 }
 0x3d5   : > { %v5658_v43 = vmul.f32 %v13811_v42, %v13795_v1  ;;  %v13363_v1 = vld [vmem:[%s13982_s19 + $0x14] ss:$8 sps:$4 sm:$0xff]   ;;  %v13397_v42 = vld [vmem:[%s13982_s19 + $0xe0] ss:$8 sps:$4 sm:$0xff]  }
 0x3d7   : > { %12832 = vmatmul.mubr.msk.f32.vlgmr.msra.gmra.mrb[58].mxu0 %vm5575_vm3, %v5658_v43 }
 0x3d8   : > { %v13813_v40 = vpop.eup %13812  ;;  %12840 = vmatpush3.msra.mxu0 %v4533_v44  ;;  %12841 = vmatprep.mubr.msk.f32.mxu0 %vm13867_vm0, %v13866_v18 }
 0x3d9   : > { %v5659_v47 = vmul.f32 %v13813_v40, %v14592_v2  ;;  %12849 = vmatprep.subr.mxu0 %v13866_v18  ;;  %v13394_v40 = vld [vmem:[%s13982_s19 + $0xc0] ss:$8 sps:$4 sm:$0xff]  }
 0x3db   : > { %12837 = vmatmul.mubr.msk.f32.vlgmr.msra.gmra.mrb[58].mxu1 %vm5575_vm3, %v5659_v47  ;;  %v13405_v47 = vld [vmem:[%s13982_s19 + $0xf4] ss:$8 sps:$4 sm:$0xff]  }
 0x3dc   : > { %12845 = vmatpush3.msra.mxu1 %v4669_v37  ;;  %12846 = vmatprep.mubr.msk.f32.mxu1 %vm13867_vm0, %v13866_v18 }
 0x3dd   : > { %12854 = vmatprep.subr.mxu1 %v13866_v18 }
 0x3ea   : > { %v5641_v46 = vpop.xlane.xlu1 %5640 }
 0x3eb   : > { %13814 = vrcp.f32 %v5641_v46  ;;  %v5638_v48 = vpop.xlane.xlu0 %5637 }
 0x3ec   : > { %13816 = vrcp.f32 %v5638_v48  ;;  %v13402_v48 = vld [vmem:[%s13982_s19 + $0xd4] ss:$8 sps:$4 sm:$0xff]  }
 0x3f5   : > { %v13815_v49 = vpop.eup %13814 }
 0x3f6   : > { %v13817_v54 = vpop.eup %13816  ;;  %v5661_v52 = vmul.f32 %v13815_v49, %v14596_v12  ;;  %v13400_v49 = vld [vmem:[%s13982_s19 + $0xd0] ss:$8 sps:$4 sm:$0xff]  }
 0x3f7   : > { %v5660_v57 = vmul.f32 %v13817_v54, %v14598_v13 }
 0x3f8   : > { %12847 = vmatmul.mubr.msk.f32.vlgmr.msra.gmra.mrb[60].mxu1 %vm5575_vm3, %v5661_v52 }
 0x3f9   : > { %12842 = vmatmul.mubr.msk.f32.vlgmr.msra.gmra.mrb[60].mxu0 %vm5575_vm3, %v5660_v57  ;;  %12855 = vmatpush3.msra.mxu1 %v4941_v55 }
 0x3fa   : > { %12850 = vmatpush3.msra.mxu0 %v4805_v59  ;;  %12851 = vmatprep.mubr.msk.f32.mxu0 %vm13867_vm0, %v13866_v18 }
 0x3fb   : > { %12856 = vmatprep.mubr.msk.f32.mxu1 %vm13867_vm0, %v13866_v18  ;;  %6311 = vmatprep.subr.bf16.mxu0 %v13360_v58  ;;  %v13361_v18 = vld [vmem:[%s13982_s19 + $0x10] ss:$8 sps:$4 sm:$0xff]  }
 0x3fc   : > { %6375 = vmatprep.subr.bf16.mxu1 %v13366_v61 }
 0x409   : > { %v5644_v60 = vpop.xlane.xlu0 %5643 }
 0x40a   : > { %v5647_v56 = vpop.xlane.xlu1 %5646  ;;  %13818 = vrcp.f32 %v5644_v60 }
 0x40b   : > { %13820 = vrcp.f32 %v5647_v56 }
 0x414   : > { %v13819_v62 = vpop.eup %13818 }
 0x415   : > { %v13821_v0 = vpop.eup %13820  ;;  %v5662_v31 = vmul.f32 %v13819_v62, %v14604_v24  ;;  %v13379_v24 = vld [vmem:[%s13982_s19 + $0x70] ss:$8 sps:$4 sm:$0xff]  }
 0x416   : > { %v5663_v2 = vmul.f32 %v13821_v0, %v14606_v25  ;;  %v13387_v25 = vld [vmem:[%s13982_s19 + $0xa4] ss:$8 sps:$4 sm:$0xff]  }
 0x417   : > { %12852 = vmatmul.mubr.msk.f32.vlgmr.msra.gmra.mrb[62].mxu0 %vm5575_vm3, %v5662_v31 }
 0x418   : > { %12857 = vmatmul.mubr.msk.f32.vlgmr.msra.gmra.mrb[62].mxu1 %vm5575_vm3, %v5663_v2  ;;  %6312 = vmatpush1.bf16.msra.mxu0 %v13358_v63 }
 0x419   : > { %6313 = vmatprep.subr.bf16.mxu0 %v13363_v1  ;;  %6376 = vmatpush1.bf16.msra.mxu1 %v13364_v32 }
 0x41a   : > { %6343 = vmatprep.mubr.bf16.mxu0 %v13869_v3  ;;  %6407 = vmatprep.mubr.bf16.mxu1 %v13869_v3 }
 0x41b   : > { %6377 = vmatprep.subr.bf16.mxu1 %v13369_v4 }
 0x41c   : > { %6314 = vmatpush1.bf16.msra.mxu0 %v13361_v18 }
 0x41d   : > { %6378 = vmatpush1.bf16.msra.mxu1 %v13367_v5  ;;  %6439 = vmatprep.subr.bf16.mxu0 %v13372_v6 }
 0x41e   : > { %6503 = vmatprep.subr.bf16.mxu1 %v13378_v7 }
 0x497   : > { %v5733_v10 = vpop.f32.mrb[56].mxu0 }
 0x498   : > { %v6248_v12 = vpack.c.bf16 %v5733_v10, %v5733_v10  ;;  %v12823_v13 = vpop.f32.mrb[57].mxu0 }
 0x49a   : > { %11611 = vmatmul.mubr.msk.bf16.vlgmr.msra.gmra.mrb[64].mxu0 %vm4950_vm1, %v6248_v12 }
 0x49b   : > { %v5806_v17 = vpop.f32.mrb[56].mxu1  ;;  %6440 = vmatpush1.bf16.msra.mxu0 %v13370_v11  ;;  %6471 = vmatprep.mubr.bf16.mxu0 %v13869_v3 }
 0x49c   : > { %v6249_v14 = vpack.c.bf16 %v5806_v17, %v5806_v17  ;;  %v12828_v21 = vpop.f32.mrb[57].mxu1  ;;  %6441 = vmatprep.subr.bf16.mxu0 %v13375_v16 }
 0x49e   : > { %11616 = vmatmul.mubr.msk.bf16.vlgmr.msra.gmra.mrb[64].mxu1 %vm4950_vm1, %v6249_v14 }
 0x49f   : > { %6442 = vmatpush1.bf16.msra.mxu0 %v13373_v19  ;;  %6504 = vmatpush1.bf16.msra.mxu1 %v13376_v20 }
 0x4a0   : > { %6505 = vmatprep.subr.bf16.mxu1 %v13381_v22  ;;  %6535 = vmatprep.mubr.bf16.mxu1 %v13869_v3 }
 0x4a1   : > { %6567 = vmatprep.subr.bf16.mxu0 %v13384_v23 }
 0x4a3   : > { %6506 = vmatpush1.bf16.msra.mxu1 %v13379_v24 }
 0x4a4   : > { %6631 = vmatprep.subr.bf16.mxu1 %v13387_v25 }
 0x4aa   : > { %v5879_v15 = vpop.f32.mrb[58].mxu0 }
 0x4ab   : > { %v6250_v8 = vpack.c.bf16 %v5879_v15, %v5879_v15  ;;  %v12833_v26 = vpop.f32.mrb[59].mxu0 }
 0x4ac   : > { %v14702_v26 = vshrl.u32 %v4946_v50, 7 }
 0x4ad   : > { %11621 = vmatmul.mubr.msk.bf16.vlgmr.msra.gmra.mrb[68].mxu0 %vm4950_vm1, %v6250_v8 }
 0x4ae   : > { %v5952_v28 = vpop.f32.mrb[58].mxu1  ;;  %6568 = vmatpush1.bf16.msra.mxu0 %v13382_v38  ;;  %6599 = vmatprep.mubr.bf16.mxu0 %v13869_v3 }
 0x4af   : > { %v6251_v9 = vpack.c.bf16 %v5952_v28, %v5952_v28  ;;  %v12838_v33 = vpop.f32.mrb[59].mxu1  ;;  %6569 = vmatprep.subr.bf16.mxu0 %v13390_v27  ;;  %v14705_v27 = vsub.s32 0, %v14702_v26  ;;  %v6814_v28 = vld [vmem:[%s15616_s22] sm:$0x3] }
 0x4b1   : > { %11626 = vmatmul.mubr.msk.bf16.vlgmr.msra.gmra.mrb[68].mxu1 %vm4950_vm1, %v6251_v9 }
 0x4b2   : > { %6632 = vmatpush1.bf16.msra.mxu1 %v13385_v29  ;;  %6570 = vmatpush1.bf16.msra.mxu0 %v13388_v30  ;;  %v14713_v29 = vsub.s32 1, %v14702_v26 }
 0x4b3   : > { %6633 = vmatprep.subr.bf16.mxu1 %v13393_v35  ;;  %6663 = vmatprep.mubr.bf16.mxu1 %v13869_v3  ;;  %v6819_v35 = vrot.slane %v6814_v28, %v14705_v27 }
 0x4b4   : > { %6695 = vmatprep.subr.bf16.mxu0 %v13396_v36 }
 0x4b6   : > { %6634 = vmatpush1.bf16.msra.mxu1 %v13391_v39 }
 0x4b7   : > { %6759 = vmatprep.subr.bf16.mxu1 %v13399_v34  ;;  %v6823_v34 = vrot.slane %v6814_v28, %v14713_v29  ;;  %v6965_v28 = vld [vmem:[%s14011_s13 + $0x2c0] sm:$0xff] }
 0x4cb   : > { %v6098_v41 = vpop.f32.mrb[60].mxu1 }
 0x4cc   : > { %v6025_v43 = vpop.f32.mrb[60].mxu0  ;;  %v6253_v44 = vpack.c.bf16 %v6098_v41, %v6098_v41  ;;  %v12848_v45 = vpop.f32.mrb[61].mxu1 }
 0x4cd   : > { %v6252_v37 = vpack.c.bf16 %v6025_v43, %v6025_v43  ;;  %v12843_v46 = vpop.f32.mrb[61].mxu0 }
 0x4ce   : > { %11636 = vmatmul.mubr.msk.bf16.vlgmr.msra.gmra.mrb[72].mxu1 %vm4950_vm1, %v6253_v44  ;;  %v13826_v46 = vld [vmem:[#allocation2] sm:$0xff] }
 0x4cf   : > { %11631 = vmatmul.mubr.msk.bf16.vlgmr.msra.gmra.mrb[72].mxu0 %vm4950_vm1, %v6252_v37  ;;  %6760 = vmatpush1.bf16.msra.mxu1 %v13397_v42 }
 0x4d0   : > { %6696 = vmatpush1.bf16.msra.mxu0 %v13394_v40  ;;  %6761 = vmatprep.subr.bf16.mxu1 %v13405_v47 }
 0x4d1   : > { %6697 = vmatprep.subr.bf16.mxu0 %v13402_v48  ;;  %6727 = vmatprep.mubr.bf16.mxu0 %v13869_v3 }
 0x4d2   : > { %6791 = vmatprep.mubr.bf16.mxu1 %v13869_v3 }
 0x4d3   : > { %6762 = vmatpush1.bf16.msra.mxu1 %v13403_v53  ;;  %v13827_v53 = vld [vmem:[#allocation2 + $0x8] sm:$0xff] }
 0x4d4   : > { %6698 = vmatpush1.bf16.msra.mxu0 %v13400_v49 }
 0x4ea   : > { %v6171_v51 = vpop.f32.mrb[62].mxu0 }
 0x4eb   : > { %v6254_v54 = vpack.c.bf16 %v6171_v51, %v6171_v51  ;;  %v6244_v52 = vpop.f32.mrb[62].mxu1  ;;  %v12853_v55 = vpop.f32.mrb[63].mxu0 }
 0x4ec   : > { %v6255_v57 = vpack.c.bf16 %v6244_v52, %v6244_v52  ;;  %v12858_v58 = vpop.f32.mrb[63].mxu1  ;;  %v6885_v52 = vld [vmem:[%s14011_s13 + $0x40] sm:$0xff]  ;;  %v6878_v55 = vld [vmem:[%s14011_s13 + $0x8] sm:$0xff] }
 0x4ed   : > { %11641 = vmatmul.mubr.msk.bf16.vlgmr.msra.gmra.mrb[76].mxu0 %vm4950_vm1, %v6254_v54  ;;  %v6877_v54 = vld [vmem:[%s14011_s13] sm:$0xff] }
 0x4ee   : > { %11646 = vmatmul.mubr.msk.bf16.vlgmr.msra.gmra.mrb[76].mxu1 %vm4950_vm1, %v6255_v57  ;;  %v11647_v57 = vcombine.low %v6877_v54, %v6885_v52  ;;  %v11648_v58 = vcombine.high %v6877_v54, %v6885_v52 }
 0x4f0   : > { %8497 = vmatprep.subr.bf16.mxu0 %v11648_v58  ;;  %v7013_v58 = vld [vmem:[%s14011_s13 + $0x440] sm:$0xff] }
 0x4f1   : > { %8498 = vmatpush1.bf16.msra.mxu0 %v11647_v57  ;;  %v7005_v57 = vld [vmem:[%s14011_s13 + $0x400] sm:$0xff] }
 0x56d   : > { %v6345_v59 = vpop.f32.mrb[64].mxu0 }
 0x56e   : > { %v6347_v61 = vpop.f32.mrb[65].mxu0 }
 0x56f   : > { %v6349_v60 = vpop.f32.mrb[66].mxu0 }
 0x570   : > { %v6350_v56 = vpop.f32.mrb[67].mxu0  ;;  %v6901_v60 = vld [vmem:[%s14011_s13 + $0xc0] sm:$0xff] }
 0x571   : > { %v6409_v62 = vpop.f32.mrb[64].mxu1 }
 0x572   : > { %v6800_v63 = vadd.f32 %v6409_v62, %v6345_v59  ;;  %v6411_v0 = vpop.f32.mrb[65].mxu1  ;;  %v6886_v59 = vld [vmem:[%s14011_s13 + $0x48] sm:$0xff] }
 0x573   : > { %v6807_v31 = vadd.f32 %v6411_v0, %v6347_v61  ;;  %v6413_v1 = vpop.f32.mrb[66].mxu1  ;;  %v6893_v61 = vld [vmem:[%s14011_s13 + $0x80] sm:$0xff]  ;;  %v11649_v56 = vcombine.low %v6878_v55, %v6886_v59  ;;  %v11650_v62 = vcombine.high %v6878_v55, %v6886_v59  ;;  %v6894_v0 = vld [vmem:[%s14011_s13 + $0x88] sm:$0xff] }
 0x574   : > { %v6414_v32 = vpop.f32.mrb[67].mxu1  ;;  %v6909_v1 = vld [vmem:[%s14011_s13 + $0x100] sm:$0xff]  ;;  %v7006_v59 = vld [vmem:[%s14011_s13 + $0x408] sm:$0xff] }
 0x575   : > { %8538 = vmatprep.subr.bf16.mxu1 %v11650_v62  ;;  %v11776_v62 = vcombine.high %v7005_v57, %v7013_v58 }
 0x576   : > { %8539 = vmatpush1.bf16.msra.mxu1 %v11649_v56 }
 0x580   : > { %v6473_v2 = vpop.f32.mrb[68].mxu0 }
 0x581   : > { %v6801_v18 = vadd.f32 %v6800_v63, %v6473_v2  ;;  %v6475_v3 = vpop.f32.mrb[69].mxu0  ;;  %v11664_v63 = vcombine.high %v6893_v61, %v6901_v60  ;;  %v6917_v2 = vld [vmem:[%s14011_s13 + $0x140] sm:$0xff] }
 0x582   : > { %v6808_v4 = vadd.f32 %v6807_v31, %v6475_v3  ;;  %v6477_v5 = vpop.f32.mrb[70].mxu0  ;;  %v6902_v31 = vld [vmem:[%s14011_s13 + $0xc8] sm:$0xff] }
 0x583   : > { %v6478_v6 = vpop.f32.mrb[71].mxu0  ;;  %v11666_v32 = vcombine.high %v6894_v0, %v6902_v31  ;;  %v6918_v3 = vld [vmem:[%s14011_s13 + $0x148] sm:$0xff]  ;;  %8499 = vmatprep.subr.bf16.mxu0 %v11664_v63  ;;  %v11665_v5 = vcombine.low %v6894_v0, %v6902_v31  ;;  %v7021_v0 = vld [vmem:[%s14011_s13 + $0x480] sm:$0xff] }
 0x584   : > { %v6537_v7 = vpop.f32.mrb[68].mxu1  ;;  %v11680_v6 = vcombine.high %v6909_v1, %v6917_v2  ;;  %v7029_v31 = vld [vmem:[%s14011_s13 + $0x4c0] sm:$0xff] }
 0x585   : > { %v6802_v10 = vadd.f32 %v6801_v18, %v6537_v7  ;;  %v6539_v11 = vpop.f32.mrb[69].mxu1  ;;  %v6910_v18 = vld [vmem:[%s14011_s13 + $0x108] sm:$0xff]  ;;  %8540 = vmatprep.subr.bf16.mxu1 %v11666_v32 }
 0x586   : > { %v6809_v12 = vadd.f32 %v6808_v4, %v6539_v11  ;;  %v6541_v13 = vpop.f32.mrb[70].mxu1  ;;  %v11663_v4 = vcombine.low %v6893_v61, %v6901_v60  ;;  %v11682_v7 = vcombine.high %v6910_v18, %v6918_v3  ;;  %v6933_v11 = vld [vmem:[%s14011_s13 + $0x1c0] sm:$0xff]  ;;  %8541 = vmatpush1.bf16.msra.mxu1 %v11665_v5  ;;  %v7014_v61 = vld [vmem:[%s14011_s13 + $0x448] sm:$0xff] }
 0x587   : > { %v6542_v16 = vpop.f32.mrb[71].mxu1  ;;  %v6934_v13 = vld [vmem:[%s14011_s13 + $0x1c8] sm:$0xff]  ;;  %v11778_v63 = vcombine.high %v7006_v59, %v7014_v61  ;;  %v7037_v5 = vld [vmem:[%s14011_s13 + $0x500] sm:$0xff] }
 0x588   : > { %8500 = vmatpush1.bf16.msra.mxu0 %v11663_v4  ;;  %v11679_v16 = vcombine.low %v6909_v1, %v6917_v2  ;;  %8542 = vmatprep.subr.bf16.mxu1 %v11682_v7  ;;  %v7022_v1 = vld [vmem:[%s14011_s13 + $0x488] sm:$0xff]  ;;  %v11775_v2 = vcombine.low %v7005_v57, %v7013_v58 }
 0x589   : > { %8501 = vmatprep.subr.bf16.mxu0 %v11680_v6  ;;  %v7030_v32 = vld [vmem:[%s14011_s13 + $0x4c8] sm:$0xff]  ;;  %v7045_v6 = vld [vmem:[%s14011_s13 + $0x540] sm:$0xff] }
 0x58a   : > { %v11794_v4 = vcombine.high %v7022_v1, %v7030_v32  ;;  %v7038_v7 = vld [vmem:[%s14011_s13 + $0x508] sm:$0xff] }
 0x58b   : > { %v7110_v57 = vld [vmem:[%s14011_s13 + $0x748] sm:$0xff] }
 0x58c   : > { %8502 = vmatpush1.bf16.msra.mxu0 %v11679_v16 }
 0x5a1   : > { %v6665_v17 = vpop.f32.mrb[72].mxu1 }
 0x5a2   : > { %v6601_v19 = vpop.f32.mrb[72].mxu0  ;;  %v6667_v20 = vpop.f32.mrb[73].mxu1 }
 0x5a3   : > { %v6803_v14 = vadd.f32 %v6802_v10, %v6601_v19  ;;  %v6603_v21 = vpop.f32.mrb[73].mxu0  ;;  %v6669_v22 = vpop.f32.mrb[74].mxu1  ;;  %v6925_v10 = vld [vmem:[%s14011_s13 + $0x180] sm:$0xff] }
 0x5a4   : > { %v6810_v23 = vadd.f32 %v6809_v12, %v6603_v21  ;;  %v6605_v24 = vpop.f32.mrb[74].mxu0  ;;  %v6670_v25 = vpop.f32.mrb[75].mxu1  ;;  %v6926_v12 = vld [vmem:[%s14011_s13 + $0x188] sm:$0xff]  ;;  %v11696_v19 = vcombine.high %v6925_v10, %v6933_v11  ;;  %v6949_v21 = vld [vmem:[%s14011_s13 + $0x240] sm:$0xff] }
 0x5a5   : > { %v6804_v15 = vadd.f32 %v6803_v14, %v6665_v17  ;;  %v6606_v38 = vpop.f32.mrb[75].mxu0  ;;  %v11681_v17 = vcombine.low %v6910_v18, %v6918_v3  ;;  %v6941_v14 = vld [vmem:[%s14011_s13 + $0x200] sm:$0xff]  ;;  %v6942_v22 = vld [vmem:[%s14011_s13 + $0x208] sm:$0xff]  ;;  %v11695_v24 = vcombine.low %v6925_v10, %v6933_v11  ;;  %v11697_v25 = vcombine.low %v6926_v12, %v6934_v13 }
 0x5a6   : > { %v6811_v8 = vadd.f32 %v6810_v23, %v6667_v20  ;;  %v11698_v20 = vcombine.high %v6926_v12, %v6934_v13  ;;  %v6950_v23 = vld [vmem:[%s14011_s13 + $0x248] sm:$0xff]  ;;  %8503 = vmatprep.subr.bf16.mxu0 %v11696_v19  ;;  %v11777_v18 = vcombine.low %v7006_v59, %v7014_v61  ;;  %v11792_v3 = vcombine.high %v7021_v0, %v7029_v31 }
 0x5a7   : > { %8543 = vmatpush1.bf16.msra.mxu1 %v11681_v17  ;;  %v11714_v38 = vcombine.high %v6942_v22, %v6950_v23  ;;  %8504 = vmatpush1.bf16.msra.mxu0 %v11695_v24  ;;  %v7046_v10 = vld [vmem:[%s14011_s13 + $0x548] sm:$0xff]  ;;  %v11791_v11 = vcombine.low %v7021_v0, %v7029_v31  ;;  %v11793_v12 = vcombine.low %v7022_v1, %v7030_v32 }
 0x5a8   : > { %8544 = vmatprep.subr.bf16.mxu1 %v11698_v20  ;;  %v11808_v13 = vcombine.high %v7037_v5, %v7045_v6  ;;  %v11810_v16 = vcombine.high %v7038_v7, %v7046_v10  ;;  %v11807_v17 = vcombine.low %v7037_v5, %v7045_v6  ;;  %v11809_v19 = vcombine.low %v7038_v7, %v7046_v10  ;;  %v7126_v31 = vld [vmem:[%s14011_s13 + $0x7c8] sm:$0xff]  ;;  %v6888_v6 = vld [vmem:[%s14011_s13 + $0x58] sm:$0xff] }
 0x5ab   : > { %8545 = vmatpush1.bf16.msra.mxu1 %v11697_v25 }
 0x5ac   : > { %8546 = vmatprep.subr.bf16.mxu1 %v11714_v38  ;;  %v7061_v38 = vld [vmem:[%s14011_s13 + $0x5c0] sm:$0xff] }
 0x5c0   : > { %v6729_v30 = vpop.f32.mrb[76].mxu0 }
 0x5c1   : > { %v6805_v9 = vadd.f32 %v6804_v15, %v6729_v30  ;;  %v6793_v33 = vpop.f32.mrb[76].mxu1  ;;  %v6731_v36 = vpop.f32.mrb[77].mxu0  ;;  %v11712_v15 = vcombine.high %v6941_v14, %v6949_v21  ;;  %v6958_v30 = vld [vmem:[%s14011_s13 + $0x288] sm:$0xff] }
 0x5c2   : > { %v6812_v39 = vadd.f32 %v6811_v8, %v6731_v36  ;;  %v6795_v50 = vpop.f32.mrb[77].mxu1  ;;  %v6733_v41 = vpop.f32.mrb[78].mxu0  ;;  %v6957_v8 = vld [vmem:[%s14011_s13 + $0x280] sm:$0xff] }
 0x5c3   : > { %v6806_v42 = vadd.f32 %v6805_v9, %v6793_v33  ;;  %v6797_v43 = vpop.f32.mrb[78].mxu1  ;;  %v6734_v44 = vpop.f32.mrb[79].mxu0  ;;  %v6966_v9 = vld [vmem:[%s14011_s13 + $0x2c8] sm:$0xff]  ;;  %v11711_v33 = vcombine.low %v6941_v14, %v6949_v21  ;;  %8505 = vmatprep.subr.bf16.mxu0 %v11712_v15  ;;  %v11728_v36 = vcombine.high %v6957_v8, %v6965_v28  ;;  %v7053_v15 = vld [vmem:[%s14011_s13 + $0x580] sm:$0xff] }
 0x5c4   : > { %v6813_v45 = vadd.f32 %v6812_v39, %v6795_v50  ;;  %v6798_v40 = vpop.f32.mrb[79].mxu1  ;;  %v11730_v39 = vcombine.high %v6958_v30, %v6966_v9  ;;  %v6973_v50 = vld [vmem:[%s14011_s13 + $0x300] sm:$0xff]  ;;  %v6974_v41 = vld [vmem:[%s14011_s13 + $0x308] sm:$0xff]  ;;  %v11727_v43 = vcombine.low %v6957_v8, %v6965_v28  ;;  %v11729_v44 = vcombine.low %v6958_v30, %v6966_v9 }
 0x5c5   : > { %v6826_v47 = vadd.f32 %v6819_v35, %v6806_v42  ;;  %v11713_v35 = vcombine.low %v6942_v22, %v6950_v23  ;;  %v6982_v42 = vld [vmem:[%s14011_s13 + $0x348] sm:$0xff]  ;;  %8506 = vmatpush1.bf16.msra.mxu0 %v11711_v33  ;;  %v11823_v30 = vcombine.low %v7053_v15, %v7061_v38  ;;  %v7069_v33 = vld [vmem:[%s14011_s13 + $0x600] sm:$0xff] }
 0x5c6   : > { %v6827_v37 = vadd.f32 %v6823_v34, %v6813_v45  ;;  %v6981_v34 = vld [vmem:[%s14011_s13 + $0x340] sm:$0xff]  ;;  %8507 = vmatprep.subr.bf16.mxu0 %v11728_v36  ;;  %v11746_v40 = vcombine.high %v6974_v41, %v6982_v42  ;;  %v11745_v54 = vcombine.low %v6974_v41, %v6982_v42  ;;  %v7054_v8 = vld [vmem:[%s14011_s13 + $0x588] sm:$0xff] }
 0x5c7   : > { %v14717_v48 = vadd.f32 %v13826_v46, %v6826_v47  ;;  %8547 = vmatpush1.bf16.msra.mxu1 %v11713_v35  ;;  %v11744_v45 = vcombine.high %v6973_v50, %v6981_v34  ;;  %v6989_v47 = vld [vmem:[%s14011_s13 + $0x380] sm:$0xff]  ;;  %v6990_v46 = vld [vmem:[%s14011_s13 + $0x388] sm:$0xff] }
 0x5c8   : > { %v14719_v49 = vadd.f32 %v13827_v53, %v6827_v37  ;;  %8548 = vmatprep.subr.bf16.mxu1 %v11730_v39  ;;  %v6997_v37 = vld [vmem:[%s14011_s13 + $0x3c0] sm:$0xff]  ;;  %v6998_v53 = vld [vmem:[%s14011_s13 + $0x3c8] sm:$0xff] }
 0x5c9   : > { %8508 = vmatpush1.bf16.msra.mxu0 %v11727_v43  ;;  %v11760_v52 = vcombine.high %v6989_v47, %v6997_v37  ;;  %v11762_v55 = vcombine.high %v6990_v46, %v6998_v53  ;;  %v11759_v60 = vcombine.low %v6989_v47, %v6997_v37  ;;  %v11761_v56 = vcombine.low %v6990_v46, %v6998_v53  ;;  %v7062_v28 = vld [vmem:[%s14011_s13 + $0x5c8] sm:$0xff]  ;;  %v7077_v35 = vld [vmem:[%s14011_s13 + $0x640] sm:$0xff] }
 0x5ca   : > { %v6830_v51 = vadd.f32 %v14719_v49, %v14717_v48  ;;  %8509 = vmatprep.subr.bf16.mxu0 %v11744_v45  ;;  %v11826_v9 = vcombine.high %v7054_v8, %v7062_v28  ;;  %v7070_v36 = vld [vmem:[%s14011_s13 + $0x608] sm:$0xff]  ;;  %v11840_v39 = vcombine.high %v7069_v33, %v7077_v35  ;;  %v7085_v43 = vld [vmem:[%s14011_s13 + $0x680] sm:$0xff] }
 0x5cb   : > { %8549 = vmatpush1.bf16.msra.mxu1 %v11729_v44  ;;  %v7093_v44 = vld [vmem:[%s14011_s13 + $0x6c0] sm:$0xff]  ;;  %v7086_v45 = vld [vmem:[%s14011_s13 + $0x688] sm:$0xff] }
 0x5cc   : > { %6831 = vadd.xlane.f32.xlu0 %v6830_v51  ;;  %v11743_v51 = vcombine.low %v6973_v50, %v6981_v34  ;;  %8550 = vmatprep.subr.bf16.mxu1 %v11746_v40  ;;  %v7078_v50 = vld [vmem:[%s14011_s13 + $0x648] sm:$0xff]  ;;  %v11839_v34 = vcombine.low %v7069_v33, %v7077_v35  ;;  %v11856_v40 = vcombine.high %v7085_v43, %v7093_v44  ;;  %v6904_v33 = vld [vmem:[%s14011_s13 + $0xd8] sm:$0xff] }
 0x5cd   : > { %v11841_v41 = vcombine.low %v7070_v36, %v7078_v50  ;;  %v11842_v42 = vcombine.high %v7070_v36, %v7078_v50  ;;  %v7094_v47 = vld [vmem:[%s14011_s13 + $0x6c8] sm:$0xff]  ;;  %v11855_v37 = vcombine.low %v7085_v43, %v7093_v44  ;;  %v6919_v50 = vld [vmem:[%s14011_s13 + $0x150] sm:$0xff] }
 0x5ce   : > { %8510 = vmatpush1.bf16.msra.mxu0 %v11743_v51  ;;  %v11857_v46 = vcombine.low %v7086_v45, %v7094_v47  ;;  %v11858_v53 = vcombine.high %v7086_v45, %v7094_v47  ;;  %v7101_v51 = vld [vmem:[%s14011_s13 + $0x700] sm:$0xff]  ;;  %v6935_v47 = vld [vmem:[%s14011_s13 + $0x1d0] sm:$0xff] }
 0x5cf   : > { %8551 = vmatpush1.bf16.msra.mxu1 %v11745_v54  ;;  %8511 = vmatprep.subr.bf16.mxu0 %v11760_v52  ;;  %v7109_v54 = vld [vmem:[%s14011_s13 + $0x740] sm:$0xff]  ;;  %v7102_v52 = vld [vmem:[%s14011_s13 + $0x708] sm:$0xff] }
 0x5d0   : > { %8552 = vmatprep.subr.bf16.mxu1 %v11762_v55  ;;  %v11872_v55 = vcombine.high %v7101_v51, %v7109_v54  ;;  %v11871_v58 = vcombine.low %v7101_v51, %v7109_v54  ;;  %v11873_v59 = vcombine.low %v7102_v52, %v7110_v57  ;;  %v11874_v61 = vcombine.high %v7102_v52, %v7110_v57  ;;  %v6951_v57 = vld [vmem:[%s14011_s13 + $0x250] sm:$0xff] }
 0x5d2   : > { %8512 = vmatpush1.bf16.msra.mxu0 %v11759_v60  ;;  %v7117_v60 = vld [vmem:[%s14011_s13 + $0x780] sm:$0xff] }
 0x5d3   : > { %8553 = vmatpush1.bf16.msra.mxu1 %v11761_v56  ;;  %8513 = vmatprep.subr.bf16.mxu0 %v11776_v62  ;;  %v7125_v56 = vld [vmem:[%s14011_s13 + $0x7c0] sm:$0xff]  ;;  %v7118_v62 = vld [vmem:[%s14011_s13 + $0x788] sm:$0xff] }
 0x5d4   : > { %8554 = vmatprep.subr.bf16.mxu1 %v11778_v63  ;;  %v11887_v63 = vcombine.low %v7117_v60, %v7125_v56  ;;  %v11888_v0 = vcombine.high %v7117_v60, %v7125_v56  ;;  %v11889_v1 = vcombine.low %v7118_v62, %v7126_v31  ;;  %v11890_v32 = vcombine.high %v7118_v62, %v7126_v31  ;;  %v6960_v31 = vld [vmem:[%s14011_s13 + $0x298] sm:$0xff] }
 0x5d6   : > { %8514 = vmatpush1.bf16.msra.mxu0 %v11775_v2  ;;  %v6879_v2 = vld [vmem:[%s14011_s13 + $0x10] sm:$0xff] }
 0x5d7   : > { %8555 = vmatpush1.bf16.msra.mxu1 %v11777_v18  ;;  %8515 = vmatprep.subr.bf16.mxu0 %v11792_v3  ;;  %v6887_v18 = vld [vmem:[%s14011_s13 + $0x50] sm:$0xff]  ;;  %v6880_v3 = vld [vmem:[%s14011_s13 + $0x18] sm:$0xff] }
 0x5d8   : > { %8556 = vmatprep.subr.bf16.mxu1 %v11794_v4  ;;  %v11651_v4 = vcombine.low %v6879_v2, %v6887_v18  ;;  %v11652_v5 = vcombine.high %v6879_v2, %v6887_v18  ;;  %v11653_v7 = vcombine.low %v6880_v3, %v6888_v6  ;;  %v11654_v10 = vcombine.high %v6880_v3, %v6888_v6  ;;  %v6976_v6 = vld [vmem:[%s14011_s13 + $0x318] sm:$0xff] }
 0x5da   : > { %8516 = vmatpush1.bf16.msra.mxu0 %v11791_v11 }
 0x5db   : > { %8557 = vmatpush1.bf16.msra.mxu1 %v11793_v12  ;;  %8517 = vmatprep.subr.bf16.mxu0 %v11808_v13 }
 0x5dc   : > { %8558 = vmatprep.subr.bf16.mxu1 %v11810_v16  ;;  %v6847_v16 = vld [vmem:[%s15617_s30] sm:$0x3] }
 0x5de   : > { %8518 = vmatpush1.bf16.msra.mxu0 %v11807_v17  ;;  %v6861_v17 = vld [vmem:[%s15618_s16] sm:$0x3] }
 0x5df   : > { %8559 = vmatpush1.bf16.msra.mxu1 %v11809_v19  ;;  %v6852_v19 = vrot.slane %v6847_v16, %v14705_v27 }
 0x5e0   : > { %8560 = vmatprep.subr.bf16.mxu1 %v11826_v9  ;;  %v6896_v9 = vld [vmem:[%s14011_s13 + $0x98] sm:$0xff] }
 0x5e1   : > { %v11669_v43 = vcombine.low %v6896_v9, %v6904_v33 }
 0x659   : > { %v6832_v20 = vpop.xlane.xlu0 %6831 }
 0x65a   : > { %v6834_v14 = vmul.f32 0.00390625, %v6832_v20  ;;  %v6856_v20 = vrot.slane %v6847_v16, %v14713_v29  ;;  %v6991_v16 = vld [vmem:[%s14011_s13 + $0x390] sm:$0xff] }
 0x65c   : > { %v14768_v21 = vsub.f32 %v14717_v48, %v6834_v14  ;;  %v14771_v22 = vsub.f32 %v14719_v49, %v6834_v14  ;;  %v11824_v48 = vcombine.high %v7053_v15, %v7061_v38  ;;  %v11825_v49 = vcombine.low %v7054_v8, %v7062_v28 }
 0x65e   : > { %v6837_v23 = vmul.f32 %v14768_v21, %v14768_v21  ;;  %v6838_v24 = vmul.f32 %v14771_v22, %v14771_v22  ;;  %8519 = vmatprep.subr.bf16.mxu0 %v11824_v48  ;;  %8561 = vmatpush1.bf16.msra.mxu1 %v11825_v49  ;;  %v6903_v49 = vld [vmem:[%s14011_s13 + $0xd0] sm:$0xff] }
 0x65f   : > { %8520 = vmatpush1.bf16.msra.mxu0 %v11823_v30  ;;  %8562 = vmatprep.subr.bf16.mxu1 %v11842_v42  ;;  %v6895_v30 = vld [vmem:[%s14011_s13 + $0x90] sm:$0xff] }
 0x660   : > { %v6839_v25 = vadd.f32 %v6838_v24, %v6837_v23  ;;  %8521 = vmatprep.subr.bf16.mxu0 %v11840_v39  ;;  %v6866_v23 = vrot.slane %v6861_v17, %v14705_v27  ;;  %v6870_v24 = vrot.slane %v6861_v17, %v14713_v29  ;;  %v11668_v36 = vcombine.high %v6895_v30, %v6903_v49  ;;  %v6999_v17 = vld [vmem:[%s14011_s13 + $0x3d0] sm:$0xff] }
 0x661   : > { %v11670_v39 = vcombine.high %v6896_v9, %v6904_v33  ;;  %v11667_v42 = vcombine.low %v6895_v30, %v6903_v49  ;;  %v7016_v30 = vld [vmem:[%s14011_s13 + $0x458] sm:$0xff]  ;;  %v11763_v49 = vcombine.low %v6991_v16, %v6999_v17 }
 0x662   : > { %6840 = vadd.xlane.f32.xlu1 %v6839_v25  ;;  %8563 = vmatpush1.bf16.msra.mxu1 %v11841_v41  ;;  %v6920_v41 = vld [vmem:[%s14011_s13 + $0x158] sm:$0xff] }
 0x663   : > { %8522 = vmatpush1.bf16.msra.mxu0 %v11839_v34  ;;  %8564 = vmatprep.subr.bf16.mxu1 %v11858_v53  ;;  %v6912_v34 = vld [vmem:[%s14011_s13 + $0x118] sm:$0xff] }
 0x664   : > { %8523 = vmatprep.subr.bf16.mxu0 %v11856_v40  ;;  %v11686_v45 = vcombine.high %v6912_v34, %v6920_v41  ;;  %v6927_v40 = vld [vmem:[%s14011_s13 + $0x190] sm:$0xff]  ;;  %v11685_v51 = vcombine.low %v6912_v34, %v6920_v41  ;;  %v7032_v34 = vld [vmem:[%s14011_s13 + $0x4d8] sm:$0xff] }
 0x665   : > { %v11700_v54 = vcombine.high %v6927_v40, %v6935_v47 }
 0x666   : > { %8565 = vmatpush1.bf16.msra.mxu1 %v11857_v46  ;;  %v6936_v46 = vld [vmem:[%s14011_s13 + $0x1d8] sm:$0xff] }
 0x667   : > { %8524 = vmatpush1.bf16.msra.mxu0 %v11855_v37  ;;  %8566 = vmatprep.subr.bf16.mxu1 %v11874_v61  ;;  %v6928_v37 = vld [vmem:[%s14011_s13 + $0x198] sm:$0xff]  ;;  %v11699_v61 = vcombine.low %v6927_v40, %v6935_v47  ;;  %v7047_v40 = vld [vmem:[%s14011_s13 + $0x550] sm:$0xff] }
 0x668   : > { %8525 = vmatprep.subr.bf16.mxu0 %v11872_v55  ;;  %v11702_v52 = vcombine.high %v6928_v37, %v6936_v46  ;;  %v6943_v55 = vld [vmem:[%s14011_s13 + $0x210] sm:$0xff]  ;;  %v11701_v60 = vcombine.low %v6928_v37, %v6936_v46  ;;  %v7040_v47 = vld [vmem:[%s14011_s13 + $0x518] sm:$0xff] }
 0x669   : > { %v11716_v56 = vcombine.high %v6943_v55, %v6951_v57  ;;  %v7048_v37 = vld [vmem:[%s14011_s13 + $0x558] sm:$0xff] }
 0x66a   : > { %8567 = vmatpush1.bf16.msra.mxu1 %v11873_v59  ;;  %v6952_v59 = vld [vmem:[%s14011_s13 + $0x258] sm:$0xff] }
 0x66b   : > { %8526 = vmatpush1.bf16.msra.mxu0 %v11871_v58  ;;  %8568 = vmatprep.subr.bf16.mxu1 %v11890_v32  ;;  %v6944_v58 = vld [vmem:[%s14011_s13 + $0x218] sm:$0xff]  ;;  %v11715_v32 = vcombine.low %v6943_v55, %v6951_v57  ;;  %v7063_v55 = vld [vmem:[%s14011_s13 + $0x5d0] sm:$0xff] }
 0x66c   : > { %8527 = vmatprep.subr.bf16.mxu0 %v11888_v0  ;;  %v11718_v62 = vcombine.high %v6944_v58, %v6952_v59  ;;  %v6967_v0 = vld [vmem:[%s14011_s13 + $0x2d0] sm:$0xff]  ;;  %v11717_v2 = vcombine.low %v6944_v58, %v6952_v59  ;;  %v7056_v57 = vld [vmem:[%s14011_s13 + $0x598] sm:$0xff] }
 0x66d   : > { %v7064_v58 = vld [vmem:[%s14011_s13 + $0x5d8] sm:$0xff] }
 0x66e   : > { %8569 = vmatpush1.bf16.msra.mxu1 %v11889_v1  ;;  %v6968_v1 = vld [vmem:[%s14011_s13 + $0x2d8] sm:$0xff] }
 0x66f   : > { %8528 = vmatpush1.bf16.msra.mxu0 %v11887_v63  ;;  %8620 = vmatprep.subr.bf16.mxu1 %v11654_v10  ;;  %v6959_v63 = vld [vmem:[%s14011_s13 + $0x290] sm:$0xff]  ;;  %v11734_v3 = vcombine.high %v6960_v31, %v6968_v1 }
 0x670   : > { %8579 = vmatprep.subr.bf16.mxu0 %v11652_v5  ;;  %v11732_v18 = vcombine.high %v6959_v63, %v6967_v0  ;;  %v6983_v5 = vld [vmem:[%s14011_s13 + $0x350] sm:$0xff]  ;;  %v11731_v10 = vcombine.low %v6959_v63, %v6967_v0  ;;  %v7072_v0 = vld [vmem:[%s14011_s13 + $0x618] sm:$0xff] }
 0x671   : > { %v7079_v63 = vld [vmem:[%s14011_s13 + $0x650] sm:$0xff] }
 0x6ef   : > { %v6841_v11 = vpop.xlane.xlu1 %6840 }
 0x6f0   : > { %v6842_v12 = vmul.f32 0.00390625, %v6841_v11  ;;  %v11733_v11 = vcombine.low %v6960_v31, %v6968_v1  ;;  %v7080_v31 = vld [vmem:[%s14011_s13 + $0x658] sm:$0xff] }
 0x6f2   : > { %v6843_v13 = vadd.f32 1e-05, %v6842_v12 }
 0x6f4   : > { %13822 = vrsqrt.f32 %v6843_v13 }
 0x6fe   : > { %v13823_v14 = vpop.eup %13822 }
 0x6ff   : > { %v6845_v25 = vmul.f32 %v13823_v14, %v14768_v21  ;;  %v6846_v15 = vmul.f32 %v13823_v14, %v14771_v22  ;;  %v6911_v22 = vld [vmem:[%s14011_s13 + $0x110] sm:$0xff] }
 0x700   : > { %v11684_v44 = vcombine.high %v6911_v22, %v6919_v50  ;;  %v11683_v53 = vcombine.low %v6911_v22, %v6919_v50  ;;  %v7024_v50 = vld [vmem:[%s14011_s13 + $0x498] sm:$0xff] }
 0x701   : > { %v6859_v38 = vmul.f32 %v6852_v19, %v6845_v25  ;;  %v6860_v8 = vmul.f32 %v6856_v20, %v6846_v15  ;;  %v6992_v19 = vld [vmem:[%s14011_s13 + $0x398] sm:$0xff]  ;;  %v7007_v15 = vld [vmem:[%s14011_s13 + $0x410] sm:$0xff] }
 0x702   : > { %v7000_v20 = vld [vmem:[%s14011_s13 + $0x3d8] sm:$0xff] }
 0x703   : > { %v14817_v48 = vadd.f32 %v6866_v23, %v6859_v38  ;;  %v14819_v28 = vadd.f32 %v6870_v24, %v6860_v8  ;;  %v11764_v24 = vcombine.high %v6991_v16, %v6999_v17  ;;  %v11766_v25 = vcombine.high %v6992_v19, %v7000_v20  ;;  %v7015_v38 = vld [vmem:[%s14011_s13 + $0x450] sm:$0xff]  ;;  %v7008_v8 = vld [vmem:[%s14011_s13 + $0x418] sm:$0xff] }
 0x704   : > { %v11765_v9 = vcombine.low %v6992_v19, %v7000_v20  ;;  %v11780_v33 = vcombine.high %v7007_v15, %v7015_v38  ;;  %v11782_v22 = vcombine.high %v7008_v8, %v7016_v30  ;;  %v11779_v41 = vcombine.low %v7007_v15, %v7015_v38  ;;  %v7111_v16 = vld [vmem:[%s14011_s13 + $0x750] sm:$0xff]  ;;  %v7104_v17 = vld [vmem:[%s14011_s13 + $0x718] sm:$0xff] }
 0x705   : > { %v14827_v35 = vpack.c.bf16 %v14817_v48, %v14817_v48  ;;  %v14831_v21 = vpack.c.bf16 %v14819_v28, %v14819_v28  ;;  %v7112_v19 = vld [vmem:[%s14011_s13 + $0x758] sm:$0xff]  ;;  %v7127_v15 = vld [vmem:[%s14011_s13 + $0x7d0] sm:$0xff] }
 0x706   : > { %v7120_v38 = vld [vmem:[%s14011_s13 + $0x798] sm:$0xff] }
 0x707   : > { %8529 = vmatprep.mubr.bf16.mxu0 %v14831_v21  ;;  %8570 = vmatprep.mubr.bf16.mxu1 %v14831_v21 }
 0x708   : > { %8530 = vmatmul.mubr.bf16.vlgmr.msra.gmra.mrb[80].mxu0 %v14827_v35  ;;  %8571 = vmatmul.mubr.bf16.vlgmr.msra.gmra.mrb[80].mxu1 %v14827_v35 }
 0x709   : > { %8580 = vmatpush1.bf16.msra.mxu0 %v11651_v4  ;;  %8621 = vmatpush1.bf16.msra.mxu1 %v11653_v7  ;;  %v6975_v4 = vld [vmem:[%s14011_s13 + $0x310] sm:$0xff]  ;;  %v6984_v7 = vld [vmem:[%s14011_s13 + $0x358] sm:$0xff] }
 0x70a   : > { %8611 = vmatprep.mubr.bf16.mxu0 %v14831_v21  ;;  %8652 = vmatprep.mubr.bf16.mxu1 %v14831_v21  ;;  %v11748_v12 = vcombine.high %v6975_v4, %v6983_v5  ;;  %v11750_v13 = vcombine.high %v6976_v6, %v6984_v7  ;;  %v11747_v14 = vcombine.low %v6975_v4, %v6983_v5  ;;  %v7095_v4 = vld [vmem:[%s14011_s13 + $0x6d0] sm:$0xff]  ;;  %v7088_v5 = vld [vmem:[%s14011_s13 + $0x698] sm:$0xff] }
 0x70b   : > { %8581 = vmatprep.subr.bf16.mxu0 %v11668_v36  ;;  %8622 = vmatprep.subr.bf16.mxu1 %v11670_v39  ;;  %v11749_v23 = vcombine.low %v6976_v6, %v6984_v7  ;;  %v7023_v36 = vld [vmem:[%s14011_s13 + $0x490] sm:$0xff]  ;;  %v7096_v6 = vld [vmem:[%s14011_s13 + $0x6d8] sm:$0xff] }
 0x70c   : > { %v7031_v39 = vld [vmem:[%s14011_s13 + $0x4d0] sm:$0xff] }
 0x70d   : > { %8582 = vmatpush1.bf16.msra.mxu0 %v11667_v42  ;;  %8623 = vmatpush1.bf16.msra.mxu1 %v11669_v43  ;;  %v11781_v42 = vcombine.low %v7008_v8, %v7016_v30  ;;  %v11796_v43 = vcombine.high %v7023_v36, %v7031_v39  ;;  %v11795_v46 = vcombine.low %v7023_v36, %v7031_v39  ;;  %v7128_v8 = vld [vmem:[%s14011_s13 + $0x7d8] sm:$0xff]  ;;  %v6889_v36 = vld [vmem:[%s14011_s13 + $0x60] sm:$0xff]  ;;  %v6882_v39 = vld [vmem:[%s14011_s13 + $0x28] sm:$0xff] }
 0x70e   : > { %8583 = vmatprep.subr.bf16.mxu0 %v11684_v44  ;;  %8624 = vmatprep.subr.bf16.mxu1 %v11686_v45  ;;  %v11798_v44 = vcombine.high %v7024_v50, %v7032_v34  ;;  %v7039_v45 = vld [vmem:[%s14011_s13 + $0x510] sm:$0xff] }
 0x70f   : > { %v11811_v59 = vcombine.low %v7039_v45, %v7047_v40 }
 0x711   : > { %8584 = vmatpush1.bf16.msra.mxu0 %v11683_v53  ;;  %8625 = vmatpush1.bf16.msra.mxu1 %v11685_v51  ;;  %v11797_v53 = vcombine.low %v7024_v50, %v7032_v34  ;;  %v11812_v51 = vcombine.high %v7039_v45, %v7047_v40  ;;  %v6890_v50 = vld [vmem:[%s14011_s13 + $0x68] sm:$0xff]  ;;  %v6905_v45 = vld [vmem:[%s14011_s13 + $0xe0] sm:$0xff] }
 0x712   : > { %8585 = vmatprep.subr.bf16.mxu0 %v11700_v54  ;;  %8626 = vmatprep.subr.bf16.mxu1 %v11702_v52  ;;  %v11814_v54 = vcombine.high %v7040_v47, %v7048_v37  ;;  %v7055_v52 = vld [vmem:[%s14011_s13 + $0x590] sm:$0xff]  ;;  %v6898_v40 = vld [vmem:[%s14011_s13 + $0xa8] sm:$0xff] }
 0x713   : > { %v11827_v1 = vcombine.low %v7055_v52, %v7063_v55 }
 0x715   : > { %8586 = vmatpush1.bf16.msra.mxu0 %v11699_v61  ;;  %8627 = vmatpush1.bf16.msra.mxu1 %v11701_v60  ;;  %v11813_v61 = vcombine.low %v7040_v47, %v7048_v37  ;;  %v11828_v60 = vcombine.high %v7055_v52, %v7063_v55  ;;  %v6906_v47 = vld [vmem:[%s14011_s13 + $0xe8] sm:$0xff]  ;;  %v6921_v52 = vld [vmem:[%s14011_s13 + $0x160] sm:$0xff] }
 0x716   : > { %8587 = vmatprep.subr.bf16.mxu0 %v11716_v56  ;;  %8628 = vmatprep.subr.bf16.mxu1 %v11718_v62  ;;  %v11830_v56 = vcombine.high %v7056_v57, %v7064_v58  ;;  %v7071_v62 = vld [vmem:[%s14011_s13 + $0x610] sm:$0xff]  ;;  %v6914_v55 = vld [vmem:[%s14011_s13 + $0x128] sm:$0xff] }
 0x717   : > { %v11843_v7 = vcombine.low %v7071_v62, %v7079_v63 }
 0x719   : > { %8588 = vmatpush1.bf16.msra.mxu0 %v11715_v32  ;;  %8629 = vmatpush1.bf16.msra.mxu1 %v11717_v2  ;;  %v11829_v32 = vcombine.low %v7056_v57, %v7064_v58  ;;  %v11844_v2 = vcombine.high %v7071_v62, %v7079_v63  ;;  %v6922_v57 = vld [vmem:[%s14011_s13 + $0x168] sm:$0xff]  ;;  %v6937_v62 = vld [vmem:[%s14011_s13 + $0x1e0] sm:$0xff] }
 0x71a   : > { %8589 = vmatprep.subr.bf16.mxu0 %v11732_v18  ;;  %8630 = vmatprep.subr.bf16.mxu1 %v11734_v3  ;;  %v11846_v18 = vcombine.high %v7072_v0, %v7080_v31  ;;  %v7087_v3 = vld [vmem:[%s14011_s13 + $0x690] sm:$0xff]  ;;  %v6930_v63 = vld [vmem:[%s14011_s13 + $0x1a8] sm:$0xff] }
 0x71b   : > { %v11859_v20 = vcombine.low %v7087_v3, %v7095_v4 }
 0x71d   : > { %8590 = vmatpush1.bf16.msra.mxu0 %v11731_v10  ;;  %8631 = vmatpush1.bf16.msra.mxu1 %v11733_v11  ;;  %v11845_v10 = vcombine.low %v7072_v0, %v7080_v31  ;;  %v11860_v11 = vcombine.high %v7087_v3, %v7095_v4  ;;  %v6938_v0 = vld [vmem:[%s14011_s13 + $0x1e8] sm:$0xff]  ;;  %v6953_v3 = vld [vmem:[%s14011_s13 + $0x260] sm:$0xff] }
 0x71e   : > { %8591 = vmatprep.subr.bf16.mxu0 %v11748_v12  ;;  %8632 = vmatprep.subr.bf16.mxu1 %v11750_v13  ;;  %v11862_v12 = vcombine.high %v7088_v5, %v7096_v6  ;;  %v7103_v13 = vld [vmem:[%s14011_s13 + $0x710] sm:$0xff]  ;;  %v6946_v4 = vld [vmem:[%s14011_s13 + $0x228] sm:$0xff] }
 0x71f   : > { %v11875_v30 = vcombine.low %v7103_v13, %v7111_v16 }
 0x721   : > { %8592 = vmatpush1.bf16.msra.mxu0 %v11747_v14  ;;  %8633 = vmatpush1.bf16.msra.mxu1 %v11749_v23  ;;  %v11861_v14 = vcombine.low %v7088_v5, %v7096_v6  ;;  %v11876_v23 = vcombine.high %v7103_v13, %v7111_v16  ;;  %v6954_v5 = vld [vmem:[%s14011_s13 + $0x268] sm:$0xff]  ;;  %v6969_v13 = vld [vmem:[%s14011_s13 + $0x2e0] sm:$0xff] }
 0x722   : > { %8593 = vmatprep.subr.bf16.mxu0 %v11764_v24  ;;  %8634 = vmatprep.subr.bf16.mxu1 %v11766_v25  ;;  %v11878_v24 = vcombine.high %v7104_v17, %v7112_v19  ;;  %v7119_v25 = vld [vmem:[%s14011_s13 + $0x790] sm:$0xff]  ;;  %v6962_v16 = vld [vmem:[%s14011_s13 + $0x2a8] sm:$0xff] }
 0x723   : > { %v11891_v34 = vcombine.low %v7119_v25, %v7127_v15 }
 0x725   : > { %8594 = vmatpush1.bf16.msra.mxu0 %v11763_v49  ;;  %8635 = vmatpush1.bf16.msra.mxu1 %v11765_v9  ;;  %v11877_v49 = vcombine.low %v7104_v17, %v7112_v19  ;;  %v11892_v9 = vcombine.high %v7119_v25, %v7127_v15  ;;  %v6970_v17 = vld [vmem:[%s14011_s13 + $0x2e8] sm:$0xff]  ;;  %v6985_v25 = vld [vmem:[%s14011_s13 + $0x360] sm:$0xff] }
 0x726   : > { %8595 = vmatprep.subr.bf16.mxu0 %v11780_v33  ;;  %8636 = vmatprep.subr.bf16.mxu1 %v11782_v22  ;;  %v11894_v33 = vcombine.high %v7120_v38, %v7128_v8  ;;  %v6881_v22 = vld [vmem:[%s14011_s13 + $0x20] sm:$0xff]  ;;  %v6978_v15 = vld [vmem:[%s14011_s13 + $0x328] sm:$0xff] }
 0x727   : > { %v11655_v37 = vcombine.low %v6881_v22, %v6889_v36 }
 0x729   : > { %8596 = vmatpush1.bf16.msra.mxu0 %v11779_v41  ;;  %8637 = vmatpush1.bf16.msra.mxu1 %v11781_v42  ;;  %v11893_v41 = vcombine.low %v7120_v38, %v7128_v8  ;;  %v11656_v42 = vcombine.high %v6881_v22, %v6889_v36  ;;  %v6986_v38 = vld [vmem:[%s14011_s13 + $0x368] sm:$0xff]  ;;  %v7001_v22 = vld [vmem:[%s14011_s13 + $0x3e0] sm:$0xff] }
 0x72a   : > { %8597 = vmatprep.subr.bf16.mxu0 %v11796_v43  ;;  %8638 = vmatprep.subr.bf16.mxu1 %v11798_v44  ;;  %v11658_v43 = vcombine.high %v6882_v39, %v6890_v50  ;;  %v6897_v44 = vld [vmem:[%s14011_s13 + $0xa0] sm:$0xff]  ;;  %v6994_v36 = vld [vmem:[%s14011_s13 + $0x3a8] sm:$0xff] }
 0x72b   : > { %v11671_v58 = vcombine.low %v6897_v44, %v6905_v45 }
 0x72d   : > { %8598 = vmatpush1.bf16.msra.mxu0 %v11795_v46  ;;  %8639 = vmatpush1.bf16.msra.mxu1 %v11797_v53  ;;  %v11657_v46 = vcombine.low %v6882_v39, %v6890_v50  ;;  %v11672_v53 = vcombine.high %v6897_v44, %v6905_v45  ;;  %v7002_v39 = vld [vmem:[%s14011_s13 + $0x3e8] sm:$0xff]  ;;  %v7017_v44 = vld [vmem:[%s14011_s13 + $0x460] sm:$0xff] }
 0x72e   : > { %8599 = vmatprep.subr.bf16.mxu0 %v11812_v51  ;;  %8640 = vmatprep.subr.bf16.mxu1 %v11814_v54  ;;  %v11674_v51 = vcombine.high %v6898_v40, %v6906_v47  ;;  %v6913_v54 = vld [vmem:[%s14011_s13 + $0x120] sm:$0xff]  ;;  %v7010_v45 = vld [vmem:[%s14011_s13 + $0x428] sm:$0xff] }
 0x72f   : > { %v11687_v31 = vcombine.low %v6913_v54, %v6921_v52 }
 0x731   : > { %8600 = vmatpush1.bf16.msra.mxu0 %v11811_v59  ;;  %8641 = vmatpush1.bf16.msra.mxu1 %v11813_v61  ;;  %v11673_v59 = vcombine.low %v6898_v40, %v6906_v47  ;;  %v11688_v61 = vcombine.high %v6913_v54, %v6921_v52  ;;  %v7018_v40 = vld [vmem:[%s14011_s13 + $0x468] sm:$0xff]  ;;  %v7033_v54 = vld [vmem:[%s14011_s13 + $0x4e0] sm:$0xff] }
 0x732   : > { %8601 = vmatprep.subr.bf16.mxu0 %v11828_v60  ;;  %8642 = vmatprep.subr.bf16.mxu1 %v11830_v56  ;;  %v11690_v60 = vcombine.high %v6914_v55, %v6922_v57  ;;  %v6929_v56 = vld [vmem:[%s14011_s13 + $0x1a0] sm:$0xff]  ;;  %v7026_v52 = vld [vmem:[%s14011_s13 + $0x4a8] sm:$0xff] }
 0x733   : > { %v11703_v6 = vcombine.low %v6929_v56, %v6937_v62 }
 0x735   : > { %8602 = vmatpush1.bf16.msra.mxu0 %v11827_v1  ;;  %8643 = vmatpush1.bf16.msra.mxu1 %v11829_v32  ;;  %v11689_v1 = vcombine.low %v6914_v55, %v6922_v57  ;;  %v11704_v32 = vcombine.high %v6929_v56, %v6937_v62  ;;  %v7034_v55 = vld [vmem:[%s14011_s13 + $0x4e8] sm:$0xff]  ;;  %v7049_v56 = vld [vmem:[%s14011_s13 + $0x560] sm:$0xff] }
 0x736   : > { %8603 = vmatprep.subr.bf16.mxu0 %v11844_v2  ;;  %8644 = vmatprep.subr.bf16.mxu1 %v11846_v18  ;;  %v11706_v2 = vcombine.high %v6930_v63, %v6938_v0  ;;  %v6945_v18 = vld [vmem:[%s14011_s13 + $0x220] sm:$0xff]  ;;  %v7042_v62 = vld [vmem:[%s14011_s13 + $0x528] sm:$0xff] }
 0x737   : > { %v11719_v19 = vcombine.low %v6945_v18, %v6953_v3 }
 0x739   : > { %8604 = vmatpush1.bf16.msra.mxu0 %v11843_v7  ;;  %8645 = vmatpush1.bf16.msra.mxu1 %v11845_v10  ;;  %v11705_v7 = vcombine.low %v6930_v63, %v6938_v0  ;;  %v11720_v10 = vcombine.high %v6945_v18, %v6953_v3  ;;  %v7050_v63 = vld [vmem:[%s14011_s13 + $0x568] sm:$0xff]  ;;  %v7065_v18 = vld [vmem:[%s14011_s13 + $0x5e0] sm:$0xff] }
 0x73a   : > { %8605 = vmatprep.subr.bf16.mxu0 %v11860_v11  ;;  %8646 = vmatprep.subr.bf16.mxu1 %v11862_v12  ;;  %v11722_v11 = vcombine.high %v6946_v4, %v6954_v5  ;;  %v6961_v12 = vld [vmem:[%s14011_s13 + $0x2a0] sm:$0xff]  ;;  %v7058_v3 = vld [vmem:[%s14011_s13 + $0x5a8] sm:$0xff] }
 0x73b   : > { %v11735_v8 = vcombine.low %v6961_v12, %v6969_v13 }
 0x73d   : > { %8606 = vmatpush1.bf16.msra.mxu0 %v11859_v20  ;;  %8647 = vmatpush1.bf16.msra.mxu1 %v11861_v14  ;;  %v11721_v20 = vcombine.low %v6946_v4, %v6954_v5  ;;  %v11736_v14 = vcombine.high %v6961_v12, %v6969_v13  ;;  %v7066_v4 = vld [vmem:[%s14011_s13 + $0x5e8] sm:$0xff]  ;;  %v7081_v12 = vld [vmem:[%s14011_s13 + $0x660] sm:$0xff] }
 0x73e   : > { %8607 = vmatprep.subr.bf16.mxu0 %v11876_v23  ;;  %8648 = vmatprep.subr.bf16.mxu1 %v11878_v24  ;;  %v11738_v23 = vcombine.high %v6962_v16, %v6970_v17  ;;  %v6977_v24 = vld [vmem:[%s14011_s13 + $0x320] sm:$0xff]  ;;  %v7074_v13 = vld [vmem:[%s14011_s13 + $0x628] sm:$0xff] }
 0x73f   : > { %v11751_v50 = vcombine.low %v6977_v24, %v6985_v25 }
 0x741   : > { %8608 = vmatpush1.bf16.msra.mxu0 %v11875_v30  ;;  %8649 = vmatpush1.bf16.msra.mxu1 %v11877_v49  ;;  %v11737_v30 = vcombine.low %v6962_v16, %v6970_v17  ;;  %v11752_v49 = vcombine.high %v6977_v24, %v6985_v25  ;;  %v7082_v16 = vld [vmem:[%s14011_s13 + $0x668] sm:$0xff]  ;;  %v7097_v24 = vld [vmem:[%s14011_s13 + $0x6e0] sm:$0xff] }
 0x742   : > { %8609 = vmatprep.subr.bf16.mxu0 %v11892_v9  ;;  %8650 = vmatprep.subr.bf16.mxu1 %v11894_v33  ;;  %v11754_v9 = vcombine.high %v6978_v15, %v6986_v38  ;;  %v6993_v33 = vld [vmem:[%s14011_s13 + $0x3a0] sm:$0xff]  ;;  %v7090_v25 = vld [vmem:[%s14011_s13 + $0x6a8] sm:$0xff] }
 0x743   : > { %v11767_v47 = vcombine.low %v6993_v33, %v7001_v22 }
 0x745   : > { %8610 = vmatpush1.bf16.msra.mxu0 %v11891_v34  ;;  %8651 = vmatpush1.bf16.msra.mxu1 %v11893_v41  ;;  %v11753_v34 = vcombine.low %v6978_v15, %v6986_v38  ;;  %v11768_v41 = vcombine.high %v6993_v33, %v7001_v22  ;;  %v7098_v15 = vld [vmem:[%s14011_s13 + $0x6e8] sm:$0xff]  ;;  %v7113_v33 = vld [vmem:[%s14011_s13 + $0x760] sm:$0xff] }
 0x746   : > { %8661 = vmatprep.subr.bf16.mxu0 %v11656_v42  ;;  %8702 = vmatprep.subr.bf16.mxu1 %v11658_v43  ;;  %v11770_v42 = vcombine.high %v6994_v36, %v7002_v39  ;;  %v7009_v43 = vld [vmem:[%s14011_s13 + $0x420] sm:$0xff]  ;;  %v7106_v22 = vld [vmem:[%s14011_s13 + $0x728] sm:$0xff] }
 0x747   : > { %v11783_v57 = vcombine.low %v7009_v43, %v7017_v44 }
 0x748   : > { %8612 = vmatmul.mubr.bf16.vlgmr.msra.gmra.mrb[84].mxu0 %v14827_v35  ;;  %8653 = vmatmul.mubr.bf16.vlgmr.msra.gmra.mrb[84].mxu1 %v14827_v35 }
 0x749   : > { %8662 = vmatpush1.bf16.msra.mxu0 %v11655_v37  ;;  %8693 = vmatprep.mubr.bf16.mxu0 %v14831_v21  ;;  %v11769_v37 = vcombine.low %v6994_v36, %v7002_v39  ;;  %v7114_v36 = vld [vmem:[%s14011_s13 + $0x768] sm:$0xff] }
 0x74a   : > { %8703 = vmatpush1.bf16.msra.mxu1 %v11657_v46  ;;  %8734 = vmatprep.mubr.bf16.mxu1 %v14831_v21  ;;  %v11784_v46 = vcombine.high %v7009_v43, %v7017_v44  ;;  %v7129_v43 = vld [vmem:[%s14011_s13 + $0x7e0] sm:$0xff]  ;;  %v7122_v44 = vld [vmem:[%s14011_s13 + $0x7a8] sm:$0xff] }
 0x74b   : > { %8663 = vmatprep.subr.bf16.mxu0 %v11672_v53  ;;  %8704 = vmatprep.subr.bf16.mxu1 %v11674_v51  ;;  %v11786_v53 = vcombine.high %v7010_v45, %v7018_v40  ;;  %v7025_v51 = vld [vmem:[%s14011_s13 + $0x4a0] sm:$0xff] }
 0x74c   : > { %v11799_v0 = vcombine.low %v7025_v51, %v7033_v54 }
 0x74d   : > { %8664 = vmatpush1.bf16.msra.mxu0 %v11671_v58  ;;  %v11785_v58 = vcombine.low %v7010_v45, %v7018_v40  ;;  %v7130_v45 = vld [vmem:[%s14011_s13 + $0x7e8] sm:$0xff] }
 0x74e   : > { %8705 = vmatpush1.bf16.msra.mxu1 %v11673_v59  ;;  %8665 = vmatprep.subr.bf16.mxu0 %v11688_v61  ;;  %v11800_v59 = vcombine.high %v7025_v51, %v7033_v54  ;;  %v11802_v61 = vcombine.high %v7026_v52, %v7034_v55  ;;  %v6891_v51 = vld [vmem:[%s14011_s13 + $0x70] sm:$0xff]  ;;  %v6884_v54 = vld [vmem:[%s14011_s13 + $0x38] sm:$0xff] }
 0x74f   : > { %8706 = vmatprep.subr.bf16.mxu1 %v11690_v60  ;;  %v7041_v60 = vld [vmem:[%s14011_s13 + $0x520] sm:$0xff] }
 0x750   : > { %v11815_v5 = vcombine.low %v7041_v60, %v7049_v56 }
 0x751   : > { %8666 = vmatpush1.bf16.msra.mxu0 %v11687_v31  ;;  %v11801_v31 = vcombine.low %v7026_v52, %v7034_v55  ;;  %v6892_v52 = vld [vmem:[%s14011_s13 + $0x78] sm:$0xff] }
 0x752   : > { %8707 = vmatpush1.bf16.msra.mxu1 %v11689_v1  ;;  %8667 = vmatprep.subr.bf16.mxu0 %v11704_v32  ;;  %v11816_v1 = vcombine.high %v7041_v60, %v7049_v56  ;;  %v11818_v32 = vcombine.high %v7042_v62, %v7050_v63  ;;  %v6907_v60 = vld [vmem:[%s14011_s13 + $0xf0] sm:$0xff] }
 0x753   : > { %8708 = vmatprep.subr.bf16.mxu1 %v11706_v2  ;;  %v7057_v2 = vld [vmem:[%s14011_s13 + $0x5a0] sm:$0xff] }
 0x754   : > { %v11831_v17 = vcombine.low %v7057_v2, %v7065_v18 }
 0x755   : > { %8668 = vmatpush1.bf16.msra.mxu0 %v11703_v6  ;;  %v11817_v6 = vcombine.low %v7042_v62, %v7050_v63  ;;  %v6900_v62 = vld [vmem:[%s14011_s13 + $0xb8] sm:$0xff] }
 0x756   : > { %8709 = vmatpush1.bf16.msra.mxu1 %v11705_v7  ;;  %8669 = vmatprep.subr.bf16.mxu0 %v11720_v10  ;;  %v11832_v7 = vcombine.high %v7057_v2, %v7065_v18  ;;  %v11834_v10 = vcombine.high %v7058_v3, %v7066_v4  ;;  %v6908_v63 = vld [vmem:[%s14011_s13 + $0xf8] sm:$0xff] }
 0x757   : > { %8710 = vmatprep.subr.bf16.mxu1 %v11722_v11  ;;  %v7073_v11 = vld [vmem:[%s14011_s13 + $0x620] sm:$0xff]  ;;  %v11678_v2 = vcombine.high %v6900_v62, %v6908_v63  ;;  %v6916_v18 = vld [vmem:[%s14011_s13 + $0x138] sm:$0xff] }
 0x758   : > { %v11847_v38 = vcombine.low %v7073_v11, %v7081_v12 }
 0x759   : > { %8670 = vmatpush1.bf16.msra.mxu0 %v11719_v19  ;;  %v11833_v19 = vcombine.low %v7058_v3, %v7066_v4  ;;  %v6924_v3 = vld [vmem:[%s14011_s13 + $0x178] sm:$0xff] }
 0x75a   : > { %8711 = vmatpush1.bf16.msra.mxu1 %v11721_v20  ;;  %8671 = vmatprep.subr.bf16.mxu0 %v11736_v14  ;;  %v11848_v20 = vcombine.high %v7073_v11, %v7081_v12  ;;  %v11850_v14 = vcombine.high %v7074_v13, %v7082_v16  ;;  %v6939_v11 = vld [vmem:[%s14011_s13 + $0x1f0] sm:$0xff]  ;;  %v6932_v12 = vld [vmem:[%s14011_s13 + $0x1b8] sm:$0xff] }
 0x75b   : > { %8712 = vmatprep.subr.bf16.mxu1 %v11738_v23  ;;  %v7089_v23 = vld [vmem:[%s14011_s13 + $0x6a0] sm:$0xff] }
 0x75c   : > { %v11863_v39 = vcombine.low %v7089_v23, %v7097_v24 }
 0x75d   : > { %8672 = vmatpush1.bf16.msra.mxu0 %v11735_v8  ;;  %v11849_v8 = vcombine.low %v7074_v13, %v7082_v16  ;;  %v6940_v13 = vld [vmem:[%s14011_s13 + $0x1f8] sm:$0xff] }
 0x75e   : > { %8713 = vmatpush1.bf16.msra.mxu1 %v11737_v30  ;;  %8673 = vmatprep.subr.bf16.mxu0 %v11752_v49  ;;  %v11864_v30 = vcombine.high %v7089_v23, %v7097_v24  ;;  %v11866_v49 = vcombine.high %v7090_v25, %v7098_v15  ;;  %v6948_v23 = vld [vmem:[%s14011_s13 + $0x238] sm:$0xff] }
 0x75f   : > { %8714 = vmatprep.subr.bf16.mxu1 %v11754_v9  ;;  %v7105_v9 = vld [vmem:[%s14011_s13 + $0x720] sm:$0xff]  ;;  %v6956_v24 = vld [vmem:[%s14011_s13 + $0x278] sm:$0xff] }
 0x760   : > { %v11879_v40 = vcombine.low %v7105_v9, %v7113_v33 }
 0x761   : > { %8674 = vmatpush1.bf16.msra.mxu0 %v11751_v50  ;;  %v11865_v50 = vcombine.low %v7090_v25, %v7098_v15  ;;  %v11709_v15 = vcombine.low %v6932_v12, %v6940_v13 }
 0x762   : > { %8715 = vmatpush1.bf16.msra.mxu1 %v11753_v34  ;;  %8675 = vmatprep.subr.bf16.mxu0 %v11768_v41  ;;  %v11880_v34 = vcombine.high %v7105_v9, %v7113_v33  ;;  %v11882_v41 = vcombine.high %v7106_v22, %v7114_v36  ;;  %v6964_v9 = vld [vmem:[%s14011_s13 + $0x2b8] sm:$0xff] }
 0x763   : > { %8716 = vmatprep.subr.bf16.mxu1 %v11770_v42  ;;  %v7121_v42 = vld [vmem:[%s14011_s13 + $0x7a0] sm:$0xff]  ;;  %v6972_v33 = vld [vmem:[%s14011_s13 + $0x2f8] sm:$0xff] }
 0x764   : > { %v11895_v55 = vcombine.low %v7121_v42, %v7129_v43 }
 0x765   : > { %8676 = vmatpush1.bf16.msra.mxu0 %v11767_v47  ;;  %v11881_v47 = vcombine.low %v7106_v22, %v7114_v36  ;;  %v11725_v36 = vcombine.low %v6948_v23, %v6956_v24 }
 0x766   : > { %8717 = vmatpush1.bf16.msra.mxu1 %v11769_v37  ;;  %8677 = vmatprep.subr.bf16.mxu0 %v11784_v46  ;;  %v11896_v37 = vcombine.high %v7121_v42, %v7129_v43  ;;  %v11898_v46 = vcombine.high %v7122_v44, %v7130_v45  ;;  %v6980_v42 = vld [vmem:[%s14011_s13 + $0x338] sm:$0xff] }
 0x767   : > { %8718 = vmatprep.subr.bf16.mxu1 %v11786_v53  ;;  %v6883_v53 = vld [vmem:[%s14011_s13 + $0x30] sm:$0xff]  ;;  %v6988_v43 = vld [vmem:[%s14011_s13 + $0x378] sm:$0xff] }
 0x768   : > { %v11659_v56 = vcombine.low %v6883_v53, %v6891_v51 }
 0x769   : > { %8678 = vmatpush1.bf16.msra.mxu0 %v11783_v57  ;;  %v11897_v57 = vcombine.low %v7122_v44, %v7130_v45  ;;  %v11741_v45 = vcombine.low %v6964_v9, %v6972_v33 }
 0x76a   : > { %8719 = vmatpush1.bf16.msra.mxu1 %v11785_v58  ;;  %8679 = vmatprep.subr.bf16.mxu0 %v11800_v59  ;;  %v11660_v58 = vcombine.high %v6883_v53, %v6891_v51  ;;  %v11662_v59 = vcombine.high %v6884_v54, %v6892_v52  ;;  %v6996_v53 = vld [vmem:[%s14011_s13 + $0x3b8] sm:$0xff] }
 0x76b   : > { %8720 = vmatprep.subr.bf16.mxu1 %v11802_v61  ;;  %v6899_v61 = vld [vmem:[%s14011_s13 + $0xb0] sm:$0xff]  ;;  %v7004_v51 = vld [vmem:[%s14011_s13 + $0x3f8] sm:$0xff] }
 0x76c   : > { %v11675_v4 = vcombine.low %v6899_v61, %v6907_v60 }
 0x76d   : > { %8680 = vmatpush1.bf16.msra.mxu0 %v11799_v0  ;;  %v11661_v0 = vcombine.low %v6884_v54, %v6892_v52  ;;  %v11757_v52 = vcombine.low %v6980_v42, %v6988_v43 }
 0x76e   : > { %8721 = vmatpush1.bf16.msra.mxu1 %v11801_v31  ;;  %8681 = vmatprep.subr.bf16.mxu0 %v11816_v1  ;;  %v11676_v31 = vcombine.high %v6899_v61, %v6907_v60  ;;  %v6915_v1 = vld [vmem:[%s14011_s13 + $0x130] sm:$0xff]  ;;  %v7012_v61 = vld [vmem:[%s14011_s13 + $0x438] sm:$0xff] }
 0x76f   : > { %8722 = vmatprep.subr.bf16.mxu1 %v11818_v32  ;;  %v6923_v32 = vld [vmem:[%s14011_s13 + $0x170] sm:$0xff]  ;;  %v7020_v60 = vld [vmem:[%s14011_s13 + $0x478] sm:$0xff] }
 0x770   : > { %v11691_v16 = vcombine.low %v6915_v1, %v6923_v32 }
 0x771   : > { %8682 = vmatpush1.bf16.msra.mxu0 %v11815_v5  ;;  %v11677_v5 = vcombine.low %v6900_v62, %v6908_v63  ;;  %v11773_v62 = vcombine.low %v6996_v53, %v7004_v51 }
 0x772   : > { %8723 = vmatpush1.bf16.msra.mxu1 %v11817_v6  ;;  %8683 = vmatprep.subr.bf16.mxu0 %v11832_v7  ;;  %v11692_v6 = vcombine.high %v6915_v1, %v6923_v32  ;;  %v11694_v7 = vcombine.high %v6916_v18, %v6924_v3  ;;  %v7035_v1 = vld [vmem:[%s14011_s13 + $0x4f0] sm:$0xff]  ;;  %v7028_v32 = vld [vmem:[%s14011_s13 + $0x4b8] sm:$0xff] }
 0x773   : > { %8724 = vmatprep.subr.bf16.mxu1 %v11834_v10  ;;  %v6931_v10 = vld [vmem:[%s14011_s13 + $0x1b0] sm:$0xff] }
 0x774   : > { %v11707_v25 = vcombine.low %v6931_v10, %v6939_v11 }
 0x775   : > { %8684 = vmatpush1.bf16.msra.mxu0 %v11831_v17  ;;  %v11693_v17 = vcombine.low %v6916_v18, %v6924_v3  ;;  %v11789_v3 = vcombine.low %v7012_v61, %v7020_v60 }
 0x776   : > { %8725 = vmatpush1.bf16.msra.mxu1 %v11833_v19  ;;  %8685 = vmatprep.subr.bf16.mxu0 %v11848_v20  ;;  %v11708_v19 = vcombine.high %v6931_v10, %v6939_v11  ;;  %v6947_v20 = vld [vmem:[%s14011_s13 + $0x230] sm:$0xff]  ;;  %v7044_v10 = vld [vmem:[%s14011_s13 + $0x538] sm:$0xff] }
 0x777   : > { %8726 = vmatprep.subr.bf16.mxu1 %v11850_v14  ;;  %v6955_v14 = vld [vmem:[%s14011_s13 + $0x270] sm:$0xff]  ;;  %v7052_v11 = vld [vmem:[%s14011_s13 + $0x578] sm:$0xff] }
 0x778   : > { %v11723_v22 = vcombine.low %v6947_v20, %v6955_v14 }
 0x779   : > { %8686 = vmatpush1.bf16.msra.mxu0 %v11847_v38  ;;  %v11724_v38 = vcombine.high %v6947_v20, %v6955_v14  ;;  %v7060_v20 = vld [vmem:[%s14011_s13 + $0x5b8] sm:$0xff] }
 0x77a   : > { %8727 = vmatpush1.bf16.msra.mxu1 %v11849_v8  ;;  %8687 = vmatprep.subr.bf16.mxu0 %v11864_v30  ;;  %v11726_v8 = vcombine.high %v6948_v23, %v6956_v24  ;;  %v6963_v30 = vld [vmem:[%s14011_s13 + $0x2b0] sm:$0xff]  ;;  %v7068_v14 = vld [vmem:[%s14011_s13 + $0x5f8] sm:$0xff]  ;;  %v11821_v24 = vcombine.low %v7044_v10, %v7052_v11 }
 0x77b   : > { %8728 = vmatprep.subr.bf16.mxu1 %v11866_v49  ;;  %v6971_v49 = vld [vmem:[%s14011_s13 + $0x2f0] sm:$0xff] }
 0x77c   : > { %v11739_v44 = vcombine.low %v6963_v30, %v6971_v49 }
 0x77d   : > { %8688 = vmatpush1.bf16.msra.mxu0 %v11863_v39  ;;  %v11740_v39 = vcombine.high %v6963_v30, %v6971_v49  ;;  %v7076_v30 = vld [vmem:[%s14011_s13 + $0x638] sm:$0xff] }
 0x77e   : > { %8729 = vmatpush1.bf16.msra.mxu1 %v11865_v50  ;;  %8689 = vmatprep.subr.bf16.mxu0 %v11880_v34  ;;  %v11742_v50 = vcombine.high %v6964_v9, %v6972_v33  ;;  %v6979_v34 = vld [vmem:[%s14011_s13 + $0x330] sm:$0xff]  ;;  %v7084_v49 = vld [vmem:[%s14011_s13 + $0x678] sm:$0xff]  ;;  %v11837_v33 = vcombine.low %v7060_v20, %v7068_v14 }
 0x77f   : > { %8730 = vmatprep.subr.bf16.mxu1 %v11882_v41  ;;  %v6987_v41 = vld [vmem:[%s14011_s13 + $0x370] sm:$0xff] }
 0x780   : > { %v11755_v54 = vcombine.low %v6979_v34, %v6987_v41 }
 0x781   : > { %8690 = vmatpush1.bf16.msra.mxu0 %v11879_v40  ;;  %v11756_v40 = vcombine.high %v6979_v34, %v6987_v41  ;;  %v7092_v34 = vld [vmem:[%s14011_s13 + $0x6b8] sm:$0xff] }
 0x782   : > { %8731 = vmatpush1.bf16.msra.mxu1 %v11881_v47  ;;  %8691 = vmatprep.subr.bf16.mxu0 %v11896_v37  ;;  %v11758_v47 = vcombine.high %v6980_v42, %v6988_v43  ;;  %v6995_v37 = vld [vmem:[%s14011_s13 + $0x3b0] sm:$0xff]  ;;  %v7100_v41 = vld [vmem:[%s14011_s13 + $0x6f8] sm:$0xff]  ;;  %v11853_v43 = vcombine.low %v7076_v30, %v7084_v49 }
 0x783   : > { %8732 = vmatprep.subr.bf16.mxu1 %v11898_v46  ;;  %v7003_v46 = vld [vmem:[%s14011_s13 + $0x3f0] sm:$0xff] }
 0x785   : > { %8692 = vmatpush1.bf16.msra.mxu0 %v11895_v55  ;;  %v11772_v55 = vcombine.high %v6995_v37, %v7003_v46 }
 0x786   : > { %8733 = vmatpush1.bf16.msra.mxu1 %v11897_v57  ;;  %8743 = vmatprep.subr.bf16.mxu0 %v11660_v58  ;;  %v11774_v57 = vcombine.high %v6996_v53, %v7004_v51  ;;  %v7011_v58 = vld [vmem:[%s14011_s13 + $0x430] sm:$0xff]  ;;  %v11869_v51 = vcombine.low %v7092_v34, %v7100_v41 }
 0x787   : > { %8784 = vmatprep.subr.bf16.mxu1 %v11662_v59  ;;  %v7019_v59 = vld [vmem:[%s14011_s13 + $0x470] sm:$0xff] }
 0x788   : > { %8694 = vmatmul.mubr.bf16.vlgmr.msra.gmra.mrb[88].mxu0 %v14827_v35  ;;  %v11788_v63 = vcombine.high %v7011_v58, %v7019_v59  ;;  %v11787_v18 = vcombine.low %v7011_v58, %v7019_v59  ;;  %v7124_v58 = vld [vmem:[%s14011_s13 + $0x7b8] sm:$0xff] }
 0x789   : > { %8735 = vmatmul.mubr.bf16.vlgmr.msra.gmra.mrb[88].mxu1 %v14827_v35  ;;  %8744 = vmatpush1.bf16.msra.mxu0 %v11659_v56  ;;  %v11771_v56 = vcombine.low %v6995_v37, %v7003_v46  ;;  %v7108_v37 = vld [vmem:[%s14011_s13 + $0x738] sm:$0xff] }
 0x78a   : > { %8775 = vmatprep.mubr.bf16.mxu0 %v14831_v21  ;;  %8785 = vmatpush1.bf16.msra.mxu1 %v11661_v0  ;;  %v11790_v0 = vcombine.high %v7012_v61, %v7020_v60  ;;  %v7116_v46 = vld [vmem:[%s14011_s13 + $0x778] sm:$0xff] }
 0x78b   : > { %8816 = vmatprep.mubr.bf16.mxu1 %v14831_v21  ;;  %8745 = vmatprep.subr.bf16.mxu0 %v11676_v31  ;;  %v11710_v21 = vcombine.high %v6932_v12, %v6940_v13  ;;  %v7027_v31 = vld [vmem:[%s14011_s13 + $0x4b0] sm:$0xff]  ;;  %v7132_v59 = vld [vmem:[%s14011_s13 + $0x7f8] sm:$0xff]  ;;  %v11885_v60 = vcombine.low %v7108_v37, %v7116_v46 }
 0x78c   : > { %8786 = vmatprep.subr.bf16.mxu1 %v11678_v2  ;;  %v7036_v2 = vld [vmem:[%s14011_s13 + $0x4f8] sm:$0xff]  ;;  %v11803_v12 = vcombine.low %v7027_v31, %v7035_v1 }
 0x78d   : > { %8746 = vmatpush1.bf16.msra.mxu0 %v11675_v4  ;;  %v11804_v4 = vcombine.high %v7027_v31, %v7035_v1  ;;  %v11805_v13 = vcombine.low %v7028_v32, %v7036_v2  ;;  %v13408_v31 = vld [vmem:[%s14021_s1 + $0x4] ss:$8 sps:$4 sm:$0xff]  }
 0x78e   : > { %8787 = vmatpush1.bf16.msra.mxu1 %v11677_v5  ;;  %8747 = vmatprep.subr.bf16.mxu0 %v11692_v6  ;;  %v11806_v5 = vcombine.high %v7028_v32, %v7036_v2  ;;  %v7043_v6 = vld [vmem:[%s14011_s13 + $0x530] sm:$0xff]  ;;  %v13411_v1 = vld [vmem:[%s14021_s1 + $0x104] ss:$8 sps:$4 sm:$0xff]   ;;  %v13406_v32 = vld [vmem:[%s14021_s1] ss:$8 sps:$4 sm:$0xff]  }
 0x78f   : > { %8788 = vmatprep.subr.bf16.mxu1 %v11694_v7  ;;  %v7051_v7 = vld [vmem:[%s14011_s13 + $0x570] sm:$0xff]  ;;  %v13409_v2 = vld [vmem:[%s14021_s1 + $0x100] ss:$8 sps:$4 sm:$0xff]  }
 0x790   : > { %v11819_v23 = vcombine.low %v7043_v6, %v7051_v7 }
 0x791   : > { %8748 = vmatpush1.bf16.msra.mxu0 %v11691_v16  ;;  %v11820_v16 = vcombine.high %v7043_v6, %v7051_v7  ;;  %v13420_v6 = vld [vmem:[%s14021_s1 + $0x24] ss:$8 sps:$4 sm:$0xff]  }
 0x792   : > { %8789 = vmatpush1.bf16.msra.mxu1 %v11693_v17  ;;  %8749 = vmatprep.subr.bf16.mxu0 %v11708_v19  ;;  %v11822_v17 = vcombine.high %v7044_v10, %v7052_v11  ;;  %v7059_v19 = vld [vmem:[%s14011_s13 + $0x5b0] sm:$0xff]  ;;  %v13423_v7 = vld [vmem:[%s14021_s1 + $0x124] ss:$8 sps:$4 sm:$0xff]   ;;  %v13418_v10 = vld [vmem:[%s14021_s1 + $0x20] ss:$8 sps:$4 sm:$0xff]  }
 0x793   : > { %8790 = vmatprep.subr.bf16.mxu1 %v11710_v21  ;;  %v7067_v21 = vld [vmem:[%s14011_s13 + $0x5f0] sm:$0xff]  ;;  %v13421_v11 = vld [vmem:[%s14021_s1 + $0x120] ss:$8 sps:$4 sm:$0xff]  }
 0x794   : > { %v11835_v9 = vcombine.low %v7059_v19, %v7067_v21 }
 0x795   : > { %8750 = vmatpush1.bf16.msra.mxu0 %v11707_v25  ;;  %v11836_v25 = vcombine.high %v7059_v19, %v7067_v21  ;;  %v13435_v19 = vld [vmem:[%s14021_s1 + $0x144] ss:$8 sps:$4 sm:$0xff]   ;;  %v13430_v21 = vld [vmem:[%s14021_s1 + $0x40] ss:$8 sps:$4 sm:$0xff]  }
 0x796   : > { %8791 = vmatpush1.bf16.msra.mxu1 %v11709_v15  ;;  %8751 = vmatprep.subr.bf16.mxu0 %v11724_v38  ;;  %v11838_v15 = vcombine.high %v7060_v20, %v7068_v14  ;;  %v7075_v38 = vld [vmem:[%s14011_s13 + $0x630] sm:$0xff]  ;;  %v7151_v20 = vsub.s32 3, %v14702_v26  ;;  %v13433_v14 = vld [vmem:[%s14021_s1 + $0x140] ss:$8 sps:$4 sm:$0xff]  }
 0x797   : > { %8792 = vmatprep.subr.bf16.mxu1 %v11726_v8  ;;  %v7083_v8 = vld [vmem:[%s14011_s13 + $0x670] sm:$0xff] }
 0x798   : > { %v11851_v42 = vcombine.low %v7075_v38, %v7083_v8 }
 0x799   : > { %8752 = vmatpush1.bf16.msra.mxu0 %v11723_v22  ;;  %v11852_v22 = vcombine.high %v7075_v38, %v7083_v8 }
 0x79a   : > { %8793 = vmatpush1.bf16.msra.mxu1 %v11725_v36  ;;  %8753 = vmatprep.subr.bf16.mxu0 %v11740_v39  ;;  %v11854_v36 = vcombine.high %v7076_v30, %v7084_v49  ;;  %v7091_v39 = vld [vmem:[%s14011_s13 + $0x6b0] sm:$0xff]  ;;  %v13444_v49 = vld [vmem:[%s14021_s1 + $0x64] ss:$8 sps:$4 sm:$0xff]  }
 0x79b   : > { %8794 = vmatprep.subr.bf16.mxu1 %v11742_v50  ;;  %v7099_v50 = vld [vmem:[%s14011_s13 + $0x6f0] sm:$0xff] }
 0x79c   : > { %v11867_v53 = vcombine.low %v7091_v39, %v7099_v50  ;;  %v13439_v30 = vld [vmem:[%s14021_s1 + $0x150] ss:$8 sps:$4 sm:$0xff]  }
 0x79d   : > { %8754 = vmatpush1.bf16.msra.mxu0 %v11739_v44  ;;  %v11868_v44 = vcombine.high %v7091_v39, %v7099_v50 }
 0x79e   : > { %8795 = vmatpush1.bf16.msra.mxu1 %v11741_v45  ;;  %8755 = vmatprep.subr.bf16.mxu0 %v11756_v40  ;;  %v11870_v45 = vcombine.high %v7092_v34, %v7100_v41  ;;  %v7107_v40 = vld [vmem:[%s14011_s13 + $0x730] sm:$0xff] }
 0x79f   : > { %8796 = vmatprep.subr.bf16.mxu1 %v11758_v47  ;;  %v7115_v47 = vld [vmem:[%s14011_s13 + $0x770] sm:$0xff] }
 0x7a0   : > { %v11883_v61 = vcombine.low %v7107_v40, %v7115_v47 }
 0x7a1   : > { %8756 = vmatpush1.bf16.msra.mxu0 %v11755_v54  ;;  %v11884_v54 = vcombine.high %v7107_v40, %v7115_v47  ;;  %v13445_v40 = vld [vmem:[%s14021_s1 + $0x160] ss:$8 sps:$4 sm:$0xff]   ;;  %v13450_v47 = vld [vmem:[%s14021_s1 + $0x74] ss:$8 sps:$4 sm:$0xff]  }
 0x7a2   : > { %8797 = vmatpush1.bf16.msra.mxu1 %v11757_v52  ;;  %8757 = vmatprep.subr.bf16.mxu0 %v11772_v55  ;;  %v11886_v52 = vcombine.high %v7108_v37, %v7116_v46  ;;  %v7123_v55 = vld [vmem:[%s14011_s13 + $0x7b0] sm:$0xff] }
 0x7a3   : > { %8798 = vmatprep.subr.bf16.mxu1 %v11774_v57  ;;  %v7131_v57 = vld [vmem:[%s14011_s13 + $0x7f0] sm:$0xff] }
 0x7a5   : > { %8758 = vmatpush1.bf16.msra.mxu0 %v11771_v56  ;;  %v11900_v56 = vcombine.high %v7123_v55, %v7131_v57 }
 0x7a6   : > { %8799 = vmatpush1.bf16.msra.mxu1 %v11773_v62  ;;  %8759 = vmatprep.subr.bf16.mxu0 %v11788_v63  ;;  %v11902_v62 = vcombine.high %v7124_v58, %v7132_v59  ;;  %v11899_v63 = vcombine.low %v7123_v55, %v7131_v57  ;;  %v13451_v55 = vld [vmem:[%s14021_s1 + $0x170] ss:$8 sps:$4 sm:$0xff]   ;;  %v13456_v57 = vld [vmem:[%s14021_s1 + $0x84] ss:$8 sps:$4 sm:$0xff]  }
 0x7a7   : > { %8800 = vmatprep.subr.bf16.mxu1 %v11790_v0  ;;  %v11901_v0 = vcombine.low %v7124_v58, %v7132_v59  ;;  %v13459_v58 = vld [vmem:[%s14021_s1 + $0x184] ss:$8 sps:$4 sm:$0xff]   ;;  %v13454_v59 = vld [vmem:[%s14021_s1 + $0x80] ss:$8 sps:$4 sm:$0xff]  }
 0x7a9   : > { %8760 = vmatpush1.bf16.msra.mxu0 %v11787_v18  ;;  %v13414_v18 = vld [vmem:[%s14021_s1 + $0x14] ss:$8 sps:$4 sm:$0xff]  }
 0x7aa   : > { %8801 = vmatpush1.bf16.msra.mxu1 %v11789_v3  ;;  %8761 = vmatprep.subr.bf16.mxu0 %v11804_v4  ;;  %v13417_v3 = vld [vmem:[%s14021_s1 + $0x114] ss:$8 sps:$4 sm:$0xff]   ;;  %v13412_v4 = vld [vmem:[%s14021_s1 + $0x10] ss:$8 sps:$4 sm:$0xff]  }
 0x7ab   : > { %8802 = vmatprep.subr.bf16.mxu1 %v11806_v5  ;;  %v13415_v5 = vld [vmem:[%s14021_s1 + $0x110] ss:$8 sps:$4 sm:$0xff]  }
 0x7ad   : > { %8762 = vmatpush1.bf16.msra.mxu0 %v11803_v12  ;;  %v13429_v12 = vld [vmem:[%s14021_s1 + $0x134] ss:$8 sps:$4 sm:$0xff]  }
 0x7ae   : > { %8803 = vmatpush1.bf16.msra.mxu1 %v11805_v13  ;;  %8763 = vmatprep.subr.bf16.mxu0 %v11820_v16  ;;  %v13424_v13 = vld [vmem:[%s14021_s1 + $0x30] ss:$8 sps:$4 sm:$0xff]  }
 0x7af   : > { %8804 = vmatprep.subr.bf16.mxu1 %v11822_v17  ;;  %v13427_v16 = vld [vmem:[%s14021_s1 + $0x130] ss:$8 sps:$4 sm:$0xff]   ;;  %v13432_v17 = vld [vmem:[%s14021_s1 + $0x44] ss:$8 sps:$4 sm:$0xff]  }
 0x7b1   : > { %8764 = vmatpush1.bf16.msra.mxu0 %v11819_v23  ;;  %v15055_v23 = vld [vmem:[%s14016_s29] sm:$0xff] }
 0x7b2   : > { %8805 = vmatpush1.bf16.msra.mxu1 %v11821_v24  ;;  %8765 = vmatprep.subr.bf16.mxu0 %v11836_v25  ;;  %v13438_v24 = vld [vmem:[%s14021_s1 + $0x54] ss:$8 sps:$4 sm:$0xff]   ;;  %v7144_v38 = vrot.slane %v15055_v23, %v14713_v29  ;;  %v7152_v8 = vrot.slane %v15055_v23, %v7151_v20 }
 0x7b3   : > { %8806 = vmatprep.subr.bf16.mxu1 %v11838_v15  ;;  %v13441_v25 = vld [vmem:[%s14021_s1 + $0x154] ss:$8 sps:$4 sm:$0xff]   ;;  %v13436_v15 = vld [vmem:[%s14021_s1 + $0x50] ss:$8 sps:$4 sm:$0xff]  }
 0x7b5   : > { %8766 = vmatpush1.bf16.msra.mxu0 %v11835_v9 }
 0x7b6   : > { %8807 = vmatpush1.bf16.msra.mxu1 %v11837_v33  ;;  %8767 = vmatprep.subr.bf16.mxu0 %v11852_v22  ;;  %v13447_v22 = vld [vmem:[%s14021_s1 + $0x164] ss:$8 sps:$4 sm:$0xff]  }
 0x7b7   : > { %8808 = vmatprep.subr.bf16.mxu1 %v11854_v36 }
 0x7b9   : > { %8768 = vmatpush1.bf16.msra.mxu0 %v11851_v42 }
 0x7ba   : > { %8809 = vmatpush1.bf16.msra.mxu1 %v11853_v43  ;;  %8769 = vmatprep.subr.bf16.mxu0 %v11868_v44  ;;  %v13442_v43 = vld [vmem:[%s14021_s1 + $0x60] ss:$8 sps:$4 sm:$0xff]  }
 0x7bb   : > { %8810 = vmatprep.subr.bf16.mxu1 %v11870_v45 }
 0x7bd   : > { %8770 = vmatpush1.bf16.msra.mxu0 %v11867_v53  ;;  %v13453_v53 = vld [vmem:[%s14021_s1 + $0x174] ss:$8 sps:$4 sm:$0xff]  }
 0x7be   : > { %8811 = vmatpush1.bf16.msra.mxu1 %v11869_v51  ;;  %8771 = vmatprep.subr.bf16.mxu0 %v11884_v54 }
 0x7bf   : > { %8812 = vmatprep.subr.bf16.mxu1 %v11886_v52  ;;  %v13448_v52 = vld [vmem:[%s14021_s1 + $0x70] ss:$8 sps:$4 sm:$0xff]  }
 0x7c1   : > { %8772 = vmatpush1.bf16.msra.mxu0 %v11883_v61  ;;  %v13457_v61 = vld [vmem:[%s14021_s1 + $0x180] ss:$8 sps:$4 sm:$0xff]  }
 0x7c2   : > { %8813 = vmatpush1.bf16.msra.mxu1 %v11885_v60  ;;  %8773 = vmatprep.subr.bf16.mxu0 %v11900_v56  ;;  %v13462_v60 = vld [vmem:[%s14021_s1 + $0x94] ss:$8 sps:$4 sm:$0xff]  }
 0x7c3   : > { %8814 = vmatprep.subr.bf16.mxu1 %v11902_v62  ;;  %v13465_v56 = vld [vmem:[%s14021_s1 + $0x194] ss:$8 sps:$4 sm:$0xff]   ;;  %v13460_v62 = vld [vmem:[%s14021_s1 + $0x90] ss:$8 sps:$4 sm:$0xff]  }
 0x7c5   : > { %8774 = vmatpush1.bf16.msra.mxu0 %v11899_v63  ;;  %v13463_v63 = vld [vmem:[%s14021_s1 + $0x190] ss:$8 sps:$4 sm:$0xff]  }
 0x7c6   : > { %8815 = vmatpush1.bf16.msra.mxu1 %v11901_v0  ;;  %10405 = vmatprep.subr.bf16.mxu0 %v13408_v31  ;;  %v13468_v0 = vld [vmem:[%s14021_s1 + $0xa4] ss:$8 sps:$4 sm:$0xff]  }
 0x7c7   : > { %10446 = vmatprep.subr.bf16.mxu1 %v13411_v1  ;;  %v13471_v31 = vld [vmem:[%s14021_s1 + $0x1a4] ss:$8 sps:$4 sm:$0xff]   ;;  %v13466_v1 = vld [vmem:[%s14021_s1 + $0xa0] ss:$8 sps:$4 sm:$0xff]  }
 0x7c8   : > { %8776 = vmatmul.mubr.bf16.vlgmr.msra.gmra.mrb[92].mxu0 %v14827_v35 }
 0x7c9   : > { %8817 = vmatmul.mubr.bf16.vlgmr.msra.gmra.mrb[92].mxu1 %v14827_v35  ;;  %10406 = vmatpush1.bf16.msra.mxu0 %v13406_v32  ;;  %v13426_v35 = vld [vmem:[%s14021_s1 + $0x34] ss:$8 sps:$4 sm:$0xff]   ;;  %v13469_v32 = vld [vmem:[%s14021_s1 + $0x1a0] ss:$8 sps:$4 sm:$0xff]  }
 0x7ca   : > { %10447 = vmatpush1.bf16.msra.mxu1 %v13409_v2  ;;  %10407 = vmatprep.subr.bf16.mxu0 %v13414_v18  ;;  %v13474_v2 = vld [vmem:[%s14021_s1 + $0xb4] ss:$8 sps:$4 sm:$0xff]  }
 0x7cb   : > { %10448 = vmatprep.subr.bf16.mxu1 %v13417_v3  ;;  %v13477_v18 = vld [vmem:[%s14021_s1 + $0x1b4] ss:$8 sps:$4 sm:$0xff]   ;;  %v13472_v3 = vld [vmem:[%s14021_s1 + $0xb0] ss:$8 sps:$4 sm:$0xff]  }
 0x7cd   : > { %10408 = vmatpush1.bf16.msra.mxu0 %v13412_v4  ;;  %v13475_v4 = vld [vmem:[%s14021_s1 + $0x1b0] ss:$8 sps:$4 sm:$0xff]  }
 0x7ce   : > { %10449 = vmatpush1.bf16.msra.mxu1 %v13415_v5  ;;  %10409 = vmatprep.subr.bf16.mxu0 %v13420_v6  ;;  %v13480_v5 = vld [vmem:[%s14021_s1 + $0xc4] ss:$8 sps:$4 sm:$0xff]  }
 0x7cf   : > { %10450 = vmatprep.subr.bf16.mxu1 %v13423_v7  ;;  %v13483_v6 = vld [vmem:[%s14021_s1 + $0x1c4] ss:$8 sps:$4 sm:$0xff]   ;;  %v13478_v7 = vld [vmem:[%s14021_s1 + $0xc0] ss:$8 sps:$4 sm:$0xff]  }
 0x7d1   : > { %10410 = vmatpush1.bf16.msra.mxu0 %v13418_v10  ;;  %v13481_v10 = vld [vmem:[%s14021_s1 + $0x1c0] ss:$8 sps:$4 sm:$0xff]  }
 0x7d2   : > { %10451 = vmatpush1.bf16.msra.mxu1 %v13421_v11  ;;  %10411 = vmatprep.subr.bf16.mxu0 %v13426_v35  ;;  %v13486_v11 = vld [vmem:[%s14021_s1 + $0xd4] ss:$8 sps:$4 sm:$0xff]   ;;  %v7147_v35 = vsub.s32 2, %v14702_v26 }
 0x7d3   : > { %10452 = vmatprep.subr.bf16.mxu1 %v13429_v12  ;;  %v13489_v12 = vld [vmem:[%s14021_s1 + $0x1d4] ss:$8 sps:$4 sm:$0xff]  }
 0x7d5   : > { %10412 = vmatpush1.bf16.msra.mxu0 %v13424_v13  ;;  %v13484_v13 = vld [vmem:[%s14021_s1 + $0xd0] ss:$8 sps:$4 sm:$0xff]  }
 0x7d6   : > { %10453 = vmatpush1.bf16.msra.mxu1 %v13427_v16  ;;  %10413 = vmatprep.subr.bf16.mxu0 %v13432_v17  ;;  %v7140_v16 = vrot.slane %v15055_v23, %v14705_v27  ;;  %v13487_v17 = vld [vmem:[%s14021_s1 + $0x1d0] ss:$8 sps:$4 sm:$0xff]  }
 0x7d7   : > { %10454 = vmatprep.subr.bf16.mxu1 %v13435_v19  ;;  %v13492_v19 = vld [vmem:[%s14021_s1 + $0xe4] ss:$8 sps:$4 sm:$0xff]  }
 0x7d9   : > { %10414 = vmatpush1.bf16.msra.mxu0 %v13430_v21  ;;  %v7148_v21 = vrot.slane %v15055_v23, %v7147_v35 }
 0x7da   : > { %10455 = vmatpush1.bf16.msra.mxu1 %v13433_v14  ;;  %10415 = vmatprep.subr.bf16.mxu0 %v13438_v24  ;;  %v13495_v14 = vld [vmem:[%s14021_s1 + $0x1e4] ss:$8 sps:$4 sm:$0xff]   ;;  %v13490_v24 = vld [vmem:[%s14021_s1 + $0xe0] ss:$8 sps:$4 sm:$0xff]  }
 0x7db   : > { %v15067_v9 = vpop.f32.mrb[80].mxu0  ;;  %v15069_v33 = vpop.f32.mrb[80].mxu1  ;;  %10456 = vmatprep.subr.bf16.mxu1 %v13441_v25 }
 0x7dc   : > { %v8533_v36 = vpop.f32.mrb[81].mxu0  ;;  %v8574_v39 = vpop.f32.mrb[81].mxu1  ;;  %v8532_v25 = vadd.f32 %v15067_v9, %v7140_v16  ;;  %v13504_v9 = vld [vmem:[%s14021_s1 + $0x204] ss:$8 sps:$4 sm:$0xff]  }
 0x7dd   : > { %v8534_v50 = vadd.f32 %v8533_v36, %v7144_v38  ;;  %v8575_v34 = vadd.f32 %v8574_v39, %v7152_v8  ;;  %10416 = vmatpush1.bf16.msra.mxu0 %v13436_v15  ;;  %v8535_v41 = vpop.f32.mrb[82].mxu0  ;;  %v8576_v42 = vpop.f32.mrb[82].mxu1  ;;  %v13493_v15 = vld [vmem:[%s14021_s1 + $0x1e0] ss:$8 sps:$4 sm:$0xff]   ;;  %v13498_v38 = vld [vmem:[%s14021_s1 + $0xf4] ss:$8 sps:$4 sm:$0xff]   ;;  %v8573_v8 = vadd.f32 %v15069_v33, %v7148_v21 }
 0x7de   : > { %10457 = vmatpush1.bf16.msra.mxu1 %v13439_v30  ;;  %v8536_v44 = vpop.f32.mrb[83].mxu0  ;;  %v8577_v45 = vpop.f32.mrb[83].mxu1  ;;  %10417 = vmatprep.subr.bf16.mxu0 %v13444_v49  ;;  %v13501_v30 = vld [vmem:[%s14021_s1 + $0x1f4] ss:$8 sps:$4 sm:$0xff]   ;;  %v13496_v49 = vld [vmem:[%s14021_s1 + $0xf0] ss:$8 sps:$4 sm:$0xff]  }
 0x7df   : > { %v8826_v37 = vmax.f32 %v8534_v50, 0.0  ;;  %v8828_v46 = vmax.f32 %v8575_v34, 0.0  ;;  %10458 = vmatprep.subr.bf16.mxu1 %v13447_v22  ;;  %v8825_v22 = vmax.f32 %v8532_v25, 0.0  ;;  %v13499_v36 = vld [vmem:[%s14021_s1 + $0x1f0] ss:$8 sps:$4 sm:$0xff]   ;;  %v8827_v39 = vmax.f32 %v8573_v8, 0.0 }
 0x7e0   : > { %v13507_v50 = vld [vmem:[%s14021_s1 + $0x304] ss:$8 sps:$4 sm:$0xff]   ;;  %v13502_v34 = vld [vmem:[%s14021_s1 + $0x200] ss:$8 sps:$4 sm:$0xff]   ;;  %v13510_v42 = vld [vmem:[%s14021_s1 + $0x214] ss:$8 sps:$4 sm:$0xff]  }
 0x7e1   : > { %v8842_v51 = vpack.c.bf16 %v8826_v37, %v8826_v37  ;;  %v8844_v54 = vpack.c.bf16 %v8828_v46, %v8828_v46  ;;  %10418 = vmatpush1.bf16.msra.mxu0 %v13442_v43  ;;  %v8841_v33 = vpack.c.bf16 %v8825_v22, %v8825_v22  ;;  %v13505_v41 = vld [vmem:[%s14021_s1 + $0x300] ss:$8 sps:$4 sm:$0xff]   ;;  %v8843_v43 = vpack.c.bf16 %v8827_v39, %v8827_v39  ;;  %v13513_v44 = vld [vmem:[%s14021_s1 + $0x314] ss:$8 sps:$4 sm:$0xff]   ;;  %v13508_v45 = vld [vmem:[%s14021_s1 + $0x210] ss:$8 sps:$4 sm:$0xff]  }
 0x7e2   : > { %10459 = vmatpush1.bf16.msra.mxu1 %v13445_v40  ;;  %10419 = vmatprep.subr.bf16.mxu0 %v13450_v47  ;;  %v13511_v40 = vld [vmem:[%s14021_s1 + $0x310] ss:$8 sps:$4 sm:$0xff]   ;;  %v13516_v47 = vld [vmem:[%s14021_s1 + $0x224] ss:$8 sps:$4 sm:$0xff]   ;;  %v13514_v46 = vld [vmem:[%s14021_s1 + $0x220] ss:$8 sps:$4 sm:$0xff]  }
 0x7e3   : > { %10437 = vmatprep.mubr.bf16.mxu0 %v8842_v51  ;;  %10460 = vmatprep.subr.bf16.mxu1 %v13453_v53  ;;  %v13519_v37 = vld [vmem:[%s14021_s1 + $0x324] ss:$8 sps:$4 sm:$0xff]   ;;  %v13517_v53 = vld [vmem:[%s14021_s1 + $0x320] ss:$8 sps:$4 sm:$0xff]   ;;  %v13522_v51 = vld [vmem:[%s14021_s1 + $0x234] ss:$8 sps:$4 sm:$0xff]  }
 0x7e4   : > { %10478 = vmatprep.mubr.bf16.mxu1 %v8844_v54  ;;  %v13525_v54 = vld [vmem:[%s14021_s1 + $0x334] ss:$8 sps:$4 sm:$0xff]   ;;  %v13544_v8 = vld [vmem:[%s14021_s1 + $0x270] ss:$8 sps:$4 sm:$0xff]   ;;  %v13555_v22 = vld [vmem:[%s14021_s1 + $0x384] ss:$8 sps:$4 sm:$0xff]  }
 0x7e5   : > { %10420 = vmatpush1.bf16.msra.mxu0 %v13448_v52  ;;  %v13520_v52 = vld [vmem:[%s14021_s1 + $0x230] ss:$8 sps:$4 sm:$0xff]   ;;  %v13546_v21 = vld [vmem:[%s14021_s1 + $0x274] ss:$8 sps:$4 sm:$0xff]  }
 0x7e6   : > { %10461 = vmatpush1.bf16.msra.mxu1 %v13451_v55  ;;  %10421 = vmatprep.subr.bf16.mxu0 %v13456_v57  ;;  %v13523_v55 = vld [vmem:[%s14021_s1 + $0x330] ss:$8 sps:$4 sm:$0xff]   ;;  %v13528_v57 = vld [vmem:[%s14021_s1 + $0x244] ss:$8 sps:$4 sm:$0xff]   ;;  %v13549_v25 = vld [vmem:[%s14021_s1 + $0x374] ss:$8 sps:$4 sm:$0xff]  }
 0x7e7   : > { %10462 = vmatprep.subr.bf16.mxu1 %v13459_v58  ;;  %v13531_v58 = vld [vmem:[%s14021_s1 + $0x344] ss:$8 sps:$4 sm:$0xff]   ;;  %v13558_v39 = vld [vmem:[%s14021_s1 + $0x294] ss:$8 sps:$4 sm:$0xff]  }
 0x7e9   : > { %10422 = vmatpush1.bf16.msra.mxu0 %v13454_v59  ;;  %v13526_v59 = vld [vmem:[%s14021_s1 + $0x240] ss:$8 sps:$4 sm:$0xff]  }
 0x7ea   : > { %10463 = vmatpush1.bf16.msra.mxu1 %v13457_v61  ;;  %10423 = vmatprep.subr.bf16.mxu0 %v13462_v60  ;;  %v7159_v61 = vsub.s32 5, %v14702_v26  ;;  %v7167_v60 = vsub.s32 7, %v14702_v26 }
 0x7eb   : > { %10464 = vmatprep.subr.bf16.mxu1 %v13465_v56  ;;  %v13529_v56 = vld [vmem:[%s14021_s1 + $0x340] ss:$8 sps:$4 sm:$0xff]  }
 0x7ed   : > { %10424 = vmatpush1.bf16.msra.mxu0 %v13460_v62  ;;  %v13534_v62 = vld [vmem:[%s14021_s1 + $0x254] ss:$8 sps:$4 sm:$0xff]  }
 0x7ee   : > { %10465 = vmatpush1.bf16.msra.mxu1 %v13463_v63  ;;  %10425 = vmatprep.subr.bf16.mxu0 %v13468_v0  ;;  %v13537_v63 = vld [vmem:[%s14021_s1 + $0x354] ss:$8 sps:$4 sm:$0xff]   ;;  %v7160_v0 = vrot.slane %v15055_v23, %v7159_v61 }
 0x7ef   : > { %10466 = vmatprep.subr.bf16.mxu1 %v13471_v31  ;;  %v7168_v31 = vrot.slane %v15055_v23, %v7167_v60 }
 0x7f1   : > { %10426 = vmatpush1.bf16.msra.mxu0 %v13466_v1  ;;  %v13532_v1 = vld [vmem:[%s14021_s1 + $0x250] ss:$8 sps:$4 sm:$0xff]  }
 0x7f2   : > { %10467 = vmatpush1.bf16.msra.mxu1 %v13469_v32  ;;  %10427 = vmatprep.subr.bf16.mxu0 %v13474_v2  ;;  %v13535_v32 = vld [vmem:[%s14021_s1 + $0x350] ss:$8 sps:$4 sm:$0xff]   ;;  %v13540_v2 = vld [vmem:[%s14021_s1 + $0x264] ss:$8 sps:$4 sm:$0xff]  }
 0x7f3   : > { %10468 = vmatprep.subr.bf16.mxu1 %v13477_v18 }
 0x7f5   : > { %10428 = vmatpush1.bf16.msra.mxu0 %v13472_v3 }
 0x7f6   : > { %10469 = vmatpush1.bf16.msra.mxu1 %v13475_v4  ;;  %10429 = vmatprep.subr.bf16.mxu0 %v13480_v5  ;;  %v13543_v4 = vld [vmem:[%s14021_s1 + $0x364] ss:$8 sps:$4 sm:$0xff]  }
 0x7f7   : > { %10470 = vmatprep.subr.bf16.mxu1 %v13483_v6 }
 0x7f9   : > { %10430 = vmatpush1.bf16.msra.mxu0 %v13478_v7 }
 0x7fa   : > { %10471 = vmatpush1.bf16.msra.mxu1 %v13481_v10  ;;  %10431 = vmatprep.subr.bf16.mxu0 %v13486_v11 }
 0x7fb   : > { %10472 = vmatprep.subr.bf16.mxu1 %v13489_v12 }
 0x7fd   : > { %10432 = vmatpush1.bf16.msra.mxu0 %v13484_v13  ;;  %v13538_v13 = vld [vmem:[%s14021_s1 + $0x260] ss:$8 sps:$4 sm:$0xff]  }
 0x7fe   : > { %10473 = vmatpush1.bf16.msra.mxu1 %v13487_v17  ;;  %10433 = vmatprep.subr.bf16.mxu0 %v13492_v19  ;;  %v13541_v19 = vld [vmem:[%s14021_s1 + $0x360] ss:$8 sps:$4 sm:$0xff]  }
 0x7ff   : > { %10474 = vmatprep.subr.bf16.mxu1 %v13495_v14 }
 0x801   : > { %10434 = vmatpush1.bf16.msra.mxu0 %v13490_v24 }
 0x802   : > { %10475 = vmatpush1.bf16.msra.mxu1 %v13493_v15  ;;  %10435 = vmatprep.subr.bf16.mxu0 %v13498_v38 }
 0x803   : > { %10476 = vmatprep.subr.bf16.mxu1 %v13501_v30  ;;  %v13547_v30 = vld [vmem:[%s14021_s1 + $0x370] ss:$8 sps:$4 sm:$0xff]  }
 0x805   : > { %10436 = vmatpush1.bf16.msra.mxu0 %v13496_v49  ;;  %v13552_v49 = vld [vmem:[%s14021_s1 + $0x284] ss:$8 sps:$4 sm:$0xff]  }
 0x806   : > { %10477 = vmatpush1.bf16.msra.mxu1 %v13499_v36  ;;  %10487 = vmatprep.subr.bf16.mxu0 %v13504_v9  ;;  %v13550_v36 = vld [vmem:[%s14021_s1 + $0x280] ss:$8 sps:$4 sm:$0xff]  }
 0x807   : > { %10528 = vmatprep.subr.bf16.mxu1 %v13507_v50  ;;  %v13553_v9 = vld [vmem:[%s14021_s1 + $0x380] ss:$8 sps:$4 sm:$0xff]   ;;  %v13561_v50 = vld [vmem:[%s14021_s1 + $0x394] ss:$8 sps:$4 sm:$0xff]  }
 0x808   : > { %10438 = vmatmul.mubr.bf16.vlgmr.msra.gmra.mrb[96].mxu0 %v8841_v33  ;;  %v13559_v33 = vld [vmem:[%s14021_s1 + $0x390] ss:$8 sps:$4 sm:$0xff]  }
 0x809   : > { %10479 = vmatmul.mubr.bf16.vlgmr.msra.gmra.mrb[96].mxu1 %v8843_v43  ;;  %10488 = vmatpush1.bf16.msra.mxu0 %v13502_v34  ;;  %v13556_v34 = vld [vmem:[%s14021_s1 + $0x290] ss:$8 sps:$4 sm:$0xff]   ;;  %v13562_v43 = vld [vmem:[%s14021_s1 + $0x2a0] ss:$8 sps:$4 sm:$0xff]  }
 0x80a   : > { %10529 = vmatpush1.bf16.msra.mxu1 %v13505_v41  ;;  %10489 = vmatprep.subr.bf16.mxu0 %v13510_v42  ;;  %v13564_v41 = vld [vmem:[%s14021_s1 + $0x2a4] ss:$8 sps:$4 sm:$0xff]  }
 0x80b   : > { %10530 = vmatprep.subr.bf16.mxu1 %v13513_v44  ;;  %v13567_v42 = vld [vmem:[%s14021_s1 + $0x3a4] ss:$8 sps:$4 sm:$0xff]   ;;  %v13565_v44 = vld [vmem:[%s14021_s1 + $0x3a0] ss:$8 sps:$4 sm:$0xff]  }
 0x80d   : > { %10490 = vmatpush1.bf16.msra.mxu0 %v13508_v45  ;;  %v13570_v45 = vld [vmem:[%s14021_s1 + $0x2b4] ss:$8 sps:$4 sm:$0xff]  }
 0x80e   : > { %10531 = vmatpush1.bf16.msra.mxu1 %v13511_v40  ;;  %10491 = vmatprep.subr.bf16.mxu0 %v13516_v47  ;;  %v13573_v40 = vld [vmem:[%s14021_s1 + $0x3b4] ss:$8 sps:$4 sm:$0xff]   ;;  %v13568_v47 = vld [vmem:[%s14021_s1 + $0x2b0] ss:$8 sps:$4 sm:$0xff]  }
 0x80f   : > { %10532 = vmatprep.subr.bf16.mxu1 %v13519_v37  ;;  %v13571_v37 = vld [vmem:[%s14021_s1 + $0x3b0] ss:$8 sps:$4 sm:$0xff]  }
 0x811   : > { %10492 = vmatpush1.bf16.msra.mxu0 %v13514_v46  ;;  %v13576_v46 = vld [vmem:[%s14021_s1 + $0x2c4] ss:$8 sps:$4 sm:$0xff]  }
 0x812   : > { %10533 = vmatpush1.bf16.msra.mxu1 %v13517_v53  ;;  %10493 = vmatprep.subr.bf16.mxu0 %v13522_v51  ;;  %v13579_v53 = vld [vmem:[%s14021_s1 + $0x3c4] ss:$8 sps:$4 sm:$0xff]   ;;  %v13574_v51 = vld [vmem:[%s14021_s1 + $0x2c0] ss:$8 sps:$4 sm:$0xff]  }
 0x813   : > { %10534 = vmatprep.subr.bf16.mxu1 %v13525_v54  ;;  %v7155_v54 = vsub.s32 4, %v14702_v26 }
 0x815   : > { %10494 = vmatpush1.bf16.msra.mxu0 %v13520_v52  ;;  %v13577_v52 = vld [vmem:[%s14021_s1 + $0x3c0] ss:$8 sps:$4 sm:$0xff]  }
 0x816   : > { %10535 = vmatpush1.bf16.msra.mxu1 %v13523_v55  ;;  %10495 = vmatprep.subr.bf16.mxu0 %v13528_v57  ;;  %v13582_v55 = vld [vmem:[%s14021_s1 + $0x2d4] ss:$8 sps:$4 sm:$0xff]   ;;  %v7163_v57 = vsub.s32 6, %v14702_v26  ;;  %v13784_v26 = vld [vmem:[%s14021_s1 + $0x6f0] ss:$8 sps:$4 sm:$0xff]  }
 0x817   : > { %10536 = vmatprep.subr.bf16.mxu1 %v13531_v58  ;;  %v13585_v58 = vld [vmem:[%s14021_s1 + $0x3d4] ss:$8 sps:$4 sm:$0xff]  }
 0x819   : > { %10496 = vmatpush1.bf16.msra.mxu0 %v13526_v59  ;;  %v13580_v59 = vld [vmem:[%s14021_s1 + $0x2d0] ss:$8 sps:$4 sm:$0xff]  }
 0x81a   : > { %10537 = vmatpush1.bf16.msra.mxu1 %v13529_v56  ;;  %10497 = vmatprep.subr.bf16.mxu0 %v13534_v62  ;;  %v7156_v56 = vrot.slane %v15055_v23, %v7155_v54  ;;  %v13583_v62 = vld [vmem:[%s14021_s1 + $0x3d0] ss:$8 sps:$4 sm:$0xff]  }
 0x81b   : > { %v15151_v18 = vpop.f32.mrb[84].mxu0  ;;  %v15153_v3 = vpop.f32.mrb[84].mxu1  ;;  %10538 = vmatprep.subr.bf16.mxu1 %v13537_v63  ;;  %v13588_v63 = vld [vmem:[%s14021_s1 + $0x2e4] ss:$8 sps:$4 sm:$0xff]  }
 0x81c   : > { %v8615_v5 = vpop.f32.mrb[85].mxu0  ;;  %v8656_v6 = vpop.f32.mrb[85].mxu1 }
 0x81d   : > { %v8616_v7 = vadd.f32 %v8615_v5, %v7160_v0  ;;  %v8657_v10 = vadd.f32 %v8656_v6, %v7168_v31  ;;  %v8617_v11 = vpop.f32.mrb[86].mxu0  ;;  %v8658_v12 = vpop.f32.mrb[86].mxu1  ;;  %10498 = vmatpush1.bf16.msra.mxu0 %v13532_v1  ;;  %v7164_v0 = vrot.slane %v15055_v23, %v7163_v57  ;;  %v13591_v31 = vld [vmem:[%s14021_s1 + $0x3e4] ss:$8 sps:$4 sm:$0xff]   ;;  %v13586_v1 = vld [vmem:[%s14021_s1 + $0x2e0] ss:$8 sps:$4 sm:$0xff]  }
 0x81e   : > { %10539 = vmatpush1.bf16.msra.mxu1 %v13535_v32  ;;  %v8618_v16 = vpop.f32.mrb[87].mxu0  ;;  %v8659_v17 = vpop.f32.mrb[87].mxu1  ;;  %10499 = vmatprep.subr.bf16.mxu0 %v13540_v2  ;;  %v8614_v32 = vadd.f32 %v15151_v18, %v7156_v56  ;;  %v13589_v2 = vld [vmem:[%s14021_s1 + $0x3e0] ss:$8 sps:$4 sm:$0xff]   ;;  %v13597_v6 = vld [vmem:[%s14021_s1 + $0x3f4] ss:$8 sps:$4 sm:$0xff]  }
 0x81f   : > { %v8830_v14 = vmax.f32 %v8616_v7, 0.0  ;;  %v8832_v24 = vmax.f32 %v8657_v10, 0.0  ;;  %10540 = vmatprep.subr.bf16.mxu1 %v13543_v4  ;;  %v13594_v4 = vld [vmem:[%s14021_s1 + $0x2f4] ss:$8 sps:$4 sm:$0xff]   ;;  %v8655_v5 = vadd.f32 %v15153_v3, %v7164_v0  ;;  %v13592_v23 = vld [vmem:[%s14021_s1 + $0x2f0] ss:$8 sps:$4 sm:$0xff]  }
 0x820   : > { %v8829_v7 = vmax.f32 %v8614_v32, 0.0  ;;  %v13595_v10 = vld [vmem:[%s14021_s1 + $0x3f0] ss:$8 sps:$4 sm:$0xff]   ;;  %v13600_v18 = vld [vmem:[%s14021_s1 + $0x404] ss:$8 sps:$4 sm:$0xff]  }
 0x821   : > { %v8846_v15 = vpack.c.bf16 %v8830_v14, %v8830_v14  ;;  %v8848_v38 = vpack.c.bf16 %v8832_v24, %v8832_v24  ;;  %10500 = vmatpush1.bf16.msra.mxu0 %v13538_v13  ;;  %v8831_v11 = vmax.f32 %v8655_v5, 0.0  ;;  %v13603_v12 = vld [vmem:[%s14021_s1 + $0x504] ss:$8 sps:$4 sm:$0xff]   ;;  %v13598_v13 = vld [vmem:[%s14021_s1 + $0x400] ss:$8 sps:$4 sm:$0xff]  }
 0x822   : > { %10541 = vmatpush1.bf16.msra.mxu1 %v13541_v19  ;;  %10501 = vmatprep.subr.bf16.mxu0 %v13546_v21  ;;  %v8845_v3 = vpack.c.bf16 %v8829_v7, %v8829_v7  ;;  %v13601_v16 = vld [vmem:[%s14021_s1 + $0x500] ss:$8 sps:$4 sm:$0xff]   ;;  %v13606_v17 = vld [vmem:[%s14021_s1 + $0x414] ss:$8 sps:$4 sm:$0xff]   ;;  %v13604_v14 = vld [vmem:[%s14021_s1 + $0x410] ss:$8 sps:$4 sm:$0xff]  }
 0x823   : > { %10519 = vmatprep.mubr.bf16.mxu0 %v8846_v15  ;;  %10560 = vmatprep.mubr.bf16.mxu1 %v8848_v38  ;;  %v8847_v19 = vpack.c.bf16 %v8831_v11, %v8831_v11  ;;  %v13609_v21 = vld [vmem:[%s14021_s1 + $0x514] ss:$8 sps:$4 sm:$0xff]   ;;  %v13607_v24 = vld [vmem:[%s14021_s1 + $0x510] ss:$8 sps:$4 sm:$0xff]   ;;  %v13615_v15 = vld [vmem:[%s14021_s1 + $0x524] ss:$8 sps:$4 sm:$0xff]  }
 0x824   : > { %10542 = vmatprep.subr.bf16.mxu1 %v13549_v25  ;;  %v13612_v25 = vld [vmem:[%s14021_s1 + $0x424] ss:$8 sps:$4 sm:$0xff]   ;;  %v13610_v38 = vld [vmem:[%s14021_s1 + $0x420] ss:$8 sps:$4 sm:$0xff]   ;;  %v13642_v0 = vld [vmem:[%s14021_s1 + $0x474] ss:$8 sps:$4 sm:$0xff]  }
 0x825   : > { %10502 = vmatpush1.bf16.msra.mxu0 %v13544_v8  ;;  %v13613_v8 = vld [vmem:[%s14021_s1 + $0x520] ss:$8 sps:$4 sm:$0xff]   ;;  %v13645_v32 = vld [vmem:[%s14021_s1 + $0x574] ss:$8 sps:$4 sm:$0xff]   ;;  %v13640_v5 = vld [vmem:[%s14021_s1 + $0x470] ss:$8 sps:$4 sm:$0xff]  }
 0x826   : > { %10543 = vmatpush1.bf16.msra.mxu1 %v13547_v30  ;;  %10503 = vmatprep.subr.bf16.mxu0 %v13552_v49  ;;  %v13618_v30 = vld [vmem:[%s14021_s1 + $0x434] ss:$8 sps:$4 sm:$0xff]   ;;  %v13648_v7 = vld [vmem:[%s14021_s1 + $0x484] ss:$8 sps:$4 sm:$0xff]   ;;  %v13649_v11 = vld [vmem:[%s14021_s1 + $0x580] ss:$8 sps:$4 sm:$0xff]  }
 0x827   : > { %10544 = vmatprep.subr.bf16.mxu1 %v13555_v22  ;;  %v13621_v49 = vld [vmem:[%s14021_s1 + $0x534] ss:$8 sps:$4 sm:$0xff]   ;;  %v13616_v22 = vld [vmem:[%s14021_s1 + $0x430] ss:$8 sps:$4 sm:$0xff]  }
 0x829   : > { %10504 = vmatpush1.bf16.msra.mxu0 %v13550_v36  ;;  %v13619_v36 = vld [vmem:[%s14021_s1 + $0x530] ss:$8 sps:$4 sm:$0xff]  }
 0x82a   : > { %10545 = vmatpush1.bf16.msra.mxu1 %v13553_v9  ;;  %10505 = vmatprep.subr.bf16.mxu0 %v13558_v39  ;;  %v13624_v9 = vld [vmem:[%s14021_s1 + $0x444] ss:$8 sps:$4 sm:$0xff]  }
 0x82b   : > { %10546 = vmatprep.subr.bf16.mxu1 %v13561_v50  ;;  %v13627_v39 = vld [vmem:[%s14021_s1 + $0x544] ss:$8 sps:$4 sm:$0xff]   ;;  %v13622_v50 = vld [vmem:[%s14021_s1 + $0x440] ss:$8 sps:$4 sm:$0xff]  }
 0x82d   : > { %10506 = vmatpush1.bf16.msra.mxu0 %v13556_v34  ;;  %v13625_v34 = vld [vmem:[%s14021_s1 + $0x540] ss:$8 sps:$4 sm:$0xff]  }
 0x82e   : > { %10547 = vmatpush1.bf16.msra.mxu1 %v13559_v33  ;;  %10507 = vmatprep.subr.bf16.mxu0 %v13564_v41  ;;  %v15225_v33 = vld [vmem:[%s14016_s29 + $0x8] sm:$0xff]  ;;  %v13630_v41 = vld [vmem:[%s14021_s1 + $0x454] ss:$8 sps:$4 sm:$0xff]  }
 0x82f   : > { %10548 = vmatprep.subr.bf16.mxu1 %v13567_v42  ;;  %v13633_v42 = vld [vmem:[%s14021_s1 + $0x554] ss:$8 sps:$4 sm:$0xff]  }
 0x831   : > { %10508 = vmatpush1.bf16.msra.mxu0 %v13562_v43  ;;  %v7176_v43 = vrot.slane %v15225_v33, %v14713_v29 }
 0x832   : > { %10549 = vmatpush1.bf16.msra.mxu1 %v13565_v44  ;;  %10509 = vmatprep.subr.bf16.mxu0 %v13570_v45  ;;  %v13628_v44 = vld [vmem:[%s14021_s1 + $0x450] ss:$8 sps:$4 sm:$0xff]   ;;  %v7184_v45 = vrot.slane %v15225_v33, %v7151_v20 }
 0x833   : > { %10550 = vmatprep.subr.bf16.mxu1 %v13573_v40  ;;  %v13631_v40 = vld [vmem:[%s14021_s1 + $0x550] ss:$8 sps:$4 sm:$0xff]  }
 0x835   : > { %10510 = vmatpush1.bf16.msra.mxu0 %v13568_v47  ;;  %v13636_v47 = vld [vmem:[%s14021_s1 + $0x464] ss:$8 sps:$4 sm:$0xff]  }
 0x836   : > { %10551 = vmatpush1.bf16.msra.mxu1 %v13571_v37  ;;  %10511 = vmatprep.subr.bf16.mxu0 %v13576_v46  ;;  %v13639_v46 = vld [vmem:[%s14021_s1 + $0x564] ss:$8 sps:$4 sm:$0xff]  }
 0x837   : > { %10552 = vmatprep.subr.bf16.mxu1 %v13579_v53 }
 0x839   : > { %10512 = vmatpush1.bf16.msra.mxu0 %v13574_v51 }
 0x83a   : > { %10553 = vmatpush1.bf16.msra.mxu1 %v13577_v52  ;;  %10513 = vmatprep.subr.bf16.mxu0 %v13582_v55 }
 0x83b   : > { %10554 = vmatprep.subr.bf16.mxu1 %v13585_v58 }
 0x83d   : > { %10514 = vmatpush1.bf16.msra.mxu0 %v13580_v59  ;;  %v13634_v59 = vld [vmem:[%s14021_s1 + $0x460] ss:$8 sps:$4 sm:$0xff]  }
 0x83e   : > { %10555 = vmatpush1.bf16.msra.mxu1 %v13583_v62  ;;  %10515 = vmatprep.subr.bf16.mxu0 %v13588_v63  ;;  %v13637_v63 = vld [vmem:[%s14021_s1 + $0x560] ss:$8 sps:$4 sm:$0xff]  }
 0x83f   : > { %10556 = vmatprep.subr.bf16.mxu1 %v13591_v31 }
 0x841   : > { %10516 = vmatpush1.bf16.msra.mxu0 %v13586_v1 }
 0x842   : > { %10557 = vmatpush1.bf16.msra.mxu1 %v13589_v2  ;;  %10517 = vmatprep.subr.bf16.mxu0 %v13594_v4 }
 0x843   : > { %10558 = vmatprep.subr.bf16.mxu1 %v13597_v6 }
 0x845   : > { %10518 = vmatpush1.bf16.msra.mxu0 %v13592_v23  ;;  %v13643_v23 = vld [vmem:[%s14021_s1 + $0x570] ss:$8 sps:$4 sm:$0xff]  }
 0x846   : > { %10559 = vmatpush1.bf16.msra.mxu1 %v13595_v10  ;;  %10569 = vmatprep.subr.bf16.mxu0 %v13600_v18  ;;  %v13651_v10 = vld [vmem:[%s14021_s1 + $0x584] ss:$8 sps:$4 sm:$0xff]   ;;  %v13646_v18 = vld [vmem:[%s14021_s1 + $0x480] ss:$8 sps:$4 sm:$0xff]  }
 0x847   : > { %10610 = vmatprep.subr.bf16.mxu1 %v13603_v12  ;;  %v13654_v12 = vld [vmem:[%s14021_s1 + $0x494] ss:$8 sps:$4 sm:$0xff]  }
 0x848   : > { %10520 = vmatmul.mubr.bf16.vlgmr.msra.gmra.mrb[100].mxu0 %v8845_v3  ;;  %v13652_v3 = vld [vmem:[%s14021_s1 + $0x490] ss:$8 sps:$4 sm:$0xff]  }
 0x849   : > { %10561 = vmatmul.mubr.bf16.vlgmr.msra.gmra.mrb[100].mxu1 %v8847_v19  ;;  %10570 = vmatpush1.bf16.msra.mxu0 %v13598_v13  ;;  %v13657_v13 = vld [vmem:[%s14021_s1 + $0x594] ss:$8 sps:$4 sm:$0xff]   ;;  %v13663_v19 = vld [vmem:[%s14021_s1 + $0x5a4] ss:$8 sps:$4 sm:$0xff]  }
 0x84a   : > { %10611 = vmatpush1.bf16.msra.mxu1 %v13601_v16  ;;  %10571 = vmatprep.subr.bf16.mxu0 %v13606_v17  ;;  %v13655_v16 = vld [vmem:[%s14021_s1 + $0x590] ss:$8 sps:$4 sm:$0xff]   ;;  %v13660_v17 = vld [vmem:[%s14021_s1 + $0x4a4] ss:$8 sps:$4 sm:$0xff]  }
 0x84b   : > { %10612 = vmatprep.subr.bf16.mxu1 %v13609_v21  ;;  %v13658_v21 = vld [vmem:[%s14021_s1 + $0x4a0] ss:$8 sps:$4 sm:$0xff]  }
 0x84d   : > { %10572 = vmatpush1.bf16.msra.mxu0 %v13604_v14  ;;  %v13661_v14 = vld [vmem:[%s14021_s1 + $0x5a0] ss:$8 sps:$4 sm:$0xff]  }
 0x84e   : > { %10613 = vmatpush1.bf16.msra.mxu1 %v13607_v24  ;;  %10573 = vmatprep.subr.bf16.mxu0 %v13612_v25  ;;  %v13666_v24 = vld [vmem:[%s14021_s1 + $0x4b4] ss:$8 sps:$4 sm:$0xff]  }
 0x84f   : > { %10614 = vmatprep.subr.bf16.mxu1 %v13615_v15  ;;  %v13669_v25 = vld [vmem:[%s14021_s1 + $0x5b4] ss:$8 sps:$4 sm:$0xff]   ;;  %v13664_v15 = vld [vmem:[%s14021_s1 + $0x4b0] ss:$8 sps:$4 sm:$0xff]  }
 0x851   : > { %10574 = vmatpush1.bf16.msra.mxu0 %v13610_v38  ;;  %v13667_v38 = vld [vmem:[%s14021_s1 + $0x5b0] ss:$8 sps:$4 sm:$0xff]  }
 0x852   : > { %10615 = vmatpush1.bf16.msra.mxu1 %v13613_v8  ;;  %10575 = vmatprep.subr.bf16.mxu0 %v13618_v30  ;;  %v13672_v8 = vld [vmem:[%s14021_s1 + $0x4c4] ss:$8 sps:$4 sm:$0xff]  }
 0x853   : > { %10616 = vmatprep.subr.bf16.mxu1 %v13621_v49  ;;  %v13675_v30 = vld [vmem:[%s14021_s1 + $0x5c4] ss:$8 sps:$4 sm:$0xff]   ;;  %v13670_v49 = vld [vmem:[%s14021_s1 + $0x4c0] ss:$8 sps:$4 sm:$0xff]  }
 0x855   : > { %10576 = vmatpush1.bf16.msra.mxu0 %v13616_v22  ;;  %v13673_v22 = vld [vmem:[%s14021_s1 + $0x5c0] ss:$8 sps:$4 sm:$0xff]  }
 0x856   : > { %10617 = vmatpush1.bf16.msra.mxu1 %v13619_v36  ;;  %10577 = vmatprep.subr.bf16.mxu0 %v13624_v9  ;;  %v13678_v36 = vld [vmem:[%s14021_s1 + $0x4d4] ss:$8 sps:$4 sm:$0xff]  }
 0x857   : > { %10618 = vmatprep.subr.bf16.mxu1 %v13627_v39  ;;  %v13681_v9 = vld [vmem:[%s14021_s1 + $0x5d4] ss:$8 sps:$4 sm:$0xff]   ;;  %v13676_v39 = vld [vmem:[%s14021_s1 + $0x4d0] ss:$8 sps:$4 sm:$0xff]  }
 0x859   : > { %10578 = vmatpush1.bf16.msra.mxu0 %v13622_v50  ;;  %v7172_v50 = vrot.slane %v15225_v33, %v14705_v27 }
 0x85a   : > { %10619 = vmatpush1.bf16.msra.mxu1 %v13625_v34  ;;  %10579 = vmatprep.subr.bf16.mxu0 %v13630_v41  ;;  %v13679_v34 = vld [vmem:[%s14021_s1 + $0x5d0] ss:$8 sps:$4 sm:$0xff]   ;;  %v13684_v41 = vld [vmem:[%s14021_s1 + $0x4e4] ss:$8 sps:$4 sm:$0xff]  }
 0x85b   : > { %v15237_v37 = vpop.f32.mrb[88].mxu0  ;;  %10620 = vmatprep.subr.bf16.mxu1 %v13633_v42  ;;  %v7180_v42 = vrot.slane %v15225_v33, %v7147_v35  ;;  %v13688_v35 = vld [vmem:[%s14021_s1 + $0x4f0] ss:$8 sps:$4 sm:$0xff]  }
 0x85c   : > { %v15240_v53 = vpop.f32.mrb[88].mxu1  ;;  %v8697_v51 = vpop.f32.mrb[89].mxu0 }
 0x85d   : > { %v8698_v52 = vadd.f32 %v8697_v51, %v7176_v43  ;;  %v8738_v55 = vpop.f32.mrb[89].mxu1  ;;  %v8699_v58 = vpop.f32.mrb[90].mxu0  ;;  %10580 = vmatpush1.bf16.msra.mxu0 %v13628_v44  ;;  %v13687_v43 = vld [vmem:[%s14021_s1 + $0x5e4] ss:$8 sps:$4 sm:$0xff]   ;;  %v13682_v44 = vld [vmem:[%s14021_s1 + $0x4e0] ss:$8 sps:$4 sm:$0xff]  }
 0x85e   : > { %v8739_v20 = vadd.f32 %v8738_v55, %v7184_v45  ;;  %v8740_v56 = vpop.f32.mrb[90].mxu1  ;;  %10621 = vmatpush1.bf16.msra.mxu1 %v13631_v40  ;;  %v8700_v62 = vpop.f32.mrb[91].mxu0  ;;  %10581 = vmatprep.subr.bf16.mxu0 %v13636_v47  ;;  %v8696_v45 = vadd.f32 %v15237_v37, %v7172_v50  ;;  %v13685_v40 = vld [vmem:[%s14021_s1 + $0x5e0] ss:$8 sps:$4 sm:$0xff]   ;;  %v13690_v47 = vld [vmem:[%s14021_s1 + $0x4f4] ss:$8 sps:$4 sm:$0xff]  }
 0x85f   : > { %v8834_v31 = vmax.f32 %v8698_v52, 0.0  ;;  %v8741_v1 = vpop.f32.mrb[91].mxu1  ;;  %10622 = vmatprep.subr.bf16.mxu1 %v13639_v46  ;;  %v8737_v46 = vadd.f32 %v15240_v53, %v7180_v42  ;;  %v13693_v51 = vld [vmem:[%s14021_s1 + $0x5f4] ss:$8 sps:$4 sm:$0xff]   ;;  %v13691_v55 = vld [vmem:[%s14021_s1 + $0x5f0] ss:$8 sps:$4 sm:$0xff]  }
 0x860   : > { %v8836_v2 = vmax.f32 %v8739_v20, 0.0  ;;  %v8833_v52 = vmax.f32 %v8696_v45, 0.0  ;;  %v13696_v37 = vld [vmem:[%s14021_s1 + $0x604] ss:$8 sps:$4 sm:$0xff]   ;;  %v13694_v20 = vld [vmem:[%s14021_s1 + $0x600] ss:$8 sps:$4 sm:$0xff]  }
 0x861   : > { %v8850_v4 = vpack.c.bf16 %v8834_v31, %v8834_v31  ;;  %10582 = vmatpush1.bf16.msra.mxu0 %v13634_v59  ;;  %v8835_v58 = vmax.f32 %v8737_v46, 0.0  ;;  %v13699_v59 = vld [vmem:[%s14021_s1 + $0x704] ss:$8 sps:$4 sm:$0xff]   ;;  %v13697_v56 = vld [vmem:[%s14021_s1 + $0x700] ss:$8 sps:$4 sm:$0xff]  }
 0x862   : > { %v8852_v6 = vpack.c.bf16 %v8836_v2, %v8836_v2  ;;  %10623 = vmatpush1.bf16.msra.mxu1 %v13637_v63  ;;  %10583 = vmatprep.subr.bf16.mxu0 %v13642_v0  ;;  %v8849_v53 = vpack.c.bf16 %v8833_v52, %v8833_v52  ;;  %v13702_v62 = vld [vmem:[%s14021_s1 + $0x614] ss:$8 sps:$4 sm:$0xff]   ;;  %v13700_v31 = vld [vmem:[%s14021_s1 + $0x610] ss:$8 sps:$4 sm:$0xff]   ;;  %v13711_v2 = vld [vmem:[%s14021_s1 + $0x724] ss:$8 sps:$4 sm:$0xff]  }
 0x863   : > { %10601 = vmatprep.mubr.bf16.mxu0 %v8850_v4  ;;  %10624 = vmatprep.subr.bf16.mxu1 %v13645_v32  ;;  %v8851_v63 = vpack.c.bf16 %v8835_v58, %v8835_v58  ;;  %v13705_v0 = vld [vmem:[%s14021_s1 + $0x714] ss:$8 sps:$4 sm:$0xff]   ;;  %v13703_v1 = vld [vmem:[%s14021_s1 + $0x710] ss:$8 sps:$4 sm:$0xff]   ;;  %v13708_v32 = vld [vmem:[%s14021_s1 + $0x624] ss:$8 sps:$4 sm:$0xff]  }
 0x864   : > { %10642 = vmatprep.mubr.bf16.mxu1 %v8852_v6  ;;  %v13706_v4 = vld [vmem:[%s14021_s1 + $0x620] ss:$8 sps:$4 sm:$0xff]   ;;  %v13714_v6 = vld [vmem:[%s14021_s1 + $0x634] ss:$8 sps:$4 sm:$0xff]   ;;  %v13736_v45 = vld [vmem:[%s14021_s1 + $0x670] ss:$8 sps:$4 sm:$0xff]  }
 0x865   : > { %10584 = vmatpush1.bf16.msra.mxu0 %v13640_v5  ;;  %v13709_v5 = vld [vmem:[%s14021_s1 + $0x720] ss:$8 sps:$4 sm:$0xff]   ;;  %v13738_v50 = vld [vmem:[%s14021_s1 + $0x674] ss:$8 sps:$4 sm:$0xff]   ;;  %v13744_v46 = vld [vmem:[%s14021_s1 + $0x684] ss:$8 sps:$4 sm:$0xff]  }
 0x866   : > { %10625 = vmatpush1.bf16.msra.mxu1 %v13643_v23  ;;  %10585 = vmatprep.subr.bf16.mxu0 %v13648_v7  ;;  %v13717_v23 = vld [vmem:[%s14021_s1 + $0x734] ss:$8 sps:$4 sm:$0xff]   ;;  %v13712_v7 = vld [vmem:[%s14021_s1 + $0x630] ss:$8 sps:$4 sm:$0xff]   ;;  %v13745_v52 = vld [vmem:[%s14021_s1 + $0x780] ss:$8 sps:$4 sm:$0xff]  }
 0x867   : > { %10626 = vmatprep.subr.bf16.mxu1 %v13651_v10  ;;  %v13715_v10 = vld [vmem:[%s14021_s1 + $0x730] ss:$8 sps:$4 sm:$0xff]   ;;  %v13741_v42 = vld [vmem:[%s14021_s1 + $0x774] ss:$8 sps:$4 sm:$0xff]  }
 0x868   : > { %v13748_v58 = vld [vmem:[%s14021_s1 + $0x690] ss:$8 sps:$4 sm:$0xff]  }
 0x869   : > { %10586 = vmatpush1.bf16.msra.mxu0 %v13646_v18  ;;  %v13720_v18 = vld [vmem:[%s14021_s1 + $0x644] ss:$8 sps:$4 sm:$0xff]  }
 0x86a   : > { %10627 = vmatpush1.bf16.msra.mxu1 %v13649_v11  ;;  %10587 = vmatprep.subr.bf16.mxu0 %v13654_v12  ;;  %v13723_v11 = vld [vmem:[%s14021_s1 + $0x744] ss:$8 sps:$4 sm:$0xff]   ;;  %v13718_v12 = vld [vmem:[%s14021_s1 + $0x640] ss:$8 sps:$4 sm:$0xff]  }
 0x86b   : > { %10628 = vmatprep.subr.bf16.mxu1 %v13657_v13  ;;  %v13721_v13 = vld [vmem:[%s14021_s1 + $0x740] ss:$8 sps:$4 sm:$0xff]  }
 0x86d   : > { %10588 = vmatpush1.bf16.msra.mxu0 %v13652_v3  ;;  %v13726_v3 = vld [vmem:[%s14021_s1 + $0x654] ss:$8 sps:$4 sm:$0xff]  }
 0x86e   : > { %10629 = vmatpush1.bf16.msra.mxu1 %v13655_v16  ;;  %10589 = vmatprep.subr.bf16.mxu0 %v13660_v17  ;;  %v13729_v16 = vld [vmem:[%s14021_s1 + $0x754] ss:$8 sps:$4 sm:$0xff]   ;;  %v7192_v17 = vrot.slane %v15225_v33, %v7159_v61 }
 0x86f   : > { %10630 = vmatprep.subr.bf16.mxu1 %v13663_v19  ;;  %v13724_v19 = vld [vmem:[%s14021_s1 + $0x650] ss:$8 sps:$4 sm:$0xff]  }
 0x871   : > { %10590 = vmatpush1.bf16.msra.mxu0 %v13658_v21  ;;  %v7200_v21 = vrot.slane %v15225_v33, %v7167_v60 }
 0x872   : > { %10631 = vmatpush1.bf16.msra.mxu1 %v13661_v14  ;;  %10591 = vmatprep.subr.bf16.mxu0 %v13666_v24  ;;  %v13727_v14 = vld [vmem:[%s14021_s1 + $0x750] ss:$8 sps:$4 sm:$0xff]   ;;  %v13732_v24 = vld [vmem:[%s14021_s1 + $0x664] ss:$8 sps:$4 sm:$0xff]  }
 0x873   : > { %10632 = vmatprep.subr.bf16.mxu1 %v13669_v25 }
 0x875   : > { %10592 = vmatpush1.bf16.msra.mxu0 %v13664_v15  ;;  %v13735_v15 = vld [vmem:[%s14021_s1 + $0x764] ss:$8 sps:$4 sm:$0xff]  }
 0x876   : > { %10633 = vmatpush1.bf16.msra.mxu1 %v13667_v38  ;;  %10593 = vmatprep.subr.bf16.mxu0 %v13672_v8 }
 0x877   : > { %10634 = vmatprep.subr.bf16.mxu1 %v13675_v30 }
 0x879   : > { %10594 = vmatpush1.bf16.msra.mxu0 %v13670_v49 }
 0x87a   : > { %10635 = vmatpush1.bf16.msra.mxu1 %v13673_v22  ;;  %10595 = vmatprep.subr.bf16.mxu0 %v13678_v36  ;;  %v13730_v22 = vld [vmem:[%s14021_s1 + $0x660] ss:$8 sps:$4 sm:$0xff]  }
 0x87b   : > { %10636 = vmatprep.subr.bf16.mxu1 %v13681_v9 }
 0x87d   : > { %10596 = vmatpush1.bf16.msra.mxu0 %v13676_v39  ;;  %v13733_v39 = vld [vmem:[%s14021_s1 + $0x760] ss:$8 sps:$4 sm:$0xff]  }
 0x87e   : > { %10637 = vmatpush1.bf16.msra.mxu1 %v13679_v34  ;;  %10597 = vmatprep.subr.bf16.mxu0 %v13684_v41 }
 0x87f   : > { %10638 = vmatprep.subr.bf16.mxu1 %v13687_v43 }
 0x881   : > { %10598 = vmatpush1.bf16.msra.mxu0 %v13682_v44 }
 0x882   : > { %10639 = vmatpush1.bf16.msra.mxu1 %v13685_v40  ;;  %10599 = vmatprep.subr.bf16.mxu0 %v13690_v47  ;;  %v13739_v47 = vld [vmem:[%s14021_s1 + $0x770] ss:$8 sps:$4 sm:$0xff]  }
 0x883   : > { %10640 = vmatprep.subr.bf16.mxu1 %v13693_v51  ;;  %v13747_v51 = vld [vmem:[%s14021_s1 + $0x784] ss:$8 sps:$4 sm:$0xff]  }
 0x885   : > { %10600 = vmatpush1.bf16.msra.mxu0 %v13688_v35  ;;  %v13742_v35 = vld [vmem:[%s14021_s1 + $0x680] ss:$8 sps:$4 sm:$0xff]  }
 0x886   : > { %10641 = vmatpush1.bf16.msra.mxu1 %v13691_v55  ;;  %10651 = vmatprep.subr.bf16.mxu0 %v13696_v37  ;;  %v13750_v55 = vld [vmem:[%s14021_s1 + $0x694] ss:$8 sps:$4 sm:$0xff]  }
 0x887   : > { %10692 = vmatprep.subr.bf16.mxu1 %v13699_v59  ;;  %v13753_v37 = vld [vmem:[%s14021_s1 + $0x794] ss:$8 sps:$4 sm:$0xff]   ;;  %v13751_v59 = vld [vmem:[%s14021_s1 + $0x790] ss:$8 sps:$4 sm:$0xff]  }
 0x888   : > { %10602 = vmatmul.mubr.bf16.vlgmr.msra.gmra.mrb[104].mxu0 %v8849_v53  ;;  %v13759_v53 = vld [vmem:[%s14021_s1 + $0x7a4] ss:$8 sps:$4 sm:$0xff]  }
 0x889   : > { %10643 = vmatmul.mubr.bf16.vlgmr.msra.gmra.mrb[104].mxu1 %v8851_v63  ;;  %10652 = vmatpush1.bf16.msra.mxu0 %v13694_v20  ;;  %v13756_v20 = vld [vmem:[%s14021_s1 + $0x6a4] ss:$8 sps:$4 sm:$0xff]   ;;  %v13762_v63 = vld [vmem:[%s14021_s1 + $0x6b4] ss:$8 sps:$4 sm:$0xff]  }
 0x88a   : > { %10693 = vmatpush1.bf16.msra.mxu1 %v13697_v56  ;;  %10653 = vmatprep.subr.bf16.mxu0 %v13702_v62  ;;  %v13754_v56 = vld [vmem:[%s14021_s1 + $0x6a0] ss:$8 sps:$4 sm:$0xff]  }
 0x88b   : > { %10694 = vmatprep.subr.bf16.mxu1 %v13705_v0  ;;  %v13757_v62 = vld [vmem:[%s14021_s1 + $0x7a0] ss:$8 sps:$4 sm:$0xff]   ;;  %v13765_v0 = vld [vmem:[%s14021_s1 + $0x7b4] ss:$8 sps:$4 sm:$0xff]  }
 0x88d   : > { %10654 = vmatpush1.bf16.msra.mxu0 %v13700_v31  ;;  %v13760_v31 = vld [vmem:[%s14021_s1 + $0x6b0] ss:$8 sps:$4 sm:$0xff]  }
 0x88e   : > { %10695 = vmatpush1.bf16.msra.mxu1 %v13703_v1  ;;  %10655 = vmatprep.subr.bf16.mxu0 %v13708_v32  ;;  %v13763_v1 = vld [vmem:[%s14021_s1 + $0x7b0] ss:$8 sps:$4 sm:$0xff]   ;;  %v13768_v32 = vld [vmem:[%s14021_s1 + $0x6c4] ss:$8 sps:$4 sm:$0xff]  }
 0x88f   : > { %10696 = vmatprep.subr.bf16.mxu1 %v13711_v2  ;;  %v13771_v2 = vld [vmem:[%s14021_s1 + $0x7c4] ss:$8 sps:$4 sm:$0xff]  }
 0x891   : > { %10656 = vmatpush1.bf16.msra.mxu0 %v13706_v4  ;;  %v13766_v4 = vld [vmem:[%s14021_s1 + $0x6c0] ss:$8 sps:$4 sm:$0xff]  }
 0x892   : > { %10697 = vmatpush1.bf16.msra.mxu1 %v13709_v5  ;;  %10657 = vmatprep.subr.bf16.mxu0 %v13714_v6  ;;  %v13769_v5 = vld [vmem:[%s14021_s1 + $0x7c0] ss:$8 sps:$4 sm:$0xff]   ;;  %v13774_v6 = vld [vmem:[%s14021_s1 + $0x6d4] ss:$8 sps:$4 sm:$0xff]  }
 0x893   : > { %10698 = vmatprep.subr.bf16.mxu1 %v13717_v23  ;;  %v13777_v23 = vld [vmem:[%s14021_s1 + $0x7d4] ss:$8 sps:$4 sm:$0xff]  }
 0x895   : > { %10658 = vmatpush1.bf16.msra.mxu0 %v13712_v7  ;;  %v13772_v7 = vld [vmem:[%s14021_s1 + $0x6d0] ss:$8 sps:$4 sm:$0xff]  }
 0x896   : > { %10699 = vmatpush1.bf16.msra.mxu1 %v13715_v10  ;;  %10659 = vmatprep.subr.bf16.mxu0 %v13720_v18  ;;  %v7188_v10 = vrot.slane %v15225_v33, %v7155_v54  ;;  %v13775_v18 = vld [vmem:[%s14021_s1 + $0x7d0] ss:$8 sps:$4 sm:$0xff]   ;;  %v13781_v54 = vld [vmem:[%s14021_s1 + $0x7e0] ss:$8 sps:$4 sm:$0xff]  }
 0x897   : > { %10700 = vmatprep.subr.bf16.mxu1 %v13723_v11  ;;  %v13780_v11 = vld [vmem:[%s14021_s1 + $0x6e4] ss:$8 sps:$4 sm:$0xff]  }
 0x899   : > { %10660 = vmatpush1.bf16.msra.mxu0 %v13718_v12  ;;  %v7196_v12 = vrot.slane %v15225_v33, %v7163_v57  ;;  %v13787_v57 = vld [vmem:[%s14021_s1 + $0x7f0] ss:$8 sps:$4 sm:$0xff]  }
 0x89a   : > { %10701 = vmatpush1.bf16.msra.mxu1 %v13721_v13  ;;  %10661 = vmatprep.subr.bf16.mxu0 %v13726_v3  ;;  %v13783_v13 = vld [vmem:[%s14021_s1 + $0x7e4] ss:$8 sps:$4 sm:$0xff]   ;;  %v13778_v3 = vld [vmem:[%s14021_s1 + $0x6e0] ss:$8 sps:$4 sm:$0xff]  }
 0x89b   : > { %v15318_v25 = vpop.f32.mrb[92].mxu0  ;;  %10702 = vmatprep.subr.bf16.mxu1 %v13729_v16 }
 0x89c   : > { %v15321_v38 = vpop.f32.mrb[92].mxu1  ;;  %v8779_v8 = vpop.f32.mrb[93].mxu0  ;;  %v8778_v16 = vadd.f32 %v15318_v25, %v7188_v10 }
 0x89d   : > { %v8780_v61 = vadd.f32 %v8779_v8, %v7192_v17  ;;  %v8820_v30 = vpop.f32.mrb[93].mxu1  ;;  %v8781_v49 = vpop.f32.mrb[94].mxu0  ;;  %10662 = vmatpush1.bf16.msra.mxu0 %v13724_v19  ;;  %v13786_v17 = vld [vmem:[%s14021_s1 + $0x6f4] ss:$8 sps:$4 sm:$0xff]   ;;  %v8819_v19 = vadd.f32 %v15321_v38, %v7196_v12 }
 0x89e   : > { %v8821_v60 = vadd.f32 %v8820_v30, %v7200_v21  ;;  %v8822_v36 = vpop.f32.mrb[94].mxu1  ;;  %10703 = vmatpush1.bf16.msra.mxu1 %v13727_v14  ;;  %v8782_v9 = vpop.f32.mrb[95].mxu0  ;;  %10663 = vmatprep.subr.bf16.mxu0 %v13732_v24  ;;  %v13789_v21 = vld [vmem:[%s14021_s1 + $0x7f4] ss:$8 sps:$4 sm:$0xff]   ;;  %v8837_v14 = vmax.f32 %v8778_v16, 0.0 }
 0x89f   : > { %v8838_v34 = vmax.f32 %v8780_v61, 0.0  ;;  %v8823_v41 = vpop.f32.mrb[95].mxu1  ;;  %10704 = vmatprep.subr.bf16.mxu1 %v13735_v15  ;;  %v8839_v33 = vmax.f32 %v8819_v19, 0.0  ;;  %v9113_v15 = vld [vmem:[%s724_s21] sm:$0x3] }
 0x8a0   : > { %v8840_v43 = vmax.f32 %v8821_v60, 0.0  ;;  %v8853_v24 = vpack.c.bf16 %v8837_v14, %v8837_v14  ;;  %v9118_v38 = vrot.slane %v9113_v15, %v14705_v27  ;;  %v9122_v8 = vrot.slane %v9113_v15, %v14713_v29 }
 0x8a1   : > { %v8854_v44 = vpack.c.bf16 %v8838_v34, %v8838_v34  ;;  %10664 = vmatpush1.bf16.msra.mxu0 %v13730_v22  ;;  %v8855_v25 = vpack.c.bf16 %v8839_v33, %v8839_v33 }
 0x8a2   : > { %v8856_v40 = vpack.c.bf16 %v8840_v43, %v8840_v43  ;;  %10705 = vmatpush1.bf16.msra.mxu1 %v13733_v39  ;;  %10665 = vmatprep.subr.bf16.mxu0 %v13738_v50 }
 0x8a3   : > { %10683 = vmatprep.mubr.bf16.mxu0 %v8854_v44  ;;  %10706 = vmatprep.subr.bf16.mxu1 %v13741_v42 }
 0x8a4   : > { %10724 = vmatprep.mubr.bf16.mxu1 %v8856_v40 }
 0x8a5   : > { %10666 = vmatpush1.bf16.msra.mxu0 %v13736_v45 }
 0x8a6   : > { %10707 = vmatpush1.bf16.msra.mxu1 %v13739_v47  ;;  %10667 = vmatprep.subr.bf16.mxu0 %v13744_v46 }
 0x8a7   : > { %10708 = vmatprep.subr.bf16.mxu1 %v13747_v51 }
 0x8a9   : > { %10668 = vmatpush1.bf16.msra.mxu0 %v13742_v35 }
 0x8aa   : > { %10709 = vmatpush1.bf16.msra.mxu1 %v13745_v52  ;;  %10669 = vmatprep.subr.bf16.mxu0 %v13750_v55 }
 0x8ab   : > { %10710 = vmatprep.subr.bf16.mxu1 %v13753_v37 }
 0x8ad   : > { %10670 = vmatpush1.bf16.msra.mxu0 %v13748_v58 }
 0x8ae   : > { %10711 = vmatpush1.bf16.msra.mxu1 %v13751_v59  ;;  %10671 = vmatprep.subr.bf16.mxu0 %v13756_v20 }
 0x8af   : > { %10712 = vmatprep.subr.bf16.mxu1 %v13759_v53 }
 0x8b1   : > { %10672 = vmatpush1.bf16.msra.mxu0 %v13754_v56 }
 0x8b2   : > { %10713 = vmatpush1.bf16.msra.mxu1 %v13757_v62  ;;  %10673 = vmatprep.subr.bf16.mxu0 %v13762_v63 }
 0x8b3   : > { %10714 = vmatprep.subr.bf16.mxu1 %v13765_v0 }
 0x8b5   : > { %10674 = vmatpush1.bf16.msra.mxu0 %v13760_v31 }
 0x8b6   : > { %10715 = vmatpush1.bf16.msra.mxu1 %v13763_v1  ;;  %10675 = vmatprep.subr.bf16.mxu0 %v13768_v32 }
 0x8b7   : > { %10716 = vmatprep.subr.bf16.mxu1 %v13771_v2 }
 0x8b9   : > { %10676 = vmatpush1.bf16.msra.mxu0 %v13766_v4 }
 0x8ba   : > { %10717 = vmatpush1.bf16.msra.mxu1 %v13769_v5  ;;  %10677 = vmatprep.subr.bf16.mxu0 %v13774_v6 }
 0x8bb   : > { %10718 = vmatprep.subr.bf16.mxu1 %v13777_v23 }
 0x8bd   : > { %10678 = vmatpush1.bf16.msra.mxu0 %v13772_v7 }
 0x8be   : > { %10719 = vmatpush1.bf16.msra.mxu1 %v13775_v18  ;;  %10679 = vmatprep.subr.bf16.mxu0 %v13780_v11 }
 0x8bf   : > { %10720 = vmatprep.subr.bf16.mxu1 %v13783_v13 }
 0x8c1   : > { %10680 = vmatpush1.bf16.msra.mxu0 %v13778_v3 }
 0x8c2   : > { %10721 = vmatpush1.bf16.msra.mxu1 %v13781_v54  ;;  %10681 = vmatprep.subr.bf16.mxu0 %v13786_v17 }
 0x8c3   : > { %10722 = vmatprep.subr.bf16.mxu1 %v13789_v21 }
 0x8c5   : > { %10682 = vmatpush1.bf16.msra.mxu0 %v13784_v26 }
 0x8c6   : > { %10723 = vmatpush1.bf16.msra.mxu1 %v13787_v57 }
 0x8c8   : > { %10684 = vmatmul.mubr.bf16.vlgmr.msra.gmra.mrb[108].mxu0 %v8853_v24 }
 0x8c9   : > { %10725 = vmatmul.mubr.bf16.vlgmr.msra.gmra.mrb[108].mxu1 %v8855_v25 }
 0x8db   : > { %v10439_v61 = vpop.f32.mrb[96].mxu0 }
 0x8dc   : > { %v10440_v30 = vadd.f32 %v10439_v61, %v9118_v38  ;;  %v10480_v49 = vpop.f32.mrb[96].mxu1  ;;  %v10441_v22 = vpop.f32.mrb[97].mxu0 }
 0x8dd   : > { %v10442_v60 = vadd.f32 %v10441_v22, %v9122_v8  ;;  %v10482_v36 = vpop.f32.mrb[97].mxu1  ;;  %v10443_v9 = vpop.f32.mrb[98].mxu0 }
 0x8de   : > { %v10481_v39 = vadd.f32 %v10480_v49, %v10440_v30  ;;  %v10484_v50 = vpop.f32.mrb[98].mxu1  ;;  %v10444_v34 = vpop.f32.mrb[99].mxu0 }
 0x8df   : > { %v10483_v41 = vadd.f32 %v10482_v36, %v10442_v60  ;;  %v10485_v42 = vpop.f32.mrb[99].mxu1 }
 0x91b   : > { %v10521_v43 = vpop.f32.mrb[100].mxu0 }
 0x91c   : > { %v10522_v44 = vadd.f32 %v10521_v43, %v10481_v39  ;;  %v10562_v45 = vpop.f32.mrb[100].mxu1  ;;  %v10523_v40 = vpop.f32.mrb[101].mxu0 }
 0x91d   : > { %v10524_v47 = vadd.f32 %v10523_v40, %v10483_v41  ;;  %v10564_v46 = vpop.f32.mrb[101].mxu1  ;;  %v10525_v51 = vpop.f32.mrb[102].mxu0 }
 0x91e   : > { %v10563_v35 = vadd.f32 %v10562_v45, %v10522_v44  ;;  %v10566_v52 = vpop.f32.mrb[102].mxu1  ;;  %v10526_v55 = vpop.f32.mrb[103].mxu0 }
 0x91f   : > { %v10565_v37 = vadd.f32 %v10564_v46, %v10524_v47  ;;  %v10567_v58 = vpop.f32.mrb[103].mxu1  ;;  %v13870_v46 = vmov (!%p12159_p5), 0.0|0.0  }
 0x920   : > { %12926 = vmatprep.subr.bf16.mxu1 (!%p12159_p5), %v13870_v46 }
 0x95b   : > { %v10603_v59 = vpop.f32.mrb[104].mxu0 }
 0x95c   : > { %v10604_v20 = vadd.f32 %v10603_v59, %v10563_v35  ;;  %v10644_v53 = vpop.f32.mrb[104].mxu1  ;;  %v10605_v56 = vpop.f32.mrb[105].mxu0 }
 0x95d   : > { %v10606_v62 = vadd.f32 %v10605_v56, %v10565_v37  ;;  %v10646_v63 = vpop.f32.mrb[105].mxu1  ;;  %v10607_v0 = vpop.f32.mrb[106].mxu0 }
 0x95e   : > { %v10645_v31 = vadd.f32 %v10644_v53, %v10604_v20  ;;  %v10648_v1 = vpop.f32.mrb[106].mxu1  ;;  %v10608_v32 = vpop.f32.mrb[107].mxu0 }
 0x95f   : > { %v10647_v2 = vadd.f32 %v10646_v63, %v10606_v62  ;;  %v10649_v4 = vpop.f32.mrb[107].mxu1 }
 0x99b   : > { %v10685_v5 = vpop.f32.mrb[108].mxu0 }
 0x99c   : > { %v10686_v6 = vadd.f32 %v10685_v5, %v10645_v31  ;;  %v10726_v23 = vpop.f32.mrb[108].mxu1  ;;  %v10687_v7 = vpop.f32.mrb[109].mxu0  ;;  %v10889_v5 = vld [vmem:[%s15620_s15] sm:$0xff] (!%p12159_p5) }
 0x99d   : > { %v10688_v10 = vadd.f32 %v10687_v7, %v10647_v2  ;;  %v10728_v18 = vpop.f32.mrb[109].mxu1  ;;  %v10689_v11 = vpop.f32.mrb[110].mxu0  ;;  %v10892_v7 = vld [vmem:[%s15620_s15 + $0x18] sm:$0xff] (!%p12159_p5) }
 0x99e   : > { %v10727_v12 = vadd.f32 %v10726_v23, %v10686_v6  ;;  %v10730_v13 = vpop.f32.mrb[110].mxu1  ;;  %v10690_v3 = vpop.f32.mrb[111].mxu0  ;;  %v10890_v6 = vld [vmem:[%s15620_s15 + $0x8] sm:$0xff] (!%p12159_p5)  ;;  %v10891_v23 = vld [vmem:[%s15620_s15 + $0x10] sm:$0xff] (!%p12159_p5) }
 0x99f   : > { %v10729_v16 = vadd.f32 %v10728_v18, %v10688_v10  ;;  %v10731_v54 = vpop.f32.mrb[111].mxu1  ;;  %v12927_v18 = vpack.c.bf16 (!%p12159_p5), %v10890_v6, %v10889_v5 }
 0x9a0   : > { %v10733_v17 = vadd.f32 %v10727_v12, %v14817_v48  ;;  %v10751_v48 = vld [vmem:[%s728_s14] sm:$0x3]  ;;  %s15619_s14 = sld [smem:[#allocation13_spill]] (!%p12159_p5)  ;;  %v12930_v54 = vpack.c.bf16 (!%p12159_p5), %v10892_v7, %v10891_v23 }
 0x9a1   : > { %v10734_v19 = vadd.f32 %v10729_v16, %v14819_v28  ;;  %v10765_v28 = vld [vmem:[%s732_s7] sm:$0x3]  ;;  %v10756_v30 = vrot.slane %v10751_v48, %v14705_v27  ;;  %v10760_v49 = vrot.slane %v10751_v48, %v14713_v29  ;;  %12928 = vmatpush3.bf16.msra.mxu1 (!%p12159_p5), %v12927_v18 }
 0x9a2   : > { %v10770_v60 = vrot.slane %v10765_v28, %v14705_v27  ;;  %v10774_v36 = vrot.slane %v10765_v28, %v14713_v29  ;;  %12929 = vmatprep.subr.bf16.mxu1 (!%p12159_p5), %v13870_v46 }
 0x9a3   : > { %v10735_v21 = vadd.f32 %v10734_v19, %v10733_v17 }
 0x9a5   : > { %10736 = vadd.xlane.f32.xlu0 %v10735_v21  ;;  %12931 = vmatpush3.bf16.msra.mxu1 (!%p12159_p5), %v12930_v54 }
 0x9a6   : > { %v10801_v43 = vld [vmem:[%s15619_s14 + $0x80] sm:$0xff] (!%p12159_p5)  ;;  %v10802_v27 = vld [vmem:[%s15619_s14 + $0x88] sm:$0xff] (!%p12159_p5)  ;;  %v10803_v40 = vld [vmem:[%s15619_s14 + $0x90] sm:$0xff] (!%p12159_p5)  ;;  %12932 = vmatprep.subr.bf16.mxu1 (!%p12159_p5), %v13870_v46 }
 0x9a7   : > { %v10785_v29 = vld [vmem:[%s15619_s14] sm:$0xff] (!%p12159_p5)  ;;  %v12894_v44 = vpack.c.bf16 (!%p12159_p5), %v10802_v27, %v10801_v43  ;;  %v10786_v45 = vld [vmem:[%s15619_s14 + $0x8] sm:$0xff] (!%p12159_p5)  ;;  %v10804_v47 = vld [vmem:[%s15619_s14 + $0x98] sm:$0xff] (!%p12159_p5) }
 0x9a8   : > { %v12896_v51 = vpack.c.bf16 (!%p12159_p5), %v10786_v45, %v10785_v29  ;;  %v12898_v35 = vpack.c.bf16 (!%p12159_p5), %v10804_v47, %v10803_v40  ;;  %v10787_v52 = vld [vmem:[%s15619_s14 + $0x10] sm:$0xff] (!%p12159_p5)  ;;  %v10788_v55 = vld [vmem:[%s15619_s14 + $0x18] sm:$0xff] (!%p12159_p5)  ;;  %v10805_v37 = vld [vmem:[%s15619_s14 + $0xa0] sm:$0xff] (!%p12159_p5) }
 0x9a9   : > { %12895 = vmatprep.subr.bf16.mxu0 (!%p12159_p5), %v12894_v44  ;;  %v10806_v58 = vld [vmem:[%s15619_s14 + $0xa8] sm:$0xff] (!%p12159_p5)  ;;  %v12900_v59 = vpack.c.bf16 (!%p12159_p5), %v10788_v55, %v10787_v52  ;;  %v10789_v53 = vld [vmem:[%s15619_s14 + $0x20] sm:$0xff] (!%p12159_p5)  ;;  %v10807_v62 = vld [vmem:[%s15619_s14 + $0xb0] sm:$0xff] (!%p12159_p5)  ;;  %v13872_v52 = vmov (!%p12159_p5), 0.0  }
 0x9aa   : > { %12897 = vmatpush3.bf16.msra.mxu0 (!%p12159_p5), %v12896_v51  ;;  %v12902_v20 = vpack.c.bf16 (!%p12159_p5), %v10806_v58, %v10805_v37  ;;  %v10790_v56 = vld [vmem:[%s15619_s14 + $0x28] sm:$0xff] (!%p12159_p5)  ;;  %v10808_v63 = vld [vmem:[%s15619_s14 + $0xb8] sm:$0xff] (!%p12159_p5)  ;;  %v10791_v1 = vld [vmem:[%s15619_s14 + $0x30] sm:$0xff] (!%p12159_p5)  ;;  %12891 = vmatprep.mubr.msk.f32.mxu1 (!%p12159_p5), %vm13871_vm4, %v13872_v52 }
 0x9ab   : > { %12899 = vmatprep.subr.bf16.mxu0 (!%p12159_p5), %v12898_v35  ;;  %v12904_v0 = vpack.c.bf16 (!%p12159_p5), %v10790_v56, %v10789_v53  ;;  %v12906_v31 = vpack.c.bf16 (!%p12159_p5), %v10808_v63, %v10807_v62  ;;  %v10792_v32 = vld [vmem:[%s15619_s14 + $0x38] sm:$0xff] (!%p12159_p5)  ;;  %v10809_v2 = vld [vmem:[%s15619_s14 + $0xc0] sm:$0xff] (!%p12159_p5)  ;;  %v10810_v4 = vld [vmem:[%s15619_s14 + $0xc8] sm:$0xff] (!%p12159_p5) }
 0x9ac   : > { %v12908_v10 = vpack.c.bf16 (!%p12159_p5), %v10792_v32, %v10791_v1  ;;  %v12910_v11 = vpack.c.bf16 (!%p12159_p5), %v10810_v4, %v10809_v2  ;;  %v10793_v12 = vld [vmem:[%s15619_s14 + $0x40] sm:$0xff] (!%p12159_p5)  ;;  %v10794_v13 = vld [vmem:[%s15619_s14 + $0x48] sm:$0xff] (!%p12159_p5)  ;;  %v10811_v3 = vld [vmem:[%s15619_s14 + $0xd0] sm:$0xff] (!%p12159_p5) }
 0x9ad   : > { %v10812_v16 = vld [vmem:[%s15619_s14 + $0xd8] sm:$0xff] (!%p12159_p5)  ;;  %v12912_v21 = vpack.c.bf16 (!%p12159_p5), %v10794_v13, %v10793_v12  ;;  %v10797_v48 = vld [vmem:[%s15619_s14 + $0x60] sm:$0xff] (!%p12159_p5)  ;;  %v10798_v28 = vld [vmem:[%s15619_s14 + $0x68] sm:$0xff] (!%p12159_p5) }
 0x9ae   : > { %12901 = vmatpush3.bf16.msra.mxu0 (!%p12159_p5), %v12900_v59  ;;  %v10899_v43 = vld [vmem:[%s15620_s15 + $0x50] sm:$0xff] (!%p12159_p5)  ;;  %v10900_v27 = vld [vmem:[%s15620_s15 + $0x58] sm:$0xff] (!%p12159_p5)  ;;  %v10901_v45 = vld [vmem:[%s15620_s15 + $0x60] sm:$0xff] (!%p12159_p5) }
 0x9af   : > { %12903 = vmatprep.subr.bf16.mxu0 (!%p12159_p5), %v12902_v20  ;;  %v12942_v44 = vpack.c.bf16 (!%p12159_p5), %v10900_v27, %v10899_v43  ;;  %v10902_v40 = vld [vmem:[%s15620_s15 + $0x68] sm:$0xff] (!%p12159_p5)  ;;  %v10903_v51 = vld [vmem:[%s15620_s15 + $0x70] sm:$0xff] (!%p12159_p5)  ;;  %v10817_v37 = vld [vmem:[%s15621_s17] sm:$0x1] (!%p12159_p5) }
 0x9b0   : > { %v12945_v47 = vpack.c.bf16 (!%p12159_p5), %v10902_v40, %v10901_v45  ;;  %v10905_v53 = vld [vmem:[#allocation3] sm:$0x1] (!%p12159_p5) }
 0x9b2   : > { %12905 = vmatpush3.bf16.msra.mxu0 (!%p12159_p5), %v12904_v0 }
 0x9b3   : > { %12907 = vmatprep.subr.bf16.mxu0 (!%p12159_p5), %v12906_v31 }
 0x9b6   : > { %12909 = vmatpush3.bf16.msra.mxu0 (!%p12159_p5), %v12908_v10 }
 0x9b7   : > { %12911 = vmatprep.subr.bf16.mxu0 (!%p12159_p5), %v12910_v11 }
 0x9ba   : > { %12913 = vmatpush3.bf16.msra.mxu0 (!%p12159_p5), %v12912_v21 }
 0xa32   : > { %v10737_v26 = vpop.xlane.xlu0 %10736 }
 0xa33   : > { %v10738_v14 = vmul.f32 0.00390625, %v10737_v26  ;;  %v12914_v26 = vpack.c.bf16 (!%p12159_p5), %v10812_v16, %v10811_v3 }
 0xa35   : > { %v10739_v57 = vsub.f32 %v10733_v17, %v10738_v14  ;;  %v10740_v33 = vsub.f32 %v10734_v19, %v10738_v14  ;;  %v10893_v17 = vld [vmem:[%s15620_s15 + $0x20] sm:$0xff] (!%p12159_p5)  ;;  %v10894_v19 = vld [vmem:[%s15620_s15 + $0x28] sm:$0xff] (!%p12159_p5)  ;;  %v10795_v14 = vld [vmem:[%s15619_s14 + $0x50] sm:$0xff] (!%p12159_p5)  ;;  %12915 = vmatprep.subr.bf16.mxu0 (!%p12159_p5), %v12914_v26 }
 0xa37   : > { %v10741_v24 = vmul.f32 %v10739_v57, %v10739_v57  ;;  %v10742_v25 = vmul.f32 %v10740_v33, %v10740_v33 }
 0xa39   : > { %v10743_v15 = vadd.f32 %v10742_v25, %v10741_v24  ;;  %v10814_v24 = vld [vmem:[%s15619_s14 + $0xe8] sm:$0xff] (!%p12159_p5)  ;;  %v12933_v25 = vpack.c.bf16 (!%p12159_p5), %v10894_v19, %v10893_v17 }
 0xa3b   : > { %10744 = vadd.xlane.f32.xlu1 %v10743_v15  ;;  %v10895_v15 = vld [vmem:[%s15620_s15 + $0x30] sm:$0xff] (!%p12159_p5)  ;;  %12934 = vmatpush3.bf16.msra.mxu1 (!%p12159_p5), %v12933_v25 }
 0xa3c   : > { %12935 = vmatprep.subr.bf16.mxu1 (!%p12159_p5), %v13870_v46 }
 0xac8   : > { %v10745_v38 = vpop.xlane.xlu1 %10744 }
 0xac9   : > { %v10746_v8 = vmul.f32 0.00390625, %v10745_v38  ;;  %v10896_v38 = vld [vmem:[%s15620_s15 + $0x38] sm:$0xff] (!%p12159_p5) }
 0xacb   : > { %v10747_v61 = vadd.f32 1e-05, %v10746_v8 }
 0xacd   : > { %13824 = vrsqrt.f32 %v10747_v61 }
 0xad7   : > { %v13825_v22 = vpop.eup %13824 }
 0xad8   : > { %v10749_v9 = vmul.f32 %v13825_v22, %v10739_v57  ;;  %v10750_v39 = vmul.f32 %v13825_v22, %v10740_v33  ;;  %10784 = sbr.rel (%p12159_p5) target bundleno = 3224 (0xc98), region = 96  ;;  %v10796_v57 = vld [vmem:[%s15619_s14 + $0x58] sm:$0xff] (!%p12159_p5)  ;;  %v10813_v33 = vld [vmem:[%s15619_s14 + $0xe0] sm:$0xff] (!%p12159_p5)  ;;  %v12936_v22 = vpack.c.bf16 (!%p12159_p5), %v10896_v38, %v10895_v15 }
 0xad9   : > { %v12916_v8 = vpack.c.bf16 (!%p12159_p5), %v10796_v57, %v10795_v14  ;;  %v12918_v61 = vpack.c.bf16 (!%p12159_p5), %v10814_v24, %v10813_v33 }
 0xada   : > { %v10763_v50 = vmul.f32 %v10756_v30, %v10749_v9  ;;  %v10764_v34 = vmul.f32 %v10760_v49, %v10750_v39  ;;  %v10815_v30 = vld [vmem:[%s15619_s14 + $0xf0] sm:$0xff] (!%p12159_p5)  ;;  %v10816_v49 = vld [vmem:[%s15619_s14 + $0xf8] sm:$0xff] (!%p12159_p5)  ;;  %v12920_v9 = vpack.c.bf16 (!%p12159_p5), %v10798_v28, %v10797_v48  ;;  %12937 = vmatpush3.bf16.msra.mxu1 (!%p12159_p5), %v12936_v22 }
 0xadb   : > { %12917 = vmatpush3.bf16.msra.mxu0 (!%p12159_p5), %v12916_v8  ;;  %v12922_v39 = vpack.c.bf16 (!%p12159_p5), %v10816_v49, %v10815_v30  ;;  %12938 = vmatprep.subr.bf16.mxu1 (!%p12159_p5), %v13870_v46 }
 0xadc   : > { %v15392_v41 = vadd.f32 %v10770_v60, %v10763_v50  ;;  %v10778_v42 = vadd.f32 %v10774_v36, %v10764_v34  ;;  %v10897_v60 = vld [vmem:[%s15620_s15 + $0x40] sm:$0xff] (!%p12159_p5)  ;;  %v10898_v36 = vld [vmem:[%s15620_s15 + $0x48] sm:$0xff] (!%p12159_p5)  ;;  %12919 = vmatprep.subr.bf16.mxu0 (!%p12159_p5), %v12918_v61  ;;  %v10799_v50 = vld [vmem:[%s15619_s14 + $0x70] sm:$0xff] (!%p12159_p5) }
 0xadd   : > { %v10800_v34 = vld [vmem:[%s15619_s14 + $0x78] sm:$0xff] (!%p12159_p5) }
 0xade   : > { %10779 = vst [vmem:[#allocation2] sm:$0xff] %v15392_v41  ;;  %10780 = vst [vmem:[#allocation2 + $0x8] sm:$0xff] %v10778_v42  ;;  %10882 = vmatprep.mubr.f32.mxu0 (!%p12159_p5), %v10778_v42  ;;  %v12939_v42 = vpack.c.bf16 (!%p12159_p5), %v10898_v36, %v10897_v60  ;;  %v12924_v29 = vpack.c.bf16 (!%p12159_p5), %v10800_v34, %v10799_v50 }
 0xadf   : > { %12921 = vmatpush3.bf16.msra.mxu0 %v12920_v9 }
 0xae0   : > { %12923 = vmatprep.subr.bf16.mxu0 %v12922_v39  ;;  %12940 = vmatpush3.bf16.msra.mxu1 %v12939_v42 }
 0xae1   : > { %12941 = vmatprep.subr.bf16.mxu1 %v13870_v46 }
 0xae3   : > { %12925 = vmatpush3.bf16.msra.mxu0 %v12924_v29 }
 0xae4   : > { %12943 = vmatpush3.bf16.msra.mxu1 %v12942_v44 }
 0xae5   : > { %12944 = vmatprep.subr.bf16.mxu1 %v13870_v46 }
 0xae6   : > { %10883 = vmatmul.mubr.f32.vlgmr.msra.gmra.mrb[0].mxu0 %v15392_v41  ;;  %v10904_v41 = vld [vmem:[%s15620_s15 + $0x78] sm:$0xff] }
 0xae7   : > { %v12948_v35 = vpack.c.bf16 %v10904_v41, %v10903_v51 }
 0xae8   : > { %12946 = vmatpush3.bf16.msra.mxu1 %v12945_v47 }
 0xae9   : > { %12947 = vmatprep.subr.bf16.mxu1 %v13870_v46 }
 0xaec   : > { %12949 = vmatpush3.bf16.msra.mxu1 %v12948_v35 }
 0xbb9   : > { %v12759_v55 = vpop.f32.mrb[0].mxu0 }
 0xbba   : > { %v12760_v58 = vpop.f32.mrb[1].mxu0 }
 0xbbb   : > { %v12761_v46 = vadd.f32 %v12760_v58, %v12759_v55 }
 0xbbd   : > { %v10885_v59 = vadd.f32 %v12761_v46, %v10817_v37 }
 0xbbf   : > { %v10888_v20 = vmax.f32 %v10885_v59, 0.0 }
 0xbc1   : > { %12892 = vmatmul.mubr.f32.vlgmr.msra.gmra.mrb[0].mxu1 %v10888_v20 }
 0xc94   : > { %v10972_v56 = vpop.f32.mrb[0].mxu1 }
 0xc95   : > { %v10973_v62 = vadd.f32 %v10972_v56, %v10905_v53  ;;  %v12893_v63 = vpop.f32.mrb[1].mxu1 }
 0xc97   : > { %10977 = vst.msk [vmem:[#allocation4] sm:$0x1] %vm10976_vm5, %v10973_v62 }
 0xc98 PF: > { %p12956_p6 = scmp.eq.s32.totalorder %s13973_s27, 5  ;;  %s13873_s25 = smov [#allocation4]  }
 0xc99   : > { %s10985_s0 = sshll.u32 %s13873_s25, 4  ;;  %s10986_s0 = int_to_ptr.vmem [resolvable:$true] %s10985_s0 }
 0xc9a   : > { %s13828_s26 = scalar_lea.vmem %s10986_s0, 16  ;;  %s13834_s19 = scalar_lea.vmem %s10986_s0, 32 }
 0xc9b   : > { %p13829_p7 = scmp.ne.s32.totalorder %s10986_s0, %s13828_s26  ;;  %p13835_p10 = scmp.lt.s32.totalorder %s10986_s0, %s10986_s0 }
 0xc9c   : > { %p13836_p11 = scmp.lt.s32.totalorder %s13834_s19, %s13828_s26 }
 0xc9d   : > { %p13830_p8 = pnand %p13829_p7, %p12956_p6 }
 0xc9e   : > { %p13837_p12 = por %p13836_p11, %p13835_p10 }
 0xc9f   : > { %p13831_p9 = pneg %p13830_p8 }
 0xca1   : > { %p13838_p13 = pnand %p13837_p12, %p13831_p9 }
 0xca3   : > { %13841 = shalt.err (!%p13838_p13)
}
 0xca4   : > { %s15622_s24 = sld [smem:[#allocation16_spill]] }
 0xcaa   : > { %s13842_s30 = scalar_lea.hbm %s15622_s24, 16 }
 0xcab   : > { %p13843_p0 = scmp.ne.s32.totalorder %s15622_s24, %s13842_s30  ;;  %p13848_p3 = scmp.lt.u32.totalorder %s13842_s30, %s15622_s24 }
 0xcad   : > { %p13844_p1 = pnand %p13843_p0, %p12956_p6 }
 0xcaf   : > { %p13845_p2 = pneg %p13844_p1 }
 0xcb1   : > { %p13850_p4 = pnand %p13848_p3, %p13845_p2 }
 0xcb3   : > { %13853 = shalt.err (!%p13850_p4)
}
 0xcb4   : > { %12953 = dma.vmem_to_hbm [thread:$0]  (%p12956_p6), %s10986_s0, 16, %s15622_s24, [#allocation5]  }
 0xcb5   : > { %13859 = dma.done.wait (%p12956_p6), [#allocation5], 16  }
 0xcb6   : > { %13861 = vsyncadd (%p12956_p6), [#allocation5], 4294967280 }
 0xcb7 PF: > { %s15623_s21 = sld [smem:[#allocation7_spill]] }
 0xcbd   : > { %s30_s26 = sadd.s32 1, %s15623_s21  }
 0xcbe   : > { %p27_p5 = scmp.ge.s32.totalorder %s30_s26, 8  }
 0xcc0   :  { %29 = sbr.rel (!%p27_p5) target bundleno = 11 (0xb), region = 156 }
 0xcc7   :  { %10998 = vsyncpa [#allocation5], 1 }
 0xcc8   :  { %11000 = vsyncpa [#allocation5 + $0x1], 1 }

</bundles_post_ra>
